<compile_context>
chip_gen: v7x
topology: tpu7x:2x2x1
jax: 0.10.0
libtpu: 0.0.40
codegen_flags: <defaults>
</compile_context>

<pallas_src>
import numpy as np

import jax
import jax.numpy as jnp
from jax.experimental import pallas as pl
from jax.experimental.pallas import tpu as pltpu


# --------------------------------------------------------------------------
# Static network geometry (flatten_size = 16*5*5  ->  32x32 RGB input)
# --------------------------------------------------------------------------
CIN, HIN, WIN = 3, 32, 32                  # input channels / spatial
K = 5                                      # conv kernel size
CH1, CH2 = 6, 16                           # conv output channels
HC1, WC1 = HIN - K + 1, WIN - K + 1        # conv1 out: 28, 28
HP1, WP1 = HC1 // 2, WC1 // 2              # pool1 out: 14, 14
HC2, WC2 = HP1 - K + 1, WP1 - K + 1        # conv2 out: 10, 10
HP2, WP2 = HC2 // 2, WC2 // 2              # pool2 out: 5, 5
FC1, FC2, NCLS = 120, 84, 10
LANE = 128                                 # lane padding for K dims / output
PADR = 8                                   # trailing zero rows per input tile (>= K-1)


# --------------------------------------------------------------------------
# The single fused, batch-tiled Pallas kernel (BT images per grid step)
# --------------------------------------------------------------------------
def _convnet_kernel(x_ref, t1_ref, b1_ref, r1_ref, c1_ref,
                    t2_ref, b2_ref, r2_ref, c2_ref,
                    wf1_ref, bf1_ref, wf2_ref, bf2_ref, wf3_ref, bf3_ref,
                    out_ref, acc1_ref, acc2_ref, p1_ref):
    dd = t1_ref.dtype                              # matmul operand dtype
    dot = lambda a, b: jnp.dot(a, b, preferred_element_type=jnp.float32)
    BT = out_ref.shape[0]                          # images per grid step
    R1, R2 = BT * HIN, BT * HP1                    # stacked accumulator rows

    # ---- conv1: 5 row-shifted band matmuls, f32 accumulation in VMEM -------
    # Rows 28..31 of each 32-row image block are garbage (cross-image / pad);
    # the pool row selectors never read them.
    acc1_ref[...] = dot(x_ref[0, 0:R1, :], t1_ref[0])
    for i in range(1, K):
        acc1_ref[...] += dot(x_ref[0, i:i + R1, :], t1_ref[i])

    # ---- pool1 (block-diagonal row selectors + column selectors), then
    #      per-channel bias + ReLU on the pooled (BT*14, 128) map -------------
    a1 = acc1_ref[...].astype(dd)
    u = jnp.maximum(dot(r1_ref[0], a1), dot(r1_ref[1], a1)).astype(dd)
    p1 = jnp.maximum(dot(u, c1_ref[0]), dot(u, c1_ref[1]))          # f32
    p1_ref[0:R2, :] = jnp.maximum(p1 + b1_ref[...], 0.0).astype(dd)
    p1_ref[R2:, :] = jnp.zeros((PADR, LANE), dd)   # keep band-slice rows finite

    # ---- conv2 --------------------------------------------------------------
    acc2_ref[...] = dot(p1_ref[0:R2, :], t2_ref[0])
    for i in range(1, K):
        acc2_ref[...] += dot(p1_ref[i:i + R2, :], t2_ref[i])

    # ---- pool2: row selectors emit (y*BT + g) ordering so fc1 can take
    #      contiguous BT-row slices per pooled row y --------------------------
    a2 = acc2_ref[...].astype(dd)
    u = jnp.maximum(dot(r2_ref[0], a2), dot(r2_ref[1], a2)).astype(dd)
    p2 = jnp.maximum(dot(u, c2_ref[0]), dot(u, c2_ref[1]))          # (BT*5,128)
    p2 = jnp.maximum(p2 + b2_ref[...], 0.0).astype(dd)

    # ---- fc1/fc2/fc3 with M = BT (single matmuls, no M=1 GEMVs) ------------
    p2_full = jnp.concatenate(
        [p2[y * BT:(y + 1) * BT, :] for y in range(HP2)], axis=1)   # (BT, 640)
    h = jnp.maximum(dot(p2_full, wf1_ref[...]) + bf1_ref[...], 0.0)  # (BT,120)
    h = jnp.maximum(dot(h.astype(dd), wf2_ref[...]) + bf2_ref[...], 0.0)
    out_ref[...] = dot(h.astype(dd), wf3_ref[...]) + bf3_ref[...]    # (BT,128)


# --------------------------------------------------------------------------
# One-time weight repacking (outside the per-call hot path)
# --------------------------------------------------------------------------
def _pool_row_selectors(bt, pitch, h_out, y_major):
    """0/1 matrices selecting the even/odd pooling rows from the stacked
    (bt*pitch)-row conv accumulator.  Output row = g*h_out + y, or y*bt + g
    when y_major (so fc1 can take contiguous bt-row slices per y)."""
    ra = np.zeros((bt * h_out, bt * pitch), np.float32)
    rb = np.zeros_like(ra)
    for g in range(bt):
        for y in range(h_out):
            r = y * bt + g if y_major else g * h_out + y
            ra[r, g * pitch + 2 * y] = 1.0
            rb[r, g * pitch + 2 * y + 1] = 1.0
    return np.stack([ra, rb])


def _pool_col_selectors(w_in, c, out_cols):
    """0/1 matrices selecting even/odd pooled columns (per channel)."""
    ca = np.zeros((w_in * c, out_cols), np.float32)
    cb = np.zeros_like(ca)
    for x in range(w_in // 2):
        for ch in range(c):
            ca[(2 * x) * c + ch, x * c + ch] = 1.0
            cb[(2 * x + 1) * c + ch, x * c + ch] = 1.0
    return np.stack([ca, cb])


def _conv_band_weights(w, w_in, k_rows):
    """Lower a KxK 'VALID' conv to K band matrices T[i] so that
         out = sum_i  A[i:i+h_out, :] @ T[i]
    with activations laid out as (height, width*channels); input col = x*Ci+c,
    output col = u*Co+o.  Rows are zero-padded to k_rows (lane alignment)."""
    w = np.asarray(w, np.float32)                   # (co, ci, k, k)
    co, ci, k, _ = w.shape
    w_out = w_in - k + 1
    taps = np.zeros((k, k_rows, w_out * co), np.float32)
    for i in range(k):
        for j in range(k):
            band = np.eye(w_in, w_out, -j, dtype=np.float32)   # [x,u] = (x==u+j)
            taps[i, :w_in * ci, :] += np.kron(band, w[:, :, i, j].T)
    return taps


def prepare_params(p, *, bt=8, dot_dtype=jnp.bfloat16):
    """Repack PyTorch-layout weights into the kernel's MXU-friendly form.
    bt = images per grid step.  Matmul operands stored in dot_dtype (bf16
    recommended on v5e/v6e/v7x); biases / accumulation stay f32."""
    f32 = jnp.float32
    to = lambda a: jnp.asarray(a, dot_dtype)

    # fc1 weights permuted so the kernel's (y, x*16+c) layout contracts exactly
    # like torch's x.view(-1, 16*5*5) (C,H,W) flatten, stacked over y.
    wf1 = np.asarray(p["fc1_w"], np.float32).reshape(FC1, CH2, HP2, WP2)
    wf1 = np.transpose(wf1, (2, 3, 1, 0)).reshape(HP2, WP2 * CH2, FC1)
    wf1 = np.pad(wf1, ((0, 0), (0, LANE - WP2 * CH2), (0, 0)))
    wf1 = wf1.reshape(HP2 * LANE, FC1)                          # (640, 120)

    wf3 = np.pad(np.asarray(p["fc3_w"], np.float32).T, ((0, 0), (0, LANE - NCLS)))
    bf3 = np.pad(np.asarray(p["fc3_b"], np.float32), (0, LANE - NCLS)).reshape(1, LANE)
    # Pooled-layout biases (bias-add/ReLU happen AFTER the pool).
    b1p = np.pad(np.tile(np.asarray(p["conv1_b"], np.float32), WP1),
                 (0, LANE - WP1 * CH1)).reshape(1, LANE)
    b2p = np.pad(np.tile(np.asarray(p["conv2_b"], np.float32), WP2),
                 (0, LANE - WP2 * CH2)).reshape(1, LANE)

    return {
        "t1": to(_conv_band_weights(p["conv1_w"], WIN, LANE)),       # (5,128,168)
        "b1": jnp.asarray(b1p, f32),                                 # (1,128)
        "r1": to(_pool_row_selectors(bt, HIN, HP1, y_major=False)),  # (2,bt*14,bt*32)
        "c1": to(_pool_col_selectors(WC1, CH1, LANE)),               # (2,168,128)
        "t2": to(_conv_band_weights(p["conv2_w"], WP1, LANE)),       # (5,128,160)
        "b2": jnp.asarray(b2p, f32),                                 # (1,128)
        "r2": to(_pool_row_selectors(bt, HP1, HP2, y_major=True)),   # (2,bt*5,bt*14)
        "c2": to(_pool_col_selectors(WC2, CH2, LANE)),               # (2,160,128)
        "wf1": to(wf1),                                              # (640,120)
        "bf1": jnp.asarray(p["fc1_b"], f32).reshape(1, FC1),
        "wf2": to(np.asarray(p["fc2_w"], np.float32).T),             # (120,84)
        "bf2": jnp.asarray(p["fc2_b"], f32).reshape(1, FC2),
        "wf3": to(wf3),                                              # (84,128)
        "bf3": jnp.asarray(bf3, f32),                                # (1,128)
    }


# --------------------------------------------------------------------------
# Forward pass: one pallas_call for the whole network, grid over batch tiles
# --------------------------------------------------------------------------
def convnet_forward(prep, x):
    B = x.shape[0]
    assert x.shape[1:] == (CIN, HIN, WIN)
    bt = prep["r1"].shape[1] // HP1            # images per grid step (static)
    dd = prep["t1"].dtype
    nb = pl.cdiv(B, bt)
    bp = nb * bt
    rows = bt * HIN + PADR

    # NCHW -> per-image (H, W*C) slab, lane-pad to 128, stack bt images per
    # tile along the sublane axis, append PADR zero rows for the band slices.
    xin = jnp.transpose(x, (0, 2, 3, 1)).reshape(B, HIN, WIN * CIN)
    xin = jnp.pad(xin, ((0, bp - B), (0, 0), (0, LANE - WIN * CIN)))
    xin = xin.reshape(nb, bt * HIN, LANE)
    xin = jnp.pad(xin, ((0, 0), (0, PADR), (0, 0))).astype(dd)

    w2 = lambda b: (0, 0)
    w3 = lambda b: (0, 0, 0)
    out = pl.pallas_call(
        _convnet_kernel,
        out_shape=jax.ShapeDtypeStruct((bp, LANE), jnp.float32),
        grid=(nb,),
        in_specs=[
            pl.BlockSpec((1, rows, LANE), lambda b: (b, 0, 0)),
            pl.BlockSpec(prep["t1"].shape, w3),
            pl.BlockSpec(prep["b1"].shape, w2),
            pl.BlockSpec(prep["r1"].shape, w3),
            pl.BlockSpec(prep["c1"].shape, w3),
            pl.BlockSpec(prep["t2"].shape, w3),
            pl.BlockSpec(prep["b2"].shape, w2),
            pl.BlockSpec(prep["r2"].shape, w3),
            pl.BlockSpec(prep["c2"].shape, w3),
            pl.BlockSpec(prep["wf1"].shape, w2),
            pl.BlockSpec(prep["bf1"].shape, w2),
            pl.BlockSpec(prep["wf2"].shape, w2),
            pl.BlockSpec(prep["bf2"].shape, w2),
            pl.BlockSpec(prep["wf3"].shape, w2),
            pl.BlockSpec(prep["bf3"].shape, w2),
        ],
        out_specs=pl.BlockSpec((bt, LANE), lambda b: (b, 0)),
        scratch_shapes=[
            pltpu.VMEM((bt * HIN, WC1 * CH1), jnp.float32),   # conv1 accumulator
            pltpu.VMEM((bt * HP1, WC2 * CH2), jnp.float32),   # conv2 accumulator
            pltpu.VMEM((bt * HP1 + PADR, LANE), dd),          # pooled map 1
        ],
        compiler_params=pltpu.CompilerParams(
            dimension_semantics=("parallel",)),
    )(xin, prep["t1"], prep["b1"], prep["r1"], prep["c1"],
      prep["t2"], prep["b2"], prep["r2"], prep["c2"],
      prep["wf1"], prep["bf1"], prep["wf2"], prep["bf2"],
      prep["wf3"], prep["bf3"])
    return out[:B, :NCLS]


# --------------------------------------------------------------------------
# Parameters (PyTorch-default-style uniform init) + plain-XLA reference
# --------------------------------------------------------------------------
def init_params(key):
    def uniform(k, shape, fan_in):
        bound = 1.0 / (fan_in ** 0.5)
        return jax.random.uniform(k, shape, jnp.float32, -bound, bound)

    ks = jax.random.split(key, 10)
    return {
        "conv1_w": uniform(ks[0], (CH1, CIN, K, K), CIN * K * K),
        "conv1_b": uniform(ks[1], (CH1,), CIN * K * K),
        "conv2_w": uniform(ks[2], (CH2, CH1, K, K), CH1 * K * K),
        "conv2_b": uniform(ks[3], (CH2,), CH1 * K * K),
        "fc1_w": uniform(ks[4], (FC1, CH2 * HP2 * WP2), CH2 * HP2 * WP2),
        "fc1_b": uniform(ks[5], (FC1,), CH2 * HP2 * WP2),
        "fc2_w": uniform(ks[6], (FC2, FC1), FC1),
        "fc2_b": uniform(ks[7], (FC2,), FC1),
        "fc3_w": uniform(ks[8], (NCLS, FC2), FC2),
        "fc3_b": uniform(ks[9], (NCLS,), FC2),
    }


def _pool_ref(y):
    b, c, h, w = y.shape
    return y.reshape(b, c, h // 2, 2, w // 2, 2).max(axis=(3, 5))


def reference_forward(p, x):
    hp = jax.lax.Precision.HIGHEST
    y = jax.lax.conv_general_dilated(
        x, p["conv1_w"], (1, 1), "VALID",
        dimension_numbers=("NCHW", "OIHW", "NCHW"), precision=hp)
    y = jnp.maximum(y + p["conv1_b"][None, :, None, None], 0.0)
    y = _pool_ref(y)
    y = jax.lax.conv_general_dilated(
        y, p["conv2_w"], (1, 1), "VALID",
        dimension_numbers=("NCHW", "OIHW", "NCHW"), precision=hp)
    y = jnp.maximum(y + p["conv2_b"][None, :, None, None], 0.0)
    y = _pool_ref(y)
    y = y.reshape(y.shape[0], -1)                               # torch .view order
    y = jnp.maximum(jnp.dot(y, p["fc1_w"].T, precision=hp) + p["fc1_b"], 0.0)
    y = jnp.maximum(jnp.dot(y, p["fc2_w"].T, precision=hp) + p["fc2_b"], 0.0)
    return jnp.dot(y, p["fc3_w"].T, precision=hp) + p["fc3_b"]


if __name__ == "__main__":
    key = jax.random.PRNGKey(0)
    pkey, xkey = jax.random.split(key)
    params = init_params(pkey)

    fwd = jax.jit(convnet_forward)
    ref_fn = jax.jit(reference_forward)

    # --- f32-operand path, single batch tile (B=2 -> padded to bt=8) --------
    # Tight tolerance: f32 MXU accumulation differs from the HIGHEST-precision
    # reference only by multi-pass matmul rounding (~1e-5 on these logits).
    x2 = jax.random.normal(xkey, (2, CIN, HIN, WIN), dtype=jnp.float32)
    prep_f32 = prepare_params(params, bt=8, dot_dtype=jnp.float32)
    out = jax.block_until_ready(fwd(prep_f32, x2))
    assert out.shape == (2, NCLS), out.shape
    assert out.dtype == jnp.float32
    ref = jax.block_until_ready(ref_fn(params, x2))
    np.testing.assert_allclose(np.asarray(out), np.asarray(ref),
                               rtol=1e-3, atol=1e-3)

    # --- bf16-operand path (recommended on v5e/v6e/v7x), multi-tile grid ----
    # B=10 with bt=8 exercises grid=2 and batch padding.  Tolerance re-derived
    # for bf16 operand rounding (~2^-8 relative per matmul over 5 layers).
    x10 = jax.random.normal(xkey, (10, CIN, HIN, WIN), dtype=jnp.float32)
    prep_bf16 = prepare_params(params, bt=8, dot_dtype=jnp.bfloat16)
    out = jax.block_until_ready(fwd(prep_bf16, x10))
    assert out.shape == (10, NCLS), out.shape
    ref = jax.block_until_ready(ref_fn(params, x10))
    np.testing.assert_allclose(np.asarray(out), np.asarray(ref),
                               rtol=5e-2, atol=5e-2)

    print("KERNEL_OK")
</pallas_src>

<mosaic_0001>
module attributes {stable_mosaic.version = 11 : i64} {
  func.func @_convnet_kernel(%arg0: i32, %arg1: memref<1x264x128xf32, #tpu.memory_space<vmem>>, %arg2: memref<5x128x168xf32, #tpu.memory_space<vmem>>, %arg3: memref<1x128xf32, #tpu.memory_space<vmem>>, %arg4: memref<2x112x256xf32, #tpu.memory_space<vmem>>, %arg5: memref<2x168x128xf32, #tpu.memory_space<vmem>>, %arg6: memref<5x128x160xf32, #tpu.memory_space<vmem>>, %arg7: memref<1x128xf32, #tpu.memory_space<vmem>>, %arg8: memref<2x40x112xf32, #tpu.memory_space<vmem>>, %arg9: memref<2x160x128xf32, #tpu.memory_space<vmem>>, %arg10: memref<640x120xf32, #tpu.memory_space<vmem>>, %arg11: memref<1x120xf32, #tpu.memory_space<vmem>>, %arg12: memref<120x84xf32, #tpu.memory_space<vmem>>, %arg13: memref<1x84xf32, #tpu.memory_space<vmem>>, %arg14: memref<84x128xf32, #tpu.memory_space<vmem>>, %arg15: memref<1x128xf32, #tpu.memory_space<vmem>>, %arg16: memref<8x128xf32, #tpu.memory_space<vmem>>, %arg17: memref<256x168xf32, #tpu.memory_space<vmem>>, %arg18: memref<112x160xf32, #tpu.memory_space<vmem>>, %arg19: memref<120x128xf32, #tpu.memory_space<vmem>>) attributes {dimension_semantics = [#tpu.dimension_semantics<parallel>], iteration_bounds = array<i64: 1>, scalar_prefetch = 0 : i64, scratch_operands = 3 : i64, tpu.core_type = #tpu.core_type<tc>, window_params = [{transform_indices = @transform_0, window_bounds = array<i64: 1, 264, 128>}, {pipeline_mode = #tpu.pipeline_mode<synchronous>, transform_indices = @transform_1, window_bounds = array<i64: 5, 128, 168>}, {pipeline_mode = #tpu.pipeline_mode<synchronous>, transform_indices = @transform_2, window_bounds = array<i64: 1, 128>}, {pipeline_mode = #tpu.pipeline_mode<synchronous>, transform_indices = @transform_3, window_bounds = array<i64: 2, 112, 256>}, {pipeline_mode = #tpu.pipeline_mode<synchronous>, transform_indices = @transform_4, window_bounds = array<i64: 2, 168, 128>}, {pipeline_mode = #tpu.pipeline_mode<synchronous>, transform_indices = @transform_5, window_bounds = array<i64: 5, 128, 160>}, {pipeline_mode = #tpu.pipeline_mode<synchronous>, transform_indices = @transform_6, window_bounds = array<i64: 1, 128>}, {pipeline_mode = #tpu.pipeline_mode<synchronous>, transform_indices = @transform_7, window_bounds = array<i64: 2, 40, 112>}, {pipeline_mode = #tpu.pipeline_mode<synchronous>, transform_indices = @transform_8, window_bounds = array<i64: 2, 160, 128>}, {pipeline_mode = #tpu.pipeline_mode<synchronous>, transform_indices = @transform_9, window_bounds = array<i64: 640, 120>}, {pipeline_mode = #tpu.pipeline_mode<synchronous>, transform_indices = @transform_10, window_bounds = array<i64: 1, 120>}, {pipeline_mode = #tpu.pipeline_mode<synchronous>, transform_indices = @transform_11, window_bounds = array<i64: 120, 84>}, {pipeline_mode = #tpu.pipeline_mode<synchronous>, transform_indices = @transform_12, window_bounds = array<i64: 1, 84>}, {pipeline_mode = #tpu.pipeline_mode<synchronous>, transform_indices = @transform_13, window_bounds = array<i64: 84, 128>}, {pipeline_mode = #tpu.pipeline_mode<synchronous>, transform_indices = @transform_14, window_bounds = array<i64: 1, 128>}, {transform_indices = @transform_15, window_bounds = array<i64: 8, 128>}]} {
    %c0 = arith.constant 0 : index
    %c0_0 = arith.constant 0 : index
    %c0_1 = arith.constant 0 : index
    %0 = vector.load %arg1[%c0, %c0_0, %c0_1] : memref<1x264x128xf32, #tpu.memory_space<vmem>>, vector<1x256x128xf32>
    %1 = vector.shape_cast %0 : vector<1x256x128xf32> to vector<256x128xf32>
    %c0_2 = arith.constant 0 : index
    %c0_3 = arith.constant 0 : index
    %c0_4 = arith.constant 0 : index
    %2 = vector.load %arg2[%c0_2, %c0_3, %c0_4] : memref<5x128x168xf32, #tpu.memory_space<vmem>>, vector<1x128x168xf32>
    %3 = vector.shape_cast %2 : vector<1x128x168xf32> to vector<128x168xf32>
    %cst = arith.constant dense<0.000000e+00> : vector<256x168xf32>
    %4 = tpu.matmul %1, %3, %cst {dimension_numbers = #tpu.dot_dimension_numbers<[1], [0], [0], [1], [0, 0, 1, 1], [], []>} : vector<256x128xf32>, vector<128x168xf32>, vector<256x168xf32> -> vector<256x168xf32>
    %c0_5 = arith.constant 0 : index
    %c0_6 = arith.constant 0 : index
    %5 = vector.load %arg17[%c0_5, %c0_6] : memref<256x168xf32, #tpu.memory_space<vmem>>, vector<256x168xf32>
    tpu.vector_store %arg17[%c0_5, %c0_6], %4 {strides = array<i32>} : memref<256x168xf32, #tpu.memory_space<vmem>>, vector<256x168xf32>,
    %c0_7 = arith.constant 0 : index
    %c0_8 = arith.constant 0 : index
    %6 = vector.load %arg17[%c0_7, %c0_8] : memref<256x168xf32, #tpu.memory_space<vmem>>, vector<256x168xf32>
    %c0_9 = arith.constant 0 : index
    %c1 = arith.constant 1 : index
    %c0_10 = arith.constant 0 : index
    %7 = vector.load %arg1[%c0_9, %c1, %c0_10] : memref<1x264x128xf32, #tpu.memory_space<vmem>>, vector<1x256x128xf32>
    %8 = vector.shape_cast %7 : vector<1x256x128xf32> to vector<256x128xf32>
    %c1_11 = arith.constant 1 : index
    %c0_12 = arith.constant 0 : index
    %c0_13 = arith.constant 0 : index
    %9 = vector.load %arg2[%c1_11, %c0_12, %c0_13] : memref<5x128x168xf32, #tpu.memory_space<vmem>>, vector<1x128x168xf32>
    %10 = vector.shape_cast %9 : vector<1x128x168xf32> to vector<128x168xf32>
    %cst_14 = arith.constant dense<0.000000e+00> : vector<256x168xf32>
    %11 = tpu.matmul %8, %10, %cst_14 {dimension_numbers = #tpu.dot_dimension_numbers<[1], [0], [0], [1], [0, 0, 1, 1], [], []>} : vector<256x128xf32>, vector<128x168xf32>, vector<256x168xf32> -> vector<256x168xf32>
    %12 = arith.addf %6, %11 : vector<256x168xf32>
    %c0_15 = arith.constant 0 : index
    %c0_16 = arith.constant 0 : index
    %13 = vector.load %arg17[%c0_15, %c0_16] : memref<256x168xf32, #tpu.memory_space<vmem>>, vector<256x168xf32>
    tpu.vector_store %arg17[%c0_15, %c0_16], %12 {strides = array<i32>} : memref<256x168xf32, #tpu.memory_space<vmem>>, vector<256x168xf32>,
    %c0_17 = arith.constant 0 : index
    %c0_18 = arith.constant 0 : index
    %14 = vector.load %arg17[%c0_17, %c0_18] : memref<256x168xf32, #tpu.memory_space<vmem>>, vector<256x168xf32>
    %c0_19 = arith.constant 0 : index
    %c2 = arith.constant 2 : index
    %c0_20 = arith.constant 0 : index
    %15 = vector.load %arg1[%c0_19, %c2, %c0_20] : memref<1x264x128xf32, #tpu.memory_space<vmem>>, vector<1x256x128xf32>
    %16 = vector.shape_cast %15 : vector<1x256x128xf32> to vector<256x128xf32>
    %c2_21 = arith.constant 2 : index
    %c0_22 = arith.constant 0 : index
    %c0_23 = arith.constant 0 : index
    %17 = vector.load %arg2[%c2_21, %c0_22, %c0_23] : memref<5x128x168xf32, #tpu.memory_space<vmem>>, vector<1x128x168xf32>
    %18 = vector.shape_cast %17 : vector<1x128x168xf32> to vector<128x168xf32>
    %cst_24 = arith.constant dense<0.000000e+00> : vector<256x168xf32>
    %19 = tpu.matmul %16, %18, %cst_24 {dimension_numbers = #tpu.dot_dimension_numbers<[1], [0], [0], [1], [0, 0, 1, 1], [], []>} : vector<256x128xf32>, vector<128x168xf32>, vector<256x168xf32> -> vector<256x168xf32>
    %20 = arith.addf %14, %19 : vector<256x168xf32>
    %c0_25 = arith.constant 0 : index
    %c0_26 = arith.constant 0 : index
    %21 = vector.load %arg17[%c0_25, %c0_26] : memref<256x168xf32, #tpu.memory_space<vmem>>, vector<256x168xf32>
    tpu.vector_store %arg17[%c0_25, %c0_26], %20 {strides = array<i32>} : memref<256x168xf32, #tpu.memory_space<vmem>>, vector<256x168xf32>,
    %c0_27 = arith.constant 0 : index
    %c0_28 = arith.constant 0 : index
    %22 = vector.load %arg17[%c0_27, %c0_28] : memref<256x168xf32, #tpu.memory_space<vmem>>, vector<256x168xf32>
    %c0_29 = arith.constant 0 : index
    %c3 = arith.constant 3 : index
    %c0_30 = arith.constant 0 : index
    %23 = vector.load %arg1[%c0_29, %c3, %c0_30] : memref<1x264x128xf32, #tpu.memory_space<vmem>>, vector<1x256x128xf32>
    %24 = vector.shape_cast %23 : vector<1x256x128xf32> to vector<256x128xf32>
    %c3_31 = arith.constant 3 : index
    %c0_32 = arith.constant 0 : index
    %c0_33 = arith.constant 0 : index
    %25 = vector.load %arg2[%c3_31, %c0_32, %c0_33] : memref<5x128x168xf32, #tpu.memory_space<vmem>>, vector<1x128x168xf32>
    %26 = vector.shape_cast %25 : vector<1x128x168xf32> to vector<128x168xf32>
    %cst_34 = arith.constant dense<0.000000e+00> : vector<256x168xf32>
    %27 = tpu.matmul %24, %26, %cst_34 {dimension_numbers = #tpu.dot_dimension_numbers<[1], [0], [0], [1], [0, 0, 1, 1], [], []>} : vector<256x128xf32>, vector<128x168xf32>, vector<256x168xf32> -> vector<256x168xf32>
    %28 = arith.addf %22, %27 : vector<256x168xf32>
    %c0_35 = arith.constant 0 : index
    %c0_36 = arith.constant 0 : index
    %29 = vector.load %arg17[%c0_35, %c0_36] : memref<256x168xf32, #tpu.memory_space<vmem>>, vector<256x168xf32>
    tpu.vector_store %arg17[%c0_35, %c0_36], %28 {strides = array<i32>} : memref<256x168xf32, #tpu.memory_space<vmem>>, vector<256x168xf32>,
    %c0_37 = arith.constant 0 : index
    %c0_38 = arith.constant 0 : index
    %30 = vector.load %arg17[%c0_37, %c0_38] : memref<256x168xf32, #tpu.memory_space<vmem>>, vector<256x168xf32>
    %c0_39 = arith.constant 0 : index
    %c4 = arith.constant 4 : index
    %c0_40 = arith.constant 0 : index
    %31 = vector.load %arg1[%c0_39, %c4, %c0_40] : memref<1x264x128xf32, #tpu.memory_space<vmem>>, vector<1x256x128xf32>
    %32 = vector.shape_cast %31 : vector<1x256x128xf32> to vector<256x128xf32>
    %c4_41 = arith.constant 4 : index
    %c0_42 = arith.constant 0 : index
    %c0_43 = arith.constant 0 : index
    %33 = vector.load %arg2[%c4_41, %c0_42, %c0_43] : memref<5x128x168xf32, #tpu.memory_space<vmem>>, vector<1x128x168xf32>
    %34 = vector.shape_cast %33 : vector<1x128x168xf32> to vector<128x168xf32>
    %cst_44 = arith.constant dense<0.000000e+00> : vector<256x168xf32>
    %35 = tpu.matmul %32, %34, %cst_44 {dimension_numbers = #tpu.dot_dimension_numbers<[1], [0], [0], [1], [0, 0, 1, 1], [], []>} : vector<256x128xf32>, vector<128x168xf32>, vector<256x168xf32> -> vector<256x168xf32>
    %36 = arith.addf %30, %35 : vector<256x168xf32>
    %c0_45 = arith.constant 0 : index
    %c0_46 = arith.constant 0 : index
    %37 = vector.load %arg17[%c0_45, %c0_46] : memref<256x168xf32, #tpu.memory_space<vmem>>, vector<256x168xf32>
    tpu.vector_store %arg17[%c0_45, %c0_46], %36 {strides = array<i32>} : memref<256x168xf32, #tpu.memory_space<vmem>>, vector<256x168xf32>,
    %c0_47 = arith.constant 0 : index
    %c0_48 = arith.constant 0 : index
    %38 = vector.load %arg17[%c0_47, %c0_48] : memref<256x168xf32, #tpu.memory_space<vmem>>, vector<256x168xf32>
    %c0_49 = arith.constant 0 : index
    %c0_50 = arith.constant 0 : index
    %c0_51 = arith.constant 0 : index
    %39 = vector.load %arg4[%c0_49, %c0_50, %c0_51] : memref<2x112x256xf32, #tpu.memory_space<vmem>>, vector<1x112x256xf32>
    %40 = vector.shape_cast %39 : vector<1x112x256xf32> to vector<112x256xf32>
    %cst_52 = arith.constant dense<0.000000e+00> : vector<112x168xf32>
    %41 = tpu.matmul %40, %38, %cst_52 {dimension_numbers = #tpu.dot_dimension_numbers<[1], [0], [0], [1], [0, 0, 1, 1], [], []>} : vector<112x256xf32>, vector<256x168xf32>, vector<112x168xf32> -> vector<112x168xf32>
    %c1_53 = arith.constant 1 : index
    %c0_54 = arith.constant 0 : index
    %c0_55 = arith.constant 0 : index
    %42 = vector.load %arg4[%c1_53, %c0_54, %c0_55] : memref<2x112x256xf32, #tpu.memory_space<vmem>>, vector<1x112x256xf32>
    %43 = vector.shape_cast %42 : vector<1x112x256xf32> to vector<112x256xf32>
    %cst_56 = arith.constant dense<0.000000e+00> : vector<112x168xf32>
    %44 = tpu.matmul %43, %38, %cst_56 {dimension_numbers = #tpu.dot_dimension_numbers<[1], [0], [0], [1], [0, 0, 1, 1], [], []>} : vector<112x256xf32>, vector<256x168xf32>, vector<112x168xf32> -> vector<112x168xf32>
    %45 = arith.maximumf %41, %44 : vector<112x168xf32>
    %c0_57 = arith.constant 0 : index
    %c0_58 = arith.constant 0 : index
    %c0_59 = arith.constant 0 : index
    %46 = vector.load %arg5[%c0_57, %c0_58, %c0_59] : memref<2x168x128xf32, #tpu.memory_space<vmem>>, vector<1x168x128xf32>
    %47 = vector.shape_cast %46 : vector<1x168x128xf32> to vector<168x128xf32>
    %cst_60 = arith.constant dense<0.000000e+00> : vector<112x128xf32>
    %48 = tpu.matmul %45, %47, %cst_60 {dimension_numbers = #tpu.dot_dimension_numbers<[1], [0], [0], [1], [0, 0, 1, 1], [], []>} : vector<112x168xf32>, vector<168x128xf32>, vector<112x128xf32> -> vector<112x128xf32>
    %c1_61 = arith.constant 1 : index
    %c0_62 = arith.constant 0 : index
    %c0_63 = arith.constant 0 : index
    %49 = vector.load %arg5[%c1_61, %c0_62, %c0_63] : memref<2x168x128xf32, #tpu.memory_space<vmem>>, vector<1x168x128xf32>
    %50 = vector.shape_cast %49 : vector<1x168x128xf32> to vector<168x128xf32>
    %cst_64 = arith.constant dense<0.000000e+00> : vector<112x128xf32>
    %51 = tpu.matmul %45, %50, %cst_64 {dimension_numbers = #tpu.dot_dimension_numbers<[1], [0], [0], [1], [0, 0, 1, 1], [], []>} : vector<112x168xf32>, vector<168x128xf32>, vector<112x128xf32> -> vector<112x128xf32>
    %52 = arith.maximumf %48, %51 : vector<112x128xf32>
    %c0_65 = arith.constant 0 : index
    %c0_66 = arith.constant 0 : index
    %53 = vector.load %arg3[%c0_65, %c0_66] : memref<1x128xf32, #tpu.memory_space<vmem>>, vector<1x128xf32>
    %54 = vector.broadcast %53 : vector<1x128xf32> to vector<112x128xf32>
    %55 = arith.addf %52, %54 : vector<112x128xf32>
    %cst_67 = arith.constant 0.000000e+00 : f32
    %56 = vector.broadcast %cst_67 : f32 to vector<112x128xf32>
    %57 = arith.maximumf %55, %56 : vector<112x128xf32>
    %c0_68 = arith.constant 0 : index
    %c0_69 = arith.constant 0 : index
    %58 = vector.load %arg19[%c0_68, %c0_69] : memref<120x128xf32, #tpu.memory_space<vmem>>, vector<112x128xf32>
    tpu.vector_store %arg19[%c0_68, %c0_69], %57 {strides = array<i32>} : memref<120x128xf32, #tpu.memory_space<vmem>>, vector<112x128xf32>,
    %cst_70 = arith.constant 0.000000e+00 : f32
    %59 = vector.broadcast %cst_70 : f32 to vector<8x128xf32>
    %c112 = arith.constant 112 : index
    %c0_71 = arith.constant 0 : index
    %60 = vector.load %arg19[%c112, %c0_71] : memref<120x128xf32, #tpu.memory_space<vmem>>, vector<8x128xf32>
    tpu.vector_store %arg19[%c112, %c0_71], %59 {strides = array<i32>} : memref<120x128xf32, #tpu.memory_space<vmem>>, vector<8x128xf32>,
    %c0_72 = arith.constant 0 : index
    %c0_73 = arith.constant 0 : index
    %61 = vector.load %arg19[%c0_72, %c0_73] : memref<120x128xf32, #tpu.memory_space<vmem>>, vector<112x128xf32>
    %c0_74 = arith.constant 0 : index
    %c0_75 = arith.constant 0 : index
    %c0_76 = arith.constant 0 : index
    %62 = vector.load %arg6[%c0_74, %c0_75, %c0_76] : memref<5x128x160xf32, #tpu.memory_space<vmem>>, vector<1x128x160xf32>
    %63 = vector.shape_cast %62 : vector<1x128x160xf32> to vector<128x160xf32>
    %cst_77 = arith.constant dense<0.000000e+00> : vector<112x160xf32>
    %64 = tpu.matmul %61, %63, %cst_77 {dimension_numbers = #tpu.dot_dimension_numbers<[1], [0], [0], [1], [0, 0, 1, 1], [], []>} : vector<112x128xf32>, vector<128x160xf32>, vector<112x160xf32> -> vector<112x160xf32>
    %c0_78 = arith.constant 0 : index
    %c0_79 = arith.constant 0 : index
    %65 = vector.load %arg18[%c0_78, %c0_79] : memref<112x160xf32, #tpu.memory_space<vmem>>, vector<112x160xf32>
    tpu.vector_store %arg18[%c0_78, %c0_79], %64 {strides = array<i32>} : memref<112x160xf32, #tpu.memory_space<vmem>>, vector<112x160xf32>,
    %c0_80 = arith.constant 0 : index
    %c0_81 = arith.constant 0 : index
    %66 = vector.load %arg18[%c0_80, %c0_81] : memref<112x160xf32, #tpu.memory_space<vmem>>, vector<112x160xf32>
    %c1_82 = arith.constant 1 : index
    %c0_83 = arith.constant 0 : index
    %67 = vector.load %arg19[%c1_82, %c0_83] : memref<120x128xf32, #tpu.memory_space<vmem>>, vector<112x128xf32>
    %c1_84 = arith.constant 1 : index
    %c0_85 = arith.constant 0 : index
    %c0_86 = arith.constant 0 : index
    %68 = vector.load %arg6[%c1_84, %c0_85, %c0_86] : memref<5x128x160xf32, #tpu.memory_space<vmem>>, vector<1x128x160xf32>
    %69 = vector.shape_cast %68 : vector<1x128x160xf32> to vector<128x160xf32>
    %cst_87 = arith.constant dense<0.000000e+00> : vector<112x160xf32>
    %70 = tpu.matmul %67, %69, %cst_87 {dimension_numbers = #tpu.dot_dimension_numbers<[1], [0], [0], [1], [0, 0, 1, 1], [], []>} : vector<112x128xf32>, vector<128x160xf32>, vector<112x160xf32> -> vector<112x160xf32>
    %71 = arith.addf %66, %70 : vector<112x160xf32>
    %c0_88 = arith.constant 0 : index
    %c0_89 = arith.constant 0 : index
    %72 = vector.load %arg18[%c0_88, %c0_89] : memref<112x160xf32, #tpu.memory_space<vmem>>, vector<112x160xf32>
    tpu.vector_store %arg18[%c0_88, %c0_89], %71 {strides = array<i32>} : memref<112x160xf32, #tpu.memory_space<vmem>>, vector<112x160xf32>,
    %c0_90 = arith.constant 0 : index
    %c0_91 = arith.constant 0 : index
    %73 = vector.load %arg18[%c0_90, %c0_91] : memref<112x160xf32, #tpu.memory_space<vmem>>, vector<112x160xf32>
    %c2_92 = arith.constant 2 : index
    %c0_93 = arith.constant 0 : index
    %74 = vector.load %arg19[%c2_92, %c0_93] : memref<120x128xf32, #tpu.memory_space<vmem>>, vector<112x128xf32>
    %c2_94 = arith.constant 2 : index
    %c0_95 = arith.constant 0 : index
    %c0_96 = arith.constant 0 : index
    %75 = vector.load %arg6[%c2_94, %c0_95, %c0_96] : memref<5x128x160xf32, #tpu.memory_space<vmem>>, vector<1x128x160xf32>
    %76 = vector.shape_cast %75 : vector<1x128x160xf32> to vector<128x160xf32>
    %cst_97 = arith.constant dense<0.000000e+00> : vector<112x160xf32>
    %77 = tpu.matmul %74, %76, %cst_97 {dimension_numbers = #tpu.dot_dimension_numbers<[1], [0], [0], [1], [0, 0, 1, 1], [], []>} : vector<112x128xf32>, vector<128x160xf32>, vector<112x160xf32> -> vector<112x160xf32>
    %78 = arith.addf %73, %77 : vector<112x160xf32>
    %c0_98 = arith.constant 0 : index
    %c0_99 = arith.constant 0 : index
    %79 = vector.load %arg18[%c0_98, %c0_99] : memref<112x160xf32, #tpu.memory_space<vmem>>, vector<112x160xf32>
    tpu.vector_store %arg18[%c0_98, %c0_99], %78 {strides = array<i32>} : memref<112x160xf32, #tpu.memory_space<vmem>>, vector<112x160xf32>,
    %c0_100 = arith.constant 0 : index
    %c0_101 = arith.constant 0 : index
    %80 = vector.load %arg18[%c0_100, %c0_101] : memref<112x160xf32, #tpu.memory_space<vmem>>, vector<112x160xf32>
    %c3_102 = arith.constant 3 : index
    %c0_103 = arith.constant 0 : index
    %81 = vector.load %arg19[%c3_102, %c0_103] : memref<120x128xf32, #tpu.memory_space<vmem>>, vector<112x128xf32>
    %c3_104 = arith.constant 3 : index
    %c0_105 = arith.constant 0 : index
    %c0_106 = arith.constant 0 : index
    %82 = vector.load %arg6[%c3_104, %c0_105, %c0_106] : memref<5x128x160xf32, #tpu.memory_space<vmem>>, vector<1x128x160xf32>
    %83 = vector.shape_cast %82 : vector<1x128x160xf32> to vector<128x160xf32>
    %cst_107 = arith.constant dense<0.000000e+00> : vector<112x160xf32>
    %84 = tpu.matmul %81, %83, %cst_107 {dimension_numbers = #tpu.dot_dimension_numbers<[1], [0], [0], [1], [0, 0, 1, 1], [], []>} : vector<112x128xf32>, vector<128x160xf32>, vector<112x160xf32> -> vector<112x160xf32>
    %85 = arith.addf %80, %84 : vector<112x160xf32>
    %c0_108 = arith.constant 0 : index
    %c0_109 = arith.constant 0 : index
    %86 = vector.load %arg18[%c0_108, %c0_109] : memref<112x160xf32, #tpu.memory_space<vmem>>, vector<112x160xf32>
    tpu.vector_store %arg18[%c0_108, %c0_109], %85 {strides = array<i32>} : memref<112x160xf32, #tpu.memory_space<vmem>>, vector<112x160xf32>,
    %c0_110 = arith.constant 0 : index
    %c0_111 = arith.constant 0 : index
    %87 = vector.load %arg18[%c0_110, %c0_111] : memref<112x160xf32, #tpu.memory_space<vmem>>, vector<112x160xf32>
    %c4_112 = arith.constant 4 : index
    %c0_113 = arith.constant 0 : index
    %88 = vector.load %arg19[%c4_112, %c0_113] : memref<120x128xf32, #tpu.memory_space<vmem>>, vector<112x128xf32>
    %c4_114 = arith.constant 4 : index
    %c0_115 = arith.constant 0 : index
    %c0_116 = arith.constant 0 : index
    %89 = vector.load %arg6[%c4_114, %c0_115, %c0_116] : memref<5x128x160xf32, #tpu.memory_space<vmem>>, vector<1x128x160xf32>
    %90 = vector.shape_cast %89 : vector<1x128x160xf32> to vector<128x160xf32>
    %cst_117 = arith.constant dense<0.000000e+00> : vector<112x160xf32>
    %91 = tpu.matmul %88, %90, %cst_117 {dimension_numbers = #tpu.dot_dimension_numbers<[1], [0], [0], [1], [0, 0, 1, 1], [], []>} : vector<112x128xf32>, vector<128x160xf32>, vector<112x160xf32> -> vector<112x160xf32>
    %92 = arith.addf %87, %91 : vector<112x160xf32>
    %c0_118 = arith.constant 0 : index
    %c0_119 = arith.constant 0 : index
    %93 = vector.load %arg18[%c0_118, %c0_119] : memref<112x160xf32, #tpu.memory_space<vmem>>, vector<112x160xf32>
    tpu.vector_store %arg18[%c0_118, %c0_119], %92 {strides = array<i32>} : memref<112x160xf32, #tpu.memory_space<vmem>>, vector<112x160xf32>,
    %c0_120 = arith.constant 0 : index
    %c0_121 = arith.constant 0 : index
    %94 = vector.load %arg18[%c0_120, %c0_121] : memref<112x160xf32, #tpu.memory_space<vmem>>, vector<112x160xf32>
    %c0_122 = arith.constant 0 : index
    %c0_123 = arith.constant 0 : index
    %c0_124 = arith.constant 0 : index
    %95 = vector.load %arg8[%c0_122, %c0_123, %c0_124] : memref<2x40x112xf32, #tpu.memory_space<vmem>>, vector<1x40x112xf32>
    %96 = vector.shape_cast %95 : vector<1x40x112xf32> to vector<40x112xf32>
    %cst_125 = arith.constant dense<0.000000e+00> : vector<40x160xf32>
    %97 = tpu.matmul %96, %94, %cst_125 {dimension_numbers = #tpu.dot_dimension_numbers<[1], [0], [0], [1], [0, 0, 1, 1], [], []>} : vector<40x112xf32>, vector<112x160xf32>, vector<40x160xf32> -> vector<40x160xf32>
    %c1_126 = arith.constant 1 : index
    %c0_127 = arith.constant 0 : index
    %c0_128 = arith.constant 0 : index
    %98 = vector.load %arg8[%c1_126, %c0_127, %c0_128] : memref<2x40x112xf32, #tpu.memory_space<vmem>>, vector<1x40x112xf32>
    %99 = vector.shape_cast %98 : vector<1x40x112xf32> to vector<40x112xf32>
    %cst_129 = arith.constant dense<0.000000e+00> : vector<40x160xf32>
    %100 = tpu.matmul %99, %94, %cst_129 {dimension_numbers = #tpu.dot_dimension_numbers<[1], [0], [0], [1], [0, 0, 1, 1], [], []>} : vector<40x112xf32>, vector<112x160xf32>, vector<40x160xf32> -> vector<40x160xf32>
    %101 = arith.maximumf %97, %100 : vector<40x160xf32>
    %c0_130 = arith.constant 0 : index
    %c0_131 = arith.constant 0 : index
    %c0_132 = arith.constant 0 : index
    %102 = vector.load %arg9[%c0_130, %c0_131, %c0_132] : memref<2x160x128xf32, #tpu.memory_space<vmem>>, vector<1x160x128xf32>
    %103 = vector.shape_cast %102 : vector<1x160x128xf32> to vector<160x128xf32>
    %cst_133 = arith.constant dense<0.000000e+00> : vector<40x128xf32>
    %104 = tpu.matmul %101, %103, %cst_133 {dimension_numbers = #tpu.dot_dimension_numbers<[1], [0], [0], [1], [0, 0, 1, 1], [], []>} : vector<40x160xf32>, vector<160x128xf32>, vector<40x128xf32> -> vector<40x128xf32>
    %c1_134 = arith.constant 1 : index
    %c0_135 = arith.constant 0 : index
    %c0_136 = arith.constant 0 : index
    %105 = vector.load %arg9[%c1_134, %c0_135, %c0_136] : memref<2x160x128xf32, #tpu.memory_space<vmem>>, vector<1x160x128xf32>
    %106 = vector.shape_cast %105 : vector<1x160x128xf32> to vector<160x128xf32>
    %cst_137 = arith.constant dense<0.000000e+00> : vector<40x128xf32>
    %107 = tpu.matmul %101, %106, %cst_137 {dimension_numbers = #tpu.dot_dimension_numbers<[1], [0], [0], [1], [0, 0, 1, 1], [], []>} : vector<40x160xf32>, vector<160x128xf32>, vector<40x128xf32> -> vector<40x128xf32>
    %108 = arith.maximumf %104, %107 : vector<40x128xf32>
    %c0_138 = arith.constant 0 : index
    %c0_139 = arith.constant 0 : index
    %109 = vector.load %arg7[%c0_138, %c0_139] : memref<1x128xf32, #tpu.memory_space<vmem>>, vector<1x128xf32>
    %110 = vector.broadcast %109 : vector<1x128xf32> to vector<40x128xf32>
    %111 = arith.addf %108, %110 : vector<40x128xf32>
    %cst_140 = arith.constant 0.000000e+00 : f32
    %112 = vector.broadcast %cst_140 : f32 to vector<40x128xf32>
    %113 = arith.maximumf %111, %112 : vector<40x128xf32>
    %114 = vector.extract_strided_slice %113 {offsets = [0, 0], sizes = [8, 128], strides = [1, 1]} : vector<40x128xf32> to vector<8x128xf32>
    %115 = vector.extract_strided_slice %113 {offsets = [8, 0], sizes = [8, 128], strides = [1, 1]} : vector<40x128xf32> to vector<8x128xf32>
    %116 = vector.extract_strided_slice %113 {offsets = [16, 0], sizes = [8, 128], strides = [1, 1]} : vector<40x128xf32> to vector<8x128xf32>
    %117 = vector.extract_strided_slice %113 {offsets = [24, 0], sizes = [8, 128], strides = [1, 1]} : vector<40x128xf32> to vector<8x128xf32>
    %118 = vector.extract_strided_slice %113 {offsets = [32, 0], sizes = [8, 128], strides = [1, 1]} : vector<40x128xf32> to vector<8x128xf32>
    %119 = tpu.concatenate %114, %115, %116, %117, %118 in 1 : vector<8x128xf32>, vector<8x128xf32>, vector<8x128xf32>, vector<8x128xf32>, vector<8x128xf32> -> vector<8x640xf32>
    %c0_141 = arith.constant 0 : index
    %c0_142 = arith.constant 0 : index
    %120 = vector.load %arg10[%c0_141, %c0_142] : memref<640x120xf32, #tpu.memory_space<vmem>>, vector<640x120xf32>
    %cst_143 = arith.constant dense<0.000000e+00> : vector<8x120xf32>
    %121 = tpu.matmul %119, %120, %cst_143 {dimension_numbers = #tpu.dot_dimension_numbers<[1], [0], [0], [1], [0, 0, 1, 1], [], []>} : vector<8x640xf32>, vector<640x120xf32>, vector<8x120xf32> -> vector<8x120xf32>
    %c0_144 = arith.constant 0 : index
    %c0_145 = arith.constant 0 : index
    %122 = vector.load %arg11[%c0_144, %c0_145] : memref<1x120xf32, #tpu.memory_space<vmem>>, vector<1x120xf32>
    %123 = vector.broadcast %122 : vector<1x120xf32> to vector<8x120xf32>
    %124 = arith.addf %121, %123 : vector<8x120xf32>
    %cst_146 = arith.constant 0.000000e+00 : f32
    %125 = vector.broadcast %cst_146 : f32 to vector<8x120xf32>
    %126 = arith.maximumf %124, %125 : vector<8x120xf32>
    %c0_147 = arith.constant 0 : index
    %c0_148 = arith.constant 0 : index
    %127 = vector.load %arg12[%c0_147, %c0_148] : memref<120x84xf32, #tpu.memory_space<vmem>>, vector<120x84xf32>
    %cst_149 = arith.constant dense<0.000000e+00> : vector<8x84xf32>
    %128 = tpu.matmul %126, %127, %cst_149 {dimension_numbers = #tpu.dot_dimension_numbers<[1], [0], [0], [1], [0, 0, 1, 1], [], []>} : vector<8x120xf32>, vector<120x84xf32>, vector<8x84xf32> -> vector<8x84xf32>
    %c0_150 = arith.constant 0 : index
    %c0_151 = arith.constant 0 : index
    %129 = vector.load %arg13[%c0_150, %c0_151] : memref<1x84xf32, #tpu.memory_space<vmem>>, vector<1x84xf32>
    %130 = vector.broadcast %129 : vector<1x84xf32> to vector<8x84xf32>
    %131 = arith.addf %128, %130 : vector<8x84xf32>
    %cst_152 = arith.constant 0.000000e+00 : f32
    %132 = vector.broadcast %cst_152 : f32 to vector<8x84xf32>
    %133 = arith.maximumf %131, %132 : vector<8x84xf32>
    %c0_153 = arith.constant 0 : index
    %c0_154 = arith.constant 0 : index
    %134 = vector.load %arg14[%c0_153, %c0_154] : memref<84x128xf32, #tpu.memory_space<vmem>>, vector<84x128xf32>
    %cst_155 = arith.constant dense<0.000000e+00> : vector<8x128xf32>
    %135 = tpu.matmul %133, %134, %cst_155 {dimension_numbers = #tpu.dot_dimension_numbers<[1], [0], [0], [1], [0, 0, 1, 1], [], []>} : vector<8x84xf32>, vector<84x128xf32>, vector<8x128xf32> -> vector<8x128xf32>
    %c0_156 = arith.constant 0 : index
    %c0_157 = arith.constant 0 : index
    %136 = vector.load %arg15[%c0_156, %c0_157] : memref<1x128xf32, #tpu.memory_space<vmem>>, vector<1x128xf32>
    %137 = vector.broadcast %136 : vector<1x128xf32> to vector<8x128xf32>
    %138 = arith.addf %135, %137 : vector<8x128xf32>
    %c0_158 = arith.constant 0 : index
    %c0_159 = arith.constant 0 : index
    %139 = vector.load %arg16[%c0_158, %c0_159] : memref<8x128xf32, #tpu.memory_space<vmem>>, vector<8x128xf32>
    tpu.vector_store %arg16[%c0_158, %c0_159], %138 {strides = array<i32>} : memref<8x128xf32, #tpu.memory_space<vmem>>, vector<8x128xf32>,
    return
  }
  func.func @transform_0(%arg0: i32) -> (i32, i32, i32) {
    %c0_i32 = arith.constant 0 : i32
    %c0_i32_0 = arith.constant 0 : i32
    %c0_i32_1 = arith.constant 0 : i32
    return %arg0, %c0_i32, %c0_i32_0 : i32, i32, i32
  }
  func.func @transform_1(%arg0: i32) -> (i32, i32, i32) {
    %c0_i32 = arith.constant 0 : i32
    %c0_i32_0 = arith.constant 0 : i32
    %c0_i32_1 = arith.constant 0 : i32
    %c0_i32_2 = arith.constant 0 : i32
    return %c0_i32, %c0_i32_0, %c0_i32_1 : i32, i32, i32
  }
  func.func @transform_2(%arg0: i32) -> (i32, i32) {
    %c0_i32 = arith.constant 0 : i32
    %c0_i32_0 = arith.constant 0 : i32
    %c0_i32_1 = arith.constant 0 : i32
    return %c0_i32, %c0_i32_0 : i32, i32
  }
  func.func @transform_3(%arg0: i32) -> (i32, i32, i32) {
    %c0_i32 = arith.constant 0 : i32
    %c0_i32_0 = arith.constant 0 : i32
    %c0_i32_1 = arith.constant 0 : i32
    %c0_i32_2 = arith.constant 0 : i32
    return %c0_i32, %c0_i32_0, %c0_i32_1 : i32, i32, i32
  }
  func.func @transform_4(%arg0: i32) -> (i32, i32, i32) {
    %c0_i32 = arith.constant 0 : i32
    %c0_i32_0 = arith.constant 0 : i32
    %c0_i32_1 = arith.constant 0 : i32
    %c0_i32_2 = arith.constant 0 : i32
    return %c0_i32, %c0_i32_0, %c0_i32_1 : i32, i32, i32
  }
  func.func @transform_5(%arg0: i32) -> (i32, i32, i32) {
    %c0_i32 = arith.constant 0 : i32
    %c0_i32_0 = arith.constant 0 : i32
    %c0_i32_1 = arith.constant 0 : i32
    %c0_i32_2 = arith.constant 0 : i32
    return %c0_i32, %c0_i32_0, %c0_i32_1 : i32, i32, i32
  }
  func.func @transform_6(%arg0: i32) -> (i32, i32) {
    %c0_i32 = arith.constant 0 : i32
    %c0_i32_0 = arith.constant 0 : i32
    %c0_i32_1 = arith.constant 0 : i32
    return %c0_i32, %c0_i32_0 : i32, i32
  }
  func.func @transform_7(%arg0: i32) -> (i32, i32, i32) {
    %c0_i32 = arith.constant 0 : i32
    %c0_i32_0 = arith.constant 0 : i32
    %c0_i32_1 = arith.constant 0 : i32
    %c0_i32_2 = arith.constant 0 : i32
    return %c0_i32, %c0_i32_0, %c0_i32_1 : i32, i32, i32
  }
  func.func @transform_8(%arg0: i32) -> (i32, i32, i32) {
    %c0_i32 = arith.constant 0 : i32
    %c0_i32_0 = arith.constant 0 : i32
    %c0_i32_1 = arith.constant 0 : i32
    %c0_i32_2 = arith.constant 0 : i32
    return %c0_i32, %c0_i32_0, %c0_i32_1 : i32, i32, i32
  }
  func.func @transform_9(%arg0: i32) -> (i32, i32) {
    %c0_i32 = arith.constant 0 : i32
    %c0_i32_0 = arith.constant 0 : i32
    %c0_i32_1 = arith.constant 0 : i32
    return %c0_i32, %c0_i32_0 : i32, i32
  }
  func.func @transform_10(%arg0: i32) -> (i32, i32) {
    %c0_i32 = arith.constant 0 : i32
    %c0_i32_0 = arith.constant 0 : i32
    %c0_i32_1 = arith.constant 0 : i32
    return %c0_i32, %c0_i32_0 : i32, i32
  }
  func.func @transform_11(%arg0: i32) -> (i32, i32) {
    %c0_i32 = arith.constant 0 : i32
    %c0_i32_0 = arith.constant 0 : i32
    %c0_i32_1 = arith.constant 0 : i32
    return %c0_i32, %c0_i32_0 : i32, i32
  }
  func.func @transform_12(%arg0: i32) -> (i32, i32) {
    %c0_i32 = arith.constant 0 : i32
    %c0_i32_0 = arith.constant 0 : i32
    %c0_i32_1 = arith.constant 0 : i32
    return %c0_i32, %c0_i32_0 : i32, i32
  }
  func.func @transform_13(%arg0: i32) -> (i32, i32) {
    %c0_i32 = arith.constant 0 : i32
    %c0_i32_0 = arith.constant 0 : i32
    %c0_i32_1 = arith.constant 0 : i32
    return %c0_i32, %c0_i32_0 : i32, i32
  }
  func.func @transform_14(%arg0: i32) -> (i32, i32) {
    %c0_i32 = arith.constant 0 : i32
    %c0_i32_0 = arith.constant 0 : i32
    %c0_i32_1 = arith.constant 0 : i32
    return %c0_i32, %c0_i32_0 : i32, i32
  }
  func.func @transform_15(%arg0: i32) -> (i32, i32) {
    %c0_i32 = arith.constant 0 : i32
    %c0_i32_0 = arith.constant 0 : i32
    return %arg0, %c0_i32 : i32, i32
  }
}

</mosaic_0001>

<bundles_post_ra>
// kernel: convnet_forward.1
= control target key start
LH: loop header
LB: loop body
LE: loop exit
PB: predicated region body
PF: predicated region fallthrough
CT: control target
= control target key end

     0   :  { %v7076_v3 = vmov 0.0   ;;  %vm372_vm0 = vcmask 326656   ;;  %vm3554_vm1 = vcmask 261120   ;;  %vm4735_vm2 = vcmask 916480   ;;  %s10521_s1 = inlined_call_operand.vmem [shape: f32[5,128,168], index: 1, kind: input, shape index: {}]   ;;  %s10522_s0 = inlined_call_operand.vmem [shape: f32[1,264,128], index: 0, kind: input, shape index: {}]   ;;  %s10523_s3 = inlined_call_operand.vmem [shape: f32[2,112,256], index: 3, kind: input, shape index: {}]   ;;  %s10524_s4 = inlined_call_operand.vmem [shape: f32[2,168,128], index: 4, kind: input, shape index: {}]   ;;  %s10525_s5 = inlined_call_operand.vmem [shape: f32[5,128,160], index: 5, kind: input, shape index: {}]   ;;  %s10526_s2 = inlined_call_operand.vmem [shape: f32[1,128], index: 2, kind: input, shape index: {}]   ;;  %s10527_s8 = inlined_call_operand.vmem [shape: f32[2,160,128], index: 8, kind: input, shape index: {}]   ;;  %s10528_s7 = inlined_call_operand.vmem [shape: f32[2,40,112], index: 7, kind: input, shape index: {}]   ;;  %s10529_s9 = inlined_call_operand.vmem [shape: f32[640,120], index: 9, kind: input, shape index: {}]   ;;  %s10530_s6 = inlined_call_operand.vmem [shape: f32[1,128], index: 6, kind: input, shape index: {}]   ;;  %s10531_s11 = inlined_call_operand.vmem [shape: f32[120,84], index: 11, kind: input, shape index: {}]   ;;  %s10532_s13 = inlined_call_operand.vmem [shape: f32[84,128], index: 13, kind: input, shape index: {}]   ;;  %s10533_s10 = inlined_call_operand.vmem [shape: f32[1,120], index: 10, kind: input, shape index: {}]   ;;  %s10534_s12 = inlined_call_operand.vmem [shape: f32[1,84], index: 12, kind: input, shape index: {}]   ;;  %s10535_s14 = inlined_call_operand.vmem [shape: f32[1,128], index: 14, kind: input, shape index: {}]   ;;  %s10536_s15 = inlined_call_operand.vmem [shape: f32[8,128], index: 15, kind: output, shape index: {}]  }
   0x1   :  { %v83_v0 = vld [vmem:[%s10521_s1 + $0x8] sm:$0xff]  ;;  %v85_v1 = vld [vmem:[%s10521_s1 + $0x18] sm:$0xff]  ;;  %v82_v2 = vld [vmem:[%s10521_s1] sm:$0xff]  ;;  %178 = vmatprep.mubr.f32.mxu0 %v7076_v3  ;;  %3357 = vst [vmem:[#allocation4 + $0x70] sm:$0xff] %v7076_v3  ;;  %629 = vmatprep.mubr.f32.mxu1 %v7076_v3  ;;  %vm7078_vm3 = vmmov 0   ;;  %vm5550_vm4 = vcmask 982016  }
   0x2   :  { %v6320_v4 = vpack.c.bf16 %v85_v1, %v83_v0  ;;  %v84_v5 = vld [vmem:[%s10521_s1 + $0x10] sm:$0xff]  ;;  %v87_v6 = vld [vmem:[%s10521_s1 + $0x28] sm:$0xff]  ;;  %v89_v7 = vld [vmem:[%s10521_s1 + $0x38] sm:$0xff]  ;;  %vm5647_vm5 = vcmask 1043456   ;;  %vm5643_vm6 = vcmask 687104  }
   0x3   :  { %v6322_v8 = vpack.c.bf16 %v84_v5, %v82_v2  ;;  %v6324_v9 = vpack.c.bf16 %v89_v7, %v87_v6  ;;  %v86_v10 = vld [vmem:[%s10521_s1 + $0x20] sm:$0xff]  ;;  %v88_v11 = vld [vmem:[%s10521_s1 + $0x30] sm:$0xff]  ;;  %v91_v12 = vld [vmem:[%s10521_s1 + $0x48] sm:$0xff] }
   0x4   :  { %6321 = vmatprep.subr.bf16.mxu0 %v6320_v4  ;;  %v93_v13 = vld [vmem:[%s10521_s1 + $0x58] sm:$0xff]  ;;  %v5727_v14 = vld [vmem:[%s10521_s1 + $0x108] sm:$0xff]  ;;  %v6326_v16 = vpack.c.bf16 %v88_v11, %v86_v10  ;;  %v90_v18 = vld [vmem:[%s10521_s1 + $0x40] sm:$0xff] }
   0x5   :  { %v5729_v15 = vld [vmem:[%s10521_s1 + $0x118] sm:$0xff]  ;;  %6323 = vmatpush1.bf16.msra.mxu0 %v6322_v8  ;;  %v5726_v19 = vld [vmem:[%s10521_s1 + $0x100] sm:$0xff]  ;;  %v6328_v20 = vpack.c.bf16 %v93_v13, %v91_v12  ;;  %v92_v21 = vld [vmem:[%s10521_s1 + $0x50] sm:$0xff] }
   0x6   :  { %v6352_v17 = vpack.c.bf16 %v5729_v15, %v5727_v14  ;;  %6325 = vmatprep.subr.bf16.mxu0 %v6324_v9  ;;  %v5728_v22 = vld [vmem:[%s10521_s1 + $0x110] sm:$0xff]  ;;  %v95_v23 = vld [vmem:[%s10521_s1 + $0x68] sm:$0xff]  ;;  %v97_v25 = vld [vmem:[%s10521_s1 + $0x78] sm:$0xff]  ;;  %v6330_v31 = vpack.c.bf16 %v92_v21, %v90_v18 }
   0x7   :  { %v6354_v24 = vpack.c.bf16 %v5728_v22, %v5726_v19  ;;  %v5731_v26 = vld [vmem:[%s10521_s1 + $0x128] sm:$0xff]  ;;  %v5733_v27 = vld [vmem:[%s10521_s1 + $0x138] sm:$0xff]  ;;  %v5730_v29 = vld [vmem:[%s10521_s1 + $0x120] sm:$0xff]  ;;  %v6332_v35 = vpack.c.bf16 %v97_v25, %v95_v23 }
   0x8   :  { %6353 = vmatprep.subr.bf16.mxu1 %v6352_v17  ;;  %v6356_v28 = vpack.c.bf16 %v5733_v27, %v5731_v26  ;;  %v5732_v30 = vld [vmem:[%s10521_s1 + $0x130] sm:$0xff]  ;;  %v94_v32 = vld [vmem:[%s10521_s1 + $0x60] sm:$0xff]  ;;  %v5735_v34 = vld [vmem:[%s10521_s1 + $0x148] sm:$0xff] }
   0x9   :  { %6327 = vmatpush1.bf16.msra.mxu0 %v6326_v16  ;;  %6355 = vmatpush1.bf16.msra.mxu1 %v6354_v24  ;;  %v6358_v33 = vpack.c.bf16 %v5732_v30, %v5730_v29  ;;  %v96_v36 = vld [vmem:[%s10521_s1 + $0x70] sm:$0xff]  ;;  %v99_v37 = vld [vmem:[%s10521_s1 + $0x88] sm:$0xff]  ;;  %v5737_v38 = vld [vmem:[%s10521_s1 + $0x158] sm:$0xff] }
   0xa   :  { %6329 = vmatprep.subr.bf16.mxu0 %v6328_v20  ;;  %6357 = vmatprep.subr.bf16.mxu1 %v6356_v28  ;;  %v101_v39 = vld [vmem:[%s10521_s1 + $0x98] sm:$0xff]  ;;  %v6360_v40 = vpack.c.bf16 %v5737_v38, %v5735_v34  ;;  %v5734_v41 = vld [vmem:[%s10521_s1 + $0x140] sm:$0xff]  ;;  %v5736_v42 = vld [vmem:[%s10521_s1 + $0x150] sm:$0xff]  ;;  %v6334_v45 = vpack.c.bf16 %v96_v36, %v94_v32 }
   0xb   :  { %v5739_v43 = vld [vmem:[%s10521_s1 + $0x168] sm:$0xff]  ;;  %v5741_v44 = vld [vmem:[%s10521_s1 + $0x178] sm:$0xff]  ;;  %v98_v46 = vld [vmem:[%s10521_s1 + $0x80] sm:$0xff]  ;;  %v6362_v48 = vpack.c.bf16 %v5736_v42, %v5734_v41  ;;  %v6336_v49 = vpack.c.bf16 %v101_v39, %v99_v37 }
   0xc   :  { %v100_v47 = vld [vmem:[%s10521_s1 + $0x90] sm:$0xff]  ;;  %v103_v50 = vld [vmem:[%s10521_s1 + $0xa8] sm:$0xff]  ;;  %v6364_v51 = vpack.c.bf16 %v5741_v44, %v5739_v43  ;;  %v5738_v52 = vld [vmem:[%s10521_s1 + $0x160] sm:$0xff] }
   0xd   :  { %6331 = vmatpush1.bf16.msra.mxu0 %v6330_v31  ;;  %6359 = vmatpush1.bf16.msra.mxu1 %v6358_v33  ;;  %v5740_v53 = vld [vmem:[%s10521_s1 + $0x170] sm:$0xff]  ;;  %v105_v54 = vld [vmem:[%s10521_s1 + $0xb8] sm:$0xff]  ;;  %v5743_v55 = vld [vmem:[%s10521_s1 + $0x188] sm:$0xff]  ;;  %v6338_v57 = vpack.c.bf16 %v100_v47, %v98_v46 }
   0xe   :  { %6333 = vmatprep.subr.bf16.mxu0 %v6332_v35  ;;  %6361 = vmatprep.subr.bf16.mxu1 %v6360_v40  ;;  %v5745_v56 = vld [vmem:[%s10521_s1 + $0x198] sm:$0xff]  ;;  %v102_v58 = vld [vmem:[%s10521_s1 + $0xa0] sm:$0xff]  ;;  %v104_v59 = vld [vmem:[%s10521_s1 + $0xb0] sm:$0xff]  ;;  %v6366_v60 = vpack.c.bf16 %v5740_v53, %v5738_v52  ;;  %v6340_v61 = vpack.c.bf16 %v105_v54, %v103_v50 }
   0xf   :  { %v107_v62 = vld [vmem:[%s10521_s1 + $0xc8] sm:$0xff]  ;;  %v6368_v63 = vpack.c.bf16 %v5745_v56, %v5743_v55  ;;  %v5742_v0 = vld [vmem:[%s10521_s1 + $0x180] sm:$0xff]  ;;  %v5744_v1 = vld [vmem:[%s10521_s1 + $0x190] sm:$0xff]  ;;  %v6342_v6 = vpack.c.bf16 %v104_v59, %v102_v58 }
  0x10   :  { %v109_v2 = vld [vmem:[%s10521_s1 + $0xd8] sm:$0xff]  ;;  %v5747_v4 = vld [vmem:[%s10521_s1 + $0x1a8] sm:$0xff]  ;;  %v106_v7 = vld [vmem:[%s10521_s1 + $0xc0] sm:$0xff]  ;;  %v6370_v9 = vpack.c.bf16 %v5744_v1, %v5742_v0 }
  0x11   :  { %6335 = vmatpush1.bf16.msra.mxu0 %v6334_v45  ;;  %6363 = vmatpush1.bf16.msra.mxu1 %v6362_v48  ;;  %v5749_v5 = vld [vmem:[%s10521_s1 + $0x1b8] sm:$0xff]  ;;  %v108_v8 = vld [vmem:[%s10521_s1 + $0xd0] sm:$0xff]  ;;  %v6344_v10 = vpack.c.bf16 %v109_v2, %v107_v62  ;;  %v111_v11 = vld [vmem:[%s10521_s1 + $0xe8] sm:$0xff] }
  0x12   :  { %6337 = vmatprep.subr.bf16.mxu0 %v6336_v49  ;;  %6365 = vmatprep.subr.bf16.mxu1 %v6364_v51  ;;  %v6372_v12 = vpack.c.bf16 %v5749_v5, %v5747_v4  ;;  %v5746_v13 = vld [vmem:[%s10521_s1 + $0x1a0] sm:$0xff]  ;;  %v5748_v14 = vld [vmem:[%s10521_s1 + $0x1b0] sm:$0xff]  ;;  %v113_v15 = vld [vmem:[%s10521_s1 + $0xf8] sm:$0xff]  ;;  %v6346_v18 = vpack.c.bf16 %v108_v8, %v106_v7 }
  0x13   :  { %v5751_v16 = vld [vmem:[%s10521_s1 + $0x1c8] sm:$0xff]  ;;  %v5753_v17 = vld [vmem:[%s10521_s1 + $0x1d8] sm:$0xff]  ;;  %v110_v19 = vld [vmem:[%s10521_s1 + $0xe0] sm:$0xff]  ;;  %v6374_v21 = vpack.c.bf16 %v5748_v14, %v5746_v13  ;;  %v6348_v22 = vpack.c.bf16 %v113_v15, %v111_v11 }
  0x14   :  { %v112_v20 = vld [vmem:[%s10521_s1 + $0xf0] sm:$0xff]  ;;  %v6376_v23 = vpack.c.bf16 %v5753_v17, %v5751_v16  ;;  %v5750_v24 = vld [vmem:[%s10521_s1 + $0x1c0] sm:$0xff]  ;;  %v5759_v26 = vld [vmem:[%s10521_s1 + $0x208] sm:$0xff] }
  0x15   :  { %6339 = vmatpush1.bf16.msra.mxu0 %v6338_v57  ;;  %6367 = vmatpush1.bf16.msra.mxu1 %v6366_v60  ;;  %v5752_v25 = vld [vmem:[%s10521_s1 + $0x1d0] sm:$0xff]  ;;  %v5761_v27 = vld [vmem:[%s10521_s1 + $0x218] sm:$0xff]  ;;  %v5755_v28 = vld [vmem:[%s10521_s1 + $0x1e8] sm:$0xff]  ;;  %v6350_v30 = vpack.c.bf16 %v112_v20, %v110_v19 }
  0x16   :  { %6341 = vmatprep.subr.bf16.mxu0 %v6340_v61  ;;  %6369 = vmatprep.subr.bf16.mxu1 %v6368_v63  ;;  %v5757_v29 = vld [vmem:[%s10521_s1 + $0x1f8] sm:$0xff]  ;;  %v6378_v31 = vpack.c.bf16 %v5752_v25, %v5750_v24  ;;  %v6384_v32 = vpack.c.bf16 %v5761_v27, %v5759_v26  ;;  %v5758_v34 = vld [vmem:[%s10521_s1 + $0x200] sm:$0xff]  ;;  %v5760_v35 = vld [vmem:[%s10521_s1 + $0x210] sm:$0xff] }
  0x17   :  { %v6380_v33 = vpack.c.bf16 %v5757_v29, %v5755_v28  ;;  %v5754_v36 = vld [vmem:[%s10521_s1 + $0x1e0] sm:$0xff]  ;;  %v5756_v37 = vld [vmem:[%s10521_s1 + $0x1f0] sm:$0xff]  ;;  %v5763_v38 = vld [vmem:[%s10521_s1 + $0x228] sm:$0xff]  ;;  %v6386_v41 = vpack.c.bf16 %v5760_v35, %v5758_v34 }
  0x18   :  { %v5765_v39 = vld [vmem:[%s10521_s1 + $0x238] sm:$0xff]  ;;  %v50_v40 = vld [vmem:[%s10522_s0] sm:$0xff]  ;;  %v6382_v42 = vpack.c.bf16 %v5756_v37, %v5754_v36  ;;  %v5764_v45 = vld [vmem:[%s10521_s1 + $0x230] sm:$0xff] }
  0x19   :  { %6343 = vmatpush1.bf16.msra.mxu0 %v6342_v6  ;;  %6371 = vmatpush1.bf16.msra.mxu1 %v6370_v9  ;;  %v6388_v43 = vpack.c.bf16 %v5765_v39, %v5763_v38  ;;  %v5762_v44 = vld [vmem:[%s10521_s1 + $0x220] sm:$0xff]  ;;  %v5767_v46 = vld [vmem:[%s10521_s1 + $0x248] sm:$0xff]  ;;  %v5769_v47 = vld [vmem:[%s10521_s1 + $0x258] sm:$0xff] }
  0x1a   :  { %6345 = vmatprep.subr.bf16.mxu0 %v6344_v10  ;;  %6373 = vmatprep.subr.bf16.mxu1 %v6372_v12  ;;  %v51_v48 = vld [vmem:[%s10522_s0 + $0x8] sm:$0xff]  ;;  %v6390_v50 = vpack.c.bf16 %v5764_v45, %v5762_v44  ;;  %v6392_v51 = vpack.c.bf16 %v5769_v47, %v5767_v46  ;;  %v5766_v52 = vld [vmem:[%s10521_s1 + $0x240] sm:$0xff]  ;;  %v5768_v53 = vld [vmem:[%s10521_s1 + $0x250] sm:$0xff] }
  0x1b   :  { %v500_v49 = vld [vmem:[%s10522_s0 + $0x1] sm:$0xff]  ;;  %v5773_v55 = vld [vmem:[%s10521_s1 + $0x278] sm:$0xff]  ;;  %v52_v56 = vld [vmem:[%s10522_s0 + $0x10] sm:$0xff]  ;;  %v6394_v58 = vpack.c.bf16 %v5768_v53, %v5766_v52 }
  0x1c   :  { %v5771_v54 = vld [vmem:[%s10521_s1 + $0x268] sm:$0xff]  ;;  %v5770_v60 = vld [vmem:[%s10521_s1 + $0x260] sm:$0xff]  ;;  %v5772_v61 = vld [vmem:[%s10521_s1 + $0x270] sm:$0xff] }
  0x1d   :  { %6347 = vmatpush1.bf16.msra.mxu0 %v6346_v18  ;;  %6375 = vmatpush1.bf16.msra.mxu1 %v6374_v21  ;;  %v501_v57 = vld [vmem:[%s10522_s0 + $0x9] sm:$0xff]  ;;  %v6396_v59 = vpack.c.bf16 %v5773_v55, %v5771_v54  ;;  %v5777_v63 = vld [vmem:[%s10521_s1 + $0x298] sm:$0xff]  ;;  %v6398_v2 = vpack.c.bf16 %v5772_v61, %v5770_v60  ;;  %v54_v4 = vld [vmem:[%s10522_s0 + $0x20] sm:$0xff] }
  0x1e   :  { %6349 = vmatprep.subr.bf16.mxu0 %v6348_v22  ;;  %6377 = vmatprep.subr.bf16.mxu1 %v6376_v23  ;;  %v5775_v62 = vld [vmem:[%s10521_s1 + $0x288] sm:$0xff]  ;;  %v53_v0 = vld [vmem:[%s10522_s0 + $0x18] sm:$0xff]  ;;  %v5774_v6 = vld [vmem:[%s10521_s1 + $0x280] sm:$0xff] }
  0x1f   :  { %v502_v1 = vld [vmem:[%s10522_s0 + $0x11] sm:$0xff]  ;;  %v6400_v5 = vpack.c.bf16 %v5777_v63, %v5775_v62  ;;  %v503_v8 = vld [vmem:[%s10522_s0 + $0x19] sm:$0xff]  ;;  %v5779_v9 = vld [vmem:[%s10521_s1 + $0x2a8] sm:$0xff] }
  0x20   :  { %v5776_v7 = vld [vmem:[%s10521_s1 + $0x290] sm:$0xff]  ;;  %v5781_v10 = vld [vmem:[%s10521_s1 + $0x2b8] sm:$0xff]  ;;  %v5791_v11 = vld [vmem:[%s10521_s1 + $0x308] sm:$0xff] }
  0x21   :  { %6351 = vmatpush1.bf16.msra.mxu0 %v6350_v30  ;;  %6379 = vmatpush1.bf16.msra.mxu1 %v6378_v31  ;;  %v5793_v12 = vld [vmem:[%s10521_s1 + $0x318] sm:$0xff]  ;;  %v5790_v13 = vld [vmem:[%s10521_s1 + $0x300] sm:$0xff]  ;;  %v6402_v14 = vpack.c.bf16 %v5776_v7, %v5774_v6  ;;  %v5780_v16 = vld [vmem:[%s10521_s1 + $0x2b0] sm:$0xff]  ;;  %v6404_v19 = vpack.c.bf16 %v5781_v10, %v5779_v9 }
  0x22   :  { %6385 = vmatprep.subr.bf16.mxu0 %v6384_v32  ;;  %6381 = vmatprep.subr.bf16.mxu1 %v6380_v33  ;;  %v5778_v15 = vld [vmem:[%s10521_s1 + $0x2a0] sm:$0xff]  ;;  %v6416_v17 = vpack.c.bf16 %v5793_v12, %v5791_v11  ;;  %v5792_v18 = vld [vmem:[%s10521_s1 + $0x310] sm:$0xff]  ;;  %v5783_v20 = vld [vmem:[%s10521_s1 + $0x2c8] sm:$0xff] }
  0x23   :  { %v6418_v21 = vpack.c.bf16 %v5792_v18, %v5790_v13  ;;  %v5795_v22 = vld [vmem:[%s10521_s1 + $0x328] sm:$0xff]  ;;  %v5797_v23 = vld [vmem:[%s10521_s1 + $0x338] sm:$0xff]  ;;  %v5794_v26 = vld [vmem:[%s10521_s1 + $0x320] sm:$0xff]  ;;  %v6406_v32 = vpack.c.bf16 %v5780_v16, %v5778_v15 }
  0x24   :  { %179 = vmatmul.mubr.f32.vlgmr.msra.gmra.mrb[0].mxu0 %v50_v40  ;;  %v5785_v24 = vld [vmem:[%s10521_s1 + $0x2d8] sm:$0xff]  ;;  %v6420_v25 = vpack.c.bf16 %v5797_v23, %v5795_v22  ;;  %v5796_v27 = vld [vmem:[%s10521_s1 + $0x330] sm:$0xff]  ;;  %v55_v28 = vld [vmem:[%s10522_s0 + $0x28] sm:$0xff] }
  0x25   :  { %184 = vmatprep.mubr.f32.mxu0 %v7076_v3  ;;  %6387 = vmatpush1.bf16.msra.mxu0 %v6386_v41  ;;  %v5799_v29 = vld [vmem:[%s10521_s1 + $0x348] sm:$0xff]  ;;  %v5801_v30 = vld [vmem:[%s10521_s1 + $0x358] sm:$0xff]  ;;  %v6408_v33 = vpack.c.bf16 %v5785_v24, %v5783_v20  ;;  %v5782_v34 = vld [vmem:[%s10521_s1 + $0x2c0] sm:$0xff]  ;;  %v6422_v36 = vpack.c.bf16 %v5796_v27, %v5794_v26 }
  0x26   :  { %6383 = vmatpush1.bf16.msra.mxu1 %v6382_v42  ;;  %6389 = vmatprep.subr.bf16.mxu0 %v6388_v43  ;;  %v504_v31 = vld [vmem:[%s10522_s0 + $0x21] sm:$0xff]  ;;  %v5784_v35 = vld [vmem:[%s10521_s1 + $0x2d0] sm:$0xff]  ;;  %v6424_v38 = vpack.c.bf16 %v5801_v30, %v5799_v29  ;;  %v5789_v39 = vld [vmem:[%s10521_s1 + $0x2f8] sm:$0xff] }
  0x27   :  { %6417 = vmatprep.subr.bf16.mxu1 %v6416_v17  ;;  %v5787_v37 = vld [vmem:[%s10521_s1 + $0x2e8] sm:$0xff]  ;;  %v5798_v40 = vld [vmem:[%s10521_s1 + $0x340] sm:$0xff]  ;;  %v5800_v41 = vld [vmem:[%s10521_s1 + $0x350] sm:$0xff]  ;;  %v6410_v46 = vpack.c.bf16 %v5784_v35, %v5782_v34 }
  0x28   :  { %185 = vmatmul.mubr.f32.gmra.mrb[2].mxu0 %v51_v48  ;;  %v56_v42 = vld [vmem:[%s10522_s0 + $0x30] sm:$0xff]  ;;  %v5803_v43 = vld [vmem:[%s10521_s1 + $0x368] sm:$0xff]  ;;  %v5805_v44 = vld [vmem:[%s10521_s1 + $0x378] sm:$0xff]  ;;  %v6412_v47 = vpack.c.bf16 %v5789_v39, %v5787_v37  ;;  %v6426_v48 = vpack.c.bf16 %v5800_v41, %v5798_v40 }
  0x29   :  { %190 = vmatprep.mubr.f32.mxu0 %v7076_v3  ;;  %630 = vmatmul.mubr.f32.vlgmr.msra.gmra.mrb[0].mxu1 %v500_v49  ;;  %v505_v45 = vld [vmem:[%s10522_s0 + $0x29] sm:$0xff]  ;;  %v5786_v49 = vld [vmem:[%s10521_s1 + $0x2e0] sm:$0xff]  ;;  %v57_v54 = vld [vmem:[%s10522_s0 + $0x38] sm:$0xff] }
  0x2a   :  { %635 = vmatprep.mubr.f32.mxu1 %v7076_v3  ;;  %6391 = vmatpush1.bf16.msra.mxu0 %v6390_v50  ;;  %v5788_v50 = vld [vmem:[%s10521_s1 + $0x2f0] sm:$0xff]  ;;  %v5802_v52 = vld [vmem:[%s10521_s1 + $0x360] sm:$0xff]  ;;  %v5807_v55 = vld [vmem:[%s10521_s1 + $0x388] sm:$0xff] }
  0x2b   :  { %6393 = vmatprep.subr.bf16.mxu0 %v6392_v51  ;;  %6419 = vmatpush1.bf16.msra.mxu1 %v6418_v21  ;;  %v6428_v51 = vpack.c.bf16 %v5805_v44, %v5803_v43  ;;  %v5804_v53 = vld [vmem:[%s10521_s1 + $0x370] sm:$0xff]  ;;  %v5823_v60 = vld [vmem:[%s10521_s1 + $0x408] sm:$0xff]  ;;  %v5806_v62 = vld [vmem:[%s10521_s1 + $0x380] sm:$0xff] }
  0x2c   :  { %191 = vmatmul.mubr.f32.gmra.mrb[4].mxu0 %v52_v56  ;;  %6421 = vmatprep.subr.bf16.mxu1 %v6420_v25  ;;  %v5809_v56 = vld [vmem:[%s10521_s1 + $0x398] sm:$0xff]  ;;  %v5808_v63 = vld [vmem:[%s10521_s1 + $0x390] sm:$0xff]  ;;  %v5810_v9 = vld [vmem:[%s10521_s1 + $0x3a0] sm:$0xff] }
  0x2d   :  { %196 = vmatprep.mubr.f32.mxu0 %v7076_v3  ;;  %636 = vmatmul.mubr.f32.gmra.mrb[2].mxu1 %v501_v57  ;;  %v506_v57 = vld [vmem:[%s10522_s0 + $0x31] sm:$0xff]  ;;  %v6432_v61 = vpack.c.bf16 %v5809_v56, %v5807_v55  ;;  %v507_v6 = vld [vmem:[%s10522_s0 + $0x39] sm:$0xff]  ;;  %v6434_v7 = vpack.c.bf16 %v5808_v63, %v5806_v62  ;;  %v59_v11 = vld [vmem:[%s10522_s0 + $0x48] sm:$0xff] }
  0x2e   :  { %641 = vmatprep.mubr.f32.mxu1 %v7076_v3  ;;  %6395 = vmatpush1.bf16.msra.mxu0 %v6394_v58  ;;  %v6414_v58 = vpack.c.bf16 %v5788_v50, %v5786_v49  ;;  %v5812_v10 = vld [vmem:[%s10521_s1 + $0x3b0] sm:$0xff]  ;;  %v5815_v12 = vld [vmem:[%s10521_s1 + $0x3c8] sm:$0xff]  ;;  %v5817_v13 = vld [vmem:[%s10521_s1 + $0x3d8] sm:$0xff] }
  0x2f   :  { %6397 = vmatprep.subr.bf16.mxu0 %v6396_v59  ;;  %6423 = vmatpush1.bf16.msra.mxu1 %v6422_v36  ;;  %v6430_v59 = vpack.c.bf16 %v5804_v53, %v5802_v52  ;;  %v6438_v15 = vpack.c.bf16 %v5812_v10, %v5810_v9  ;;  %v6440_v16 = vpack.c.bf16 %v5817_v13, %v5815_v12  ;;  %v5814_v17 = vld [vmem:[%s10521_s1 + $0x3c0] sm:$0xff]  ;;  %v5816_v18 = vld [vmem:[%s10521_s1 + $0x3d0] sm:$0xff]  ;;  %v5819_v20 = vld [vmem:[%s10521_s1 + $0x3e8] sm:$0xff] }
  0x30   :  { %197 = vmatmul.mubr.f32.gmra.mrb[6].mxu0 %v53_v0  ;;  %6425 = vmatprep.subr.bf16.mxu1 %v6424_v38  ;;  %v5825_v0 = vld [vmem:[%s10521_s1 + $0x418] sm:$0xff]  ;;  %v509_v22 = vld [vmem:[%s10522_s0 + $0x49] sm:$0xff]  ;;  %v6442_v23 = vpack.c.bf16 %v5816_v18, %v5814_v17  ;;  %v5818_v25 = vld [vmem:[%s10521_s1 + $0x3e0] sm:$0xff] }
  0x31   :  { %202 = vmatprep.mubr.f32.mxu0 %v7076_v3  ;;  %642 = vmatmul.mubr.f32.gmra.mrb[4].mxu1 %v502_v1  ;;  %v58_v1 = vld [vmem:[%s10522_s0 + $0x40] sm:$0xff]  ;;  %v5821_v21 = vld [vmem:[%s10521_s1 + $0x3f8] sm:$0xff]  ;;  %v5820_v26 = vld [vmem:[%s10521_s1 + $0x3f0] sm:$0xff] }
  0x32   :  { %647 = vmatprep.mubr.f32.mxu1 %v7076_v3  ;;  %6399 = vmatpush1.bf16.msra.mxu0 %v6398_v2  ;;  %v5811_v2 = vld [vmem:[%s10521_s1 + $0x3a8] sm:$0xff]  ;;  %v6444_v24 = vpack.c.bf16 %v5821_v21, %v5819_v20  ;;  %v61_v27 = vld [vmem:[%s10522_s0 + $0x58] sm:$0xff]  ;;  %v6446_v29 = vpack.c.bf16 %v5820_v26, %v5818_v25  ;;  %v62_v30 = vld [vmem:[%s10522_s0 + $0x60] sm:$0xff] }
  0x33   :  { %6401 = vmatprep.subr.bf16.mxu0 %v6400_v5  ;;  %6427 = vmatpush1.bf16.msra.mxu1 %v6426_v48  ;;  %v6448_v5 = vpack.c.bf16 %v5825_v0, %v5823_v60  ;;  %v64_v34 = vld [vmem:[%s10522_s0 + $0x70] sm:$0xff]  ;;  %v65_v36 = vld [vmem:[%s10522_s0 + $0x78] sm:$0xff]  ;;  %v66_v38 = vld [vmem:[%s10522_s0 + $0x80] sm:$0xff] }
  0x34   :  { %203 = vmatmul.mubr.f32.gmra.mrb[8].mxu0 %v54_v4  ;;  %6429 = vmatprep.subr.bf16.mxu1 %v6428_v51  ;;  %v5813_v4 = vld [vmem:[%s10521_s1 + $0x3b8] sm:$0xff]  ;;  %v513_v35 = vld [vmem:[%s10522_s0 + $0x69] sm:$0xff]  ;;  %v516_v41 = vld [vmem:[%s10522_s0 + $0x81] sm:$0xff] }
  0x35   :  { %208 = vmatprep.mubr.f32.mxu0 %v7076_v3  ;;  %648 = vmatmul.mubr.f32.gmra.mrb[6].mxu1 %v503_v8  ;;  %v6436_v8 = vpack.c.bf16 %v5813_v4, %v5811_v2  ;;  %v514_v37 = vld [vmem:[%s10522_s0 + $0x71] sm:$0xff]  ;;  %v515_v39 = vld [vmem:[%s10522_s0 + $0x79] sm:$0xff]  ;;  %v67_v40 = vld [vmem:[%s10522_s0 + $0x88] sm:$0xff] }
  0x36   :  { %653 = vmatprep.mubr.f32.mxu1 %v7076_v3  ;;  %6403 = vmatpush1.bf16.msra.mxu0 %v6402_v14  ;;  %v508_v14 = vld [vmem:[%s10522_s0 + $0x41] sm:$0xff]  ;;  %v517_v43 = vld [vmem:[%s10522_s0 + $0x89] sm:$0xff]  ;;  %v69_v44 = vld [vmem:[%s10522_s0 + $0x98] sm:$0xff] }
  0x37   :  { %6405 = vmatprep.subr.bf16.mxu0 %v6404_v19  ;;  %6431 = vmatpush1.bf16.msra.mxu1 %v6430_v59  ;;  %v60_v19 = vld [vmem:[%s10522_s0 + $0x50] sm:$0xff]  ;;  %v71_v48 = vld [vmem:[%s10522_s0 + $0xa8] sm:$0xff]  ;;  %v73_v52 = vld [vmem:[%s10522_s0 + $0xb8] sm:$0xff] }
  0x38   :  { %209 = vmatmul.mubr.f32.gmra.mrb[10].mxu0 %v55_v28  ;;  %6433 = vmatprep.subr.bf16.mxu1 %v6432_v61  ;;  %v510_v28 = vld [vmem:[%s10522_s0 + $0x51] sm:$0xff]  ;;  %v520_v49 = vld [vmem:[%s10522_s0 + $0xa1] sm:$0xff]  ;;  %v521_v51 = vld [vmem:[%s10522_s0 + $0xa9] sm:$0xff] }
  0x39   :  { %214 = vmatprep.mubr.f32.mxu0 %v7076_v3  ;;  %654 = vmatmul.mubr.f32.gmra.mrb[8].mxu1 %v504_v31  ;;  %v511_v31 = vld [vmem:[%s10522_s0 + $0x59] sm:$0xff]  ;;  %v72_v50 = vld [vmem:[%s10522_s0 + $0xb0] sm:$0xff]  ;;  %v75_v56 = vld [vmem:[%s10522_s0 + $0xc8] sm:$0xff] }
  0x3a   :  { %659 = vmatprep.mubr.f32.mxu1 %v7076_v3  ;;  %6407 = vmatpush1.bf16.msra.mxu0 %v6406_v32  ;;  %v63_v32 = vld [vmem:[%s10522_s0 + $0x68] sm:$0xff]  ;;  %v522_v53 = vld [vmem:[%s10522_s0 + $0xb1] sm:$0xff]  ;;  %v523_v55 = vld [vmem:[%s10522_s0 + $0xb9] sm:$0xff] }
  0x3b   :  { %6409 = vmatprep.subr.bf16.mxu0 %v6408_v33  ;;  %6435 = vmatpush1.bf16.msra.mxu1 %v6434_v7  ;;  %v512_v33 = vld [vmem:[%s10522_s0 + $0x61] sm:$0xff]  ;;  %v525_v59 = vld [vmem:[%s10522_s0 + $0xc9] sm:$0xff]  ;;  %v77_v60 = vld [vmem:[%s10522_s0 + $0xd8] sm:$0xff] }
  0x3c   :  { %215 = vmatmul.mubr.f32.gmra.mrb[12].mxu0 %v56_v42  ;;  %6437 = vmatprep.subr.bf16.mxu1 %v6436_v8  ;;  %v68_v42 = vld [vmem:[%s10522_s0 + $0x90] sm:$0xff]  ;;  %v78_v62 = vld [vmem:[%s10522_s0 + $0xe0] sm:$0xff]  ;;  %v79_v0 = vld [vmem:[%s10522_s0 + $0xe8] sm:$0xff] }
  0x3d   :  { %220 = vmatprep.mubr.f32.mxu0 %v7076_v3  ;;  %660 = vmatmul.mubr.f32.gmra.mrb[10].mxu1 %v505_v45  ;;  %v518_v45 = vld [vmem:[%s10522_s0 + $0x91] sm:$0xff]  ;;  %v527_v63 = vld [vmem:[%s10522_s0 + $0xd9] sm:$0xff]  ;;  %v529_v4 = vld [vmem:[%s10522_s0 + $0xe9] sm:$0xff] }
  0x3e   :  { %665 = vmatprep.mubr.f32.mxu1 %v7076_v3  ;;  %6411 = vmatpush1.bf16.msra.mxu0 %v6410_v46  ;;  %v70_v46 = vld [vmem:[%s10522_s0 + $0xa0] sm:$0xff]  ;;  %v526_v61 = vld [vmem:[%s10522_s0 + $0xd1] sm:$0xff]  ;;  %v5827_v9 = vld [vmem:[%s10521_s1 + $0x428] sm:$0xff] }
  0x3f   :  { %6413 = vmatprep.subr.bf16.mxu0 %v6412_v47  ;;  %6439 = vmatpush1.bf16.msra.mxu1 %v6438_v15  ;;  %v519_v47 = vld [vmem:[%s10522_s0 + $0x99] sm:$0xff]  ;;  %v80_v2 = vld [vmem:[%s10522_s0 + $0xf0] sm:$0xff]  ;;  %v5831_v17 = vld [vmem:[%s10521_s1 + $0x448] sm:$0xff] }
  0x40   :  { %221 = vmatmul.mubr.f32.gmra.mrb[14].mxu0 %v57_v54  ;;  %6441 = vmatprep.subr.bf16.mxu1 %v6440_v16  ;;  %v74_v54 = vld [vmem:[%s10522_s0 + $0xc0] sm:$0xff]  ;;  %v5824_v8 = vld [vmem:[%s10521_s1 + $0x410] sm:$0xff]  ;;  %v5829_v10 = vld [vmem:[%s10521_s1 + $0x438] sm:$0xff] }
  0x41   :  { %226 = vmatprep.mubr.f32.mxu0 %v7076_v3  ;;  %666 = vmatmul.mubr.f32.gmra.mrb[12].mxu1 %v506_v57  ;;  %v524_v57 = vld [vmem:[%s10522_s0 + $0xc1] sm:$0xff]  ;;  %v531_v12 = vld [vmem:[%s10522_s0 + $0xf9] sm:$0xff]  ;;  %v5828_v16 = vld [vmem:[%s10521_s1 + $0x430] sm:$0xff] }
  0x42   :  { %671 = vmatprep.mubr.f32.mxu1 %v7076_v3  ;;  %6415 = vmatpush1.bf16.msra.mxu0 %v6414_v58  ;;  %v76_v58 = vld [vmem:[%s10522_s0 + $0xd0] sm:$0xff]  ;;  %v5822_v7 = vld [vmem:[%s10521_s1 + $0x400] sm:$0xff]  ;;  %v5833_v18 = vld [vmem:[%s10521_s1 + $0x458] sm:$0xff] }
  0x43   :  { %6449 = vmatprep.subr.bf16.mxu0 %v6448_v5  ;;  %6443 = vmatpush1.bf16.msra.mxu1 %v6442_v23  ;;  %v81_v5 = vld [vmem:[%s10522_s0 + $0xf8] sm:$0xff]  ;;  %v6450_v13 = vpack.c.bf16 %v5824_v8, %v5822_v7  ;;  %v5826_v15 = vld [vmem:[%s10521_s1 + $0x420] sm:$0xff]  ;;  %v5835_v25 = vld [vmem:[%s10521_s1 + $0x468] sm:$0xff] }
  0x44   :  { %227 = vmatmul.mubr.f32.gmra.mrb[16].mxu0 %v58_v1  ;;  %6445 = vmatprep.subr.bf16.mxu1 %v6444_v24  ;;  %v528_v1 = vld [vmem:[%s10522_s0 + $0xe1] sm:$0xff]  ;;  %v6454_v21 = vpack.c.bf16 %v5828_v16, %v5826_v15  ;;  %v5832_v24 = vld [vmem:[%s10521_s1 + $0x450] sm:$0xff]  ;;  %v5837_v26 = vld [vmem:[%s10521_s1 + $0x478] sm:$0xff] }
  0x45   :  { %232 = vmatprep.mubr.f32.mxu0 %v7076_v3  ;;  %672 = vmatmul.mubr.f32.gmra.mrb[14].mxu1 %v507_v6  ;;  %v530_v6 = vld [vmem:[%s10522_s0 + $0xf1] sm:$0xff]  ;;  %v1528_v20 = vld [vmem:[%s10522_s0 + $0x3] sm:$0xff] }
  0x46   :  { %677 = vmatprep.mubr.f32.mxu1 %v7076_v3  ;;  %v5830_v23 = vld [vmem:[%s10521_s1 + $0x440] sm:$0xff]  ;;  %v1023_v7 = vld [vmem:[%s10522_s0 + $0x4a] sm:$0xff] }
  0x47   :  { %6447 = vmatpush1.bf16.msra.mxu1 %v6446_v29  ;;  %v6458_v29 = vpack.c.bf16 %v5832_v24, %v5830_v23  ;;  %v1536_v8 = vld [vmem:[%s10522_s0 + $0x43] sm:$0xff] }
  0x48   :  { %233 = vmatmul.mubr.f32.gmra.mrb[18].mxu0 %v59_v11  ;;  %v1014_v11 = vld [vmem:[%s10522_s0 + $0x2] sm:$0xff]  ;;  %v1027_v15 = vld [vmem:[%s10522_s0 + $0x6a] sm:$0xff] }
  0x49   :  { %238 = vmatprep.mubr.f32.mxu0 %v7076_v3  ;;  %678 = vmatmul.mubr.f32.gmra.mrb[16].mxu1 %v508_v14  ;;  %v6452_v14 = vpack.c.bf16 %v5829_v10, %v5827_v9  ;;  %v1024_v9 = vld [vmem:[%s10522_s0 + $0x52] sm:$0xff]  ;;  %v1540_v16 = vld [vmem:[%s10522_s0 + $0x63] sm:$0xff] }
  0x4a   :  { %683 = vmatprep.mubr.f32.mxu1 %v7076_v3  ;;  %v1537_v10 = vld [vmem:[%s10522_s0 + $0x4b] sm:$0xff]  ;;  %v1544_v24 = vld [vmem:[%s10522_s0 + $0x83] sm:$0xff] }
  0x4b   :  { %v1031_v23 = vld [vmem:[%s10522_s0 + $0x8a] sm:$0xff] }
  0x4c   :  { %239 = vmatmul.mubr.f32.gmra.mrb[20].mxu0 %v60_v19  ;;  %v1015_v19 = vld [vmem:[%s10522_s0 + $0xa] sm:$0xff] }
  0x4d   :  { %244 = vmatprep.mubr.f32.mxu0 %v7076_v3  ;;  %684 = vmatmul.mubr.f32.gmra.mrb[18].mxu1 %v509_v22  ;;  %v6456_v22 = vpack.c.bf16 %v5833_v18, %v5831_v17  ;;  %v1028_v17 = vld [vmem:[%s10522_s0 + $0x72] sm:$0xff] }
  0x4e   :  { %689 = vmatprep.mubr.f32.mxu1 %v7076_v3  ;;  %v1541_v18 = vld [vmem:[%s10522_s0 + $0x6b] sm:$0xff] }
  0x50   :  { %245 = vmatmul.mubr.f32.gmra.mrb[22].mxu0 %v61_v27  ;;  %v1016_v27 = vld [vmem:[%s10522_s0 + $0x12] sm:$0xff] }
  0x51   :  { %250 = vmatprep.mubr.f32.mxu0 %v7076_v3  ;;  %690 = vmatmul.mubr.f32.gmra.mrb[20].mxu1 %v510_v28  ;;  %v1529_v28 = vld [vmem:[%s10522_s0 + $0xb] sm:$0xff] }
  0x52   :  { %695 = vmatprep.mubr.f32.mxu1 %v7076_v3 }
  0x54   :  { %251 = vmatmul.mubr.f32.gmra.mrb[24].mxu0 %v62_v30  ;;  %v6460_v30 = vpack.c.bf16 %v5837_v26, %v5835_v25  ;;  %v1032_v25 = vld [vmem:[%s10522_s0 + $0x92] sm:$0xff] }
  0x55   :  { %256 = vmatprep.mubr.f32.mxu0 %v7076_v3  ;;  %696 = vmatmul.mubr.f32.gmra.mrb[22].mxu1 %v511_v31  ;;  %v5834_v31 = vld [vmem:[%s10521_s1 + $0x460] sm:$0xff]  ;;  %v1545_v26 = vld [vmem:[%s10522_s0 + $0x8b] sm:$0xff] }
  0x56   :  { %701 = vmatprep.mubr.f32.mxu1 %v7076_v3 }
  0x58   :  { %257 = vmatmul.mubr.f32.gmra.mrb[26].mxu0 %v63_v32  ;;  %v5836_v32 = vld [vmem:[%s10521_s1 + $0x470] sm:$0xff] }
  0x59   :  { %262 = vmatprep.mubr.f32.mxu0 %v7076_v3  ;;  %702 = vmatmul.mubr.f32.gmra.mrb[24].mxu1 %v512_v33  ;;  %v5839_v33 = vld [vmem:[%s10521_s1 + $0x488] sm:$0xff] }
  0x5a   :  { %707 = vmatprep.mubr.f32.mxu1 %v7076_v3 }
  0x5c   :  { %263 = vmatmul.mubr.f32.gmra.mrb[28].mxu0 %v64_v34  ;;  %v5841_v34 = vld [vmem:[%s10521_s1 + $0x498] sm:$0xff] }
  0x5d   :  { %268 = vmatprep.mubr.f32.mxu0 %v7076_v3  ;;  %708 = vmatmul.mubr.f32.gmra.mrb[26].mxu1 %v513_v35  ;;  %v1017_v35 = vld [vmem:[%s10522_s0 + $0x1a] sm:$0xff] }
  0x5e   :  { %713 = vmatprep.mubr.f32.mxu1 %v7076_v3 }
  0x60   :  { %269 = vmatmul.mubr.f32.gmra.mrb[30].mxu0 %v65_v36  ;;  %v1530_v36 = vld [vmem:[%s10522_s0 + $0x13] sm:$0xff] }
  0x61   :  { %274 = vmatprep.mubr.f32.mxu0 %v7076_v3  ;;  %714 = vmatmul.mubr.f32.gmra.mrb[28].mxu1 %v514_v37  ;;  %v6462_v37 = vpack.c.bf16 %v5836_v32, %v5834_v31  ;;  %v1035_v31 = vld [vmem:[%s10522_s0 + $0xaa] sm:$0xff] }
  0x62   :  { %719 = vmatprep.mubr.f32.mxu1 %v7076_v3  ;;  %v1548_v32 = vld [vmem:[%s10522_s0 + $0xa3] sm:$0xff] }
  0x64   :  { %275 = vmatmul.mubr.f32.gmra.mrb[32].mxu0 %v66_v38  ;;  %v6464_v38 = vpack.c.bf16 %v5841_v34, %v5839_v33 }
  0x65   :  { %280 = vmatprep.mubr.f32.mxu0 %v7076_v3  ;;  %720 = vmatmul.mubr.f32.gmra.mrb[30].mxu1 %v515_v39  ;;  %v5838_v39 = vld [vmem:[%s10521_s1 + $0x480] sm:$0xff] }
  0x66   :  { %725 = vmatprep.mubr.f32.mxu1 %v7076_v3 }
  0x68   :  { %281 = vmatmul.mubr.f32.gmra.mrb[34].mxu0 %v67_v40  ;;  %v5840_v40 = vld [vmem:[%s10521_s1 + $0x490] sm:$0xff] }
  0x69   :  { %286 = vmatprep.mubr.f32.mxu0 %v7076_v3  ;;  %726 = vmatmul.mubr.f32.gmra.mrb[32].mxu1 %v516_v41  ;;  %v5843_v41 = vld [vmem:[%s10521_s1 + $0x4a8] sm:$0xff] }
  0x6a   :  { %731 = vmatprep.mubr.f32.mxu1 %v7076_v3 }
  0x6c   :  { %287 = vmatmul.mubr.f32.gmra.mrb[36].mxu0 %v68_v42  ;;  %v5845_v42 = vld [vmem:[%s10521_s1 + $0x4b8] sm:$0xff] }
  0x6d   :  { %292 = vmatprep.mubr.f32.mxu0 %v7076_v3  ;;  %732 = vmatmul.mubr.f32.gmra.mrb[34].mxu1 %v517_v43  ;;  %v1018_v43 = vld [vmem:[%s10522_s0 + $0x22] sm:$0xff] }
  0x6e   :  { %737 = vmatprep.mubr.f32.mxu1 %v7076_v3 }
  0x70   :  { %293 = vmatmul.mubr.f32.gmra.mrb[38].mxu0 %v69_v44  ;;  %v1531_v44 = vld [vmem:[%s10522_s0 + $0x1b] sm:$0xff] }
  0x71   :  { %298 = vmatprep.mubr.f32.mxu0 %v7076_v3  ;;  %738 = vmatmul.mubr.f32.gmra.mrb[36].mxu1 %v518_v45  ;;  %v6466_v45 = vpack.c.bf16 %v5840_v40, %v5838_v39 }
  0x72   :  { %743 = vmatprep.mubr.f32.mxu1 %v7076_v3 }
  0x74   :  { %299 = vmatmul.mubr.f32.gmra.mrb[40].mxu0 %v70_v46  ;;  %v6468_v46 = vpack.c.bf16 %v5845_v42, %v5843_v41  ;;  %v1037_v42 = vld [vmem:[%s10522_s0 + $0xba] sm:$0xff] }
  0x75   :  { %304 = vmatprep.mubr.f32.mxu0 %v7076_v3  ;;  %744 = vmatmul.mubr.f32.gmra.mrb[38].mxu1 %v519_v47  ;;  %v5842_v47 = vld [vmem:[%s10521_s1 + $0x4a0] sm:$0xff] }
  0x76   :  { %749 = vmatprep.mubr.f32.mxu1 %v7076_v3 }
  0x78   :  { %305 = vmatmul.mubr.f32.gmra.mrb[42].mxu0 %v71_v48  ;;  %v5844_v48 = vld [vmem:[%s10521_s1 + $0x4b0] sm:$0xff] }
  0x79   :  { %310 = vmatprep.mubr.f32.mxu0 %v7076_v3  ;;  %750 = vmatmul.mubr.f32.gmra.mrb[40].mxu1 %v520_v49  ;;  %v5849_v49 = vld [vmem:[%s10521_s1 + $0x4d8] sm:$0xff] }
  0x7a   :  { %755 = vmatprep.mubr.f32.mxu1 %v7076_v3 }
  0x7c   :  { %311 = vmatmul.mubr.f32.gmra.mrb[44].mxu0 %v72_v50  ;;  %v7914_v50 = vld [vmem:[#allocation4 + $0x70] sm:$0xff] }
  0x7d   :  { %316 = vmatprep.mubr.f32.mxu0 %v7076_v3  ;;  %756 = vmatmul.mubr.f32.gmra.mrb[42].mxu1 %v521_v51  ;;  %v1019_v51 = vld [vmem:[%s10522_s0 + $0x2a] sm:$0xff] }
  0x7e   :  { %761 = vmatprep.mubr.f32.mxu1 %v7076_v3 }
  0x80   :  { %317 = vmatmul.mubr.f32.gmra.mrb[46].mxu0 %v73_v52  ;;  %v1532_v52 = vld [vmem:[%s10522_s0 + $0x23] sm:$0xff] }
  0x81   :  { %322 = vmatprep.mubr.f32.mxu0 %v7076_v3  ;;  %762 = vmatmul.mubr.f32.gmra.mrb[44].mxu1 %v522_v53  ;;  %v6470_v53 = vpack.c.bf16 %v5844_v48, %v5842_v47 }
  0x82   :  { %767 = vmatprep.mubr.f32.mxu1 %v7076_v3 }
  0x84   :  { %323 = vmatmul.mubr.f32.gmra.mrb[48].mxu0 %v74_v54 }
  0x85   :  { %328 = vmatprep.mubr.f32.mxu0 %v7076_v3  ;;  %768 = vmatmul.mubr.f32.gmra.mrb[46].mxu1 %v523_v55  ;;  %v5846_v55 = vld [vmem:[%s10521_s1 + $0x4c0] sm:$0xff] }
  0x86   :  { %773 = vmatprep.mubr.f32.mxu1 %v7076_v3 }
  0x88   :  { %329 = vmatmul.mubr.f32.gmra.mrb[50].mxu0 %v75_v56  ;;  %v5848_v56 = vld [vmem:[%s10521_s1 + $0x4d0] sm:$0xff] }
  0x89   :  { %334 = vmatprep.mubr.f32.mxu0 %v7076_v3  ;;  %774 = vmatmul.mubr.f32.gmra.mrb[48].mxu1 %v524_v57  ;;  %v5851_v57 = vld [vmem:[%s10521_s1 + $0x4e8] sm:$0xff] }
  0x8a   :  { %779 = vmatprep.mubr.f32.mxu1 %v7076_v3 }
  0x8c   :  { %335 = vmatmul.mubr.f32.gmra.mrb[52].mxu0 %v76_v58  ;;  %v5853_v58 = vld [vmem:[%s10521_s1 + $0x4f8] sm:$0xff] }
  0x8d   :  { %340 = vmatprep.mubr.f32.mxu0 %v7076_v3  ;;  %780 = vmatmul.mubr.f32.gmra.mrb[50].mxu1 %v525_v59  ;;  %v1020_v59 = vld [vmem:[%s10522_s0 + $0x32] sm:$0xff] }
  0x8e   :  { %785 = vmatprep.mubr.f32.mxu1 %v7076_v3 }
  0x90   :  { %341 = vmatmul.mubr.f32.gmra.mrb[54].mxu0 %v77_v60  ;;  %v1533_v60 = vld [vmem:[%s10522_s0 + $0x2b] sm:$0xff] }
  0x91   :  { %346 = vmatprep.mubr.f32.mxu0 %v7076_v3  ;;  %786 = vmatmul.mubr.f32.gmra.mrb[52].mxu1 %v526_v61  ;;  %v6474_v61 = vpack.c.bf16 %v5848_v56, %v5846_v55 }
  0x92   :  { %791 = vmatprep.mubr.f32.mxu1 %v7076_v3 }
  0x94   :  { %347 = vmatmul.mubr.f32.gmra.mrb[56].mxu0 %v78_v62  ;;  %v6476_v62 = vpack.c.bf16 %v5853_v58, %v5851_v57 }
  0x95   :  { %352 = vmatprep.mubr.f32.mxu0 %v7076_v3  ;;  %792 = vmatmul.mubr.f32.gmra.mrb[54].mxu1 %v527_v63  ;;  %v5850_v63 = vld [vmem:[%s10521_s1 + $0x4e0] sm:$0xff] }
  0x96   :  { %797 = vmatprep.mubr.f32.mxu1 %v7076_v3 }
  0x98   :  { %353 = vmatmul.mubr.f32.gmra.mrb[58].mxu0 %v79_v0  ;;  %v5852_v0 = vld [vmem:[%s10521_s1 + $0x4f0] sm:$0xff] }
  0x99   :  { %358 = vmatprep.mubr.f32.mxu0 %v7076_v3  ;;  %798 = vmatmul.mubr.f32.gmra.mrb[56].mxu1 %v528_v1  ;;  %v1021_v1 = vld [vmem:[%s10522_s0 + $0x3a] sm:$0xff] }
  0x9a   :  { %803 = vmatprep.mubr.f32.mxu1 %v7076_v3 }
  0x9c   :  { %359 = vmatmul.mubr.f32.gmra.mrb[60].mxu0 %v80_v2  ;;  %v1534_v2 = vld [vmem:[%s10522_s0 + $0x33] sm:$0xff] }
  0x9d   :  { %364 = vmatprep.mubr.f32.mxu0 %v7076_v3  ;;  %804 = vmatmul.mubr.f32.gmra.mrb[58].mxu1 %v529_v4  ;;  %v6478_v4 = vpack.c.bf16 %v5852_v0, %v5850_v63 }
  0x9e   :  { %809 = vmatprep.mubr.f32.mxu1 %v7076_v3 }
  0xa0   :  { %365 = vmatmul.mubr.f32.gmra.mrb[62].mxu0 %v81_v5  ;;  %v1022_v5 = vld [vmem:[%s10522_s0 + $0x42] sm:$0xff] }
  0xa1   :  { %1143 = vmatprep.mubr.f32.mxu0 %v7076_v3  ;;  %810 = vmatmul.mubr.f32.gmra.mrb[60].mxu1 %v530_v6  ;;  %v1535_v6 = vld [vmem:[%s10522_s0 + $0x3b] sm:$0xff] }
  0xa2   :  { %815 = vmatprep.mubr.f32.mxu1 %v7076_v3 }
  0xa4   :  { %1144 = vmatmul.mubr.f32.vlgmr.msra.gmra.mrb[64].mxu0 %v1014_v11  ;;  %v1025_v11 = vld [vmem:[%s10522_s0 + $0x5a] sm:$0xff] }
  0xa5   :  { %1149 = vmatprep.mubr.f32.mxu0 %v7076_v3  ;;  %816 = vmatmul.mubr.f32.gmra.mrb[62].mxu1 %v531_v12  ;;  %v1538_v12 = vld [vmem:[%s10522_s0 + $0x53] sm:$0xff] }
  0xa6   :  { %6451 = vmatpush1.bf16.msra.mxu0 %v6450_v13  ;;  %1657 = vmatprep.mubr.f32.mxu1 %v7076_v3  ;;  %v1026_v13 = vld [vmem:[%s10522_s0 + $0x62] sm:$0xff] }
  0xa7   :  { %6453 = vmatprep.subr.bf16.mxu0 %v6452_v14  ;;  %v1539_v14 = vld [vmem:[%s10522_s0 + $0x5b] sm:$0xff] }
  0xa8   :  { %1150 = vmatmul.mubr.f32.gmra.mrb[66].mxu0 %v1015_v19  ;;  %v1029_v19 = vld [vmem:[%s10522_s0 + $0x7a] sm:$0xff] }
  0xa9   :  { %1155 = vmatprep.mubr.f32.mxu0 %v7076_v3  ;;  %1658 = vmatmul.mubr.f32.vlgmr.msra.gmra.mrb[64].mxu1 %v1528_v20  ;;  %v1542_v20 = vld [vmem:[%s10522_s0 + $0x73] sm:$0xff] }
  0xaa   :  { %1663 = vmatprep.mubr.f32.mxu1 %v7076_v3  ;;  %6455 = vmatpush1.bf16.msra.mxu0 %v6454_v21  ;;  %v1030_v21 = vld [vmem:[%s10522_s0 + $0x82] sm:$0xff] }
  0xab   :  { %6457 = vmatprep.subr.bf16.mxu0 %v6456_v22  ;;  %v1543_v22 = vld [vmem:[%s10522_s0 + $0x7b] sm:$0xff] }
  0xac   :  { %1156 = vmatmul.mubr.f32.gmra.mrb[68].mxu0 %v1016_v27  ;;  %v1033_v27 = vld [vmem:[%s10522_s0 + $0x9a] sm:$0xff] }
  0xad   :  { %1161 = vmatprep.mubr.f32.mxu0 %v7076_v3  ;;  %1664 = vmatmul.mubr.f32.gmra.mrb[66].mxu1 %v1529_v28  ;;  %v1546_v28 = vld [vmem:[%s10522_s0 + $0x93] sm:$0xff] }
  0xae   :  { %1669 = vmatprep.mubr.f32.mxu1 %v7076_v3  ;;  %6459 = vmatpush1.bf16.msra.mxu0 %v6458_v29  ;;  %v1034_v29 = vld [vmem:[%s10522_s0 + $0xa2] sm:$0xff] }
  0xaf   :  { %6461 = vmatprep.subr.bf16.mxu0 %v6460_v30  ;;  %v1547_v30 = vld [vmem:[%s10522_s0 + $0x9b] sm:$0xff] }
  0xb0   :  { %1162 = vmatmul.mubr.f32.gmra.mrb[70].mxu0 %v1017_v35  ;;  %v1036_v35 = vld [vmem:[%s10522_s0 + $0xb2] sm:$0xff] }
  0xb1   :  { %1167 = vmatprep.mubr.f32.mxu0 %v7076_v3  ;;  %1670 = vmatmul.mubr.f32.gmra.mrb[68].mxu1 %v1530_v36  ;;  %v1549_v36 = vld [vmem:[%s10522_s0 + $0xab] sm:$0xff] }
  0xb2   :  { %1675 = vmatprep.mubr.f32.mxu1 %v7076_v3  ;;  %6463 = vmatpush1.bf16.msra.mxu0 %v6462_v37  ;;  %v5847_v3 = vld [vmem:[%s10521_s1 + $0x4c8] sm:$0xff] }
  0xb3   :  { %6465 = vmatprep.subr.bf16.mxu0 %v6464_v38  ;;  %v6472_v54 = vpack.c.bf16 %v5849_v49, %v5847_v3 }
  0xb4   :  { %1168 = vmatmul.mubr.f32.gmra.mrb[72].mxu0 %v1018_v43  ;;  %v1550_v43 = vld [vmem:[%s10522_s0 + $0xb3] sm:$0xff] }
  0xb5   :  { %1173 = vmatprep.mubr.f32.mxu0 %v7914_v50  ;;  %1676 = vmatmul.mubr.f32.gmra.mrb[70].mxu1 %v1531_v44 }
  0xb6   :  { %1681 = vmatprep.mubr.f32.mxu1 %v7914_v50  ;;  %6467 = vmatpush1.bf16.msra.mxu0 %v6466_v45 }
  0xb7   :  { %6469 = vmatprep.subr.bf16.mxu0 %v6468_v46 }
  0xb8   :  { %1174 = vmatmul.mubr.f32.gmra.mrb[74].mxu0 %v1019_v51  ;;  %v1038_v51 = vld [vmem:[%s10522_s0 + $0xc2] sm:$0xff] }
  0xb9   :  { %1179 = vmatprep.mubr.f32.mxu0 %v7914_v50  ;;  %1682 = vmatmul.mubr.f32.gmra.mrb[72].mxu1 %v1532_v52  ;;  %v1551_v52 = vld [vmem:[%s10522_s0 + $0xbb] sm:$0xff] }
  0xba   :  { %1687 = vmatprep.mubr.f32.mxu1 %v7914_v50  ;;  %6471 = vmatpush1.bf16.msra.mxu0 %v6470_v53 }
  0xbb   :  { %6473 = vmatprep.subr.bf16.mxu0 %v6472_v54 }
  0xbc   :  { %1180 = vmatmul.mubr.f32.gmra.mrb[76].mxu0 %v1020_v59 }
  0xbd   :  { %1185 = vmatprep.mubr.f32.mxu0 %v7914_v50  ;;  %1688 = vmatmul.mubr.f32.gmra.mrb[74].mxu1 %v1533_v60  ;;  %v1039_v60 = vld [vmem:[%s10522_s0 + $0xca] sm:$0xff] }
  0xbe   :  { %1693 = vmatprep.mubr.f32.mxu1 %v7914_v50  ;;  %6475 = vmatpush1.bf16.msra.mxu0 %v6474_v61  ;;  %v1552_v61 = vld [vmem:[%s10522_s0 + $0xc3] sm:$0xff] }
  0xbf   :  { %6477 = vmatprep.subr.bf16.mxu0 %v6476_v62 }
  0xc0   :  { %1186 = vmatmul.mubr.f32.gmra.mrb[78].mxu0 %v1021_v1 }
  0xc1   :  { %1191 = vmatprep.mubr.f32.mxu0 %v7914_v50  ;;  %1694 = vmatmul.mubr.f32.gmra.mrb[76].mxu1 %v1534_v2 }
  0xc2   :  { %1699 = vmatprep.mubr.f32.mxu1 %v7914_v50  ;;  %6479 = vmatpush1.bf16.msra.mxu0 %v6478_v4 }
  0xc4   :  { %1192 = vmatmul.mubr.f32.gmra.mrb[80].mxu0 %v1022_v5 }
  0xc5   :  { %1197 = vmatprep.mubr.f32.mxu0 %v7914_v50  ;;  %1700 = vmatmul.mubr.f32.gmra.mrb[78].mxu1 %v1535_v6  ;;  %v1040_v6 = vld [vmem:[%s10522_s0 + $0xd2] sm:$0xff] }
  0xc6   :  { %1705 = vmatprep.mubr.f32.mxu1 %v7914_v50 }
  0xc8   :  { %1198 = vmatmul.mubr.f32.gmra.mrb[82].mxu0 %v1023_v7  ;;  %v1553_v7 = vld [vmem:[%s10522_s0 + $0xcb] sm:$0xff] }
  0xc9   :  { %1203 = vmatprep.mubr.f32.mxu0 %v7914_v50  ;;  %1706 = vmatmul.mubr.f32.gmra.mrb[80].mxu1 %v1536_v8 }
  0xca   :  { %1711 = vmatprep.mubr.f32.mxu1 %v7914_v50 }
  0xcc   :  { %1204 = vmatmul.mubr.f32.gmra.mrb[84].mxu0 %v1024_v9 }
  0xcd   :  { %1209 = vmatprep.mubr.f32.mxu0 %v7914_v50  ;;  %1712 = vmatmul.mubr.f32.gmra.mrb[82].mxu1 %v1537_v10 }
  0xce   :  { %1717 = vmatprep.mubr.f32.mxu1 %v7914_v50 }
  0xd0   :  { %1210 = vmatmul.mubr.f32.gmra.mrb[86].mxu0 %v1025_v11 }
  0xd1   :  { %1215 = vmatprep.mubr.f32.mxu0 %v7914_v50  ;;  %1718 = vmatmul.mubr.f32.gmra.mrb[84].mxu1 %v1538_v12 }
  0xd2   :  { %1723 = vmatprep.mubr.f32.mxu1 %v7914_v50 }
  0xd4   :  { %1216 = vmatmul.mubr.f32.gmra.mrb[88].mxu0 %v1026_v13 }
  0xd5   :  { %1221 = vmatprep.mubr.f32.mxu0 %v7914_v50  ;;  %1724 = vmatmul.mubr.f32.gmra.mrb[86].mxu1 %v1539_v14 }
  0xd6   :  { %1729 = vmatprep.mubr.f32.mxu1 %v7914_v50 }
  0xd8   :  { %1222 = vmatmul.mubr.f32.gmra.mrb[90].mxu0 %v1027_v15  ;;  %v1041_v15 = vld [vmem:[%s10522_s0 + $0xda] sm:$0xff] }
  0xd9   :  { %1227 = vmatprep.mubr.f32.mxu0 %v7914_v50  ;;  %1730 = vmatmul.mubr.f32.gmra.mrb[88].mxu1 %v1540_v16  ;;  %v1554_v16 = vld [vmem:[%s10522_s0 + $0xd3] sm:$0xff] }
  0xda   :  { %1735 = vmatprep.mubr.f32.mxu1 %v7914_v50 }
  0xdc   :  { %1228 = vmatmul.mubr.f32.gmra.mrb[92].mxu0 %v1028_v17 }
  0xdd   :  { %1233 = vmatprep.mubr.f32.mxu0 %v7914_v50  ;;  %1736 = vmatmul.mubr.f32.gmra.mrb[90].mxu1 %v1541_v18 }
  0xde   :  { %1741 = vmatprep.mubr.f32.mxu1 %v7914_v50 }
  0xe0   :  { %1234 = vmatmul.mubr.f32.gmra.mrb[94].mxu0 %v1029_v19 }
  0xe1   :  { %1239 = vmatprep.mubr.f32.mxu0 %v7914_v50  ;;  %1742 = vmatmul.mubr.f32.gmra.mrb[92].mxu1 %v1542_v20 }
  0xe2   :  { %1747 = vmatprep.mubr.f32.mxu1 %v7914_v50 }
  0xe4   :  { %1240 = vmatmul.mubr.f32.gmra.mrb[96].mxu0 %v1030_v21 }
  0xe5   :  { %1245 = vmatprep.mubr.f32.mxu0 %v7914_v50  ;;  %1748 = vmatmul.mubr.f32.gmra.mrb[94].mxu1 %v1543_v22 }
  0xe6   :  { %1753 = vmatprep.mubr.f32.mxu1 %v7914_v50 }
  0xe8   :  { %1246 = vmatmul.mubr.f32.gmra.mrb[98].mxu0 %v1031_v23 }
  0xe9   :  { %1251 = vmatprep.mubr.f32.mxu0 %v7914_v50  ;;  %1754 = vmatmul.mubr.f32.gmra.mrb[96].mxu1 %v1544_v24  ;;  %v1042_v24 = vld [vmem:[%s10522_s0 + $0xe2] sm:$0xff] }
  0xea   :  { %1759 = vmatprep.mubr.f32.mxu1 %v7914_v50 }
  0xec   :  { %1252 = vmatmul.mubr.f32.gmra.mrb[100].mxu0 %v1032_v25  ;;  %v1555_v25 = vld [vmem:[%s10522_s0 + $0xdb] sm:$0xff] }
  0xed   :  { %1257 = vmatprep.mubr.f32.mxu0 %v7914_v50  ;;  %1760 = vmatmul.mubr.f32.gmra.mrb[98].mxu1 %v1545_v26 }
  0xee   :  { %1765 = vmatprep.mubr.f32.mxu1 %v7914_v50 }
  0xf0   :  { %1258 = vmatmul.mubr.f32.gmra.mrb[102].mxu0 %v1033_v27 }
  0xf1   :  { %1263 = vmatprep.mubr.f32.mxu0 %v7914_v50  ;;  %1766 = vmatmul.mubr.f32.gmra.mrb[100].mxu1 %v1546_v28 }
  0xf2   :  { %1771 = vmatprep.mubr.f32.mxu1 %v7914_v50 }
  0xf4   :  { %1264 = vmatmul.mubr.f32.gmra.mrb[104].mxu0 %v1034_v29 }
  0xf5   :  { %1269 = vmatprep.mubr.f32.mxu0 %v7914_v50  ;;  %1772 = vmatmul.mubr.f32.gmra.mrb[102].mxu1 %v1547_v30 }
  0xf6   :  { %1777 = vmatprep.mubr.f32.mxu1 %v7914_v50 }
  0xf7   :  { %v180_v33 = vpop.f32.mrb[0].mxu0 }
  0xf8   :  { %v182_v34 = vpop.f32.mrb[1].mxu0  ;;  %1270 = vmatmul.mubr.f32.gmra.mrb[106].mxu0 %v1035_v31 }
  0xf9   :  { %373 = vst.msk [vmem:[#allocation2 + $0x8] sm:$0xff] %vm372_vm0, %v182_v34  ;;  %1275 = vmatprep.mubr.f32.mxu0 %v7914_v50  ;;  %1778 = vmatmul.mubr.f32.gmra.mrb[104].mxu1 %v1548_v32  ;;  %v1556_v34 = vld [vmem:[%s10522_s0 + $0xe3] sm:$0xff] }
  0xfa   :  { %1783 = vmatprep.mubr.f32.mxu1 %v7914_v50 }
  0xfb   :  { %v186_v37 = vpop.f32.mrb[2].mxu0 }
  0xfc   :  { %v188_v38 = vpop.f32.mrb[3].mxu0  ;;  %1276 = vmatmul.mubr.f32.gmra.mrb[108].mxu0 %v1036_v35  ;;  %v631_v39 = vpop.f32.mrb[0].mxu1 }
  0xfd   :  { %375 = vst.msk [vmem:[#allocation2 + $0x18] sm:$0xff] %vm372_vm0, %v188_v38  ;;  %v8080_v40 = vadd.f32 %v631_v39, %v180_v33  ;;  %1281 = vmatprep.mubr.f32.mxu0 %v7914_v50  ;;  %v633_v41 = vpop.f32.mrb[1].mxu1  ;;  %1784 = vmatmul.mubr.f32.gmra.mrb[106].mxu1 %v1549_v36  ;;  %v1043_v33 = vld [vmem:[%s10522_s0 + $0xea] sm:$0xff] }
  0xfe   :  { %1789 = vmatprep.mubr.f32.mxu1 %v7914_v50 }
  0xff   :  { %v192_v44 = vpop.f32.mrb[4].mxu0 }
 0x100   :  { %v194_v45 = vpop.f32.mrb[5].mxu0  ;;  %v437_v46 = vld [vmem:[#allocation2 + $0x8] sm:$0xff]  ;;  %1282 = vmatmul.mubr.f32.gmra.mrb[110].mxu0 %v1037_v42  ;;  %v637_v47 = vpop.f32.mrb[2].mxu1 }
 0x101   :  { %377 = vst.msk [vmem:[#allocation2 + $0x28] sm:$0xff] %vm372_vm0, %v194_v45  ;;  %v823_v48 = vadd.f32 %v633_v41, %v437_v46  ;;  %v8091_v3 = vadd.f32 %v637_v47, %v186_v37  ;;  %1287 = vmatprep.mubr.f32.mxu0 %v7914_v50  ;;  %v639_v49 = vpop.f32.mrb[3].mxu1  ;;  %1790 = vmatmul.mubr.f32.gmra.mrb[108].mxu1 %v1550_v43  ;;  %v1044_v43 = vld [vmem:[%s10522_s0 + $0xf2] sm:$0xff] }
 0x102   :  { %1795 = vmatprep.mubr.f32.mxu1 %v7914_v50 }
 0x103   :  { %887 = vst.msk [vmem:[#allocation2 + $0x8] sm:$0xff] %vm372_vm0, %v823_v48  ;;  %v198_v53 = vpop.f32.mrb[6].mxu0 }
 0x104   :  { %v200_v54 = vpop.f32.mrb[7].mxu0  ;;  %v439_v55 = vld [vmem:[#allocation2 + $0x18] sm:$0xff]  ;;  %1288 = vmatmul.mubr.f32.gmra.mrb[112].mxu0 %v1038_v51  ;;  %v643_v56 = vpop.f32.mrb[4].mxu1 }
 0x105   :  { %379 = vst.msk [vmem:[#allocation2 + $0x38] sm:$0xff] %vm372_vm0, %v200_v54  ;;  %v825_v57 = vadd.f32 %v639_v49, %v439_v55  ;;  %v8103_v58 = vadd.f32 %v643_v56, %v192_v44  ;;  %1293 = vmatprep.mubr.f32.mxu0 %v7914_v50  ;;  %v645_v59 = vpop.f32.mrb[5].mxu1  ;;  %1796 = vmatmul.mubr.f32.gmra.mrb[110].mxu1 %v1551_v52  ;;  %v1557_v44 = vld [vmem:[%s10522_s0 + $0xeb] sm:$0xff]  ;;  %v1558_v54 = vld [vmem:[%s10522_s0 + $0xf3] sm:$0xff] }
 0x106   :  { %1801 = vmatprep.mubr.f32.mxu1 %v7914_v50 }
 0x107   :  { %889 = vst.msk [vmem:[#allocation2 + $0x18] sm:$0xff] %vm372_vm0, %v825_v57  ;;  %v204_v62 = vpop.f32.mrb[8].mxu0 }
 0x108   :  { %v206_v63 = vpop.f32.mrb[9].mxu0  ;;  %v441_v0 = vld [vmem:[#allocation2 + $0x28] sm:$0xff]  ;;  %1294 = vmatmul.mubr.f32.gmra.mrb[114].mxu0 %v1039_v60  ;;  %v649_v1 = vpop.f32.mrb[6].mxu1 }
 0x109   :  { %381 = vst.msk [vmem:[#allocation2 + $0x48] sm:$0xff] %vm372_vm0, %v206_v63  ;;  %v827_v2 = vadd.f32 %v645_v59, %v441_v0  ;;  %v8115_v4 = vadd.f32 %v649_v1, %v198_v53  ;;  %1299 = vmatprep.mubr.f32.mxu0 %v7914_v50  ;;  %v651_v5 = vpop.f32.mrb[7].mxu1  ;;  %1802 = vmatmul.mubr.f32.gmra.mrb[112].mxu1 %v1552_v61  ;;  %v1045_v53 = vld [vmem:[%s10522_s0 + $0xfa] sm:$0xff]  ;;  %v2042_v63 = vld [vmem:[%s10522_s0 + $0x4] sm:$0xff] }
 0x10a   :  { %1807 = vmatprep.mubr.f32.mxu1 %v7914_v50  ;;  %v1559_v0 = vld [vmem:[%s10522_s0 + $0xfb] sm:$0xff] }
 0x10b   :  { %891 = vst.msk [vmem:[#allocation2 + $0x28] sm:$0xff] %vm372_vm0, %v827_v2  ;;  %v210_v8 = vpop.f32.mrb[10].mxu0 }
 0x10c   :  { %v212_v9 = vpop.f32.mrb[11].mxu0  ;;  %v443_v10 = vld [vmem:[#allocation2 + $0x38] sm:$0xff]  ;;  %1300 = vmatmul.mubr.f32.gmra.mrb[116].mxu0 %v1040_v6  ;;  %v655_v11 = vpop.f32.mrb[8].mxu1 }
 0x10d   :  { %383 = vst.msk [vmem:[#allocation2 + $0x58] sm:$0xff] %vm372_vm0, %v212_v9  ;;  %v829_v12 = vadd.f32 %v651_v5, %v443_v10  ;;  %v8127_v13 = vadd.f32 %v655_v11, %v204_v62  ;;  %1305 = vmatprep.mubr.f32.mxu0 %v7914_v50  ;;  %v657_v14 = vpop.f32.mrb[9].mxu1  ;;  %1808 = vmatmul.mubr.f32.gmra.mrb[114].mxu1 %v1553_v7  ;;  %v2043_v10 = vld [vmem:[%s10522_s0 + $0xc] sm:$0xff] }
 0x10e   :  { %1813 = vmatprep.mubr.f32.mxu1 %v7914_v50 }
 0x10f   :  { %893 = vst.msk [vmem:[#allocation2 + $0x38] sm:$0xff] %vm372_vm0, %v829_v12  ;;  %v216_v17 = vpop.f32.mrb[12].mxu0 }
 0x110   :  { %v218_v18 = vpop.f32.mrb[13].mxu0  ;;  %v445_v19 = vld [vmem:[#allocation2 + $0x48] sm:$0xff]  ;;  %1306 = vmatmul.mubr.f32.gmra.mrb[118].mxu0 %v1041_v15  ;;  %v661_v20 = vpop.f32.mrb[10].mxu1 }
 0x111   :  { %385 = vst.msk [vmem:[#allocation2 + $0x68] sm:$0xff] %vm372_vm0, %v218_v18  ;;  %v831_v21 = vadd.f32 %v657_v14, %v445_v19  ;;  %v8139_v22 = vadd.f32 %v661_v20, %v210_v8  ;;  %1311 = vmatprep.mubr.f32.mxu0 %v7914_v50  ;;  %v663_v23 = vpop.f32.mrb[11].mxu1  ;;  %1814 = vmatmul.mubr.f32.gmra.mrb[116].mxu1 %v1554_v16  ;;  %v2044_v19 = vld [vmem:[%s10522_s0 + $0x14] sm:$0xff] }
 0x112   :  { %1819 = vmatprep.mubr.f32.mxu1 %v7914_v50 }
 0x113   :  { %895 = vst.msk [vmem:[#allocation2 + $0x48] sm:$0xff] %vm372_vm0, %v831_v21  ;;  %v222_v26 = vpop.f32.mrb[14].mxu0 }
 0x114   :  { %v224_v27 = vpop.f32.mrb[15].mxu0  ;;  %v447_v28 = vld [vmem:[#allocation2 + $0x58] sm:$0xff]  ;;  %1312 = vmatmul.mubr.f32.gmra.mrb[120].mxu0 %v1042_v24  ;;  %v667_v29 = vpop.f32.mrb[12].mxu1 }
 0x115   :  { %387 = vst.msk [vmem:[#allocation2 + $0x78] sm:$0xff] %vm372_vm0, %v224_v27  ;;  %v833_v30 = vadd.f32 %v663_v23, %v447_v28  ;;  %v8151_v31 = vadd.f32 %v667_v29, %v216_v17  ;;  %1317 = vmatprep.mubr.f32.mxu0 %v7914_v50  ;;  %v669_v32 = vpop.f32.mrb[13].mxu1  ;;  %1820 = vmatmul.mubr.f32.gmra.mrb[118].mxu1 %v1555_v25  ;;  %v2045_v28 = vld [vmem:[%s10522_s0 + $0x1c] sm:$0xff] }
 0x116   :  { %1825 = vmatprep.mubr.f32.mxu1 %v7914_v50 }
 0x117   :  { %897 = vst.msk [vmem:[#allocation2 + $0x58] sm:$0xff] %vm372_vm0, %v833_v30  ;;  %v228_v35 = vpop.f32.mrb[16].mxu0 }
 0x118   :  { %v230_v36 = vpop.f32.mrb[17].mxu0  ;;  %v449_v37 = vld [vmem:[#allocation2 + $0x68] sm:$0xff]  ;;  %1318 = vmatmul.mubr.f32.gmra.mrb[122].mxu0 %v1043_v33  ;;  %v673_v38 = vpop.f32.mrb[14].mxu1 }
 0x119   :  { %389 = vst.msk [vmem:[#allocation2 + $0x88] sm:$0xff] %vm372_vm0, %v230_v36  ;;  %v835_v39 = vadd.f32 %v669_v32, %v449_v37  ;;  %v8163_v41 = vadd.f32 %v673_v38, %v222_v26  ;;  %1323 = vmatprep.mubr.f32.mxu0 %v7914_v50  ;;  %v675_v42 = vpop.f32.mrb[15].mxu1  ;;  %1826 = vmatmul.mubr.f32.gmra.mrb[120].mxu1 %v1556_v34  ;;  %v2046_v37 = vld [vmem:[%s10522_s0 + $0x24] sm:$0xff] }
 0x11a   :  { %1831 = vmatprep.mubr.f32.mxu1 %v7914_v50 }
 0x11b   :  { %899 = vst.msk [vmem:[#allocation2 + $0x68] sm:$0xff] %vm372_vm0, %v835_v39  ;;  %v234_v45 = vpop.f32.mrb[18].mxu0 }
 0x11c   :  { %v236_v46 = vpop.f32.mrb[19].mxu0  ;;  %v451_v47 = vld [vmem:[#allocation2 + $0x78] sm:$0xff]  ;;  %1324 = vmatmul.mubr.f32.gmra.mrb[124].mxu0 %v1044_v43  ;;  %v679_v48 = vpop.f32.mrb[16].mxu1 }
 0x11d   :  { %391 = vst.msk [vmem:[#allocation2 + $0x98] sm:$0xff] %vm372_vm0, %v236_v46  ;;  %v837_v49 = vadd.f32 %v675_v42, %v451_v47  ;;  %v8175_v51 = vadd.f32 %v679_v48, %v228_v35  ;;  %1329 = vmatprep.mubr.f32.mxu0 %v7914_v50  ;;  %v681_v52 = vpop.f32.mrb[17].mxu1  ;;  %1832 = vmatmul.mubr.f32.gmra.mrb[122].mxu1 %v1557_v44  ;;  %v2047_v47 = vld [vmem:[%s10522_s0 + $0x2c] sm:$0xff] }
 0x11e   :  { %1837 = vmatprep.mubr.f32.mxu1 %v7914_v50 }
 0x11f   :  { %901 = vst.msk [vmem:[#allocation2 + $0x78] sm:$0xff] %vm372_vm0, %v837_v49  ;;  %v240_v55 = vpop.f32.mrb[20].mxu0 }
 0x120   :  { %v242_v56 = vpop.f32.mrb[21].mxu0  ;;  %v453_v57 = vld [vmem:[#allocation2 + $0x88] sm:$0xff]  ;;  %1330 = vmatmul.mubr.f32.gmra.mrb[126].mxu0 %v1045_v53  ;;  %v685_v59 = vpop.f32.mrb[18].mxu1 }
 0x121   :  { %393 = vst.msk [vmem:[#allocation2 + $0xa8] sm:$0xff] %vm372_vm0, %v242_v56  ;;  %v839_v60 = vadd.f32 %v681_v52, %v453_v57  ;;  %v8187_v61 = vadd.f32 %v685_v59, %v234_v45  ;;  %2171 = vmatprep.mubr.f32.mxu0 %v7914_v50  ;;  %v687_v62 = vpop.f32.mrb[19].mxu1  ;;  %1838 = vmatmul.mubr.f32.gmra.mrb[124].mxu1 %v1558_v54  ;;  %v2048_v57 = vld [vmem:[%s10522_s0 + $0x34] sm:$0xff] }
 0x122   :  { %1843 = vmatprep.mubr.f32.mxu1 %v7914_v50 }
 0x123   :  { %903 = vst.msk [vmem:[#allocation2 + $0x88] sm:$0xff] %vm372_vm0, %v839_v60  ;;  %v246_v1 = vpop.f32.mrb[22].mxu0 }
 0x124   :  { %v248_v2 = vpop.f32.mrb[23].mxu0  ;;  %v455_v5 = vld [vmem:[#allocation2 + $0x98] sm:$0xff]  ;;  %2172 = vmatmul.mubr.f32.vlgmr.msra.gmra.mrb[128].mxu0 %v2042_v63  ;;  %v691_v6 = vpop.f32.mrb[20].mxu1 }
 0x125   :  { %395 = vst.msk [vmem:[#allocation2 + $0xb8] sm:$0xff] %vm372_vm0, %v248_v2  ;;  %v841_v7 = vadd.f32 %v687_v62, %v455_v5  ;;  %v8199_v8 = vadd.f32 %v691_v6, %v240_v55  ;;  %2177 = vmatprep.mubr.f32.mxu0 %v7914_v50  ;;  %v693_v9 = vpop.f32.mrb[21].mxu1  ;;  %1844 = vmatmul.mubr.f32.gmra.mrb[126].mxu1 %v1559_v0  ;;  %v2049_v5 = vld [vmem:[%s10522_s0 + $0x3c] sm:$0xff] }
 0x127   :  { %905 = vst.msk [vmem:[#allocation2 + $0x98] sm:$0xff] %vm372_vm0, %v841_v7  ;;  %v252_v11 = vpop.f32.mrb[24].mxu0 }
 0x128   :  { %v254_v12 = vpop.f32.mrb[25].mxu0  ;;  %v457_v14 = vld [vmem:[#allocation2 + $0xa8] sm:$0xff]  ;;  %2178 = vmatmul.mubr.f32.gmra.mrb[130].mxu0 %v2043_v10  ;;  %v697_v15 = vpop.f32.mrb[22].mxu1 }
 0x129   :  { %397 = vst.msk [vmem:[#allocation2 + $0xc8] sm:$0xff] %vm372_vm0, %v254_v12  ;;  %v843_v16 = vadd.f32 %v693_v9, %v457_v14  ;;  %v8207_v17 = vadd.f32 %v697_v15, %v246_v1  ;;  %2183 = vmatprep.mubr.f32.mxu0 %v7914_v50  ;;  %v699_v18 = vpop.f32.mrb[23].mxu1  ;;  %v2050_v15 = vld [vmem:[%s10522_s0 + $0x44] sm:$0xff] }
 0x12b   :  { %907 = vst.msk [vmem:[#allocation2 + $0xa8] sm:$0xff] %vm372_vm0, %v843_v16  ;;  %v258_v20 = vpop.f32.mrb[26].mxu0 }
 0x12c   :  { %v260_v21 = vpop.f32.mrb[27].mxu0  ;;  %v459_v23 = vld [vmem:[#allocation2 + $0xb8] sm:$0xff]  ;;  %2184 = vmatmul.mubr.f32.gmra.mrb[132].mxu0 %v2044_v19  ;;  %v703_v24 = vpop.f32.mrb[24].mxu1 }
 0x12d   :  { %399 = vst.msk [vmem:[#allocation2 + $0xd8] sm:$0xff] %vm372_vm0, %v260_v21  ;;  %v845_v25 = vadd.f32 %v699_v18, %v459_v23  ;;  %v8215_v26 = vadd.f32 %v703_v24, %v252_v11  ;;  %2189 = vmatprep.mubr.f32.mxu0 %v7914_v50  ;;  %v705_v27 = vpop.f32.mrb[25].mxu1 }
 0x12f   :  { %909 = vst.msk [vmem:[#allocation2 + $0xb8] sm:$0xff] %vm372_vm0, %v845_v25  ;;  %v264_v29 = vpop.f32.mrb[28].mxu0  ;;  %v2051_v25 = vld [vmem:[%s10522_s0 + $0x4c] sm:$0xff] }
 0x130   :  { %v266_v30 = vpop.f32.mrb[29].mxu0  ;;  %v461_v32 = vld [vmem:[#allocation2 + $0xc8] sm:$0xff]  ;;  %2190 = vmatmul.mubr.f32.gmra.mrb[134].mxu0 %v2045_v28  ;;  %v709_v33 = vpop.f32.mrb[26].mxu1 }
 0x131   :  { %401 = vst.msk [vmem:[#allocation2 + $0xe8] sm:$0xff] %vm372_vm0, %v266_v30  ;;  %v847_v34 = vadd.f32 %v705_v27, %v461_v32  ;;  %v8223_v35 = vadd.f32 %v709_v33, %v258_v20  ;;  %2195 = vmatprep.mubr.f32.mxu0 %v7914_v50  ;;  %v711_v36 = vpop.f32.mrb[27].mxu1 }
 0x133   :  { %911 = vst.msk [vmem:[#allocation2 + $0xc8] sm:$0xff] %vm372_vm0, %v847_v34  ;;  %v270_v38 = vpop.f32.mrb[30].mxu0 }
 0x134   :  { %v272_v39 = vpop.f32.mrb[31].mxu0  ;;  %v463_v42 = vld [vmem:[#allocation2 + $0xd8] sm:$0xff]  ;;  %2196 = vmatmul.mubr.f32.gmra.mrb[136].mxu0 %v2046_v37  ;;  %v715_v43 = vpop.f32.mrb[28].mxu1 }
 0x135   :  { %403 = vst.msk [vmem:[#allocation2 + $0xf8] sm:$0xff] %vm372_vm0, %v272_v39  ;;  %v849_v44 = vadd.f32 %v711_v36, %v463_v42  ;;  %v8231_v45 = vadd.f32 %v715_v43, %v264_v29  ;;  %2201 = vmatprep.mubr.f32.mxu0 %v7914_v50  ;;  %v717_v46 = vpop.f32.mrb[29].mxu1  ;;  %v2052_v36 = vld [vmem:[%s10522_s0 + $0x54] sm:$0xff] }
 0x137   :  { %913 = vst.msk [vmem:[#allocation2 + $0xd8] sm:$0xff] %vm372_vm0, %v849_v44  ;;  %v276_v48 = vpop.f32.mrb[32].mxu0 }
 0x138   :  { %v278_v49 = vpop.f32.mrb[33].mxu0  ;;  %v465_v52 = vld [vmem:[#allocation2 + $0xe8] sm:$0xff]  ;;  %2202 = vmatmul.mubr.f32.gmra.mrb[138].mxu0 %v2047_v47  ;;  %v721_v53 = vpop.f32.mrb[30].mxu1  ;;  %v2053_v47 = vld [vmem:[%s10522_s0 + $0x5c] sm:$0xff] }
 0x139   :  { %405 = vst.msk [vmem:[#allocation2 + $0x108] sm:$0xff] %vm372_vm0, %v278_v49  ;;  %v851_v54 = vadd.f32 %v717_v46, %v465_v52  ;;  %v8239_v55 = vadd.f32 %v721_v53, %v270_v38  ;;  %2207 = vmatprep.mubr.f32.mxu0 %v7914_v50  ;;  %v723_v56 = vpop.f32.mrb[31].mxu1 }
 0x13b   :  { %915 = vst.msk [vmem:[#allocation2 + $0xe8] sm:$0xff] %vm372_vm0, %v851_v54  ;;  %v282_v59 = vpop.f32.mrb[34].mxu0 }
 0x13c   :  { %v284_v60 = vpop.f32.mrb[35].mxu0  ;;  %v467_v62 = vld [vmem:[#allocation2 + $0xf8] sm:$0xff]  ;;  %2208 = vmatmul.mubr.f32.gmra.mrb[140].mxu0 %v2048_v57  ;;  %v727_v63 = vpop.f32.mrb[32].mxu1 }
 0x13d   :  { %407 = vst.msk [vmem:[#allocation2 + $0x118] sm:$0xff] %vm372_vm0, %v284_v60  ;;  %v853_v0 = vadd.f32 %v723_v56, %v467_v62  ;;  %v8247_v1 = vadd.f32 %v727_v63, %v276_v48  ;;  %2213 = vmatprep.mubr.f32.mxu0 %v7914_v50  ;;  %v729_v2 = vpop.f32.mrb[33].mxu1 }
 0x13f   :  { %917 = vst.msk [vmem:[#allocation2 + $0xf8] sm:$0xff] %vm372_vm0, %v853_v0  ;;  %v288_v6 = vpop.f32.mrb[36].mxu0 }
 0x140   :  { %v290_v7 = vpop.f32.mrb[37].mxu0  ;;  %v469_v9 = vld [vmem:[#allocation2 + $0x108] sm:$0xff]  ;;  %2214 = vmatmul.mubr.f32.gmra.mrb[142].mxu0 %v2049_v5  ;;  %v733_v10 = vpop.f32.mrb[34].mxu1 }
 0x141   :  { %409 = vst.msk [vmem:[#allocation2 + $0x128] sm:$0xff] %vm372_vm0, %v290_v7  ;;  %v855_v11 = vadd.f32 %v729_v2, %v469_v9  ;;  %v8255_v12 = vadd.f32 %v733_v10, %v282_v59  ;;  %2219 = vmatprep.mubr.f32.mxu0 %v7914_v50  ;;  %v735_v14 = vpop.f32.mrb[35].mxu1  ;;  %v2054_v59 = vld [vmem:[%s10522_s0 + $0x64] sm:$0xff]  ;;  %v2055_v7 = vld [vmem:[%s10522_s0 + $0x6c] sm:$0xff] }
 0x143   :  { %919 = vst.msk [vmem:[#allocation2 + $0x108] sm:$0xff] %vm372_vm0, %v855_v11  ;;  %v294_v16 = vpop.f32.mrb[38].mxu0 }
 0x144   :  { %v296_v18 = vpop.f32.mrb[39].mxu0  ;;  %v471_v19 = vld [vmem:[#allocation2 + $0x118] sm:$0xff]  ;;  %2220 = vmatmul.mubr.f32.gmra.mrb[144].mxu0 %v2050_v15  ;;  %v739_v20 = vpop.f32.mrb[36].mxu1 }
 0x145   :  { %411 = vst.msk [vmem:[#allocation2 + $0x138] sm:$0xff] %vm372_vm0, %v296_v18  ;;  %v857_v21 = vadd.f32 %v735_v14, %v471_v19  ;;  %v8263_v23 = vadd.f32 %v739_v20, %v288_v6  ;;  %2225 = vmatprep.mubr.f32.mxu0 %v7914_v50  ;;  %v741_v24 = vpop.f32.mrb[37].mxu1  ;;  %v2056_v19 = vld [vmem:[%s10522_s0 + $0x74] sm:$0xff] }
 0x147   :  { %921 = vst.msk [vmem:[#allocation2 + $0x118] sm:$0xff] %vm372_vm0, %v857_v21  ;;  %v300_v27 = vpop.f32.mrb[40].mxu0 }
 0x148   :  { %v302_v28 = vpop.f32.mrb[41].mxu0  ;;  %v473_v29 = vld [vmem:[#allocation2 + $0x128] sm:$0xff]  ;;  %2226 = vmatmul.mubr.f32.gmra.mrb[146].mxu0 %v2051_v25  ;;  %v745_v30 = vpop.f32.mrb[38].mxu1 }
 0x149   :  { %413 = vst.msk [vmem:[#allocation2 + $0x148] sm:$0xff] %vm372_vm0, %v302_v28  ;;  %v859_v32 = vadd.f32 %v741_v24, %v473_v29  ;;  %v8271_v33 = vadd.f32 %v745_v30, %v294_v16  ;;  %2231 = vmatprep.mubr.f32.mxu0 %v7914_v50  ;;  %v747_v34 = vpop.f32.mrb[39].mxu1  ;;  %v2057_v30 = vld [vmem:[%s10522_s0 + $0x7c] sm:$0xff] }
 0x14b   :  { %923 = vst.msk [vmem:[#allocation2 + $0x128] sm:$0xff] %vm372_vm0, %v859_v32  ;;  %v306_v37 = vpop.f32.mrb[42].mxu0 }
 0x14c   :  { %v308_v38 = vpop.f32.mrb[43].mxu0  ;;  %v475_v39 = vld [vmem:[#allocation2 + $0x138] sm:$0xff]  ;;  %2232 = vmatmul.mubr.f32.gmra.mrb[148].mxu0 %v2052_v36  ;;  %v751_v42 = vpop.f32.mrb[40].mxu1 }
 0x14d   :  { %415 = vst.msk [vmem:[#allocation2 + $0x158] sm:$0xff] %vm372_vm0, %v308_v38  ;;  %v861_v43 = vadd.f32 %v747_v34, %v475_v39  ;;  %v8279_v44 = vadd.f32 %v751_v42, %v300_v27  ;;  %2237 = vmatprep.mubr.f32.mxu0 %v7914_v50  ;;  %v753_v46 = vpop.f32.mrb[41].mxu1 }
 0x14f   :  { %925 = vst.msk [vmem:[#allocation2 + $0x138] sm:$0xff] %vm372_vm0, %v861_v43  ;;  %v312_v48 = vpop.f32.mrb[44].mxu0  ;;  %v2058_v43 = vld [vmem:[%s10522_s0 + $0x84] sm:$0xff] }
 0x150   :  { %v314_v49 = vpop.f32.mrb[45].mxu0  ;;  %v477_v52 = vld [vmem:[#allocation2 + $0x148] sm:$0xff]  ;;  %2238 = vmatmul.mubr.f32.gmra.mrb[150].mxu0 %v2053_v47  ;;  %v757_v53 = vpop.f32.mrb[42].mxu1 }
 0x151   :  { %417 = vst.msk [vmem:[#allocation2 + $0x168] sm:$0xff] %vm372_vm0, %v314_v49  ;;  %v863_v54 = vadd.f32 %v753_v46, %v477_v52  ;;  %v8287_v56 = vadd.f32 %v757_v53, %v306_v37  ;;  %2243 = vmatprep.mubr.f32.mxu0 %v7914_v50  ;;  %v759_v57 = vpop.f32.mrb[43].mxu1 }
 0x153   :  { %927 = vst.msk [vmem:[#allocation2 + $0x148] sm:$0xff] %vm372_vm0, %v863_v54  ;;  %v318_v60 = vpop.f32.mrb[46].mxu0 }
 0x154   :  { %v320_v62 = vpop.f32.mrb[47].mxu0  ;;  %v479_v63 = vld [vmem:[#allocation2 + $0x158] sm:$0xff]  ;;  %2244 = vmatmul.mubr.f32.gmra.mrb[152].mxu0 %v2054_v59  ;;  %v763_v0 = vpop.f32.mrb[44].mxu1 }
 0x155   :  { %419 = vst.msk [vmem:[#allocation2 + $0x178] sm:$0xff] %vm372_vm0, %v320_v62  ;;  %v865_v2 = vadd.f32 %v759_v57, %v479_v63  ;;  %v8295_v5 = vadd.f32 %v763_v0, %v312_v48  ;;  %2249 = vmatprep.mubr.f32.mxu0 %v7914_v50  ;;  %v765_v6 = vpop.f32.mrb[45].mxu1  ;;  %v2059_v57 = vld [vmem:[%s10522_s0 + $0x8c] sm:$0xff] }
 0x157   :  { %929 = vst.msk [vmem:[#allocation2 + $0x158] sm:$0xff] %vm372_vm0, %v865_v2  ;;  %v324_v9 = vpop.f32.mrb[48].mxu0 }
 0x158   :  { %v326_v10 = vpop.f32.mrb[49].mxu0  ;;  %v481_v11 = vld [vmem:[#allocation2 + $0x168] sm:$0xff]  ;;  %2250 = vmatmul.mubr.f32.gmra.mrb[154].mxu0 %v2055_v7  ;;  %v769_v14 = vpop.f32.mrb[46].mxu1  ;;  %v2060_v7 = vld [vmem:[%s10522_s0 + $0x94] sm:$0xff] }
 0x159   :  { %421 = vst.msk [vmem:[#allocation2 + $0x188] sm:$0xff] %vm372_vm0, %v326_v10  ;;  %v867_v15 = vadd.f32 %v765_v6, %v481_v11  ;;  %v8303_v16 = vadd.f32 %v769_v14, %v318_v60  ;;  %2255 = vmatprep.mubr.f32.mxu0 %v7914_v50  ;;  %v771_v18 = vpop.f32.mrb[47].mxu1 }
 0x15b   :  { %931 = vst.msk [vmem:[#allocation2 + $0x168] sm:$0xff] %vm372_vm0, %v867_v15  ;;  %v330_v20 = vpop.f32.mrb[50].mxu0 }
 0x15c   :  { %v332_v21 = vpop.f32.mrb[51].mxu0  ;;  %v483_v24 = vld [vmem:[#allocation2 + $0x178] sm:$0xff]  ;;  %2256 = vmatmul.mubr.f32.gmra.mrb[156].mxu0 %v2056_v19  ;;  %v775_v25 = vpop.f32.mrb[48].mxu1 }
 0x15d   :  { %423 = vst.msk [vmem:[#allocation2 + $0x198] sm:$0xff] %vm372_vm0, %v332_v21  ;;  %v869_v27 = vadd.f32 %v771_v18, %v483_v24  ;;  %v8311_v28 = vadd.f32 %v775_v25, %v324_v9  ;;  %2261 = vmatprep.mubr.f32.mxu0 %v7914_v50  ;;  %v777_v29 = vpop.f32.mrb[49].mxu1 }
 0x15f   :  { %933 = vst.msk [vmem:[#allocation2 + $0x178] sm:$0xff] %vm372_vm0, %v869_v27  ;;  %v336_v32 = vpop.f32.mrb[52].mxu0 }
 0x160   :  { %v338_v34 = vpop.f32.mrb[53].mxu0  ;;  %v485_v36 = vld [vmem:[#allocation2 + $0x188] sm:$0xff]  ;;  %2262 = vmatmul.mubr.f32.gmra.mrb[158].mxu0 %v2057_v30  ;;  %v781_v37 = vpop.f32.mrb[50].mxu1 }
 0x161   :  { %425 = vst.msk [vmem:[#allocation2 + $0x1a8] sm:$0xff] %vm372_vm0, %v338_v34  ;;  %v871_v38 = vadd.f32 %v777_v29, %v485_v36  ;;  %v8319_v39 = vadd.f32 %v781_v37, %v330_v20  ;;  %2267 = vmatprep.mubr.f32.mxu0 %v7914_v50  ;;  %v783_v42 = vpop.f32.mrb[51].mxu1  ;;  %v2061_v20 = vld [vmem:[%s10522_s0 + $0x9c] sm:$0xff]  ;;  %v2062_v34 = vld [vmem:[%s10522_s0 + $0xa4] sm:$0xff] }
 0x163   :  { %935 = vst.msk [vmem:[#allocation2 + $0x188] sm:$0xff] %vm372_vm0, %v871_v38  ;;  %v342_v46 = vpop.f32.mrb[54].mxu0 }
 0x164   :  { %v344_v47 = vpop.f32.mrb[55].mxu0  ;;  %v487_v48 = vld [vmem:[#allocation2 + $0x198] sm:$0xff]  ;;  %2268 = vmatmul.mubr.f32.gmra.mrb[160].mxu0 %v2058_v43  ;;  %v787_v49 = vpop.f32.mrb[52].mxu1 }
 0x165   :  { %427 = vst.msk [vmem:[#allocation2 + $0x1b8] sm:$0xff] %vm372_vm0, %v344_v47  ;;  %v873_v52 = vadd.f32 %v783_v42, %v487_v48  ;;  %v8327_v53 = vadd.f32 %v787_v49, %v336_v32  ;;  %2273 = vmatprep.mubr.f32.mxu0 %v7914_v50  ;;  %v789_v54 = vpop.f32.mrb[53].mxu1  ;;  %v8353_v32 = vld [vmem:[#allocation4 + $0x70] sm:$0xff] }
 0x166   :  { %v2063_v48 = vld [vmem:[%s10522_s0 + $0xac] sm:$0xff] }
 0x167   :  { %937 = vst.msk [vmem:[#allocation2 + $0x198] sm:$0xff] %vm372_vm0, %v873_v52  ;;  %v348_v59 = vpop.f32.mrb[56].mxu0 }
 0x168   :  { %v350_v60 = vpop.f32.mrb[57].mxu0  ;;  %v489_v62 = vld [vmem:[#allocation2 + $0x1a8] sm:$0xff]  ;;  %2274 = vmatmul.mubr.f32.gmra.mrb[162].mxu0 %v2059_v57  ;;  %v793_v63 = vpop.f32.mrb[54].mxu1 }
 0x169   :  { %429 = vst.msk [vmem:[#allocation2 + $0x1c8] sm:$0xff] %vm372_vm0, %v350_v60  ;;  %v875_v0 = vadd.f32 %v789_v54, %v489_v62  ;;  %v8335_v2 = vadd.f32 %v793_v63, %v342_v46  ;;  %2279 = vmatprep.mubr.f32.mxu0 %v7914_v50  ;;  %v795_v6 = vpop.f32.mrb[55].mxu1  ;;  %v951_v57 = vld [vmem:[#allocation2 + $0x8] sm:$0xff] }
 0x16b   :  { %939 = vst.msk [vmem:[#allocation2 + $0x1a8] sm:$0xff] %vm372_vm0, %v875_v0  ;;  %v354_v9 = vpop.f32.mrb[58].mxu0 }
 0x16c   :  { %v356_v10 = vpop.f32.mrb[59].mxu0  ;;  %v491_v11 = vld [vmem:[#allocation2 + $0x1b8] sm:$0xff]  ;;  %2280 = vmatmul.mubr.f32.gmra.mrb[164].mxu0 %v2060_v7  ;;  %v799_v14 = vpop.f32.mrb[56].mxu1 }
 0x16d   :  { %431 = vst.msk [vmem:[#allocation2 + $0x1d8] sm:$0xff] %vm372_vm0, %v356_v10  ;;  %v877_v15 = vadd.f32 %v795_v6, %v491_v11  ;;  %v8343_v18 = vadd.f32 %v799_v14, %v348_v59  ;;  %2285 = vmatprep.mubr.f32.mxu0 %v7914_v50  ;;  %v801_v19 = vpop.f32.mrb[57].mxu1  ;;  %v2064_v7 = vld [vmem:[%s10522_s0 + $0xb4] sm:$0xff] }
 0x16e   :  { %v953_v11 = vld [vmem:[#allocation2 + $0x18] sm:$0xff] }
 0x16f   :  { %941 = vst.msk [vmem:[#allocation2 + $0x1b8] sm:$0xff] %vm372_vm0, %v877_v15  ;;  %v360_v21 = vpop.f32.mrb[60].mxu0 }
 0x170   :  { %v362_v24 = vpop.f32.mrb[61].mxu0  ;;  %v493_v25 = vld [vmem:[#allocation2 + $0x1c8] sm:$0xff]  ;;  %2286 = vmatmul.mubr.f32.gmra.mrb[166].mxu0 %v2061_v20  ;;  %v805_v27 = vpop.f32.mrb[58].mxu1 }
 0x171   :  { %433 = vst.msk [vmem:[#allocation2 + $0x1e8] sm:$0xff] %vm372_vm0, %v362_v24  ;;  %v879_v29 = vadd.f32 %v801_v19, %v493_v25  ;;  %v8351_v30 = vadd.f32 %v805_v27, %v354_v9  ;;  %2291 = vmatprep.mubr.f32.mxu0 %v8353_v32  ;;  %v807_v50 = vpop.f32.mrb[59].mxu1 }
 0x173   :  { %943 = vst.msk [vmem:[#allocation2 + $0x1c8] sm:$0xff] %vm372_vm0, %v879_v29  ;;  %v366_v36 = vpop.f32.mrb[62].mxu0  ;;  %v955_v29 = vld [vmem:[#allocation2 + $0x28] sm:$0xff] }
 0x174   :  { %v368_v37 = vpop.f32.mrb[63].mxu0  ;;  %v495_v38 = vld [vmem:[#allocation2 + $0x1d8] sm:$0xff]  ;;  %2292 = vmatmul.mubr.f32.gmra.mrb[168].mxu0 %v2062_v34  ;;  %v811_v42 = vpop.f32.mrb[60].mxu1 }
 0x175   :  { %435 = vst.msk [vmem:[#allocation2 + $0x1f8] sm:$0xff] %vm372_vm0, %v368_v37  ;;  %v881_v43 = vadd.f32 %v807_v50, %v495_v38  ;;  %v8361_v46 = vadd.f32 %v811_v42, %v360_v21  ;;  %2297 = vmatprep.mubr.f32.mxu0 %v8353_v32  ;;  %v813_v47 = vpop.f32.mrb[61].mxu1  ;;  %v2065_v21 = vld [vmem:[%s10522_s0 + $0xbc] sm:$0xff]  ;;  %v2066_v37 = vld [vmem:[%s10522_s0 + $0xc4] sm:$0xff] }
 0x177   :  { %945 = vst.msk [vmem:[#allocation2 + $0x1d8] sm:$0xff] %vm372_vm0, %v881_v43  ;;  %v1145_v49 = vpop.f32.mrb[64].mxu0 }
 0x178   :  { %v1336_v52 = vadd.f32 %v1145_v49, %v8080_v40  ;;  %v497_v54 = vld [vmem:[#allocation2 + $0x1e8] sm:$0xff]  ;;  %v1147_v59 = vpop.f32.mrb[65].mxu0  ;;  %2298 = vmatmul.mubr.f32.gmra.mrb[170].mxu0 %v2063_v48  ;;  %v817_v60 = vpop.f32.mrb[62].mxu1  ;;  %v957_v49 = vld [vmem:[#allocation2 + $0x38] sm:$0xff] }
 0x179   :  { %v883_v62 = vadd.f32 %v813_v47, %v497_v54  ;;  %v1337_v63 = vadd.f32 %v1147_v59, %v951_v57  ;;  %v8369_v0 = vadd.f32 %v817_v60, %v366_v36  ;;  %2303 = vmatprep.mubr.f32.mxu0 %v8353_v32  ;;  %v819_v6 = vpop.f32.mrb[63].mxu1  ;;  %v2067_v59 = vld [vmem:[%s10522_s0 + $0xcc] sm:$0xff] }
 0x17b   :  { %947 = vst.msk [vmem:[#allocation2 + $0x1e8] sm:$0xff] %vm372_vm0, %v883_v62  ;;  %1401 = vst.msk [vmem:[#allocation2 + $0x8] sm:$0xff] %vm372_vm0, %v1337_v63  ;;  %v1151_v40 = vpop.f32.mrb[66].mxu0 }
 0x17c   :  { %v1338_v9 = vadd.f32 %v1151_v40, %v8091_v3  ;;  %v499_v10 = vld [vmem:[#allocation2 + $0x1f8] sm:$0xff]  ;;  %v1153_v14 = vpop.f32.mrb[67].mxu0  ;;  %2304 = vmatmul.mubr.f32.gmra.mrb[172].mxu0 %v2064_v7  ;;  %v1659_v15 = vpop.f32.mrb[64].mxu1  ;;  %v959_v40 = vld [vmem:[#allocation2 + $0x48] sm:$0xff] }
 0x17d   :  { %v885_v19 = vadd.f32 %v819_v6, %v499_v10  ;;  %v1339_v20 = vadd.f32 %v1153_v14, %v953_v11  ;;  %2309 = vmatprep.mubr.f32.mxu0 %v8353_v32  ;;  %v8382_v24 = vadd.f32 %v1659_v15, %v1336_v52  ;;  %v1661_v25 = vpop.f32.mrb[65].mxu1  ;;  %v2068_v14 = vld [vmem:[%s10522_s0 + $0xd4] sm:$0xff] }
 0x17f   :  { %949 = vst.msk [vmem:[#allocation2 + $0x1f8] sm:$0xff] %vm372_vm0, %v885_v19  ;;  %1403 = vst.msk [vmem:[#allocation2 + $0x18] sm:$0xff] %vm372_vm0, %v1339_v20  ;;  %v1157_v3 = vpop.f32.mrb[68].mxu0 }
 0x180   :  { %v1340_v27 = vadd.f32 %v1157_v3, %v8103_v58  ;;  %v1159_v50 = vpop.f32.mrb[69].mxu0  ;;  %2310 = vmatmul.mubr.f32.gmra.mrb[174].mxu0 %v2065_v21  ;;  %v1665_v34 = vpop.f32.mrb[66].mxu1  ;;  %v961_v3 = vld [vmem:[#allocation2 + $0x58] sm:$0xff] }
 0x181   :  { %v1341_v36 = vadd.f32 %v1159_v50, %v955_v29  ;;  %2315 = vmatprep.mubr.f32.mxu0 %v8353_v32  ;;  %v8391_v38 = vadd.f32 %v1665_v34, %v1338_v9  ;;  %v1667_v42 = vpop.f32.mrb[67].mxu1  ;;  %v2069_v34 = vld [vmem:[%s10522_s0 + $0xdc] sm:$0xff] }
 0x182   :  { %v1465_v43 = vld [vmem:[#allocation2 + $0x8] sm:$0xff] }
 0x183   :  { %1405 = vst.msk [vmem:[#allocation2 + $0x28] sm:$0xff] %vm372_vm0, %v1341_v36  ;;  %v1851_v47 = vadd.f32 %v1661_v25, %v1465_v43  ;;  %v1163_v48 = vpop.f32.mrb[70].mxu0 }
 0x184   :  { %v1342_v58 = vadd.f32 %v1163_v48, %v8115_v4  ;;  %v1165_v52 = vpop.f32.mrb[71].mxu0  ;;  %2316 = vmatmul.mubr.f32.gmra.mrb[176].mxu0 %v2066_v37  ;;  %v1671_v54 = vpop.f32.mrb[68].mxu1  ;;  %v963_v48 = vld [vmem:[#allocation2 + $0x68] sm:$0xff] }
 0x185   :  { %1915 = vst.msk [vmem:[#allocation2 + $0x8] sm:$0xff] %vm372_vm0, %v1851_v47  ;;  %v1343_v57 = vadd.f32 %v1165_v52, %v957_v49  ;;  %2321 = vmatprep.mubr.f32.mxu0 %v8353_v32  ;;  %v8400_v60 = vadd.f32 %v1671_v54, %v1340_v27  ;;  %v1673_v62 = vpop.f32.mrb[69].mxu1  ;;  %v2070_v54 = vld [vmem:[%s10522_s0 + $0xe4] sm:$0xff] }
 0x186   :  { %v1467_v63 = vld [vmem:[#allocation2 + $0x18] sm:$0xff] }
 0x187   :  { %1407 = vst.msk [vmem:[#allocation2 + $0x38] sm:$0xff] %vm372_vm0, %v1343_v57  ;;  %v1853_v4 = vadd.f32 %v1667_v42, %v1467_v63  ;;  %v1169_v6 = vpop.f32.mrb[72].mxu0 }
 0x188   :  { %v1344_v7 = vadd.f32 %v1169_v6, %v8127_v13  ;;  %v1171_v9 = vpop.f32.mrb[73].mxu0  ;;  %2322 = vmatmul.mubr.f32.gmra.mrb[178].mxu0 %v2067_v59  ;;  %v1677_v10 = vpop.f32.mrb[70].mxu1  ;;  %v965_v6 = vld [vmem:[#allocation2 + $0x78] sm:$0xff] }
 0x189   :  { %1917 = vst.msk [vmem:[#allocation2 + $0x18] sm:$0xff] %vm372_vm0, %v1853_v4  ;;  %v1345_v11 = vadd.f32 %v1171_v9, %v959_v40  ;;  %2327 = vmatprep.mubr.f32.mxu0 %v8353_v32  ;;  %v8409_v15 = vadd.f32 %v1677_v10, %v1342_v58  ;;  %v1679_v19 = vpop.f32.mrb[71].mxu1  ;;  %v2071_v10 = vld [vmem:[%s10522_s0 + $0xec] sm:$0xff] }
 0x18a   :  { %v1469_v20 = vld [vmem:[#allocation2 + $0x28] sm:$0xff] }
 0x18b   :  { %1409 = vst.msk [vmem:[#allocation2 + $0x48] sm:$0xff] %vm372_vm0, %v1345_v11  ;;  %v1855_v13 = vadd.f32 %v1673_v62, %v1469_v20  ;;  %v1175_v21 = vpop.f32.mrb[74].mxu0 }
 0x18c   :  { %v1346_v25 = vadd.f32 %v1175_v21, %v8139_v22  ;;  %v1177_v27 = vpop.f32.mrb[75].mxu0  ;;  %2328 = vmatmul.mubr.f32.gmra.mrb[180].mxu0 %v2068_v14  ;;  %v1683_v29 = vpop.f32.mrb[72].mxu1  ;;  %v967_v21 = vld [vmem:[#allocation2 + $0x88] sm:$0xff] }
 0x18d   :  { %1919 = vst.msk [vmem:[#allocation2 + $0x28] sm:$0xff] %vm372_vm0, %v1855_v13  ;;  %v1347_v50 = vadd.f32 %v1177_v27, %v961_v3  ;;  %2333 = vmatprep.mubr.f32.mxu0 %v8353_v32  ;;  %v8418_v36 = vadd.f32 %v1683_v29, %v1344_v7  ;;  %v1685_v37 = vpop.f32.mrb[73].mxu1  ;;  %v2072_v29 = vld [vmem:[%s10522_s0 + $0xf4] sm:$0xff] }
 0x18e   :  { %v1471_v42 = vld [vmem:[#allocation2 + $0x38] sm:$0xff] }
 0x18f   :  { %1411 = vst.msk [vmem:[#allocation2 + $0x58] sm:$0xff] %vm372_vm0, %v1347_v50  ;;  %v1857_v22 = vadd.f32 %v1679_v19, %v1471_v42  ;;  %v1181_v43 = vpop.f32.mrb[76].mxu0 }
 0x190   :  { %v1348_v47 = vadd.f32 %v1181_v43, %v8151_v31  ;;  %v1183_v58 = vpop.f32.mrb[77].mxu0  ;;  %2334 = vmatmul.mubr.f32.gmra.mrb[182].mxu0 %v2069_v34  ;;  %v1689_v49 = vpop.f32.mrb[74].mxu1  ;;  %v969_v43 = vld [vmem:[#allocation2 + $0x98] sm:$0xff] }
 0x191   :  { %1921 = vst.msk [vmem:[#allocation2 + $0x38] sm:$0xff] %vm372_vm0, %v1857_v22  ;;  %v1349_v52 = vadd.f32 %v1183_v58, %v963_v48  ;;  %2339 = vmatprep.mubr.f32.mxu0 %v8353_v32  ;;  %v8427_v57 = vadd.f32 %v1689_v49, %v1346_v25  ;;  %v1691_v59 = vpop.f32.mrb[75].mxu1  ;;  %v2073_v49 = vld [vmem:[%s10522_s0 + $0xfc] sm:$0xff] }
 0x192   :  { %v1473_v62 = vld [vmem:[#allocation2 + $0x48] sm:$0xff] }
 0x193   :  { %1413 = vst.msk [vmem:[#allocation2 + $0x68] sm:$0xff] %vm372_vm0, %v1349_v52  ;;  %v1859_v31 = vadd.f32 %v1685_v37, %v1473_v62  ;;  %v1187_v63 = vpop.f32.mrb[78].mxu0 }
 0x194   :  { %v1350_v4 = vadd.f32 %v1187_v63, %v8163_v41  ;;  %v1189_v7 = vpop.f32.mrb[79].mxu0  ;;  %2340 = vmatmul.mubr.f32.gmra.mrb[184].mxu0 %v2070_v54  ;;  %v1695_v40 = vpop.f32.mrb[76].mxu1  ;;  %v971_v63 = vld [vmem:[#allocation2 + $0xa8] sm:$0xff] }
 0x195   :  { %1923 = vst.msk [vmem:[#allocation2 + $0x48] sm:$0xff] %vm372_vm0, %v1859_v31  ;;  %v1351_v9 = vadd.f32 %v1189_v7, %v965_v6  ;;  %2345 = vmatprep.mubr.f32.mxu0 %v8353_v32  ;;  %v8436_v11 = vadd.f32 %v1695_v40, %v1348_v47  ;;  %v1697_v14 = vpop.f32.mrb[77].mxu1 }
 0x196   :  { %v1475_v19 = vld [vmem:[#allocation2 + $0x58] sm:$0xff] }
 0x197   :  { %1415 = vst.msk [vmem:[#allocation2 + $0x78] sm:$0xff] %vm372_vm0, %v1351_v9  ;;  %v1861_v41 = vadd.f32 %v1691_v59, %v1475_v19  ;;  %v1193_v20 = vpop.f32.mrb[80].mxu0 }
 0x198   :  { %v1352_v13 = vadd.f32 %v1193_v20, %v8175_v51  ;;  %v1195_v25 = vpop.f32.mrb[81].mxu0  ;;  %2346 = vmatmul.mubr.f32.gmra.mrb[186].mxu0 %v2071_v10  ;;  %v1701_v3 = vpop.f32.mrb[78].mxu1 }
 0x199   :  { %1925 = vst.msk [vmem:[#allocation2 + $0x58] sm:$0xff] %vm372_vm0, %v1861_v41  ;;  %v1353_v27 = vadd.f32 %v1195_v25, %v967_v21  ;;  %2351 = vmatprep.mubr.f32.mxu0 %v8353_v32  ;;  %v8445_v50 = vadd.f32 %v1701_v3, %v1350_v4  ;;  %v1703_v34 = vpop.f32.mrb[79].mxu1  ;;  %v973_v41 = vld [vmem:[#allocation2 + $0xb8] sm:$0xff] }
 0x19a   :  { %v1477_v37 = vld [vmem:[#allocation2 + $0x68] sm:$0xff] }
 0x19b   :  { %1417 = vst.msk [vmem:[#allocation2 + $0x88] sm:$0xff] %vm372_vm0, %v1353_v27  ;;  %v1863_v51 = vadd.f32 %v1697_v14, %v1477_v37  ;;  %v1199_v42 = vpop.f32.mrb[82].mxu0  ;;  %v975_v37 = vld [vmem:[#allocation2 + $0xc8] sm:$0xff] }
 0x19c   :  { %v1354_v22 = vadd.f32 %v1199_v42, %v8187_v61  ;;  %v1201_v47 = vpop.f32.mrb[83].mxu0  ;;  %2352 = vmatmul.mubr.f32.gmra.mrb[188].mxu0 %v2072_v29  ;;  %v1707_v48 = vpop.f32.mrb[80].mxu1 }
 0x19d   :  { %1927 = vst.msk [vmem:[#allocation2 + $0x68] sm:$0xff] %vm372_vm0, %v1863_v51  ;;  %v1355_v58 = vadd.f32 %v1201_v47, %v969_v43  ;;  %2357 = vmatprep.mubr.f32.mxu0 %v8353_v32  ;;  %v8454_v52 = vadd.f32 %v1707_v48, %v1352_v13  ;;  %v1709_v54 = vpop.f32.mrb[81].mxu1 }
 0x19e   :  { %v1479_v59 = vld [vmem:[#allocation2 + $0x78] sm:$0xff] }
 0x19f   :  { %1419 = vst.msk [vmem:[#allocation2 + $0x98] sm:$0xff] %vm372_vm0, %v1355_v58  ;;  %v1865_v61 = vadd.f32 %v1703_v34, %v1479_v59  ;;  %v1205_v62 = vpop.f32.mrb[84].mxu0 }
 0x1a0   :  { %v1356_v31 = vadd.f32 %v1205_v62, %v8199_v8  ;;  %v1207_v4 = vpop.f32.mrb[85].mxu0  ;;  %2358 = vmatmul.mubr.f32.gmra.mrb[190].mxu0 %v2073_v49  ;;  %v1713_v6 = vpop.f32.mrb[82].mxu1 }
 0x1a1   :  { %1929 = vst.msk [vmem:[#allocation2 + $0x78] sm:$0xff] %vm372_vm0, %v1865_v61  ;;  %v1357_v32 = vadd.f32 %v1207_v4, %v971_v63  ;;  %v8459_v7 = vadd.f32 %v1713_v6, %v1354_v22  ;;  %v1715_v40 = vpop.f32.mrb[83].mxu1 }
 0x1a2   :  { %v1481_v9 = vld [vmem:[#allocation2 + $0x88] sm:$0xff] }
 0x1a3   :  { %1421 = vst.msk [vmem:[#allocation2 + $0xa8] sm:$0xff] %vm372_vm0, %v1357_v32  ;;  %v1867_v10 = vadd.f32 %v1709_v54, %v1481_v9  ;;  %v1211_v14 = vpop.f32.mrb[86].mxu0  ;;  %v977_v54 = vld [vmem:[#allocation2 + $0xd8] sm:$0xff] }
 0x1a4   :  { %v1358_v19 = vadd.f32 %v1211_v14, %v8207_v17  ;;  %v1213_v20 = vpop.f32.mrb[87].mxu0  ;;  %v1719_v8 = vpop.f32.mrb[84].mxu1 }
 0x1a5   :  { %1931 = vst.msk [vmem:[#allocation2 + $0x88] sm:$0xff] %vm372_vm0, %v1867_v10  ;;  %v1359_v13 = vadd.f32 %v1213_v20, %v973_v41  ;;  %v8464_v21 = vadd.f32 %v1719_v8, %v1356_v31  ;;  %v1721_v25 = vpop.f32.mrb[85].mxu1 }
 0x1a6   :  { %v1483_v3 = vld [vmem:[#allocation2 + $0x98] sm:$0xff] }
 0x1a7   :  { %1423 = vst.msk [vmem:[#allocation2 + $0xb8] sm:$0xff] %vm372_vm0, %v1359_v13  ;;  %v1869_v27 = vadd.f32 %v1715_v40, %v1483_v3  ;;  %v1217_v29 = vpop.f32.mrb[88].mxu0  ;;  %v979_v40 = vld [vmem:[#allocation2 + $0xe8] sm:$0xff] }
 0x1a8   :  { %v1360_v34 = vadd.f32 %v1217_v29, %v8215_v26  ;;  %v1219_v51 = vpop.f32.mrb[89].mxu0  ;;  %v1725_v42 = vpop.f32.mrb[86].mxu1 }
 0x1a9   :  { %1933 = vst.msk [vmem:[#allocation2 + $0x98] sm:$0xff] %vm372_vm0, %v1869_v27  ;;  %v1361_v17 = vadd.f32 %v1219_v51, %v975_v37  ;;  %v8469_v22 = vadd.f32 %v1725_v42, %v1358_v19  ;;  %v1727_v43 = vpop.f32.mrb[87].mxu1 }
 0x1aa   :  { %v1485_v47 = vld [vmem:[#allocation2 + $0xa8] sm:$0xff] }
 0x1ab   :  { %1425 = vst.msk [vmem:[#allocation2 + $0xc8] sm:$0xff] %vm372_vm0, %v1361_v17  ;;  %v1871_v48 = vadd.f32 %v1721_v25, %v1485_v47  ;;  %v1223_v58 = vpop.f32.mrb[90].mxu0  ;;  %v981_v25 = vld [vmem:[#allocation2 + $0xf8] sm:$0xff] }
 0x1ac   :  { %v1362_v49 = vadd.f32 %v1223_v58, %v8223_v35  ;;  %v1225_v59 = vpop.f32.mrb[91].mxu0  ;;  %v1731_v61 = vpop.f32.mrb[88].mxu1 }
 0x1ad   :  { %1935 = vst.msk [vmem:[#allocation2 + $0xa8] sm:$0xff] %vm372_vm0, %v1871_v48  ;;  %v1363_v26 = vadd.f32 %v1225_v59, %v977_v54  ;;  %v8474_v62 = vadd.f32 %v1731_v61, %v1360_v34  ;;  %v1733_v31 = vpop.f32.mrb[89].mxu1 }
 0x1ae   :  { %v1487_v63 = vld [vmem:[#allocation2 + $0xb8] sm:$0xff] }
 0x1af   :  { %1427 = vst.msk [vmem:[#allocation2 + $0xd8] sm:$0xff] %vm372_vm0, %v1363_v26  ;;  %v1873_v4 = vadd.f32 %v1727_v43, %v1487_v63  ;;  %v1229_v6 = vpop.f32.mrb[92].mxu0  ;;  %v983_v43 = vld [vmem:[#allocation2 + $0x108] sm:$0xff] }
 0x1b0   :  { %v1364_v32 = vadd.f32 %v1229_v6, %v8231_v45  ;;  %v1231_v9 = vpop.f32.mrb[93].mxu0  ;;  %v1737_v10 = vpop.f32.mrb[90].mxu1 }
 0x1b1   :  { %1937 = vst.msk [vmem:[#allocation2 + $0xb8] sm:$0xff] %vm372_vm0, %v1873_v4  ;;  %v1365_v35 = vadd.f32 %v1231_v9, %v979_v40  ;;  %v8479_v14 = vadd.f32 %v1737_v10, %v1362_v49  ;;  %v1739_v19 = vpop.f32.mrb[91].mxu1 }
 0x1b2   :  { %v1489_v41 = vld [vmem:[#allocation2 + $0xc8] sm:$0xff] }
 0x1b3   :  { %1429 = vst.msk [vmem:[#allocation2 + $0xe8] sm:$0xff] %vm372_vm0, %v1365_v35  ;;  %v1875_v20 = vadd.f32 %v1733_v31, %v1489_v41  ;;  %v1235_v8 = vpop.f32.mrb[94].mxu0  ;;  %v985_v31 = vld [vmem:[#allocation2 + $0x118] sm:$0xff] }
 0x1b4   :  { %v1366_v13 = vadd.f32 %v1235_v8, %v8239_v55  ;;  %v1237_v3 = vpop.f32.mrb[95].mxu0  ;;  %v1743_v27 = vpop.f32.mrb[92].mxu1 }
 0x1b5   :  { %1939 = vst.msk [vmem:[#allocation2 + $0xc8] sm:$0xff] %vm372_vm0, %v1875_v20  ;;  %v1367_v45 = vadd.f32 %v1237_v3, %v981_v25  ;;  %v8484_v29 = vadd.f32 %v1743_v27, %v1364_v32  ;;  %v1745_v34 = vpop.f32.mrb[93].mxu1 }
 0x1b6   :  { %v1491_v37 = vld [vmem:[#allocation2 + $0xd8] sm:$0xff] }
 0x1b7   :  { %1431 = vst.msk [vmem:[#allocation2 + $0xf8] sm:$0xff] %vm372_vm0, %v1367_v45  ;;  %v1877_v51 = vadd.f32 %v1739_v19, %v1491_v37  ;;  %v1241_v42 = vpop.f32.mrb[96].mxu0  ;;  %v987_v19 = vld [vmem:[#allocation2 + $0x128] sm:$0xff] }
 0x1b8   :  { %v1368_v17 = vadd.f32 %v1241_v42, %v8247_v1  ;;  %v1243_v47 = vpop.f32.mrb[97].mxu0  ;;  %v1749_v48 = vpop.f32.mrb[94].mxu1 }
 0x1b9   :  { %1941 = vst.msk [vmem:[#allocation2 + $0xd8] sm:$0xff] %vm372_vm0, %v1877_v51  ;;  %v1369_v55 = vadd.f32 %v1243_v47, %v983_v43  ;;  %v8489_v58 = vadd.f32 %v1749_v48, %v1366_v13  ;;  %v1751_v49 = vpop.f32.mrb[95].mxu1 }
 0x1ba   :  { %v1493_v54 = vld [vmem:[#allocation2 + $0xe8] sm:$0xff] }
 0x1bb   :  { %1433 = vst.msk [vmem:[#allocation2 + $0x108] sm:$0xff] %vm372_vm0, %v1369_v55  ;;  %v1879_v59 = vadd.f32 %v1745_v34, %v1493_v54  ;;  %v1247_v61 = vpop.f32.mrb[98].mxu0  ;;  %v989_v34 = vld [vmem:[#allocation2 + $0x138] sm:$0xff] }
 0x1bc   :  { %v1370_v26 = vadd.f32 %v1247_v61, %v8255_v12  ;;  %v1249_v63 = vpop.f32.mrb[99].mxu0  ;;  %v1755_v4 = vpop.f32.mrb[96].mxu1 }
 0x1bd   :  { %1943 = vst.msk [vmem:[#allocation2 + $0xe8] sm:$0xff] %vm372_vm0, %v1879_v59  ;;  %v1371_v1 = vadd.f32 %v1249_v63, %v985_v31  ;;  %v8494_v6 = vadd.f32 %v1755_v4, %v1368_v17  ;;  %v1757_v32 = vpop.f32.mrb[97].mxu1 }
 0x1be   :  { %v1495_v40 = vld [vmem:[#allocation2 + $0xf8] sm:$0xff] }
 0x1bf   :  { %1435 = vst.msk [vmem:[#allocation2 + $0x118] sm:$0xff] %vm372_vm0, %v1371_v1  ;;  %v1881_v9 = vadd.f32 %v1751_v49, %v1495_v40  ;;  %v1253_v10 = vpop.f32.mrb[100].mxu0  ;;  %v991_v49 = vld [vmem:[#allocation2 + $0x148] sm:$0xff] }
 0x1c0   :  { %v1372_v35 = vadd.f32 %v1253_v10, %v8263_v23  ;;  %v1255_v41 = vpop.f32.mrb[101].mxu0  ;;  %v1761_v20 = vpop.f32.mrb[98].mxu1 }
 0x1c1   :  { %1945 = vst.msk [vmem:[#allocation2 + $0xf8] sm:$0xff] %vm372_vm0, %v1881_v9  ;;  %v1373_v12 = vadd.f32 %v1255_v41, %v987_v19  ;;  %v8499_v8 = vadd.f32 %v1761_v20, %v1370_v26  ;;  %v1763_v13 = vpop.f32.mrb[99].mxu1 }
 0x1c2   :  { %v1497_v25 = vld [vmem:[#allocation2 + $0x108] sm:$0xff] }
 0x1c3   :  { %1437 = vst.msk [vmem:[#allocation2 + $0x128] sm:$0xff] %vm372_vm0, %v1373_v12  ;;  %v1883_v3 = vadd.f32 %v1757_v32, %v1497_v25  ;;  %v1259_v27 = vpop.f32.mrb[102].mxu0  ;;  %v993_v32 = vld [vmem:[#allocation2 + $0x158] sm:$0xff] }
 0x1c4   :  { %v1374_v45 = vadd.f32 %v1259_v27, %v8271_v33  ;;  %v1261_v37 = vpop.f32.mrb[103].mxu0  ;;  %v1767_v51 = vpop.f32.mrb[100].mxu1 }
 0x1c5   :  { %1947 = vst.msk [vmem:[#allocation2 + $0x108] sm:$0xff] %vm372_vm0, %v1883_v3  ;;  %v1375_v23 = vadd.f32 %v1261_v37, %v989_v34  ;;  %v8504_v42 = vadd.f32 %v1767_v51, %v1372_v35  ;;  %v1769_v17 = vpop.f32.mrb[101].mxu1 }
 0x1c6   :  { %v1499_v43 = vld [vmem:[#allocation2 + $0x118] sm:$0xff] }
 0x1c7   :  { %1439 = vst.msk [vmem:[#allocation2 + $0x138] sm:$0xff] %vm372_vm0, %v1375_v23  ;;  %v1885_v47 = vadd.f32 %v1763_v13, %v1499_v43  ;;  %v1265_v48 = vpop.f32.mrb[104].mxu0  ;;  %v995_v13 = vld [vmem:[#allocation2 + $0x168] sm:$0xff] }
 0x1c8   :  { %v1376_v55 = vadd.f32 %v1265_v48, %v8279_v44  ;;  %v1267_v54 = vpop.f32.mrb[105].mxu0  ;;  %v1773_v59 = vpop.f32.mrb[102].mxu1 }
 0x1c9   :  { %1949 = vst.msk [vmem:[#allocation2 + $0x118] sm:$0xff] %vm372_vm0, %v1885_v47  ;;  %v1377_v33 = vadd.f32 %v1267_v54, %v991_v49  ;;  %v8509_v61 = vadd.f32 %v1773_v59, %v1374_v45  ;;  %v1775_v26 = vpop.f32.mrb[103].mxu1 }
 0x1ca   :  { %v1501_v31 = vld [vmem:[#allocation2 + $0x128] sm:$0xff] }
 0x1cb   :  { %1441 = vst.msk [vmem:[#allocation2 + $0x148] sm:$0xff] %vm372_vm0, %v1377_v33  ;;  %v1887_v63 = vadd.f32 %v1769_v17, %v1501_v31  ;;  %v1271_v4 = vpop.f32.mrb[106].mxu0  ;;  %v997_v17 = vld [vmem:[#allocation2 + $0x178] sm:$0xff] }
 0x1cc   :  { %v1378_v1 = vadd.f32 %v1271_v4, %v8287_v56  ;;  %v1273_v40 = vpop.f32.mrb[107].mxu0  ;;  %v1779_v9 = vpop.f32.mrb[104].mxu1 }
 0x1cd   :  { %1951 = vst.msk [vmem:[#allocation2 + $0x128] sm:$0xff] %vm372_vm0, %v1887_v63  ;;  %v1379_v44 = vadd.f32 %v1273_v40, %v993_v32  ;;  %v8514_v10 = vadd.f32 %v1779_v9, %v1376_v55  ;;  %v1781_v35 = vpop.f32.mrb[105].mxu1 }
 0x1ce   :  { %v1503_v19 = vld [vmem:[#allocation2 + $0x138] sm:$0xff] }
 0x1cf   :  { %1443 = vst.msk [vmem:[#allocation2 + $0x158] sm:$0xff] %vm372_vm0, %v1379_v44  ;;  %v1889_v41 = vadd.f32 %v1775_v26, %v1503_v19  ;;  %v1277_v20 = vpop.f32.mrb[108].mxu0  ;;  %v999_v26 = vld [vmem:[#allocation2 + $0x188] sm:$0xff] }
 0x1d0   :  { %v1380_v12 = vadd.f32 %v1277_v20, %v8295_v5  ;;  %v1279_v25 = vpop.f32.mrb[109].mxu0  ;;  %v1785_v3 = vpop.f32.mrb[106].mxu1 }
 0x1d1   :  { %1953 = vst.msk [vmem:[#allocation2 + $0x138] sm:$0xff] %vm372_vm0, %v1889_v41  ;;  %v1381_v56 = vadd.f32 %v1279_v25, %v995_v13  ;;  %v8519_v27 = vadd.f32 %v1785_v3, %v1378_v1  ;;  %v1787_v45 = vpop.f32.mrb[107].mxu1 }
 0x1d2   :  { %v1505_v34 = vld [vmem:[#allocation2 + $0x148] sm:$0xff] }
 0x1d3   :  { %1445 = vst.msk [vmem:[#allocation2 + $0x168] sm:$0xff] %vm372_vm0, %v1381_v56  ;;  %v1891_v37 = vadd.f32 %v1781_v35, %v1505_v34  ;;  %v1283_v51 = vpop.f32.mrb[110].mxu0  ;;  %v1001_v35 = vld [vmem:[#allocation2 + $0x198] sm:$0xff] }
 0x1d4   :  { %v1382_v23 = vadd.f32 %v1283_v51, %v8303_v16  ;;  %v1285_v43 = vpop.f32.mrb[111].mxu0  ;;  %v1791_v47 = vpop.f32.mrb[108].mxu1 }
 0x1d5   :  { %1955 = vst.msk [vmem:[#allocation2 + $0x148] sm:$0xff] %vm372_vm0, %v1891_v37  ;;  %v1383_v5 = vadd.f32 %v1285_v43, %v997_v17  ;;  %v8524_v48 = vadd.f32 %v1791_v47, %v1380_v12  ;;  %v1793_v55 = vpop.f32.mrb[109].mxu1 }
 0x1d6   :  { %v1507_v49 = vld [vmem:[#allocation2 + $0x158] sm:$0xff] }
 0x1d7   :  { %1447 = vst.msk [vmem:[#allocation2 + $0x178] sm:$0xff] %vm372_vm0, %v1383_v5  ;;  %v1893_v54 = vadd.f32 %v1787_v45, %v1507_v49  ;;  %v1289_v59 = vpop.f32.mrb[112].mxu0  ;;  %v1003_v45 = vld [vmem:[#allocation2 + $0x1a8] sm:$0xff] }
 0x1d8   :  { %v1384_v33 = vadd.f32 %v1289_v59, %v8311_v28  ;;  %v1291_v31 = vpop.f32.mrb[113].mxu0  ;;  %v1797_v63 = vpop.f32.mrb[110].mxu1 }
 0x1d9   :  { %1957 = vst.msk [vmem:[#allocation2 + $0x158] sm:$0xff] %vm372_vm0, %v1893_v54  ;;  %v1385_v16 = vadd.f32 %v1291_v31, %v999_v26  ;;  %v8529_v4 = vadd.f32 %v1797_v63, %v1382_v23  ;;  %v1799_v1 = vpop.f32.mrb[111].mxu1 }
 0x1da   :  { %v1509_v32 = vld [vmem:[#allocation2 + $0x168] sm:$0xff] }
 0x1db   :  { %1449 = vst.msk [vmem:[#allocation2 + $0x188] sm:$0xff] %vm372_vm0, %v1385_v16  ;;  %v1895_v40 = vadd.f32 %v1793_v55, %v1509_v32  ;;  %v1295_v9 = vpop.f32.mrb[114].mxu0  ;;  %v1005_v55 = vld [vmem:[#allocation2 + $0x1b8] sm:$0xff] }
 0x1dc   :  { %v1386_v44 = vadd.f32 %v1295_v9, %v8319_v39  ;;  %v1297_v19 = vpop.f32.mrb[115].mxu0  ;;  %v1803_v41 = vpop.f32.mrb[112].mxu1 }
 0x1dd   :  { %1959 = vst.msk [vmem:[#allocation2 + $0x168] sm:$0xff] %vm372_vm0, %v1895_v40  ;;  %v1387_v28 = vadd.f32 %v1297_v19, %v1001_v35  ;;  %v8534_v20 = vadd.f32 %v1803_v41, %v1384_v33  ;;  %v1805_v12 = vpop.f32.mrb[113].mxu1 }
 0x1de   :  { %v1511_v13 = vld [vmem:[#allocation2 + $0x178] sm:$0xff] }
 0x1df   :  { %1451 = vst.msk [vmem:[#allocation2 + $0x198] sm:$0xff] %vm372_vm0, %v1387_v28  ;;  %v1897_v25 = vadd.f32 %v1799_v1, %v1511_v13  ;;  %v1301_v3 = vpop.f32.mrb[116].mxu0  ;;  %v1007_v1 = vld [vmem:[#allocation2 + $0x1c8] sm:$0xff] }
 0x1e0   :  { %v1388_v56 = vadd.f32 %v1301_v3, %v8327_v53  ;;  %v1303_v34 = vpop.f32.mrb[117].mxu0  ;;  %v1809_v37 = vpop.f32.mrb[114].mxu1 }
 0x1e1   :  { %1961 = vst.msk [vmem:[#allocation2 + $0x178] sm:$0xff] %vm372_vm0, %v1897_v25  ;;  %v1389_v39 = vadd.f32 %v1303_v34, %v1003_v45  ;;  %v8539_v51 = vadd.f32 %v1809_v37, %v1386_v44  ;;  %v1811_v23 = vpop.f32.mrb[115].mxu1 }
 0x1e2   :  { %v1513_v17 = vld [vmem:[#allocation2 + $0x188] sm:$0xff] }
 0x1e3   :  { %1453 = vst.msk [vmem:[#allocation2 + $0x1a8] sm:$0xff] %vm372_vm0, %v1389_v39  ;;  %v1899_v43 = vadd.f32 %v1805_v12, %v1513_v17  ;;  %v1307_v47 = vpop.f32.mrb[118].mxu0  ;;  %v1009_v12 = vld [vmem:[#allocation2 + $0x1d8] sm:$0xff] }
 0x1e4   :  { %v1390_v5 = vadd.f32 %v1307_v47, %v8335_v2  ;;  %v1309_v49 = vpop.f32.mrb[119].mxu0  ;;  %v1815_v54 = vpop.f32.mrb[116].mxu1 }
 0x1e5   :  { %1963 = vst.msk [vmem:[#allocation2 + $0x188] sm:$0xff] %vm372_vm0, %v1899_v43  ;;  %v1391_v53 = vadd.f32 %v1309_v49, %v1005_v55  ;;  %v8544_v59 = vadd.f32 %v1815_v54, %v1388_v56  ;;  %v1817_v33 = vpop.f32.mrb[117].mxu1 }
 0x1e6   :  { %v1515_v26 = vld [vmem:[#allocation2 + $0x198] sm:$0xff] }
 0x1e7   :  { %1455 = vst.msk [vmem:[#allocation2 + $0x1b8] sm:$0xff] %vm372_vm0, %v1391_v53  ;;  %v1901_v31 = vadd.f32 %v1811_v23, %v1515_v26  ;;  %v1313_v63 = vpop.f32.mrb[120].mxu0  ;;  %v1011_v23 = vld [vmem:[#allocation2 + $0x1e8] sm:$0xff] }
 0x1e8   :  { %v1392_v16 = vadd.f32 %v1313_v63, %v8343_v18  ;;  %v1315_v32 = vpop.f32.mrb[121].mxu0  ;;  %v1821_v40 = vpop.f32.mrb[118].mxu1 }
 0x1e9   :  { %1965 = vst.msk [vmem:[#allocation2 + $0x198] sm:$0xff] %vm372_vm0, %v1901_v31  ;;  %v1393_v2 = vadd.f32 %v1315_v32, %v1007_v1  ;;  %v8549_v9 = vadd.f32 %v1821_v40, %v1390_v5  ;;  %v1823_v44 = vpop.f32.mrb[119].mxu1 }
 0x1ea   :  { %v1517_v35 = vld [vmem:[#allocation2 + $0x1a8] sm:$0xff] }
 0x1eb   :  { %1457 = vst.msk [vmem:[#allocation2 + $0x1c8] sm:$0xff] %vm372_vm0, %v1393_v2  ;;  %v1903_v19 = vadd.f32 %v1817_v33, %v1517_v35  ;;  %v1319_v41 = vpop.f32.mrb[122].mxu0  ;;  %v1013_v33 = vld [vmem:[#allocation2 + $0x1f8] sm:$0xff] }
 0x1ec   :  { %v1394_v28 = vadd.f32 %v1319_v41, %v8351_v30  ;;  %v1321_v13 = vpop.f32.mrb[123].mxu0  ;;  %v1827_v25 = vpop.f32.mrb[120].mxu1 }
 0x1ed   :  { %1967 = vst.msk [vmem:[#allocation2 + $0x1a8] sm:$0xff] %vm372_vm0, %v1903_v19  ;;  %v1395_v18 = vadd.f32 %v1321_v13, %v1009_v12  ;;  %v8554_v3 = vadd.f32 %v1827_v25, %v1392_v16  ;;  %v1829_v56 = vpop.f32.mrb[121].mxu1 }
 0x1ee   :  { %v1519_v45 = vld [vmem:[#allocation2 + $0x1b8] sm:$0xff] }
 0x1ef   :  { %1459 = vst.msk [vmem:[#allocation2 + $0x1d8] sm:$0xff] %vm372_vm0, %v1395_v18  ;;  %v1905_v34 = vadd.f32 %v1823_v44, %v1519_v45  ;;  %v1325_v37 = vpop.f32.mrb[124].mxu0  ;;  %v1979_v44 = vld [vmem:[#allocation2 + $0x8] sm:$0xff] }
 0x1f0   :  { %v1396_v39 = vadd.f32 %v1325_v37, %v8361_v46  ;;  %v1327_v17 = vpop.f32.mrb[125].mxu0  ;;  %v1833_v43 = vpop.f32.mrb[122].mxu1 }
 0x1f1   :  { %1969 = vst.msk [vmem:[#allocation2 + $0x1b8] sm:$0xff] %vm372_vm0, %v1905_v34  ;;  %v1397_v30 = vadd.f32 %v1327_v17, %v1011_v23  ;;  %v8559_v47 = vadd.f32 %v1833_v43, %v1394_v28  ;;  %v1835_v5 = vpop.f32.mrb[123].mxu1  ;;  %v1983_v43 = vld [vmem:[#allocation2 + $0x28] sm:$0xff] }
 0x1f2   :  { %v1521_v55 = vld [vmem:[#allocation2 + $0x1c8] sm:$0xff] }
 0x1f3   :  { %1461 = vst.msk [vmem:[#allocation2 + $0x1e8] sm:$0xff] %vm372_vm0, %v1397_v30  ;;  %v1907_v49 = vadd.f32 %v1829_v56, %v1521_v55  ;;  %v1331_v54 = vpop.f32.mrb[126].mxu0  ;;  %v1981_v56 = vld [vmem:[#allocation2 + $0x18] sm:$0xff] }
 0x1f4   :  { %v1398_v53 = vadd.f32 %v1331_v54, %v8369_v0  ;;  %v1333_v26 = vpop.f32.mrb[127].mxu0  ;;  %v1839_v31 = vpop.f32.mrb[124].mxu1 }
 0x1f5   :  { %1971 = vst.msk [vmem:[#allocation2 + $0x1c8] sm:$0xff] %vm372_vm0, %v1907_v49  ;;  %v1399_v46 = vadd.f32 %v1333_v26, %v1013_v33  ;;  %v8564_v63 = vadd.f32 %v1839_v31, %v1396_v39  ;;  %v1841_v16 = vpop.f32.mrb[125].mxu1  ;;  %v1985_v49 = vld [vmem:[#allocation2 + $0x38] sm:$0xff] }
 0x1f6   :  { %v1523_v1 = vld [vmem:[#allocation2 + $0x1d8] sm:$0xff] }
 0x1f7   :  { %1463 = vst.msk [vmem:[#allocation2 + $0x1f8] sm:$0xff] %vm372_vm0, %v1399_v46  ;;  %v1909_v32 = vadd.f32 %v1835_v5, %v1523_v1  ;;  %v2173_v40 = vpop.f32.mrb[128].mxu0 }
 0x1f8   :  { %v2364_v2 = vadd.f32 %v2173_v40, %v8382_v24  ;;  %v2175_v35 = vpop.f32.mrb[129].mxu0  ;;  %v1845_v19 = vpop.f32.mrb[126].mxu1 }
 0x1f9   :  { %1973 = vst.msk [vmem:[#allocation2 + $0x1d8] sm:$0xff] %vm372_vm0, %v1909_v32  ;;  %v2365_v0 = vadd.f32 %v2175_v35, %v1979_v44  ;;  %v8569_v41 = vadd.f32 %v1845_v19, %v1398_v53  ;;  %v1847_v28 = vpop.f32.mrb[127].mxu1  ;;  %v2557_v53 = vld [vmem:[%s10523_s3 + $0x8] sm:$0xff]  ;;  %v1989_v35 = vld [vmem:[#allocation2 + $0x58] sm:$0xff] }
 0x1fa   :  { %v1525_v12 = vld [vmem:[#allocation2 + $0x1e8] sm:$0xff]  ;;  %2648 = vmatprep.mubr.f32.mxu1 %v2557_v53 }
 0x1fb   :  { %2429 = vst.msk [vmem:[#allocation2 + $0x8] sm:$0xff] %vm372_vm0, %v2365_v0  ;;  %v1911_v13 = vadd.f32 %v1841_v16, %v1525_v12  ;;  %v2179_v25 = vpop.f32.mrb[130].mxu0 }
 0x1fc   :  { %v2366_v18 = vadd.f32 %v2179_v25, %v8391_v38  ;;  %v2181_v45 = vpop.f32.mrb[131].mxu0 }
 0x1fd   :  { %1975 = vst.msk [vmem:[#allocation2 + $0x1e8] sm:$0xff] %vm372_vm0, %v1911_v13  ;;  %v2367_v24 = vadd.f32 %v2181_v45, %v1981_v56  ;;  %v1991_v56 = vld [vmem:[#allocation2 + $0x68] sm:$0xff] }
 0x1fe   :  { %v1527_v34 = vld [vmem:[#allocation2 + $0x1f8] sm:$0xff]  ;;  %v8574_v37 = vpack.c.bf16 %v2366_v18, %v2364_v2 }
 0x1ff   :  { %2431 = vst.msk [vmem:[#allocation2 + $0x18] sm:$0xff] %vm372_vm0, %v2367_v24  ;;  %v1913_v39 = vadd.f32 %v1847_v28, %v1527_v34  ;;  %v2185_v23 = vpop.f32.mrb[132].mxu0 }
 0x200   :  { %v2368_v17 = vadd.f32 %v2185_v23, %v8400_v60  ;;  %v2187_v30 = vpop.f32.mrb[133].mxu0 }
 0x201   :  { %1977 = vst.msk [vmem:[#allocation2 + $0x1f8] sm:$0xff] %vm372_vm0, %v1913_v39  ;;  %v2369_v5 = vadd.f32 %v2187_v30, %v1983_v43  ;;  %v1993_v39 = vld [vmem:[#allocation2 + $0x78] sm:$0xff] }
 0x202   :  { %v2493_v26 = vld [vmem:[#allocation2 + $0x8] sm:$0xff] }
 0x203   :  { %2433 = vst.msk [vmem:[#allocation2 + $0x28] sm:$0xff] %vm372_vm0, %v2369_v5  ;;  %v2191_v38 = vpop.f32.mrb[134].mxu0 }
 0x204   :  { %v2370_v55 = vadd.f32 %v2191_v38, %v8409_v15  ;;  %v2193_v54 = vpop.f32.mrb[135].mxu0  ;;  %v1987_v15 = vld [vmem:[#allocation2 + $0x48] sm:$0xff] }
 0x205   :  { %v2371_v33 = vadd.f32 %v2193_v54, %v1985_v49  ;;  %v1995_v49 = vld [vmem:[#allocation2 + $0x88] sm:$0xff] }
 0x206   :  { %v2495_v60 = vld [vmem:[#allocation2 + $0x18] sm:$0xff]  ;;  %v8584_v31 = vpack.c.bf16 %v2370_v55, %v2368_v17 }
 0x207   :  { %2435 = vst.msk [vmem:[#allocation2 + $0x38] sm:$0xff] %vm372_vm0, %v2371_v33  ;;  %v2197_v46 = vpop.f32.mrb[136].mxu0  ;;  %v8587_v16 = vpack.c.bf16 %v2495_v60, %v2493_v26  ;;  %v1997_v26 = vld [vmem:[#allocation2 + $0x98] sm:$0xff] }
 0x208   :  { %v2372_v1 = vadd.f32 %v2197_v46, %v8418_v36  ;;  %v2199_v32 = vpop.f32.mrb[137].mxu0 }
 0x209   :  { %v2373_v40 = vadd.f32 %v2199_v32, %v1987_v15  ;;  %6481 = vmatprep.subr.bf16.mxu1 %v8587_v16 }
 0x20a   :  { %6483 = vmatpush1.bf16.msra.mxu1 %v8574_v37  ;;  %v2497_v28 = vld [vmem:[#allocation2 + $0x28] sm:$0xff] }
 0x20b   :  { %2437 = vst.msk [vmem:[#allocation2 + $0x48] sm:$0xff] %vm372_vm0, %v2373_v40  ;;  %v2203_v2 = vpop.f32.mrb[138].mxu0 }
 0x20c   :  { %v2374_v44 = vadd.f32 %v2203_v2, %v8427_v57  ;;  %v2205_v19 = vpop.f32.mrb[139].mxu0 }
 0x20d   :  { %v2375_v0 = vadd.f32 %v2205_v19, %v1989_v35 }
 0x20e   :  { %v2499_v12 = vld [vmem:[#allocation2 + $0x38] sm:$0xff]  ;;  %v8594_v13 = vpack.c.bf16 %v2374_v44, %v2372_v1  ;;  %v1999_v44 = vld [vmem:[#allocation2 + $0xa8] sm:$0xff] }
 0x20f   :  { %2439 = vst.msk [vmem:[#allocation2 + $0x58] sm:$0xff] %vm372_vm0, %v2375_v0  ;;  %v2209_v36 = vpop.f32.mrb[140].mxu0  ;;  %v8597_v25 = vpack.c.bf16 %v2499_v12, %v2497_v28  ;;  %v2001_v28 = vld [vmem:[#allocation2 + $0xb8] sm:$0xff] }
 0x210   :  { %v2376_v18 = vadd.f32 %v2209_v36, %v8436_v11  ;;  %v2211_v45 = vpop.f32.mrb[141].mxu0 }
 0x211   :  { %v2377_v24 = vadd.f32 %v2211_v45, %v1991_v56  ;;  %6485 = vmatprep.subr.bf16.mxu1 %v8597_v25 }
 0x212   :  { %6487 = vmatpush1.bf16.msra.mxu1 %v8584_v31  ;;  %v2501_v43 = vld [vmem:[#allocation2 + $0x48] sm:$0xff] }
 0x213   :  { %2441 = vst.msk [vmem:[#allocation2 + $0x68] sm:$0xff] %vm372_vm0, %v2377_v24  ;;  %v2215_v57 = vpop.f32.mrb[142].mxu0 }
 0x214   :  { %v2378_v34 = vadd.f32 %v2215_v57, %v8445_v50  ;;  %v2217_v23 = vpop.f32.mrb[143].mxu0 }
 0x215   :  { %v2379_v17 = vadd.f32 %v2217_v23, %v1993_v39 }
 0x216   :  { %v2503_v30 = vld [vmem:[#allocation2 + $0x58] sm:$0xff]  ;;  %v8604_v5 = vpack.c.bf16 %v2378_v34, %v2376_v18  ;;  %v2003_v34 = vld [vmem:[#allocation2 + $0xc8] sm:$0xff] }
 0x217   :  { %2443 = vst.msk [vmem:[#allocation2 + $0x78] sm:$0xff] %vm372_vm0, %v2379_v17  ;;  %v2221_v11 = vpop.f32.mrb[144].mxu0  ;;  %v8607_v38 = vpack.c.bf16 %v2503_v30, %v2501_v43  ;;  %v2005_v43 = vld [vmem:[#allocation2 + $0xd8] sm:$0xff] }
 0x218   :  { %v2380_v55 = vadd.f32 %v2221_v11, %v8454_v52  ;;  %v2223_v54 = vpop.f32.mrb[145].mxu0 }
 0x219   :  { %v2381_v53 = vadd.f32 %v2223_v54, %v1995_v49  ;;  %6489 = vmatprep.subr.bf16.mxu1 %v8607_v38 }
 0x21a   :  { %6491 = vmatpush1.bf16.msra.mxu1 %v8594_v13  ;;  %v2505_v1 = vld [vmem:[#allocation2 + $0x68] sm:$0xff] }
 0x21b   :  { %2445 = vst.msk [vmem:[#allocation2 + $0x88] sm:$0xff] %vm372_vm0, %v2381_v53  ;;  %v2227_v50 = vpop.f32.mrb[146].mxu0 }
 0x21c   :  { %v2382_v33 = vadd.f32 %v2227_v50, %v8459_v7  ;;  %v2229_v60 = vpop.f32.mrb[147].mxu0 }
 0x21d   :  { %v2383_v46 = vadd.f32 %v2229_v60, %v1997_v26 }
 0x21e   :  { %v2507_v15 = vld [vmem:[#allocation2 + $0x78] sm:$0xff]  ;;  %v8614_v32 = vpack.c.bf16 %v2382_v33, %v2380_v55  ;;  %v2007_v33 = vld [vmem:[#allocation2 + $0xe8] sm:$0xff] }
 0x21f   :  { %2447 = vst.msk [vmem:[#allocation2 + $0x98] sm:$0xff] %vm372_vm0, %v2383_v46  ;;  %v2233_v52 = vpop.f32.mrb[148].mxu0  ;;  %v8617_v40 = vpack.c.bf16 %v2507_v15, %v2505_v1  ;;  %v2009_v1 = vld [vmem:[#allocation2 + $0xf8] sm:$0xff] }
 0x220   :  { %v2384_v2 = vadd.f32 %v2233_v52, %v8464_v21  ;;  %v2235_v35 = vpop.f32.mrb[149].mxu0 }
 0x221   :  { %v2385_v19 = vadd.f32 %v2235_v35, %v1999_v44  ;;  %6493 = vmatprep.subr.bf16.mxu1 %v8617_v40 }
 0x222   :  { %6495 = vmatpush1.bf16.msra.mxu1 %v8604_v5  ;;  %v2509_v18 = vld [vmem:[#allocation2 + $0x88] sm:$0xff] }
 0x223   :  { %2449 = vst.msk [vmem:[#allocation2 + $0xa8] sm:$0xff] %vm372_vm0, %v2385_v19  ;;  %v2239_v7 = vpop.f32.mrb[150].mxu0 }
 0x224   :  { %v2386_v0 = vadd.f32 %v2239_v7, %v8469_v22  ;;  %v2241_v12 = vpop.f32.mrb[151].mxu0 }
 0x225   :  { %v2387_v36 = vadd.f32 %v2241_v12, %v2001_v28 }
 0x226   :  { %v2511_v56 = vld [vmem:[#allocation2 + $0x98] sm:$0xff]  ;;  %v8624_v45 = vpack.c.bf16 %v2386_v0, %v2384_v2  ;;  %v2011_v0 = vld [vmem:[#allocation2 + $0x108] sm:$0xff] }
 0x227   :  { %2451 = vst.msk [vmem:[#allocation2 + $0xb8] sm:$0xff] %vm372_vm0, %v2387_v36  ;;  %v2245_v21 = vpop.f32.mrb[152].mxu0  ;;  %v8627_v24 = vpack.c.bf16 %v2511_v56, %v2509_v18  ;;  %v2013_v18 = vld [vmem:[#allocation2 + $0x118] sm:$0xff] }
 0x228   :  { %v2388_v57 = vadd.f32 %v2245_v21, %v8474_v62  ;;  %v2247_v39 = vpop.f32.mrb[153].mxu0 }
 0x229   :  { %v2389_v23 = vadd.f32 %v2247_v39, %v2003_v34  ;;  %6497 = vmatprep.subr.bf16.mxu1 %v8627_v24 }
 0x22a   :  { %6499 = vmatpush1.bf16.msra.mxu1 %v8614_v32  ;;  %v2513_v55 = vld [vmem:[#allocation2 + $0xa8] sm:$0xff] }
 0x22b   :  { %2453 = vst.msk [vmem:[#allocation2 + $0xc8] sm:$0xff] %vm372_vm0, %v2389_v23  ;;  %v2251_v22 = vpop.f32.mrb[154].mxu0 }
 0x22c   :  { %v2390_v17 = vadd.f32 %v2251_v22, %v8479_v14  ;;  %v2253_v30 = vpop.f32.mrb[155].mxu0 }
 0x22d   :  { %v2391_v11 = vadd.f32 %v2253_v30, %v2005_v43 }
 0x22e   :  { %v2515_v49 = vld [vmem:[#allocation2 + $0xb8] sm:$0xff]  ;;  %v8634_v54 = vpack.c.bf16 %v2390_v17, %v2388_v57  ;;  %v2015_v17 = vld [vmem:[#allocation2 + $0x128] sm:$0xff] }
 0x22f   :  { %2455 = vst.msk [vmem:[#allocation2 + $0xd8] sm:$0xff] %vm372_vm0, %v2391_v11  ;;  %v2257_v62 = vpop.f32.mrb[156].mxu0  ;;  %v8637_v53 = vpack.c.bf16 %v2515_v49, %v2513_v55  ;;  %v2017_v55 = vld [vmem:[#allocation2 + $0x138] sm:$0xff] }
 0x230   :  { %v2392_v50 = vadd.f32 %v2257_v62, %v8484_v29  ;;  %v2259_v26 = vpop.f32.mrb[157].mxu0 }
 0x231   :  { %v2393_v60 = vadd.f32 %v2259_v26, %v2007_v33  ;;  %6501 = vmatprep.subr.bf16.mxu1 %v8637_v53 }
 0x232   :  { %6503 = vmatpush1.bf16.msra.mxu1 %v8624_v45  ;;  %v2517_v2 = vld [vmem:[#allocation2 + $0xc8] sm:$0xff] }
 0x233   :  { %2457 = vst.msk [vmem:[#allocation2 + $0xe8] sm:$0xff] %vm372_vm0, %v2393_v60  ;;  %v2263_v14 = vpop.f32.mrb[158].mxu0 }
 0x234   :  { %v2394_v46 = vadd.f32 %v2263_v14, %v8489_v58  ;;  %v2265_v15 = vpop.f32.mrb[159].mxu0 }
 0x235   :  { %v2395_v52 = vadd.f32 %v2265_v15, %v2009_v1 }
 0x236   :  { %v2519_v44 = vld [vmem:[#allocation2 + $0xd8] sm:$0xff]  ;;  %v8644_v35 = vpack.c.bf16 %v2394_v46, %v2392_v50  ;;  %v2019_v46 = vld [vmem:[#allocation2 + $0x148] sm:$0xff] }
 0x237   :  { %2459 = vst.msk [vmem:[#allocation2 + $0xf8] sm:$0xff] %vm372_vm0, %v2395_v52  ;;  %v2269_v29 = vpop.f32.mrb[160].mxu0  ;;  %v8647_v19 = vpack.c.bf16 %v2519_v44, %v2517_v2  ;;  %v2021_v2 = vld [vmem:[#allocation2 + $0x158] sm:$0xff] }
 0x238   :  { %v2396_v7 = vadd.f32 %v2269_v29, %v8494_v6  ;;  %v2271_v28 = vpop.f32.mrb[161].mxu0 }
 0x239   :  { %v2397_v12 = vadd.f32 %v2271_v28, %v2011_v0  ;;  %6505 = vmatprep.subr.bf16.mxu1 %v8647_v19 }
 0x23a   :  { %6507 = vmatpush1.bf16.msra.mxu1 %v8634_v54  ;;  %v2521_v57 = vld [vmem:[#allocation2 + $0xe8] sm:$0xff] }
 0x23b   :  { %2461 = vst.msk [vmem:[#allocation2 + $0x108] sm:$0xff] %vm372_vm0, %v2397_v12  ;;  %v2275_v58 = vpop.f32.mrb[162].mxu0 }
 0x23c   :  { %v2398_v36 = vadd.f32 %v2275_v58, %v8499_v8  ;;  %v2277_v56 = vpop.f32.mrb[163].mxu0 }
 0x23d   :  { %v2399_v21 = vadd.f32 %v2277_v56, %v2013_v18 }
 0x23e   :  { %v2523_v34 = vld [vmem:[#allocation2 + $0xf8] sm:$0xff]  ;;  %v8654_v39 = vpack.c.bf16 %v2398_v36, %v2396_v7  ;;  %v2023_v36 = vld [vmem:[#allocation2 + $0x168] sm:$0xff] }
 0x23f   :  { %2463 = vst.msk [vmem:[#allocation2 + $0x118] sm:$0xff] %vm372_vm0, %v2399_v21  ;;  %v2281_v6 = vpop.f32.mrb[164].mxu0  ;;  %v8657_v23 = vpack.c.bf16 %v2523_v34, %v2521_v57  ;;  %v2025_v57 = vld [vmem:[#allocation2 + $0x178] sm:$0xff] }
 0x240   :  { %v2400_v22 = vadd.f32 %v2281_v6, %v8504_v42  ;;  %v2283_v43 = vpop.f32.mrb[165].mxu0 }
 0x241   :  { %v2401_v30 = vadd.f32 %v2283_v43, %v2015_v17  ;;  %6509 = vmatprep.subr.bf16.mxu1 %v8657_v23 }
 0x242   :  { %6511 = vmatpush1.bf16.msra.mxu1 %v8644_v35  ;;  %v2525_v50 = vld [vmem:[#allocation2 + $0x108] sm:$0xff] }
 0x243   :  { %2465 = vst.msk [vmem:[#allocation2 + $0x128] sm:$0xff] %vm372_vm0, %v2401_v30  ;;  %v2287_v8 = vpop.f32.mrb[166].mxu0 }
 0x244   :  { %v2402_v11 = vadd.f32 %v2287_v8, %v8509_v61  ;;  %v2289_v49 = vpop.f32.mrb[167].mxu0 }
 0x245   :  { %v2403_v62 = vadd.f32 %v2289_v49, %v2017_v55 }
 0x246   :  { %v2527_v33 = vld [vmem:[#allocation2 + $0x118] sm:$0xff]  ;;  %v8664_v26 = vpack.c.bf16 %v2402_v11, %v2400_v22  ;;  %v2027_v11 = vld [vmem:[#allocation2 + $0x188] sm:$0xff] }
 0x247   :  { %2467 = vst.msk [vmem:[#allocation2 + $0x138] sm:$0xff] %vm372_vm0, %v2403_v62  ;;  %v2293_v42 = vpop.f32.mrb[168].mxu0  ;;  %v8667_v60 = vpack.c.bf16 %v2527_v33, %v2525_v50  ;;  %v2029_v50 = vld [vmem:[#allocation2 + $0x198] sm:$0xff] }
 0x248   :  { %v2404_v14 = vadd.f32 %v2293_v42, %v8514_v10  ;;  %v2295_v1 = vpop.f32.mrb[169].mxu0 }
 0x249   :  { %v2405_v15 = vadd.f32 %v2295_v1, %v2019_v46  ;;  %6513 = vmatprep.subr.bf16.mxu1 %v8667_v60 }
 0x24a   :  { %6515 = vmatpush1.bf16.msra.mxu1 %v8654_v39  ;;  %v2529_v7 = vld [vmem:[#allocation2 + $0x128] sm:$0xff] }
 0x24b   :  { %2469 = vst.msk [vmem:[#allocation2 + $0x148] sm:$0xff] %vm372_vm0, %v2405_v15  ;;  %v2299_v61 = vpop.f32.mrb[170].mxu0 }
 0x24c   :  { %v2406_v52 = vadd.f32 %v2299_v61, %v8519_v27  ;;  %v2301_v44 = vpop.f32.mrb[171].mxu0 }
 0x24d   :  { %v2407_v29 = vadd.f32 %v2301_v44, %v2021_v2 }
 0x24e   :  { %v2531_v0 = vld [vmem:[#allocation2 + $0x138] sm:$0xff]  ;;  %v8674_v28 = vpack.c.bf16 %v2406_v52, %v2404_v14  ;;  %v2031_v52 = vld [vmem:[#allocation2 + $0x1a8] sm:$0xff] }
 0x24f   :  { %2471 = vst.msk [vmem:[#allocation2 + $0x158] sm:$0xff] %vm372_vm0, %v2407_v29  ;;  %v2305_v10 = vpop.f32.mrb[172].mxu0  ;;  %v8677_v12 = vpack.c.bf16 %v2531_v0, %v2529_v7  ;;  %v2033_v7 = vld [vmem:[#allocation2 + $0x1b8] sm:$0xff] }
 0x250   :  { %v2408_v58 = vadd.f32 %v2305_v10, %v8524_v48  ;;  %v2307_v18 = vpop.f32.mrb[173].mxu0 }
 0x251   :  { %v2409_v56 = vadd.f32 %v2307_v18, %v2023_v36  ;;  %6517 = vmatprep.subr.bf16.mxu1 %v8677_v12 }
 0x252   :  { %6519 = vmatpush1.bf16.msra.mxu1 %v8664_v26  ;;  %v2533_v22 = vld [vmem:[#allocation2 + $0x148] sm:$0xff] }
 0x253   :  { %2473 = vst.msk [vmem:[#allocation2 + $0x168] sm:$0xff] %vm372_vm0, %v2409_v56  ;;  %v2311_v27 = vpop.f32.mrb[174].mxu0 }
 0x254   :  { %v2410_v21 = vadd.f32 %v2311_v27, %v8529_v4  ;;  %v2313_v34 = vpop.f32.mrb[175].mxu0 }
 0x255   :  { %v2411_v6 = vadd.f32 %v2313_v34, %v2025_v57 }
 0x256   :  { %v2535_v17 = vld [vmem:[#allocation2 + $0x158] sm:$0xff]  ;;  %v8684_v43 = vpack.c.bf16 %v2410_v21, %v2408_v58  ;;  %v2035_v21 = vld [vmem:[#allocation2 + $0x1c8] sm:$0xff] }
 0x257   :  { %2475 = vst.msk [vmem:[#allocation2 + $0x178] sm:$0xff] %vm372_vm0, %v2411_v6  ;;  %v2317_v48 = vpop.f32.mrb[176].mxu0  ;;  %v8687_v30 = vpack.c.bf16 %v2535_v17, %v2533_v22  ;;  %v2037_v22 = vld [vmem:[#allocation2 + $0x1d8] sm:$0xff] }
 0x258   :  { %v2412_v8 = vadd.f32 %v2317_v48, %v8534_v20  ;;  %v2319_v55 = vpop.f32.mrb[177].mxu0 }
 0x259   :  { %v2413_v49 = vadd.f32 %v2319_v55, %v2027_v11  ;;  %6521 = vmatprep.subr.bf16.mxu1 %v8687_v30 }
 0x25a   :  { %6523 = vmatpush1.bf16.msra.mxu1 %v8674_v28  ;;  %v2537_v14 = vld [vmem:[#allocation2 + $0x168] sm:$0xff] }
 0x25b   :  { %2477 = vst.msk [vmem:[#allocation2 + $0x188] sm:$0xff] %vm372_vm0, %v2413_v49  ;;  %v2323_v4 = vpop.f32.mrb[178].mxu0 }
 0x25c   :  { %v2414_v62 = vadd.f32 %v2323_v4, %v8539_v51  ;;  %v2325_v33 = vpop.f32.mrb[179].mxu0 }
 0x25d   :  { %v2415_v42 = vadd.f32 %v2325_v33, %v2029_v50 }
 0x25e   :  { %v2539_v46 = vld [vmem:[#allocation2 + $0x178] sm:$0xff]  ;;  %v8694_v1 = vpack.c.bf16 %v2414_v62, %v2412_v8  ;;  %v2039_v62 = vld [vmem:[#allocation2 + $0x1e8] sm:$0xff] }
 0x25f   :  { %2479 = vst.msk [vmem:[#allocation2 + $0x198] sm:$0xff] %vm372_vm0, %v2415_v42  ;;  %v2329_v20 = vpop.f32.mrb[180].mxu0  ;;  %v8697_v15 = vpack.c.bf16 %v2539_v46, %v2537_v14  ;;  %v2041_v14 = vld [vmem:[#allocation2 + $0x1f8] sm:$0xff] }
 0x260   :  { %v2416_v61 = vadd.f32 %v2329_v20, %v8544_v59  ;;  %v2331_v2 = vpop.f32.mrb[181].mxu0 }
 0x261   :  { %v2417_v44 = vadd.f32 %v2331_v2, %v2031_v52  ;;  %6525 = vmatprep.subr.bf16.mxu1 %v8697_v15 }
 0x262   :  { %6527 = vmatpush1.bf16.msra.mxu1 %v8684_v43  ;;  %v2541_v58 = vld [vmem:[#allocation2 + $0x188] sm:$0xff] }
 0x263   :  { %2481 = vst.msk [vmem:[#allocation2 + $0x1a8] sm:$0xff] %vm372_vm0, %v2417_v44  ;;  %v2335_v51 = vpop.f32.mrb[182].mxu0  ;;  %v7077_v44 = vmov 0.0|0.0  }
 0x264   :  { %v2418_v29 = vadd.f32 %v2335_v51, %v8549_v9  ;;  %v2337_v0 = vpop.f32.mrb[183].mxu0  ;;  %6638 = vmatprep.subr.bf16.mxu0 %v7077_v44  ;;  %v5897_v51 = vld [vmem:[%s10524_s4 + $0xb0] sm:$0xff] }
 0x265   :  { %v2419_v10 = vadd.f32 %v2337_v0, %v2033_v7  ;;  %v5898_v7 = vld [vmem:[%s10524_s4 + $0xb8] sm:$0xff]  ;;  %v5899_v0 = vld [vmem:[%s10524_s4 + $0xc0] sm:$0xff] }
 0x266   :  { %v2543_v36 = vld [vmem:[#allocation2 + $0x198] sm:$0xff]  ;;  %v8704_v18 = vpack.c.bf16 %v2418_v29, %v2416_v61 }
 0x267   :  { %2483 = vst.msk [vmem:[#allocation2 + $0x1b8] sm:$0xff] %vm372_vm0, %v2419_v10  ;;  %v2341_v59 = vpop.f32.mrb[184].mxu0  ;;  %v8707_v56 = vpack.c.bf16 %v2543_v36, %v2541_v58  ;;  %v6642_v58 = vpack.c.bf16 %v5899_v0, %v5898_v7  ;;  %v5909_v7 = vld [vmem:[%s10524_s4 + $0x110] sm:$0xff] }
 0x268   :  { %v2420_v27 = vadd.f32 %v2341_v59, %v8554_v3  ;;  %v2343_v57 = vpop.f32.mrb[185].mxu0  ;;  %v5900_v59 = vld [vmem:[%s10524_s4 + $0xc8] sm:$0xff] }
 0x269   :  { %v2421_v34 = vadd.f32 %v2343_v57, %v2035_v21  ;;  %6529 = vmatprep.subr.bf16.mxu1 %v8707_v56 }
 0x26a   :  { %6531 = vmatpush1.bf16.msra.mxu1 %v8694_v1  ;;  %v2545_v8 = vld [vmem:[#allocation2 + $0x1a8] sm:$0xff] }
 0x26b   :  { %2485 = vst.msk [vmem:[#allocation2 + $0x1c8] sm:$0xff] %vm372_vm0, %v2421_v34  ;;  %v2347_v9 = vpop.f32.mrb[186].mxu0  ;;  %v2556_v34 = vld [vmem:[%s10523_s3] sm:$0xff] }
 0x26c   :  { %v2422_v6 = vadd.f32 %v2347_v9, %v8559_v47  ;;  %v2349_v17 = vpop.f32.mrb[187].mxu0  ;;  %v5902_v9 = vld [vmem:[%s10524_s4 + $0xd8] sm:$0xff] }
 0x26d   :  { %v2423_v48 = vadd.f32 %v2349_v17, %v2037_v22  ;;  %v2559_v22 = vld [vmem:[%s10523_s3 + $0x18] sm:$0xff] }
 0x26e   :  { %v2547_v11 = vld [vmem:[#allocation2 + $0x1b8] sm:$0xff]  ;;  %v8714_v55 = vpack.c.bf16 %v2422_v6, %v2420_v27  ;;  %v5901_v27 = vld [vmem:[%s10524_s4 + $0xd0] sm:$0xff]  ;;  %v5903_v6 = vld [vmem:[%s10524_s4 + $0xe0] sm:$0xff] }
 0x26f   :  { %2487 = vst.msk [vmem:[#allocation2 + $0x1d8] sm:$0xff] %vm372_vm0, %v2423_v48  ;;  %v2353_v3 = vpop.f32.mrb[188].mxu0  ;;  %v8717_v49 = vpack.c.bf16 %v2547_v11, %v2545_v8  ;;  %v6645_v57 = vpack.c.bf16 %v5901_v27, %v5900_v59  ;;  %v6648_v17 = vpack.c.bf16 %v5903_v6, %v5902_v9  ;;  %v2558_v48 = vld [vmem:[%s10523_s3 + $0x10] sm:$0xff]  ;;  %v5904_v8 = vld [vmem:[%s10524_s4 + $0xe8] sm:$0xff]  ;;  %v5873_v27 = vld [vmem:[%s10523_s3 + $0x178] sm:$0xff] }
 0x270   :  { %v2424_v4 = vadd.f32 %v2353_v3, %v8564_v63  ;;  %v2355_v50 = vpop.f32.mrb[189].mxu0  ;;  %v2561_v11 = vld [vmem:[%s10523_s3 + $0x28] sm:$0xff]  ;;  %v2560_v3 = vld [vmem:[%s10523_s3 + $0x20] sm:$0xff]  ;;  %v2942_v9 = vld [vmem:[%s10524_s4 + $0x18] sm:$0xff] }
 0x271   :  { %v2425_v33 = vadd.f32 %v2355_v50, %v2039_v62  ;;  %6533 = vmatprep.subr.bf16.mxu1 %v8717_v49  ;;  %v5861_v62 = vld [vmem:[%s10523_s3 + $0x118] sm:$0xff]  ;;  %v5860_v50 = vld [vmem:[%s10523_s3 + $0x110] sm:$0xff] }
 0x272   :  { %6535 = vmatpush1.bf16.msra.mxu1 %v8704_v18  ;;  %v2549_v61 = vld [vmem:[#allocation2 + $0x1c8] sm:$0xff] }
 0x273   :  { %2489 = vst.msk [vmem:[#allocation2 + $0x1e8] sm:$0xff] %vm372_vm0, %v2425_v33  ;;  %v2359_v47 = vpop.f32.mrb[190].mxu0  ;;  %v5863_v33 = vld [vmem:[%s10523_s3 + $0x128] sm:$0xff] }
 0x274   :  { %v2426_v42 = vadd.f32 %v2359_v47, %v8569_v41  ;;  %v2361_v46 = vpop.f32.mrb[191].mxu0  ;;  %v5896_v41 = vld [vmem:[%s10524_s4 + $0xa8] sm:$0xff]  ;;  %v5862_v47 = vld [vmem:[%s10523_s3 + $0x120] sm:$0xff] }
 0x275   :  { %v2427_v20 = vadd.f32 %v2361_v46, %v2041_v14  ;;  %v6639_v29 = vpack.c.bf16 %v5897_v51, %v5896_v41  ;;  %v5864_v14 = vld [vmem:[%s10523_s3 + $0x130] sm:$0xff]  ;;  %v5867_v46 = vld [vmem:[%s10523_s3 + $0x148] sm:$0xff] }
 0x276   :  { %v2551_v52 = vld [vmem:[#allocation2 + $0x1d8] sm:$0xff]  ;;  %v8724_v2 = vpack.c.bf16 %v2426_v42, %v2424_v4  ;;  %v2566_v4 = vld [vmem:[%s10523_s3 + $0x50] sm:$0xff]  ;;  %v5871_v51 = vld [vmem:[%s10523_s3 + $0x168] sm:$0xff] }
 0x277   :  { %2491 = vst.msk [vmem:[#allocation2 + $0x1f8] sm:$0xff] %vm372_vm0, %v2427_v20  ;;  %v8727_v63 = vpack.c.bf16 %v2551_v52, %v2549_v61  ;;  %6640 = vmatpush1.bf16.msra.mxu0 %v6639_v29  ;;  %v5865_v42 = vld [vmem:[%s10523_s3 + $0x138] sm:$0xff]  ;;  %v5907_v61 = vld [vmem:[%s10524_s4 + $0x100] sm:$0xff]  ;;  %v5868_v41 = vld [vmem:[%s10523_s3 + $0x150] sm:$0xff] }
 0x278   :  { %6641 = vmatprep.subr.bf16.mxu0 %v7077_v44  ;;  %v5906_v20 = vld [vmem:[%s10524_s4 + $0xf8] sm:$0xff]  ;;  %v5866_v52 = vld [vmem:[%s10523_s3 + $0x140] sm:$0xff]  ;;  %v5908_v29 = vld [vmem:[%s10524_s4 + $0x108] sm:$0xff] }
 0x279   :  { %6537 = vmatprep.subr.bf16.mxu1 %v8727_v63  ;;  %v6657_v0 = vpack.c.bf16 %v5909_v7, %v5908_v29 }
 0x27a   :  { %6539 = vmatpush1.bf16.msra.mxu1 %v8714_v55  ;;  %v2553_v10 = vld [vmem:[#allocation2 + $0x1e8] sm:$0xff] }
 0x27b   :  { %6643 = vmatpush1.bf16.msra.mxu0 %v6642_v58  ;;  %v2940_v58 = vld [vmem:[%s10524_s4 + $0x8] sm:$0xff] }
 0x27c   :  { %6644 = vmatprep.subr.bf16.mxu0 %v7077_v44 }
 0x27e   :  { %v2555_v36 = vld [vmem:[#allocation2 + $0x1f8] sm:$0xff] }
 0x27f   :  { %v8751_v21 = vpack.c.bf16 %v2555_v36, %v2553_v10  ;;  %6646 = vmatpush1.bf16.msra.mxu0 %v6645_v57  ;;  %v2939_v10 = vld [vmem:[%s10524_s4] sm:$0xff]  ;;  %v5875_v57 = vld [vmem:[%s10523_s3 + $0x188] sm:$0xff] }
 0x280   :  { %6647 = vmatprep.subr.bf16.mxu0 %v7077_v44  ;;  %v5870_v36 = vld [vmem:[%s10523_s3 + $0x160] sm:$0xff]  ;;  %v6609_v59 = vpack.c.bf16 %v2940_v58, %v2939_v10 }
 0x281   :  { %6541 = vmatprep.subr.bf16.mxu1 %v8751_v21 }
 0x282   :  { %6543 = vmatpush1.bf16.msra.mxu1 %v8724_v2 }
 0x283   :  { %6545 = vmatprep.subr.bf16.mxu1 %v8587_v16  ;;  %v5905_v16 = vld [vmem:[%s10524_s4 + $0xf0] sm:$0xff]  ;;  %6649 = vmatpush1.bf16.msra.mxu0 %v6648_v17  ;;  %v5877_v17 = vld [vmem:[%s10523_s3 + $0x198] sm:$0xff] }
 0x284   :  { %6650 = vmatprep.subr.bf16.mxu0 %v7077_v44 }
 0x285   :  { %2649 = vmatmul.mubr.f32.vlgmr.msra.gmra.mrb[128].mxu1 %v2556_v34  ;;  %v2941_v34 = vld [vmem:[%s10524_s4 + $0x10] sm:$0xff] }
 0x286   :  { %6547 = vmatpush1.bf16.msra.mxu1 %v8574_v37  ;;  %2654 = vmatprep.mubr.f32.mxu1 %v2559_v22  ;;  %v6651_v37 = vpack.c.bf16 %v5905_v16, %v5904_v8  ;;  %v6612_v6 = vpack.c.bf16 %v2942_v9, %v2941_v34  ;;  %v5874_v22 = vld [vmem:[%s10523_s3 + $0x180] sm:$0xff] }
 0x287   :  { %6549 = vmatprep.subr.bf16.mxu1 %v8597_v25  ;;  %v2563_v25 = vld [vmem:[%s10523_s3 + $0x38] sm:$0xff]  ;;  %v5911_v8 = vld [vmem:[%s10524_s4 + $0x120] sm:$0xff] }
 0x288   :  { %6652 = vmatpush1.bf16.msra.mxu0 %v6651_v37  ;;  %v2944_v37 = vld [vmem:[%s10524_s4 + $0x28] sm:$0xff] }
 0x289   :  { %2655 = vmatmul.mubr.f32.gmra.mrb[130].mxu1 %v2558_v48  ;;  %6653 = vmatprep.subr.bf16.mxu0 %v7077_v44  ;;  %v5910_v48 = vld [vmem:[%s10524_s4 + $0x118] sm:$0xff] }
 0x28a   :  { %6551 = vmatpush1.bf16.msra.mxu1 %v8584_v31  ;;  %2660 = vmatprep.mubr.f32.mxu1 %v2561_v11  ;;  %v2562_v31 = vld [vmem:[%s10523_s3 + $0x30] sm:$0xff]  ;;  %v6660_v16 = vpack.c.bf16 %v5911_v8, %v5910_v48  ;;  %v2943_v11 = vld [vmem:[%s10524_s4 + $0x20] sm:$0xff] }
 0x28b   :  { %6553 = vmatprep.subr.bf16.mxu1 %v8607_v38  ;;  %v2565_v38 = vld [vmem:[%s10523_s3 + $0x48] sm:$0xff] }
 0x28d   :  { %2661 = vmatmul.mubr.f32.gmra.mrb[132].mxu1 %v2560_v3  ;;  %v5876_v3 = vld [vmem:[%s10523_s3 + $0x190] sm:$0xff] }
 0x28e   :  { %6555 = vmatpush1.bf16.msra.mxu1 %v8594_v13  ;;  %2666 = vmatprep.mubr.f32.mxu1 %v2563_v25  ;;  %v2564_v13 = vld [vmem:[%s10523_s3 + $0x40] sm:$0xff]  ;;  %v6615_v25 = vpack.c.bf16 %v2944_v37, %v2943_v11 }
 0x28f   :  { %6557 = vmatprep.subr.bf16.mxu1 %v8617_v40  ;;  %v2567_v40 = vld [vmem:[%s10523_s3 + $0x58] sm:$0xff] }
 0x291   :  { %2667 = vmatmul.mubr.f32.gmra.mrb[134].mxu1 %v2562_v31  ;;  %v5879_v31 = vld [vmem:[%s10523_s3 + $0x1a8] sm:$0xff] }
 0x292   :  { %6559 = vmatpush1.bf16.msra.mxu1 %v8604_v5  ;;  %2672 = vmatprep.mubr.f32.mxu1 %v2565_v38  ;;  %v2569_v5 = vld [vmem:[%s10523_s3 + $0x68] sm:$0xff]  ;;  %v2945_v38 = vld [vmem:[%s10524_s4 + $0x30] sm:$0xff] }
 0x293   :  { %6561 = vmatprep.subr.bf16.mxu1 %v8627_v24  ;;  %v2568_v24 = vld [vmem:[%s10523_s3 + $0x60] sm:$0xff] }
 0x295   :  { %2673 = vmatmul.mubr.f32.gmra.mrb[136].mxu1 %v2564_v13  ;;  %v2946_v13 = vld [vmem:[%s10524_s4 + $0x38] sm:$0xff] }
 0x296   :  { %6563 = vmatpush1.bf16.msra.mxu1 %v8614_v32  ;;  %2678 = vmatprep.mubr.f32.mxu1 %v2567_v40  ;;  %v2571_v32 = vld [vmem:[%s10523_s3 + $0x78] sm:$0xff]  ;;  %v5878_v40 = vld [vmem:[%s10523_s3 + $0x1a0] sm:$0xff] }
 0x297   :  { %6565 = vmatprep.subr.bf16.mxu1 %v8637_v53  ;;  %v2570_v53 = vld [vmem:[%s10523_s3 + $0x70] sm:$0xff] }
 0x299   :  { %2679 = vmatmul.mubr.f32.gmra.mrb[138].mxu1 %v2566_v4  ;;  %v6618_v4 = vpack.c.bf16 %v2946_v13, %v2945_v38 }
 0x29a   :  { %6567 = vmatpush1.bf16.msra.mxu1 %v8624_v45  ;;  %2684 = vmatprep.mubr.f32.mxu1 %v2569_v5  ;;  %v2573_v45 = vld [vmem:[%s10523_s3 + $0x88] sm:$0xff]  ;;  %v5881_v5 = vld [vmem:[%s10523_s3 + $0x1b8] sm:$0xff] }
 0x29b   :  { %6569 = vmatprep.subr.bf16.mxu1 %v8647_v19  ;;  %v2572_v19 = vld [vmem:[%s10523_s3 + $0x80] sm:$0xff] }
 0x29d   :  { %2685 = vmatmul.mubr.f32.gmra.mrb[140].mxu1 %v2568_v24  ;;  %v2947_v24 = vld [vmem:[%s10524_s4 + $0x40] sm:$0xff] }
 0x29e   :  { %6571 = vmatpush1.bf16.msra.mxu1 %v8634_v54  ;;  %2690 = vmatprep.mubr.f32.mxu1 %v2571_v32  ;;  %v2575_v54 = vld [vmem:[%s10523_s3 + $0x98] sm:$0xff]  ;;  %v2948_v32 = vld [vmem:[%s10524_s4 + $0x48] sm:$0xff] }
 0x29f   :  { %6573 = vmatprep.subr.bf16.mxu1 %v8657_v23  ;;  %v2574_v23 = vld [vmem:[%s10523_s3 + $0x90] sm:$0xff] }
 0x2a1   :  { %2691 = vmatmul.mubr.f32.gmra.mrb[142].mxu1 %v2570_v53  ;;  %v5880_v53 = vld [vmem:[%s10523_s3 + $0x1b0] sm:$0xff] }
 0x2a2   :  { %6575 = vmatpush1.bf16.msra.mxu1 %v8644_v35  ;;  %2696 = vmatprep.mubr.f32.mxu1 %v2573_v45  ;;  %v2577_v35 = vld [vmem:[%s10523_s3 + $0xa8] sm:$0xff]  ;;  %v6621_v45 = vpack.c.bf16 %v2948_v32, %v2947_v24  ;;  %v3374_v24 = vld [vmem:[%s10525_s5 + $0x10] sm:$0xff] }
 0x2a3   :  { %6577 = vmatprep.subr.bf16.mxu1 %v8667_v60  ;;  %v2576_v60 = vld [vmem:[%s10523_s3 + $0xa0] sm:$0xff]  ;;  %v3377_v32 = vld [vmem:[%s10525_s5 + $0x28] sm:$0xff] }
 0x2a5   :  { %2697 = vmatmul.mubr.f32.gmra.mrb[144].mxu1 %v2572_v19  ;;  %v5912_v19 = vld [vmem:[%s10524_s4 + $0x128] sm:$0xff] }
 0x2a6   :  { %6579 = vmatpush1.bf16.msra.mxu1 %v8654_v39  ;;  %2702 = vmatprep.mubr.f32.mxu1 %v2575_v54  ;;  %v2579_v39 = vld [vmem:[%s10523_s3 + $0xb8] sm:$0xff]  ;;  %v5913_v54 = vld [vmem:[%s10524_s4 + $0x130] sm:$0xff] }
 0x2a7   :  { %6581 = vmatprep.subr.bf16.mxu1 %v8677_v12  ;;  %v2578_v12 = vld [vmem:[%s10523_s3 + $0xb0] sm:$0xff] }
 0x2a9   :  { %2703 = vmatmul.mubr.f32.gmra.mrb[146].mxu1 %v2574_v23  ;;  %v6663_v23 = vpack.c.bf16 %v5913_v54, %v5912_v19  ;;  %v3379_v54 = vld [vmem:[%s10525_s5 + $0x38] sm:$0xff] }
 0x2aa   :  { %6583 = vmatpush1.bf16.msra.mxu1 %v8664_v26  ;;  %2708 = vmatprep.mubr.f32.mxu1 %v2577_v35  ;;  %v2581_v26 = vld [vmem:[%s10523_s3 + $0xc8] sm:$0xff]  ;;  %v2949_v35 = vld [vmem:[%s10524_s4 + $0x50] sm:$0xff] }
 0x2ab   :  { %6585 = vmatprep.subr.bf16.mxu1 %v8687_v30  ;;  %v2580_v30 = vld [vmem:[%s10523_s3 + $0xc0] sm:$0xff] }
 0x2ad   :  { %2709 = vmatmul.mubr.f32.gmra.mrb[148].mxu1 %v2576_v60  ;;  %v2950_v60 = vld [vmem:[%s10524_s4 + $0x58] sm:$0xff] }
 0x2ae   :  { %6587 = vmatpush1.bf16.msra.mxu1 %v8674_v28  ;;  %2714 = vmatprep.mubr.f32.mxu1 %v2579_v39  ;;  %v2583_v28 = vld [vmem:[%s10523_s3 + $0xd8] sm:$0xff]  ;;  %v6624_v39 = vpack.c.bf16 %v2950_v60, %v2949_v35 }
 0x2af   :  { %6589 = vmatprep.subr.bf16.mxu1 %v8697_v15  ;;  %v2582_v15 = vld [vmem:[%s10523_s3 + $0xd0] sm:$0xff]  ;;  %v5939_v35 = vld [vmem:[%s10525_s5 + $0x138] sm:$0xff] }
 0x2b1   :  { %2715 = vmatmul.mubr.f32.gmra.mrb[150].mxu1 %v2578_v12  ;;  %v2951_v12 = vld [vmem:[%s10524_s4 + $0x60] sm:$0xff] }
 0x2b2   :  { %6591 = vmatpush1.bf16.msra.mxu1 %v8684_v43  ;;  %2720 = vmatprep.mubr.f32.mxu1 %v2581_v26  ;;  %v5855_v43 = vld [vmem:[%s10523_s3 + $0xe8] sm:$0xff] }
 0x2b3   :  { %6593 = vmatprep.subr.bf16.mxu1 %v8707_v56  ;;  %v5857_v56 = vld [vmem:[%s10523_s3 + $0xf8] sm:$0xff]  ;;  %v2952_v26 = vld [vmem:[%s10524_s4 + $0x68] sm:$0xff] }
 0x2b5   :  { %2721 = vmatmul.mubr.f32.gmra.mrb[152].mxu1 %v2580_v30  ;;  %v5914_v30 = vld [vmem:[%s10524_s4 + $0x138] sm:$0xff] }
 0x2b6   :  { %6595 = vmatpush1.bf16.msra.mxu1 %v8694_v1  ;;  %2726 = vmatprep.mubr.f32.mxu1 %v2583_v28  ;;  %v5854_v1 = vld [vmem:[%s10523_s3 + $0xe0] sm:$0xff]  ;;  %v6627_v28 = vpack.c.bf16 %v2952_v26, %v2951_v12 }
 0x2b7   :  { %6597 = vmatprep.subr.bf16.mxu1 %v8717_v49  ;;  %v5858_v49 = vld [vmem:[%s10523_s3 + $0x100] sm:$0xff] }
 0x2b9   :  { %2727 = vmatmul.mubr.f32.gmra.mrb[154].mxu1 %v2582_v15  ;;  %v5915_v15 = vld [vmem:[%s10524_s4 + $0x140] sm:$0xff] }
 0x2ba   :  { %6599 = vmatpush1.bf16.msra.mxu1 %v8704_v18  ;;  %2826 = vmatprep.mubr.f32.mxu1 %v5855_v43  ;;  %v5856_v18 = vld [vmem:[%s10523_s3 + $0xf0] sm:$0xff]  ;;  %v6666_v43 = vpack.c.bf16 %v5915_v15, %v5914_v30  ;;  %v3376_v30 = vld [vmem:[%s10525_s5 + $0x20] sm:$0xff] }
 0x2bb   :  { %6601 = vmatprep.subr.bf16.mxu1 %v8727_v63  ;;  %v5869_v63 = vld [vmem:[%s10523_s3 + $0x158] sm:$0xff] }
 0x2be   :  { %6603 = vmatpush1.bf16.msra.mxu1 %v8714_v55  ;;  %v5859_v55 = vld [vmem:[%s10523_s3 + $0x108] sm:$0xff] }
 0x2bf   :  { %6605 = vmatprep.subr.bf16.mxu1 %v8751_v21  ;;  %v5872_v21 = vld [vmem:[%s10523_s3 + $0x170] sm:$0xff] }
 0x2c2   :  { %6607 = vmatpush1.bf16.msra.mxu1 %v8724_v2  ;;  %v6654_v2 = vpack.c.bf16 %v5907_v61, %v5906_v20  ;;  %v3373_v20 = vld [vmem:[%s10525_s5 + $0x8] sm:$0xff]  ;;  %v3375_v61 = vld [vmem:[%s10525_s5 + $0x18] sm:$0xff] }
 0x2c3   :  { %6608 = vmatprep.subr.bf16.mxu1 %v7077_v44 }
 0x2c4   :  { %6655 = vmatpush1.bf16.msra.mxu0 %v6654_v2  ;;  %v5933_v2 = vld [vmem:[%s10525_s5 + $0x108] sm:$0xff] }
 0x2c5   :  { %2827 = vmatmul.mubr.f32.vlgmr.msra.gmra.mrb[156].mxu1 %v5854_v1  ;;  %6656 = vmatprep.subr.bf16.mxu0 %v7077_v44  ;;  %v2953_v1 = vld [vmem:[%s10524_s4 + $0x70] sm:$0xff] }
 0x2c6   :  { %2832 = vmatprep.mubr.f32.mxu1 %v5857_v56  ;;  %6610 = vmatpush1.bf16.msra.mxu1 %v6609_v59  ;;  %v2954_v56 = vld [vmem:[%s10524_s4 + $0x78] sm:$0xff] }
 0x2c7   :  { %6611 = vmatprep.subr.bf16.mxu1 %v7077_v44 }
 0x2c8   :  { %6658 = vmatpush1.bf16.msra.mxu0 %v6657_v0 }
 0x2c9   :  { %2833 = vmatmul.mubr.f32.gmra.mrb[158].mxu1 %v5856_v18  ;;  %6659 = vmatprep.subr.bf16.mxu0 %v7077_v44  ;;  %v6630_v18 = vpack.c.bf16 %v2954_v56, %v2953_v1  ;;  %v3381_v1 = vld [vmem:[%s10525_s5 + $0x48] sm:$0xff] }
 0x2ca   :  { %2838 = vmatprep.mubr.f32.mxu1 %v5859_v55  ;;  %6613 = vmatpush1.bf16.msra.mxu1 %v6612_v6  ;;  %v9058_v55 = vld [vmem:[#allocation4 + $0x70] sm:$0xff] }
 0x2cb   :  { %6614 = vmatprep.subr.bf16.mxu1 %v7077_v44 }
 0x2cc   :  { %6661 = vmatpush1.bf16.msra.mxu0 %v6660_v16 }
 0x2cd   :  { %2839 = vmatmul.mubr.f32.gmra.mrb[160].mxu1 %v5858_v49  ;;  %6662 = vmatprep.subr.bf16.mxu0 %v7077_v44  ;;  %v2955_v49 = vld [vmem:[%s10524_s4 + $0x80] sm:$0xff] }
 0x2ce   :  { %2844 = vmatprep.mubr.f32.mxu1 %v5861_v62  ;;  %6616 = vmatpush1.bf16.msra.mxu1 %v6615_v25  ;;  %v2956_v62 = vld [vmem:[%s10524_s4 + $0x88] sm:$0xff] }
 0x2cf   :  { %6617 = vmatprep.subr.bf16.mxu1 %v7077_v44 }
 0x2d0   :  { %6664 = vmatpush1.bf16.msra.mxu0 %v6663_v23  ;;  %v5937_v23 = vld [vmem:[%s10525_s5 + $0x128] sm:$0xff] }
 0x2d1   :  { %2845 = vmatmul.mubr.f32.gmra.mrb[162].mxu1 %v5860_v50  ;;  %6665 = vmatprep.subr.bf16.mxu0 %v7077_v44  ;;  %v6633_v50 = vpack.c.bf16 %v2956_v62, %v2955_v49  ;;  %v6704_v56 = vpack.c.bf16 %v5939_v35, %v5937_v23  ;;  %v5938_v49 = vld [vmem:[%s10525_s5 + $0x130] sm:$0xff] }
 0x2d2   :  { %2850 = vmatprep.mubr.f32.mxu1 %v5863_v33  ;;  %6619 = vmatpush1.bf16.msra.mxu1 %v6618_v4  ;;  %v5916_v33 = vld [vmem:[%s10524_s4 + $0x148] sm:$0xff] }
 0x2d3   :  { %6620 = vmatprep.subr.bf16.mxu1 %v7077_v44 }
 0x2d4   :  { %6667 = vmatpush1.bf16.msra.mxu0 %v6666_v43  ;;  %v6672_v43 = vpack.c.bf16 %v3379_v54, %v3377_v32  ;;  %v5947_v32 = vld [vmem:[%s10525_s5 + $0x178] sm:$0xff] }
 0x2d5   :  { %2851 = vmatmul.mubr.f32.gmra.mrb[164].mxu1 %v5862_v47  ;;  %3199 = vmatprep.subr.mxu0 %v9058_v55  ;;  %v2957_v47 = vld [vmem:[%s10524_s4 + $0x90] sm:$0xff] }
 0x2d6   :  { %2856 = vmatprep.mubr.f32.mxu1 %v5865_v42  ;;  %6622 = vmatpush1.bf16.msra.mxu1 %v6621_v45  ;;  %v2958_v42 = vld [vmem:[%s10524_s4 + $0x98] sm:$0xff]  ;;  %v5934_v45 = vld [vmem:[%s10525_s5 + $0x110] sm:$0xff] }
 0x2d7   :  { %6623 = vmatprep.subr.bf16.mxu1 %v7077_v44 }
 0x2d8   :  { %3200 = vmatpush1.msra.mxu0 %v5916_v33  ;;  %v5941_v33 = vld [vmem:[%s10525_s5 + $0x148] sm:$0xff] }
 0x2d9   :  { %2857 = vmatmul.mubr.f32.gmra.mrb[166].mxu1 %v5864_v14  ;;  %v6636_v14 = vpack.c.bf16 %v2958_v42, %v2957_v47  ;;  %v5943_v47 = vld [vmem:[%s10525_s5 + $0x158] sm:$0xff] }
 0x2da   :  { %2862 = vmatprep.mubr.f32.mxu1 %v5867_v46  ;;  %6625 = vmatpush1.bf16.msra.mxu1 %v6624_v39  ;;  %v2959_v46 = vld [vmem:[%s10524_s4 + $0xa0] sm:$0xff] }
 0x2db   :  { %6626 = vmatprep.subr.bf16.mxu1 %v7077_v44 }
 0x2dd   :  { %2863 = vmatmul.mubr.f32.gmra.mrb[168].mxu1 %v5866_v52  ;;  %v6668_v52 = vpack.c.bf16 %v3375_v61, %v3373_v20  ;;  %v3380_v61 = vld [vmem:[%s10525_s5 + $0x40] sm:$0xff] }
 0x2de   :  { %2868 = vmatprep.mubr.f32.mxu1 %v5869_v63  ;;  %6628 = vmatpush1.bf16.msra.mxu1 %v6627_v28  ;;  %v5935_v63 = vld [vmem:[%s10525_s5 + $0x118] sm:$0xff]  ;;  %v3378_v28 = vld [vmem:[%s10525_s5 + $0x30] sm:$0xff] }
 0x2df   :  { %6629 = vmatprep.subr.bf16.mxu1 %v7077_v44  ;;  %v6674_v20 = vpack.c.bf16 %v3378_v28, %v3376_v30 }
 0x2e1   :  { %2869 = vmatmul.mubr.f32.gmra.mrb[170].mxu1 %v5868_v41 }
 0x2e2   :  { %2874 = vmatprep.mubr.f32.mxu1 %v5871_v51  ;;  %6631 = vmatpush1.bf16.msra.mxu1 %v6630_v18  ;;  %v6700_v51 = vpack.c.bf16 %v5935_v63, %v5933_v2  ;;  %v5936_v18 = vld [vmem:[%s10525_s5 + $0x120] sm:$0xff] }
 0x2e3   :  { %6632 = vmatprep.subr.bf16.mxu1 %v7077_v44  ;;  %v6706_v2 = vpack.c.bf16 %v5938_v49, %v5936_v18  ;;  %v3390_v18 = vld [vmem:[%s10525_s5 + $0x90] sm:$0xff]  ;;  %v3395_v49 = vld [vmem:[%s10525_s5 + $0xb8] sm:$0xff] }
 0x2e4   :  { %6701 = vmatprep.subr.bf16.mxu0 %v6700_v51  ;;  %v6708_v51 = vpack.c.bf16 %v5943_v47, %v5941_v33 }
 0x2e5   :  { %2875 = vmatmul.mubr.f32.gmra.mrb[172].mxu1 %v5870_v36 }
 0x2e6   :  { %2880 = vmatprep.mubr.f32.mxu1 %v5873_v27  ;;  %6634 = vmatpush1.bf16.msra.mxu1 %v6633_v50  ;;  %v3383_v50 = vld [vmem:[%s10525_s5 + $0x58] sm:$0xff] }
 0x2e7   :  { %6635 = vmatprep.subr.bf16.mxu1 %v7077_v44  ;;  %v6676_v63 = vpack.c.bf16 %v3383_v50, %v3381_v1 }
 0x2e9   :  { %2881 = vmatmul.mubr.f32.gmra.mrb[174].mxu1 %v5872_v21 }
 0x2ea   :  { %2886 = vmatprep.mubr.f32.mxu1 %v5875_v57  ;;  %6637 = vmatpush1.bf16.msra.mxu1 %v6636_v14 }
 0x2eb   :  { %3042 = vmatprep.subr.mxu1 %v9058_v55 }
 0x2ed   :  { %2887 = vmatmul.mubr.f32.gmra.mrb[176].mxu1 %v5874_v22 }
 0x2ee   :  { %2892 = vmatprep.mubr.f32.mxu1 %v5877_v17  ;;  %3043 = vmatpush1.msra.mxu1 %v2959_v46 }
 0x2ef   :  { %6669 = vmatprep.subr.bf16.mxu1 %v6668_v52  ;;  %v3382_v52 = vld [vmem:[%s10525_s5 + $0x50] sm:$0xff] }
 0x2f0   :  { %v6678_v54 = vpack.c.bf16 %v3382_v52, %v3380_v61 }
 0x2f1   :  { %2893 = vmatmul.mubr.f32.gmra.mrb[178].mxu1 %v5876_v3 }
 0x2f2   :  { %2898 = vmatprep.mubr.f32.mxu1 %v5879_v31 }
 0x2f5   :  { %2899 = vmatmul.mubr.f32.gmra.mrb[180].mxu1 %v5878_v40 }
 0x2f6   :  { %2904 = vmatprep.mubr.f32.mxu1 %v5881_v5  ;;  %v3372_v5 = vld [vmem:[%s10525_s5] sm:$0xff] }
 0x2f7   :  { %v6670_v26 = vpack.c.bf16 %v3374_v24, %v3372_v5  ;;  %v3387_v5 = vld [vmem:[%s10525_s5 + $0x78] sm:$0xff]  ;;  %v5945_v24 = vld [vmem:[%s10525_s5 + $0x168] sm:$0xff] }
 0x2f9   :  { %2905 = vmatmul.mubr.f32.gmra.mrb[182].mxu1 %v5880_v53  ;;  %v5932_v53 = vld [vmem:[%s10525_s5 + $0x100] sm:$0xff] }
 0x2fa   :  { %v6702_v15 = vpack.c.bf16 %v5934_v45, %v5932_v53 }
 0x358   :  { %v2650_v41 = vpop.f32.mrb[128].mxu1 }
 0x359   :  { %v2652_v29 = vpop.f32.mrb[129].mxu1 }
 0x35c   :  { %v2656_v7 = vpop.f32.mrb[130].mxu1 }
 0x35d   :  { %v2658_v0 = vpop.f32.mrb[131].mxu1 }
 0x360   :  { %v9094_v10 = vpop.f32.mrb[132].mxu1 }
 0x361   :  { %v9096_v58 = vpop.f32.mrb[133].mxu1 }
 0x364   :  { %v9098_v36 = vpop.f32.mrb[134].mxu1 }
 0x365   :  { %v9100_v59 = vpop.f32.mrb[135].mxu1 }
 0x368   :  { %v9102_v27 = vpop.f32.mrb[136].mxu1 }
 0x369   :  { %v9104_v21 = vpop.f32.mrb[137].mxu1 }
 0x36c   :  { %v9106_v57 = vpop.f32.mrb[138].mxu1 }
 0x36d   :  { %v9108_v34 = vpop.f32.mrb[139].mxu1 }
 0x370   :  { %v9110_v9 = vpop.f32.mrb[140].mxu1 }
 0x371   :  { %v9112_v6 = vpop.f32.mrb[141].mxu1 }
 0x374   :  { %v9114_v22 = vpop.f32.mrb[142].mxu1 }
 0x375   :  { %v9116_v17 = vpop.f32.mrb[143].mxu1 }
 0x378   :  { %v9118_v48 = vpop.f32.mrb[144].mxu1 }
 0x379   :  { %v9120_v8 = vpop.f32.mrb[145].mxu1 }
 0x37c   :  { %v9122_v16 = vpop.f32.mrb[146].mxu1 }
 0x37d   :  { %v9124_v11 = vpop.f32.mrb[147].mxu1 }
 0x380   :  { %v9126_v37 = vpop.f32.mrb[148].mxu1 }
 0x381   :  { %v9128_v3 = vpop.f32.mrb[149].mxu1 }
 0x384   :  { %v9130_v25 = vpop.f32.mrb[150].mxu1 }
 0x385   :  { %v9132_v31 = vpop.f32.mrb[151].mxu1 }
 0x388   :  { %v9134_v38 = vpop.f32.mrb[152].mxu1 }
 0x389   :  { %v9136_v13 = vpop.f32.mrb[153].mxu1 }
 0x38c   :  { %v9138_v40 = vpop.f32.mrb[154].mxu1 }
 0x38d   :  { %v9140_v4 = vpop.f32.mrb[155].mxu1 }
 0x398   :  { %v2828_v19 = vpop.f32.mrb[156].mxu1 }
 0x399   :  { %v2911_v60 = vmax.f32 %v2650_v41, %v2828_v19  ;;  %v2830_v39 = vpop.f32.mrb[157].mxu1  ;;  %v3385_v41 = vld [vmem:[%s10525_s5 + $0x68] sm:$0xff] }
 0x39a   :  { %v2912_v12 = vmax.f32 %v2652_v29, %v2830_v39  ;;  %v5940_v29 = vld [vmem:[%s10525_s5 + $0x140] sm:$0xff]  ;;  %v6680_v35 = vpack.c.bf16 %v3387_v5, %v3385_v41  ;;  %v3386_v39 = vld [vmem:[%s10525_s5 + $0x70] sm:$0xff] }
 0x39c   :  { %v2834_v62 = vpop.f32.mrb[158].mxu1  ;;  %5882 = vmatprep.mubr.msk.f32.mxu1 %vm372_vm0, %v2912_v12  ;;  %5917 = vmatprep.mubr.msk.f32.mxu0 %vm372_vm0, %v2912_v12 }
 0x39d   :  { %v2913_v42 = vmax.f32 %v2656_v7, %v2834_v62  ;;  %v2836_v14 = vpop.f32.mrb[159].mxu1  ;;  %3067 = vmatmul.mubr.f32.vlgmr.msra.gmra.mrb[184].mxu1 %v2911_v60  ;;  %3224 = vmatmul.mubr.f32.vlgmr.msra.gmra.mrb[192].mxu0 %v2911_v60  ;;  %v5942_v7 = vld [vmem:[%s10525_s5 + $0x150] sm:$0xff]  ;;  %v3384_v60 = vld [vmem:[%s10525_s5 + $0x60] sm:$0xff] }
 0x39e   :  { %v2914_v46 = vmax.f32 %v2658_v0, %v2836_v14  ;;  %6671 = vmatpush1.bf16.msra.mxu1 %v6670_v26  ;;  %6703 = vmatpush1.bf16.msra.mxu0 %v6702_v15  ;;  %v6710_v23 = vpack.c.bf16 %v5942_v7, %v5940_v29  ;;  %v3391_v26 = vld [vmem:[%s10525_s5 + $0x98] sm:$0xff]  ;;  %v3392_v14 = vld [vmem:[%s10525_s5 + $0xa0] sm:$0xff] }
 0x39f   :  { %6673 = vmatprep.subr.bf16.mxu1 %v6672_v43  ;;  %6705 = vmatprep.subr.bf16.mxu0 %v6704_v56  ;;  %v6682_v43 = vpack.c.bf16 %v3386_v39, %v3384_v60  ;;  %v3388_v56 = vld [vmem:[%s10525_s5 + $0x80] sm:$0xff] }
 0x3a0   :  { %v2840_v0 = vpop.f32.mrb[160].mxu1  ;;  %5883 = vmatprep.mubr.msk.f32.mxu1 %vm372_vm0, %v2914_v46  ;;  %5918 = vmatprep.mubr.msk.f32.mxu0 %vm372_vm0, %v2914_v46  ;;  %v6686_v47 = vpack.c.bf16 %v3390_v18, %v3388_v56  ;;  %v3394_v46 = vld [vmem:[%s10525_s5 + $0xb0] sm:$0xff]  ;;  %v5948_v56 = vld [vmem:[%s10525_s5 + $0x180] sm:$0xff] }
 0x3a1   :  { %v2915_v53 = vmax.f32 %v9094_v10, %v2840_v0  ;;  %v2842_v45 = vpop.f32.mrb[161].mxu1  ;;  %3072 = vmatmul.mubr.f32.gmra.mrb[186].mxu1 %v2913_v42  ;;  %3229 = vmatmul.mubr.f32.gmra.mrb[194].mxu0 %v2913_v42  ;;  %v6712_v10 = vpack.c.bf16 %v5947_v32, %v5945_v24  ;;  %v6690_v52 = vpack.c.bf16 %v3394_v46, %v3392_v14  ;;  %v5950_v18 = vld [vmem:[%s10525_s5 + $0x190] sm:$0xff]  ;;  %v5952_v46 = vld [vmem:[%s10525_s5 + $0x1a0] sm:$0xff] }
 0x3a2   :  { %v2916_v19 = vmax.f32 %v9096_v58, %v2842_v45  ;;  %6675 = vmatpush1.bf16.msra.mxu1 %v6674_v20  ;;  %6707 = vmatpush1.bf16.msra.mxu0 %v6706_v2  ;;  %v3389_v58 = vld [vmem:[%s10525_s5 + $0x88] sm:$0xff] }
 0x3a3   :  { %6677 = vmatprep.subr.bf16.mxu1 %v6676_v63  ;;  %6709 = vmatprep.subr.bf16.mxu0 %v6708_v51  ;;  %v6684_v1 = vpack.c.bf16 %v3391_v26, %v3389_v58  ;;  %v3398_v26 = vld [vmem:[%s10525_s5 + $0xd0] sm:$0xff] }
 0x3a4   :  { %v2846_v12 = vpop.f32.mrb[162].mxu1  ;;  %5884 = vmatprep.mubr.msk.f32.mxu1 %vm372_vm0, %v2916_v19  ;;  %5919 = vmatprep.mubr.msk.f32.mxu0 %vm372_vm0, %v2916_v19 }
 0x3a5   :  { %v2917_v30 = vmax.f32 %v9098_v36, %v2846_v12  ;;  %v2848_v28 = vpop.f32.mrb[163].mxu1  ;;  %3077 = vmatmul.mubr.f32.gmra.mrb[188].mxu1 %v2915_v53  ;;  %3234 = vmatmul.mubr.f32.gmra.mrb[196].mxu0 %v2915_v53  ;;  %v3396_v12 = vld [vmem:[%s10525_s5 + $0xc0] sm:$0xff] }
 0x3a6   :  { %v2918_v15 = vmax.f32 %v9100_v59, %v2848_v28  ;;  %6679 = vmatpush1.bf16.msra.mxu1 %v6678_v54  ;;  %6711 = vmatpush1.bf16.msra.mxu0 %v6710_v23  ;;  %v3393_v59 = vld [vmem:[%s10525_s5 + $0xa8] sm:$0xff] }
 0x3a7   :  { %6681 = vmatprep.subr.bf16.mxu1 %v6680_v35  ;;  %6713 = vmatprep.subr.bf16.mxu0 %v6712_v10  ;;  %v6688_v42 = vpack.c.bf16 %v3395_v49, %v3393_v59  ;;  %v5949_v28 = vld [vmem:[%s10525_s5 + $0x188] sm:$0xff]  ;;  %v6718_v59 = vpack.c.bf16 %v5950_v18, %v5948_v56 }
 0x3a8   :  { %v2852_v36 = vpop.f32.mrb[164].mxu1  ;;  %5885 = vmatprep.mubr.msk.f32.mxu1 %vm372_vm0, %v2918_v15  ;;  %5920 = vmatprep.mubr.msk.f32.mxu0 %vm372_vm0, %v2918_v15  ;;  %v5951_v15 = vld [vmem:[%s10525_s5 + $0x198] sm:$0xff] }
 0x3a9   :  { %v2919_v62 = vmax.f32 %v9102_v27, %v2852_v36  ;;  %v2854_v50 = vpop.f32.mrb[165].mxu1  ;;  %3082 = vmatmul.mubr.f32.gmra.mrb[190].mxu1 %v2917_v30  ;;  %3239 = vmatmul.mubr.f32.gmra.mrb[198].mxu0 %v2917_v30  ;;  %v6694_v30 = vpack.c.bf16 %v3398_v26, %v3396_v12  ;;  %v3403_v36 = vld [vmem:[%s10525_s5 + $0xf8] sm:$0xff] }
 0x3aa   :  { %v2920_v33 = vmax.f32 %v9104_v21, %v2854_v50  ;;  %6683 = vmatpush1.bf16.msra.mxu1 %v6682_v43  ;;  %v3401_v43 = vld [vmem:[%s10525_s5 + $0xe8] sm:$0xff]  ;;  %v3402_v50 = vld [vmem:[%s10525_s5 + $0xf0] sm:$0xff]  ;;  %v5975_v12 = vld [vmem:[%s10525_s5 + $0x258] sm:$0xff] }
 0x3ab   :  { %6685 = vmatprep.subr.bf16.mxu1 %v6684_v1  ;;  %v6716_v1 = vpack.c.bf16 %v5951_v15, %v5949_v28  ;;  %v6696_v49 = vpack.c.bf16 %v3403_v36, %v3401_v43  ;;  %v5972_v36 = vld [vmem:[%s10525_s5 + $0x240] sm:$0xff] }
 0x3ac   :  { %v2858_v20 = vpop.f32.mrb[166].mxu1  ;;  %5886 = vmatprep.mubr.msk.f32.mxu1 %vm372_vm0, %v2920_v33  ;;  %5921 = vmatprep.mubr.msk.f32.mxu0 %vm372_vm0, %v2920_v33 }
 0x3ad   :  { %v2921_v27 = vmax.f32 %v9106_v57, %v2858_v20  ;;  %v2860_v21 = vpop.f32.mrb[167].mxu1  ;;  %3087 = vmatmul.mubr.f32.gmra.mrb[192].mxu1 %v2919_v62  ;;  %3244 = vmatmul.mubr.f32.gmra.mrb[200].mxu0 %v2919_v62  ;;  %v3400_v62 = vld [vmem:[%s10525_s5 + $0xe0] sm:$0xff]  ;;  %v5954_v20 = vld [vmem:[%s10525_s5 + $0x1b0] sm:$0xff] }
 0x3ae   :  { %v2922_v61 = vmax.f32 %v9108_v34, %v2860_v21  ;;  %6687 = vmatpush1.bf16.msra.mxu1 %v6686_v47  ;;  %v6698_v33 = vpack.c.bf16 %v3402_v50, %v3400_v62  ;;  %v5953_v47 = vld [vmem:[%s10525_s5 + $0x1a8] sm:$0xff]  ;;  %v5979_v62 = vld [vmem:[%s10525_s5 + $0x278] sm:$0xff] }
 0x3af   :  { %6689 = vmatprep.subr.bf16.mxu1 %v6688_v42  ;;  %v5955_v42 = vld [vmem:[%s10525_s5 + $0x1b8] sm:$0xff]  ;;  %v5957_v21 = vld [vmem:[%s10525_s5 + $0x1c8] sm:$0xff] }
 0x3b0   :  { %v2864_v2 = vpop.f32.mrb[168].mxu1  ;;  %5887 = vmatprep.mubr.msk.f32.mxu1 %vm372_vm0, %v2922_v61  ;;  %5922 = vmatprep.mubr.msk.f32.mxu0 %vm372_vm0, %v2922_v61  ;;  %v6720_v14 = vpack.c.bf16 %v5955_v42, %v5953_v47  ;;  %v5959_v61 = vld [vmem:[%s10525_s5 + $0x1d8] sm:$0xff] }
 0x3b1   :  { %v2923_v63 = vmax.f32 %v9110_v9, %v2864_v2  ;;  %v2866_v41 = vpop.f32.mrb[169].mxu1  ;;  %3092 = vmatmul.mubr.f32.gmra.mrb[194].mxu1 %v2921_v27  ;;  %3249 = vmatmul.mubr.f32.gmra.mrb[202].mxu0 %v2921_v27  ;;  %v6722_v27 = vpack.c.bf16 %v5954_v20, %v5952_v46  ;;  %v5956_v2 = vld [vmem:[%s10525_s5 + $0x1c0] sm:$0xff] }
 0x3b2   :  { %v2924_v57 = vmax.f32 %v9112_v6, %v2866_v41  ;;  %6691 = vmatpush1.bf16.msra.mxu1 %v6690_v52  ;;  %v6724_v52 = vpack.c.bf16 %v5959_v61, %v5957_v21  ;;  %v5976_v61 = vld [vmem:[%s10525_s5 + $0x260] sm:$0xff] }
 0x3b4   :  { %v2870_v51 = vpop.f32.mrb[170].mxu1  ;;  %5888 = vmatprep.mubr.msk.f32.mxu1 %vm372_vm0, %v2924_v57  ;;  %5923 = vmatprep.mubr.msk.f32.mxu0 %vm372_vm0, %v2924_v57  ;;  %v5961_v57 = vld [vmem:[%s10525_s5 + $0x1e8] sm:$0xff] }
 0x3b5   :  { %v2925_v34 = vmax.f32 %v9114_v22, %v2870_v51  ;;  %v2872_v29 = vpop.f32.mrb[171].mxu1  ;;  %3097 = vmatmul.mubr.f32.gmra.mrb[196].mxu1 %v2923_v63  ;;  %3254 = vmatmul.mubr.f32.gmra.mrb[204].mxu0 %v2923_v63  ;;  %v5958_v63 = vld [vmem:[%s10525_s5 + $0x1d0] sm:$0xff]  ;;  %v5963_v51 = vld [vmem:[%s10525_s5 + $0x1f8] sm:$0xff] }
 0x3b6   :  { %v2926_v7 = vmax.f32 %v9116_v17, %v2872_v29  ;;  %v6726_v41 = vpack.c.bf16 %v5958_v63, %v5956_v2  ;;  %v5960_v29 = vld [vmem:[%s10525_s5 + $0x1e0] sm:$0xff]  ;;  %v5998_v63 = vld [vmem:[%s10525_s5 + $0x310] sm:$0xff] }
 0x3b7   :  { %v5996_v2 = vld [vmem:[%s10525_s5 + $0x300] sm:$0xff] }
 0x3b8   :  { %v2876_v0 = vpop.f32.mrb[172].mxu1  ;;  %5889 = vmatprep.mubr.msk.f32.mxu1 %vm372_vm0, %v2926_v7  ;;  %5924 = vmatprep.mubr.msk.f32.mxu0 %vm372_vm0, %v2926_v7  ;;  %v5962_v7 = vld [vmem:[%s10525_s5 + $0x1f0] sm:$0xff] }
 0x3b9   :  { %v2927_v9 = vmax.f32 %v9118_v48, %v2876_v0  ;;  %v2878_v6 = vpop.f32.mrb[173].mxu1  ;;  %3102 = vmatmul.mubr.f32.gmra.mrb[198].mxu1 %v2925_v34  ;;  %3259 = vmatmul.mubr.f32.gmra.mrb[206].mxu0 %v2925_v34  ;;  %v6728_v34 = vpack.c.bf16 %v5963_v51, %v5961_v57  ;;  %v6730_v0 = vpack.c.bf16 %v5962_v7, %v5960_v29  ;;  %v5983_v51 = vld [vmem:[%s10525_s5 + $0x298] sm:$0xff] }
 0x3ba   :  { %v2928_v5 = vmax.f32 %v9120_v8, %v2878_v6  ;;  %v5967_v6 = vld [vmem:[%s10525_s5 + $0x218] sm:$0xff] }
 0x3bb   :  { %v6003_v29 = vld [vmem:[%s10525_s5 + $0x338] sm:$0xff] }
 0x3bc   :  { %v2882_v24 = vpop.f32.mrb[174].mxu1  ;;  %5890 = vmatprep.mubr.msk.f32.mxu1 %vm372_vm0, %v2928_v5  ;;  %5925 = vmatprep.mubr.msk.f32.mxu0 %vm372_vm0, %v2928_v5 }
 0x3bd   :  { %v2929_v22 = vmax.f32 %v9122_v16, %v2882_v24  ;;  %v2884_v17 = vpop.f32.mrb[175].mxu1  ;;  %3107 = vmatmul.mubr.f32.gmra.mrb[200].mxu1 %v2927_v9  ;;  %3264 = vmatmul.mubr.f32.gmra.mrb[208].mxu0 %v2927_v9  ;;  %v5965_v9 = vld [vmem:[%s10525_s5 + $0x208] sm:$0xff] }
 0x3be   :  { %v2930_v32 = vmax.f32 %v9124_v11, %v2884_v17  ;;  %v6732_v5 = vpack.c.bf16 %v5967_v6, %v5965_v9  ;;  %v5997_v24 = vld [vmem:[%s10525_s5 + $0x308] sm:$0xff] }
 0x3c0   :  { %v2888_v53 = vpop.f32.mrb[176].mxu1  ;;  %5891 = vmatprep.mubr.msk.f32.mxu1 %vm372_vm0, %v2930_v32  ;;  %5926 = vmatprep.mubr.msk.f32.mxu0 %vm372_vm0, %v2930_v32 }
 0x3c1   :  { %v2931_v48 = vmax.f32 %v9126_v37, %v2888_v53  ;;  %v2890_v8 = vpop.f32.mrb[177].mxu1  ;;  %3112 = vmatmul.mubr.f32.gmra.mrb[202].mxu1 %v2929_v22  ;;  %3269 = vmatmul.mubr.f32.gmra.mrb[210].mxu0 %v2929_v22  ;;  %v5999_v22 = vld [vmem:[%s10525_s5 + $0x318] sm:$0xff] }
 0x3c2   :  { %v2932_v45 = vmax.f32 %v9128_v3, %v2890_v8  ;;  %v6764_v17 = vpack.c.bf16 %v5999_v22, %v5997_v24 }
 0x3c4   :  { %v2894_v19 = vpop.f32.mrb[178].mxu1  ;;  %5892 = vmatprep.mubr.msk.f32.mxu1 %vm372_vm0, %v2932_v45  ;;  %5927 = vmatprep.mubr.msk.f32.mxu0 %vm372_vm0, %v2932_v45 }
 0x3c5   :  { %v2933_v16 = vmax.f32 %v9130_v25, %v2894_v19  ;;  %v2896_v11 = vpop.f32.mrb[179].mxu1  ;;  %3117 = vmatmul.mubr.f32.gmra.mrb[204].mxu1 %v2931_v48  ;;  %3274 = vmatmul.mubr.f32.gmra.mrb[212].mxu0 %v2931_v48  ;;  %v9391_v48 = vld [vmem:[%s10526_s2] ss:$0 sm:$0xff] }
 0x3c6   :  { %v2934_v54 = vmax.f32 %v9132_v31, %v2896_v11  ;;  %v5966_v11 = vld [vmem:[%s10525_s5 + $0x210] sm:$0xff] }
 0x3c8   :  { %v2900_v23 = vpop.f32.mrb[180].mxu1  ;;  %5893 = vmatprep.mubr.msk.f32.mxu1 %vm372_vm0, %v2934_v54  ;;  %5928 = vmatprep.mubr.msk.f32.mxu0 %vm372_vm0, %v2934_v54  ;;  %v5969_v54 = vld [vmem:[%s10525_s5 + $0x228] sm:$0xff] }
 0x3c9   :  { %v2935_v37 = vmax.f32 %v9134_v38, %v2900_v23  ;;  %v2902_v3 = vpop.f32.mrb[181].mxu1  ;;  %3122 = vmatmul.mubr.f32.gmra.mrb[206].mxu1 %v2933_v16  ;;  %3279 = vmatmul.mubr.f32.gmra.mrb[214].mxu0 %v2933_v16  ;;  %v3397_v38 = vld [vmem:[%s10525_s5 + $0xc8] sm:$0xff]  ;;  %v5964_v16 = vld [vmem:[%s10525_s5 + $0x200] sm:$0xff]  ;;  %v5971_v23 = vld [vmem:[%s10525_s5 + $0x238] sm:$0xff] }
 0x3ca   :  { %v2936_v35 = vmax.f32 %v9136_v13, %v2902_v3  ;;  %v3399_v13 = vld [vmem:[%s10525_s5 + $0xd8] sm:$0xff] }
 0x3cb   :  { %v6692_v10 = vpack.c.bf16 %v3399_v13, %v3397_v38  ;;  %v6736_v13 = vpack.c.bf16 %v5971_v23, %v5969_v54  ;;  %v6005_v54 = vld [vmem:[%s10525_s5 + $0x348] sm:$0xff] }
 0x3cc   :  { %v2906_v60 = vpop.f32.mrb[182].mxu1  ;;  %5894 = vmatprep.mubr.msk.f32.mxu1 %vm372_vm0, %v2936_v35  ;;  %5929 = vmatprep.mubr.msk.f32.mxu0 %vm372_vm0, %v2936_v35 }
 0x3cd   :  { %v2937_v25 = vmax.f32 %v9138_v40, %v2906_v60  ;;  %v2908_v31 = vpop.f32.mrb[183].mxu1  ;;  %3127 = vmatmul.mubr.f32.gmra.mrb[208].mxu1 %v2935_v37  ;;  %3284 = vmatmul.mubr.f32.gmra.mrb[216].mxu0 %v2935_v37  ;;  %v5944_v40 = vld [vmem:[%s10525_s5 + $0x160] sm:$0xff]  ;;  %v6734_v60 = vpack.c.bf16 %v5966_v11, %v5964_v16  ;;  %v6002_v11 = vld [vmem:[%s10525_s5 + $0x330] sm:$0xff] }
 0x3ce   :  { %v2938_v39 = vmax.f32 %v9140_v4, %v2908_v31  ;;  %v5946_v4 = vld [vmem:[%s10525_s5 + $0x170] sm:$0xff]  ;;  %6693 = vmatprep.subr.bf16.mxu1 %v6692_v10  ;;  %v5973_v10 = vld [vmem:[%s10525_s5 + $0x248] sm:$0xff] }
 0x3cf   :  { %v6714_v58 = vpack.c.bf16 %v5946_v4, %v5944_v40  ;;  %6695 = vmatpush1.bf16.msra.mxu1 %v6694_v30  ;;  %v5968_v40 = vld [vmem:[%s10525_s5 + $0x220] sm:$0xff]  ;;  %v5970_v4 = vld [vmem:[%s10525_s5 + $0x230] sm:$0xff]  ;;  %v6740_v18 = vpack.c.bf16 %v5975_v12, %v5973_v10 }
 0x3d0   :  { %5895 = vmatprep.mubr.msk.f32.mxu1 %vm372_vm0, %v2938_v39  ;;  %5930 = vmatprep.mubr.msk.f32.mxu0 %vm372_vm0, %v2938_v39  ;;  %v6738_v28 = vpack.c.bf16 %v5970_v4, %v5968_v40  ;;  %v6004_v10 = vld [vmem:[%s10525_s5 + $0x340] sm:$0xff]  ;;  %v6006_v12 = vld [vmem:[%s10525_s5 + $0x350] sm:$0xff] }
 0x3d1   :  { %3132 = vmatmul.mubr.f32.gmra.mrb[210].mxu1 %v2937_v25  ;;  %3289 = vmatmul.mubr.f32.gmra.mrb[218].mxu0 %v2937_v25 }
 0x3d2   :  { %3468 = vmatprep.mubr.f32.mxu1 %v9058_v55  ;;  %3721 = vmatprep.mubr.f32.mxu0 %v9058_v55 }
 0x3d3   :  { %6715 = vmatpush1.bf16.msra.mxu0 %v6714_v58  ;;  %6697 = vmatprep.subr.bf16.mxu1 %v6696_v49  ;;  %v5977_v49 = vld [vmem:[%s10525_s5 + $0x268] sm:$0xff] }
 0x3d4   :  { %6717 = vmatprep.subr.bf16.mxu0 %v6716_v1  ;;  %6699 = vmatpush1.bf16.msra.mxu1 %v6698_v33  ;;  %v6744_v21 = vpack.c.bf16 %v5979_v62, %v5977_v49 }
 0x3d5   :  { %6733 = vmatprep.subr.bf16.mxu1 %v6732_v5 }
 0x3d7   :  { %6719 = vmatpush1.bf16.msra.mxu0 %v6718_v59  ;;  %v5974_v59 = vld [vmem:[%s10525_s5 + $0x250] sm:$0xff] }
 0x3d8   :  { %6721 = vmatprep.subr.bf16.mxu0 %v6720_v14  ;;  %v6742_v42 = vpack.c.bf16 %v5974_v59, %v5972_v36  ;;  %v5991_v36 = vld [vmem:[%s10525_s5 + $0x2d8] sm:$0xff] }
 0x3db   :  { %6723 = vmatpush1.bf16.msra.mxu0 %v6722_v27 }
 0x3dc   :  { %6725 = vmatprep.subr.bf16.mxu0 %v6724_v52  ;;  %v5978_v52 = vld [vmem:[%s10525_s5 + $0x270] sm:$0xff] }
 0x3dd   :  { %v6746_v22 = vpack.c.bf16 %v5978_v52, %v5976_v61 }
 0x3df   :  { %6727 = vmatpush1.bf16.msra.mxu0 %v6726_v41  ;;  %v5981_v41 = vld [vmem:[%s10525_s5 + $0x288] sm:$0xff] }
 0x3e0   :  { %6729 = vmatprep.subr.bf16.mxu0 %v6728_v34  ;;  %v6001_v34 = vld [vmem:[%s10525_s5 + $0x328] sm:$0xff] }
 0x3e1   :  { %v6768_v16 = vpack.c.bf16 %v6003_v29, %v6001_v34  ;;  %v5995_v34 = vld [vmem:[%s10525_s5 + $0x2f8] sm:$0xff] }
 0x3e3   :  { %6731 = vmatpush1.bf16.msra.mxu0 %v6730_v0 }
 0x3e4   :  { %6765 = vmatprep.subr.bf16.mxu0 %v6764_v17  ;;  %v6766_v17 = vpack.c.bf16 %v5998_v63, %v5996_v2  ;;  %v5988_v2 = vld [vmem:[%s10525_s5 + $0x2c0] sm:$0xff]  ;;  %v5990_v63 = vld [vmem:[%s10525_s5 + $0x2d0] sm:$0xff] }
 0x470   :  { %v3068_v32 = vpop.f32.mrb[184].mxu1  ;;  %v3225_v53 = vpop.f32.mrb[192].mxu0 }
 0x471   :  { %v3294_v8 = vmax.f32 %v3068_v32, %v3225_v53  ;;  %v3070_v45 = vpop.f32.mrb[185].mxu1  ;;  %v3227_v19 = vpop.f32.mrb[193].mxu0  ;;  %v5980_v32 = vld [vmem:[%s10525_s5 + $0x280] sm:$0xff]  ;;  %v5982_v53 = vld [vmem:[%s10525_s5 + $0x290] sm:$0xff] }
 0x472   :  { %v6748_v19 = vpack.c.bf16 %v5983_v51, %v5981_v41  ;;  %v6750_v40 = vpack.c.bf16 %v5982_v53, %v5980_v32  ;;  %v5993_v51 = vld [vmem:[%s10525_s5 + $0x2e8] sm:$0xff]  ;;  %v6758_v32 = vpack.c.bf16 %v5990_v63, %v5988_v2  ;;  %v5992_v53 = vld [vmem:[%s10525_s5 + $0x2e0] sm:$0xff] }
 0x473   :  { %v3315_v37 = vadd.f32 %v9391_v48, %v3294_v8  ;;  %v6000_v8 = vld [vmem:[%s10525_s5 + $0x320] sm:$0xff] }
 0x474   :  { %v3073_v3 = vpop.f32.mrb[186].mxu1  ;;  %v3230_v35 = vpop.f32.mrb[194].mxu0  ;;  %v6770_v4 = vpack.c.bf16 %v6002_v11, %v6000_v8  ;;  %v5994_v11 = vld [vmem:[%s10525_s5 + $0x2f0] sm:$0xff] }
 0x475   :  { %v3329_v25 = vmax.f32 %v3315_v37, 0.0  ;;  %v3295_v31 = vmax.f32 %v3073_v3, %v3230_v35  ;;  %v3075_v39 = vpop.f32.mrb[187].mxu1  ;;  %v3232_v38 = vpop.f32.mrb[195].mxu0  ;;  %v6007_v37 = vld [vmem:[%s10525_s5 + $0x358] sm:$0xff]  ;;  %v5985_v3 = vld [vmem:[%s10525_s5 + $0x2a8] sm:$0xff] }
 0x476   :  { %v5987_v35 = vld [vmem:[%s10525_s5 + $0x2b8] sm:$0xff] }
 0x477   :  { %3343 = vst [vmem:[#allocation4] sm:$0xff] %v3329_v25  ;;  %v3316_v58 = vadd.f32 %v9391_v48, %v3295_v31  ;;  %3469 = vmatmul.mubr.f32.vlgmr.msra.gmra.mrb[212].mxu1 %v3329_v25 }
 0x478   :  { %v3078_v26 = vpop.f32.mrb[188].mxu1  ;;  %v3235_v30 = vpop.f32.mrb[196].mxu0  ;;  %3474 = vmatprep.mubr.f32.mxu1 %v9058_v55  ;;  %6735 = vmatpush1.bf16.msra.mxu1 %v6734_v60 }
 0x479   :  { %v3330_v15 = vmax.f32 %v3316_v58, 0.0  ;;  %v3296_v43 = vmax.f32 %v3078_v26, %v3235_v30  ;;  %v3080_v1 = vpop.f32.mrb[189].mxu1  ;;  %v3237_v56 = vpop.f32.mrb[197].mxu0  ;;  %6737 = vmatprep.subr.bf16.mxu1 %v6736_v13  ;;  %v5984_v58 = vld [vmem:[%s10525_s5 + $0x2a0] sm:$0xff]  ;;  %v6772_v30 = vpack.c.bf16 %v6007_v37, %v6005_v54  ;;  %v6029_v37 = vld [vmem:[%s10525_s5 + $0x408] sm:$0xff] }
 0x47a   :  { %v6011_v56 = vld [vmem:[%s10525_s5 + $0x378] sm:$0xff] }
 0x47b   :  { %3344 = vst [vmem:[#allocation4 + $0x8] sm:$0xff] %v3330_v15  ;;  %v3317_v50 = vadd.f32 %v9391_v48, %v3296_v43  ;;  %3475 = vmatmul.mubr.f32.gmra.mrb[214].mxu1 %v3330_v15  ;;  %v5986_v15 = vld [vmem:[%s10525_s5 + $0x2b0] sm:$0xff]  ;;  %v6009_v43 = vld [vmem:[%s10525_s5 + $0x368] sm:$0xff] }
 0x47c   :  { %v3083_v33 = vpop.f32.mrb[190].mxu1  ;;  %v3240_v47 = vpop.f32.mrb[198].mxu0  ;;  %3480 = vmatprep.mubr.f32.mxu1 %v9058_v55  ;;  %6739 = vmatpush1.bf16.msra.mxu1 %v6738_v28  ;;  %v6752_v28 = vpack.c.bf16 %v5987_v35, %v5985_v3  ;;  %v6776_v61 = vpack.c.bf16 %v6011_v56, %v6009_v43  ;;  %v6031_v3 = vld [vmem:[%s10525_s5 + $0x418] sm:$0xff] }
 0x47d   :  { %v3331_v14 = vmax.f32 %v3317_v50, 0.0  ;;  %v3297_v46 = vmax.f32 %v3083_v33, %v3240_v47  ;;  %v3085_v20 = vpop.f32.mrb[191].mxu1  ;;  %v3242_v27 = vpop.f32.mrb[199].mxu0  ;;  %6741 = vmatprep.subr.bf16.mxu1 %v6740_v18  ;;  %v5989_v18 = vld [vmem:[%s10525_s5 + $0x2c8] sm:$0xff] }
 0x47e   :  { %v6010_v20 = vld [vmem:[%s10525_s5 + $0x370] sm:$0xff]  ;;  %v6013_v27 = vld [vmem:[%s10525_s5 + $0x388] sm:$0xff]  ;;  %v6756_v52 = vpack.c.bf16 %v5991_v36, %v5989_v18 }
 0x47f   :  { %3345 = vst [vmem:[#allocation4 + $0x10] sm:$0xff] %v3331_v14  ;;  %v3318_v57 = vadd.f32 %v9391_v48, %v3297_v46  ;;  %3481 = vmatmul.mubr.f32.gmra.mrb[216].mxu1 %v3331_v14  ;;  %v6754_v14 = vpack.c.bf16 %v5986_v15, %v5984_v58  ;;  %v6008_v46 = vld [vmem:[%s10525_s5 + $0x360] sm:$0xff]  ;;  %v6018_v58 = vld [vmem:[%s10525_s5 + $0x3b0] sm:$0xff]  ;;  %v6023_v15 = vld [vmem:[%s10525_s5 + $0x3d8] sm:$0xff] }
 0x480   :  { %v3088_v7 = vpop.f32.mrb[192].mxu1  ;;  %v3245_v0 = vpop.f32.mrb[200].mxu0  ;;  %3486 = vmatprep.mubr.f32.mxu1 %v9058_v55  ;;  %6743 = vmatpush1.bf16.msra.mxu1 %v6742_v42  ;;  %v6774_v42 = vpack.c.bf16 %v6006_v12, %v6004_v10  ;;  %v6016_v12 = vld [vmem:[%s10525_s5 + $0x3a0] sm:$0xff] }
 0x481   :  { %v3332_v9 = vmax.f32 %v3318_v57, 0.0  ;;  %v3298_v6 = vmax.f32 %v3088_v7, %v3245_v0  ;;  %v3090_v5 = vpop.f32.mrb[193].mxu1  ;;  %v3247_v24 = vpop.f32.mrb[201].mxu0  ;;  %6745 = vmatprep.subr.bf16.mxu1 %v6744_v21  ;;  %v6015_v57 = vld [vmem:[%s10525_s5 + $0x398] sm:$0xff] }
 0x482   :  { %v3610_v45 = vld [vmem:[#allocation4 + $0x1] sm:$0xff]  ;;  %v6778_v24 = vpack.c.bf16 %v6010_v20, %v6008_v46 }
 0x483   :  { %3346 = vst [vmem:[#allocation4 + $0x18] sm:$0xff] %v3332_v9  ;;  %v3319_v23 = vadd.f32 %v9391_v48, %v3298_v6  ;;  %3722 = vmatmul.mubr.f32.vlgmr.msra.gmra.mrb[220].mxu0 %v3610_v45  ;;  %3487 = vmatmul.mubr.f32.gmra.mrb[218].mxu1 %v3332_v9  ;;  %v6780_v45 = vpack.c.bf16 %v6015_v57, %v6013_v27  ;;  %v9596_v27 = vld [vmem:[#allocation4 + $0x70] sm:$0xff] }
 0x484   :  { %v3093_v60 = vpop.f32.mrb[194].mxu1  ;;  %v3250_v25 = vpop.f32.mrb[202].mxu0  ;;  %3727 = vmatprep.mubr.f32.mxu0 %v9058_v55  ;;  %3492 = vmatprep.mubr.f32.mxu1 %v9058_v55 }
 0x485   :  { %v3333_v31 = vmax.f32 %v3319_v23, 0.0  ;;  %v3299_v39 = vmax.f32 %v3093_v60, %v3250_v25  ;;  %v3095_v38 = vpop.f32.mrb[195].mxu1  ;;  %v3252_v13 = vpop.f32.mrb[203].mxu0  ;;  %6747 = vmatpush1.bf16.msra.mxu1 %v6746_v22  ;;  %6767 = vmatpush1.bf16.msra.mxu0 %v6766_v17  ;;  %v6012_v22 = vld [vmem:[%s10525_s5 + $0x380] sm:$0xff]  ;;  %v6014_v17 = vld [vmem:[%s10525_s5 + $0x390] sm:$0xff]  ;;  %v6019_v23 = vld [vmem:[%s10525_s5 + $0x3b8] sm:$0xff] }
 0x486   :  { %v3611_v26 = vld [vmem:[#allocation4 + $0x9] sm:$0xff]  ;;  %6749 = vmatprep.subr.bf16.mxu1 %v6748_v19  ;;  %6769 = vmatprep.subr.bf16.mxu0 %v6768_v16  ;;  %v6760_v16 = vpack.c.bf16 %v5995_v34, %v5993_v51  ;;  %v6782_v13 = vpack.c.bf16 %v6014_v17, %v6012_v22  ;;  %v6024_v51 = vld [vmem:[%s10525_s5 + $0x3e0] sm:$0xff] }
 0x487   :  { %3347 = vst [vmem:[#allocation4 + $0x20] sm:$0xff] %v3333_v31  ;;  %v3320_v1 = vadd.f32 %v9391_v48, %v3299_v39  ;;  %3728 = vmatmul.mubr.f32.gmra.mrb[222].mxu0 %v3611_v26  ;;  %3493 = vmatmul.mubr.f32.gmra.mrb[220].mxu1 %v3333_v31  ;;  %v6017_v19 = vld [vmem:[%s10525_s5 + $0x3a8] sm:$0xff]  ;;  %v6796_v26 = vpack.c.bf16 %v6031_v3, %v6029_v37  ;;  %v6026_v34 = vld [vmem:[%s10525_s5 + $0x3f0] sm:$0xff] }
 0x488   :  { %v3098_v59 = vpop.f32.mrb[196].mxu1  ;;  %v3255_v49 = vpop.f32.mrb[204].mxu0  ;;  %3733 = vmatprep.mubr.f32.mxu0 %v9058_v55  ;;  %3498 = vmatprep.mubr.f32.mxu1 %v9058_v55  ;;  %v6784_v10 = vpack.c.bf16 %v6019_v23, %v6017_v19  ;;  %v6794_v22 = vpack.c.bf16 %v6026_v34, %v6024_v51  ;;  %v6046_v34 = vld [vmem:[%s10525_s5 + $0x490] sm:$0xff] }
 0x489   :  { %v3334_v62 = vmax.f32 %v3320_v1, 0.0  ;;  %v3300_v50 = vmax.f32 %v3098_v59, %v3255_v49  ;;  %v3100_v33 = vpop.f32.mrb[197].mxu1  ;;  %v3257_v47 = vpop.f32.mrb[205].mxu0  ;;  %6751 = vmatpush1.bf16.msra.mxu1 %v6750_v40  ;;  %6771 = vmatpush1.bf16.msra.mxu0 %v6770_v4  ;;  %v6762_v40 = vpack.c.bf16 %v5994_v11, %v5992_v53  ;;  %v6786_v49 = vpack.c.bf16 %v6018_v58, %v6016_v12  ;;  %v6035_v12 = vld [vmem:[%s10525_s5 + $0x438] sm:$0xff] }
 0x48a   :  { %v3612_v21 = vld [vmem:[#allocation4 + $0x11] sm:$0xff]  ;;  %6773 = vmatprep.subr.bf16.mxu0 %v6772_v30  ;;  %6753 = vmatprep.subr.bf16.mxu1 %v6752_v28  ;;  %v6021_v28 = vld [vmem:[%s10525_s5 + $0x3c8] sm:$0xff]  ;;  %v6020_v33 = vld [vmem:[%s10525_s5 + $0x3c0] sm:$0xff] }
 0x48b   :  { %3348 = vst [vmem:[#allocation4 + $0x28] sm:$0xff] %v3334_v62  ;;  %v3321_v41 = vadd.f32 %v9391_v48, %v3300_v50  ;;  %3734 = vmatmul.mubr.f32.gmra.mrb[224].mxu0 %v3612_v21  ;;  %3499 = vmatmul.mubr.f32.gmra.mrb[222].mxu1 %v3334_v62  ;;  %v6788_v50 = vpack.c.bf16 %v6023_v15, %v6021_v28  ;;  %v6022_v47 = vld [vmem:[%s10525_s5 + $0x3d0] sm:$0xff]  ;;  %v3890_v28 = vld [vmem:[#allocation4 + $0x2] sm:$0xff] }
 0x48c   :  { %v3103_v29 = vpop.f32.mrb[198].mxu1  ;;  %v3260_v7 = vpop.f32.mrb[206].mxu0  ;;  %3739 = vmatprep.mubr.f32.mxu0 %v9058_v55  ;;  %3504 = vmatprep.mubr.f32.mxu1 %v9058_v55  ;;  %v6790_v63 = vpack.c.bf16 %v6022_v47, %v6020_v33  ;;  %v6041_v33 = vld [vmem:[%s10525_s5 + $0x468] sm:$0xff]  ;;  %v6043_v47 = vld [vmem:[%s10525_s5 + $0x478] sm:$0xff] }
 0x48d   :  { %v3335_v0 = vmax.f32 %v3321_v41, 0.0  ;;  %v3301_v9 = vmax.f32 %v3103_v29, %v3260_v7  ;;  %v3105_v6 = vpop.f32.mrb[199].mxu1  ;;  %v3262_v5 = vpop.f32.mrb[207].mxu0  ;;  %6775 = vmatpush1.bf16.msra.mxu0 %v6774_v42  ;;  %6755 = vmatpush1.bf16.msra.mxu1 %v6754_v14  ;;  %v6025_v42 = vld [vmem:[%s10525_s5 + $0x3e8] sm:$0xff]  ;;  %v6027_v14 = vld [vmem:[%s10525_s5 + $0x3f8] sm:$0xff] }
 0x48e   :  { %v3613_v8 = vld [vmem:[#allocation4 + $0x19] sm:$0xff]  ;;  %6777 = vmatprep.subr.bf16.mxu0 %v6776_v61  ;;  %6757 = vmatprep.subr.bf16.mxu1 %v6756_v52  ;;  %v6792_v57 = vpack.c.bf16 %v6027_v14, %v6025_v42 }
 0x48f   :  { %3349 = vst [vmem:[#allocation4 + $0x30] sm:$0xff] %v3335_v0  ;;  %v3322_v54 = vadd.f32 %v9391_v48, %v3301_v9  ;;  %3740 = vmatmul.mubr.f32.gmra.mrb[226].mxu0 %v3613_v8  ;;  %3505 = vmatmul.mubr.f32.gmra.mrb[224].mxu1 %v3335_v0  ;;  %v6040_v42 = vld [vmem:[%s10525_s5 + $0x460] sm:$0xff] }
 0x490   :  { %v3108_v35 = vpop.f32.mrb[200].mxu1  ;;  %v3265_v60 = vpop.f32.mrb[208].mxu0  ;;  %3745 = vmatprep.mubr.f32.mxu0 %v9058_v55  ;;  %3510 = vmatprep.mubr.f32.mxu1 %v9058_v55 }
 0x491   :  { %v3336_v25 = vmax.f32 %v3322_v54, 0.0  ;;  %v3302_v31 = vmax.f32 %v3108_v35, %v3265_v60  ;;  %v3110_v39 = vpop.f32.mrb[201].mxu1  ;;  %v3267_v38 = vpop.f32.mrb[209].mxu0  ;;  %6779 = vmatpush1.bf16.msra.mxu0 %v6778_v24  ;;  %6759 = vmatpush1.bf16.msra.mxu1 %v6758_v32 }
 0x492   :  { %v3614_v4 = vld [vmem:[#allocation4 + $0x21] sm:$0xff]  ;;  %6781 = vmatprep.subr.bf16.mxu0 %v6780_v45  ;;  %6761 = vmatprep.subr.bf16.mxu1 %v6760_v16 }
 0x493   :  { %3350 = vst [vmem:[#allocation4 + $0x38] sm:$0xff] %v3336_v25  ;;  %v3323_v30 = vadd.f32 %v9391_v48, %v3302_v31  ;;  %3746 = vmatmul.mubr.f32.gmra.mrb[228].mxu0 %v3614_v4  ;;  %3511 = vmatmul.mubr.f32.gmra.mrb[226].mxu1 %v3336_v25  ;;  %v6028_v4 = vld [vmem:[%s10525_s5 + $0x400] sm:$0xff] }
 0x494   :  { %v3113_v43 = vpop.f32.mrb[202].mxu1  ;;  %v3270_v1 = vpop.f32.mrb[210].mxu0  ;;  %3751 = vmatprep.mubr.f32.mxu0 %v9058_v55  ;;  %3516 = vmatprep.mubr.f32.mxu1 %v9058_v55 }
 0x495   :  { %v3337_v56 = vmax.f32 %v3323_v30, 0.0  ;;  %v3303_v18 = vmax.f32 %v3113_v43, %v3270_v1  ;;  %v3115_v36 = vpop.f32.mrb[203].mxu1  ;;  %v3272_v59 = vpop.f32.mrb[211].mxu0  ;;  %6783 = vmatpush1.bf16.msra.mxu0 %v6782_v13  ;;  %6763 = vmatpush1.bf16.msra.mxu1 %v6762_v40  ;;  %v6034_v43 = vld [vmem:[%s10525_s5 + $0x430] sm:$0xff]  ;;  %v6037_v1 = vld [vmem:[%s10525_s5 + $0x448] sm:$0xff] }
 0x496   :  { %v3615_v62 = vld [vmem:[#allocation4 + $0x29] sm:$0xff]  ;;  %6785 = vmatprep.subr.bf16.mxu0 %v6784_v10  ;;  %6797 = vmatprep.subr.bf16.mxu1 %v6796_v26  ;;  %v6032_v26 = vld [vmem:[%s10525_s5 + $0x420] sm:$0xff] }
 0x497   :  { %3351 = vst [vmem:[#allocation4 + $0x40] sm:$0xff] %v3337_v56  ;;  %v3324_v55 = vadd.f32 %v9391_v48, %v3303_v18  ;;  %3752 = vmatmul.mubr.f32.gmra.mrb[230].mxu0 %v3615_v62  ;;  %3517 = vmatmul.mubr.f32.gmra.mrb[228].mxu1 %v3337_v56  ;;  %v6030_v10 = vld [vmem:[%s10525_s5 + $0x410] sm:$0xff]  ;;  %v6039_v56 = vld [vmem:[%s10525_s5 + $0x458] sm:$0xff]  ;;  %v6802_v18 = vpack.c.bf16 %v6034_v43, %v6032_v26  ;;  %v6036_v36 = vld [vmem:[%s10525_s5 + $0x440] sm:$0xff] }
 0x498   :  { %v3118_v46 = vpop.f32.mrb[204].mxu1  ;;  %v3275_v20 = vpop.f32.mrb[212].mxu0  ;;  %3757 = vmatprep.mubr.f32.mxu0 %v9596_v27  ;;  %3522 = vmatprep.mubr.f32.mxu1 %v9596_v27  ;;  %v6798_v58 = vpack.c.bf16 %v6030_v10, %v6028_v4  ;;  %v6804_v62 = vpack.c.bf16 %v6039_v56, %v6037_v1 }
 0x499   :  { %v3338_v21 = vmax.f32 %v3324_v55, 0.0  ;;  %v3304_v61 = vmax.f32 %v3118_v46, %v3275_v20  ;;  %v3120_v52 = vpop.f32.mrb[205].mxu1  ;;  %v3277_v2 = vpop.f32.mrb[213].mxu0  ;;  %6787 = vmatpush1.bf16.msra.mxu0 %v6786_v49  ;;  %v3891_v49 = vld [vmem:[#allocation4 + $0xa] sm:$0xff]  ;;  %v3892_v46 = vld [vmem:[#allocation4 + $0x12] sm:$0xff]  ;;  %v6808_v20 = vpack.c.bf16 %v6043_v47, %v6041_v33 }
 0x49a   :  { %v3616_v41 = vld [vmem:[#allocation4 + $0x31] sm:$0xff]  ;;  %6789 = vmatprep.subr.bf16.mxu0 %v6788_v50  ;;  %v4454_v33 = vld [vmem:[#allocation4 + $0x24] sm:$0xff] }
 0x49b   :  { %3352 = vst [vmem:[#allocation4 + $0x48] sm:$0xff] %v3338_v21  ;;  %v3325_v29 = vadd.f32 %v9391_v48, %v3304_v61  ;;  %3758 = vmatmul.mubr.f32.gmra.mrb[232].mxu0 %v3616_v41  ;;  %3523 = vmatmul.mubr.f32.gmra.mrb[230].mxu1 %v3338_v21  ;;  %v6038_v50 = vld [vmem:[%s10525_s5 + $0x450] sm:$0xff]  ;;  %v6045_v61 = vld [vmem:[%s10525_s5 + $0x488] sm:$0xff]  ;;  %v6047_v52 = vld [vmem:[%s10525_s5 + $0x498] sm:$0xff] }
 0x49c   :  { %v3123_v7 = vpop.f32.mrb[206].mxu1  ;;  %v3280_v0 = vpop.f32.mrb[214].mxu0  ;;  %3763 = vmatprep.mubr.f32.mxu0 %v9596_v27  ;;  %3528 = vmatprep.mubr.f32.mxu1 %v9596_v27  ;;  %v6806_v55 = vpack.c.bf16 %v6038_v50, %v6036_v36  ;;  %v6042_v21 = vld [vmem:[%s10525_s5 + $0x470] sm:$0xff]  ;;  %v4170_v41 = vld [vmem:[#allocation4 + $0x3] sm:$0xff]  ;;  %v6812_v51 = vpack.c.bf16 %v6047_v52, %v6045_v61 }
 0x49d   :  { %v3339_v9 = vmax.f32 %v3325_v29, 0.0  ;;  %v3305_v6 = vmax.f32 %v3123_v7, %v3280_v0  ;;  %v3125_v5 = vpop.f32.mrb[207].mxu1  ;;  %v3282_v24 = vpop.f32.mrb[215].mxu0  ;;  %6791 = vmatpush1.bf16.msra.mxu0 %v6790_v63  ;;  %v6810_v2 = vpack.c.bf16 %v6042_v21, %v6040_v42  ;;  %v6044_v63 = vld [vmem:[%s10525_s5 + $0x480] sm:$0xff]  ;;  %v6049_v29 = vld [vmem:[%s10525_s5 + $0x4a8] sm:$0xff]  ;;  %v6051_v7 = vld [vmem:[%s10525_s5 + $0x4b8] sm:$0xff] }
 0x49e   :  { %v3617_v17 = vld [vmem:[#allocation4 + $0x39] sm:$0xff]  ;;  %6793 = vmatprep.subr.bf16.mxu0 %v6792_v57  ;;  %v6814_v0 = vpack.c.bf16 %v6046_v34, %v6044_v63  ;;  %v3894_v5 = vld [vmem:[#allocation4 + $0x22] sm:$0xff]  ;;  %v6816_v24 = vpack.c.bf16 %v6051_v7, %v6049_v29  ;;  %v4455_v47 = vld [vmem:[#allocation4 + $0x2c] sm:$0xff] }
 0x49f   :  { %3353 = vst [vmem:[#allocation4 + $0x50] sm:$0xff] %v3339_v9  ;;  %v3326_v32 = vadd.f32 %v9391_v48, %v3305_v6  ;;  %3764 = vmatmul.mubr.f32.gmra.mrb[234].mxu0 %v3617_v17  ;;  %3529 = vmatmul.mubr.f32.gmra.mrb[232].mxu1 %v3339_v9  ;;  %v3893_v57 = vld [vmem:[#allocation4 + $0x1a] sm:$0xff]  ;;  %v4171_v6 = vld [vmem:[#allocation4 + $0xb] sm:$0xff] }
 0x4a0   :  { %v3128_v53 = vpop.f32.mrb[208].mxu1  ;;  %v3285_v8 = vpop.f32.mrb[216].mxu0  ;;  %3769 = vmatprep.mubr.f32.mxu0 %v9596_v27  ;;  %3534 = vmatprep.mubr.f32.mxu1 %v9596_v27  ;;  %v6048_v9 = vld [vmem:[%s10525_s5 + $0x4a0] sm:$0xff]  ;;  %v6053_v17 = vld [vmem:[%s10525_s5 + $0x4c8] sm:$0xff]  ;;  %v4176_v10 = vld [vmem:[#allocation4 + $0x33] sm:$0xff] }
 0x4a1   :  { %v3340_v45 = vmax.f32 %v3326_v32, 0.0  ;;  %v3306_v19 = vmax.f32 %v3128_v53, %v3285_v8  ;;  %v3130_v16 = vpop.f32.mrb[209].mxu1  ;;  %v3287_v11 = vpop.f32.mrb[217].mxu0  ;;  %6795 = vmatpush1.bf16.msra.mxu0 %v6794_v22  ;;  %v6050_v22 = vld [vmem:[%s10525_s5 + $0x4b0] sm:$0xff]  ;;  %v6055_v32 = vld [vmem:[%s10525_s5 + $0x4d8] sm:$0xff]  ;;  %v6052_v8 = vld [vmem:[%s10525_s5 + $0x4c0] sm:$0xff] }
 0x4a2   :  { %v3618_v54 = vld [vmem:[#allocation4 + $0x41] sm:$0xff]  ;;  %v6818_v53 = vpack.c.bf16 %v6050_v22, %v6048_v9  ;;  %v6820_v16 = vpack.c.bf16 %v6055_v32, %v6053_v17  ;;  %v6054_v11 = vld [vmem:[%s10525_s5 + $0x4d0] sm:$0xff] }
 0x4a3   :  { %3354 = vst [vmem:[#allocation4 + $0x58] sm:$0xff] %v3340_v45  ;;  %v3327_v23 = vadd.f32 %v9391_v48, %v3306_v19  ;;  %3770 = vmatmul.mubr.f32.gmra.mrb[236].mxu0 %v3618_v54  ;;  %3535 = vmatmul.mubr.f32.gmra.mrb[234].mxu1 %v3340_v45  ;;  %v4172_v45 = vld [vmem:[#allocation4 + $0x13] sm:$0xff]  ;;  %v3895_v19 = vld [vmem:[#allocation4 + $0x2a] sm:$0xff]  ;;  %v3898_v4 = vld [vmem:[#allocation4 + $0x42] sm:$0xff] }
 0x4a4   :  { %v3133_v37 = vpop.f32.mrb[210].mxu1  ;;  %v3290_v3 = vpop.f32.mrb[218].mxu0  ;;  %3775 = vmatprep.mubr.f32.mxu0 %v9596_v27  ;;  %3540 = vmatprep.mubr.f32.mxu1 %v9596_v27  ;;  %v6057_v54 = vld [vmem:[%s10525_s5 + $0x4e8] sm:$0xff]  ;;  %v4453_v50 = vld [vmem:[#allocation4 + $0x1c] sm:$0xff] }
 0x4a5   :  { %v3341_v35 = vmax.f32 %v3327_v23, 0.0  ;;  %v3307_v60 = vmax.f32 %v3133_v37, %v3290_v3  ;;  %v3135_v25 = vpop.f32.mrb[211].mxu1  ;;  %v3292_v31 = vpop.f32.mrb[219].mxu0  ;;  %v6059_v23 = vld [vmem:[%s10525_s5 + $0x4f8] sm:$0xff]  ;;  %v6822_v37 = vpack.c.bf16 %v6054_v11, %v6052_v8  ;;  %v6056_v3 = vld [vmem:[%s10525_s5 + $0x4e0] sm:$0xff] }
 0x4a6   :  { %v3619_v39 = vld [vmem:[#allocation4 + $0x49] sm:$0xff]  ;;  %v6824_v25 = vpack.c.bf16 %v6059_v23, %v6057_v54  ;;  %v4457_v42 = vld [vmem:[#allocation4 + $0x3c] sm:$0xff] }
 0x4a7   :  { %3355 = vst [vmem:[#allocation4 + $0x60] sm:$0xff] %v3341_v35  ;;  %v3328_v38 = vadd.f32 %v9391_v48, %v3307_v60  ;;  %3776 = vmatmul.mubr.f32.gmra.mrb[238].mxu0 %v3619_v39  ;;  %3541 = vmatmul.mubr.f32.gmra.mrb[236].mxu1 %v3341_v35  ;;  %v6033_v48 = vld [vmem:[%s10525_s5 + $0x428] sm:$0xff]  ;;  %v4173_v35 = vld [vmem:[#allocation4 + $0x1b] sm:$0xff]  ;;  %v3896_v60 = vld [vmem:[#allocation4 + $0x32] sm:$0xff] }
 0x4a8   :  { %3781 = vmatprep.mubr.f32.mxu0 %v9596_v27  ;;  %3546 = vmatprep.mubr.f32.mxu1 %v9596_v27  ;;  %v6800_v15 = vpack.c.bf16 %v6035_v12, %v6033_v48  ;;  %v6058_v31 = vld [vmem:[%s10525_s5 + $0x4f0] sm:$0xff]  ;;  %v4177_v12 = vld [vmem:[#allocation4 + $0x3b] sm:$0xff]  ;;  %v4178_v26 = vld [vmem:[#allocation4 + $0x43] sm:$0xff] }
 0x4a9   :  { %v3342_v13 = vmax.f32 %v3328_v38, 0.0  ;;  %v6826_v39 = vpack.c.bf16 %v6058_v31, %v6056_v3  ;;  %v4174_v38 = vld [vmem:[#allocation4 + $0x23] sm:$0xff] }
 0x4aa   :  { %v3620_v40 = vld [vmem:[#allocation4 + $0x51] sm:$0xff] }
 0x4ab   :  { %3356 = vst [vmem:[#allocation4 + $0x68] sm:$0xff] %v3342_v13  ;;  %3782 = vmatmul.mubr.f32.gmra.mrb[240].mxu0 %v3620_v40  ;;  %3547 = vmatmul.mubr.f32.gmra.mrb[238].mxu1 %v3342_v13  ;;  %v3897_v13 = vld [vmem:[#allocation4 + $0x3a] sm:$0xff]  ;;  %v4175_v40 = vld [vmem:[#allocation4 + $0x2b] sm:$0xff] }
 0x4ac   :  { %3787 = vmatprep.mubr.f32.mxu0 %v9596_v27  ;;  %4001 = vmatprep.mubr.f32.mxu1 %v9596_v27  ;;  %v3899_v48 = vld [vmem:[#allocation4 + $0x4a] sm:$0xff]  ;;  %v4180_v43 = vld [vmem:[#allocation4 + $0x53] sm:$0xff] }
 0x4ae   :  { %v3621_v30 = vld [vmem:[#allocation4 + $0x59] sm:$0xff] }
 0x4af   :  { %3788 = vmatmul.mubr.f32.gmra.mrb[242].mxu0 %v3621_v30  ;;  %4002 = vmatmul.mubr.f32.vlgmr.msra.gmra.mrb[240].mxu1 %v3890_v28  ;;  %v3901_v30 = vld [vmem:[#allocation4 + $0x5a] sm:$0xff]  ;;  %v4179_v28 = vld [vmem:[#allocation4 + $0x4b] sm:$0xff] }
 0x4b0   :  { %3793 = vmatprep.mubr.f32.mxu0 %v9596_v27  ;;  %4007 = vmatprep.mubr.f32.mxu1 %v9596_v27  ;;  %v4181_v56 = vld [vmem:[#allocation4 + $0x5b] sm:$0xff] }
 0x4b1   :  { %6799 = vmatpush1.bf16.msra.mxu1 %v6798_v58  ;;  %v3900_v58 = vld [vmem:[#allocation4 + $0x52] sm:$0xff]  ;;  %v4461_v21 = vld [vmem:[#allocation4 + $0x5c] sm:$0xff] }
 0x4b2   :  { %v3622_v59 = vld [vmem:[#allocation4 + $0x61] sm:$0xff]  ;;  %6801 = vmatprep.subr.bf16.mxu1 %v6800_v15  ;;  %v3623_v14 = vld [vmem:[#allocation4 + $0x69] sm:$0xff] }
 0x4b3   :  { %3794 = vmatmul.mubr.f32.gmra.mrb[244].mxu0 %v3622_v59  ;;  %4008 = vmatmul.mubr.f32.gmra.mrb[242].mxu1 %v3891_v49  ;;  %v3902_v15 = vld [vmem:[#allocation4 + $0x62] sm:$0xff]  ;;  %v3903_v1 = vld [vmem:[#allocation4 + $0x6a] sm:$0xff] }
 0x4b4   :  { %3799 = vmatprep.mubr.f32.mxu0 %v9596_v27  ;;  %4013 = vmatprep.mubr.f32.mxu1 %v9596_v27  ;;  %v4182_v36 = vld [vmem:[#allocation4 + $0x63] sm:$0xff]  ;;  %v4451_v59 = vld [vmem:[#allocation4 + $0xc] sm:$0xff] }
 0x4b5   :  { %6803 = vmatpush1.bf16.msra.mxu1 %v6802_v18  ;;  %v4450_v18 = vld [vmem:[#allocation4 + $0x4] sm:$0xff]  ;;  %v4463_v52 = vld [vmem:[#allocation4 + $0x6c] sm:$0xff] }
 0x4b6   :  { %6805 = vmatprep.subr.bf16.mxu1 %v6804_v62  ;;  %v4183_v49 = vld [vmem:[#allocation4 + $0x6b] sm:$0xff]  ;;  %v4452_v62 = vld [vmem:[#allocation4 + $0x14] sm:$0xff] }
 0x4b7   :  { %3800 = vmatmul.mubr.f32.gmra.mrb[246].mxu0 %v3623_v14  ;;  %4014 = vmatmul.mubr.f32.gmra.mrb[244].mxu1 %v3892_v46  ;;  %v4458_v14 = vld [vmem:[#allocation4 + $0x44] sm:$0xff]  ;;  %v4459_v46 = vld [vmem:[#allocation4 + $0x4c] sm:$0xff] }
 0x4b8   :  { %4281 = vmatprep.mubr.f32.mxu0 %v9596_v27  ;;  %4019 = vmatprep.mubr.f32.mxu1 %v9596_v27  ;;  %v4462_v61 = vld [vmem:[#allocation4 + $0x64] sm:$0xff] }
 0x4b9   :  { %6807 = vmatpush1.bf16.msra.mxu1 %v6806_v55  ;;  %v4456_v55 = vld [vmem:[#allocation4 + $0x34] sm:$0xff] }
 0x4ba   :  { %6809 = vmatprep.subr.bf16.mxu1 %v6808_v20  ;;  %v4460_v20 = vld [vmem:[#allocation4 + $0x54] sm:$0xff] }
 0x4bb   :  { %4282 = vmatmul.mubr.f32.vlgmr.msra.gmra.mrb[248].mxu0 %v4170_v41  ;;  %4020 = vmatmul.mubr.f32.gmra.mrb[246].mxu1 %v3893_v57 }
 0x4bc   :  { %4287 = vmatprep.mubr.f32.mxu0 %v9596_v27  ;;  %4025 = vmatprep.mubr.f32.mxu1 %v9596_v27 }
 0x4bd   :  { %6811 = vmatpush1.bf16.msra.mxu1 %v6810_v2 }
 0x4be   :  { %6813 = vmatprep.subr.bf16.mxu1 %v6812_v51 }
 0x4bf   :  { %4288 = vmatmul.mubr.f32.gmra.mrb[250].mxu0 %v4171_v6  ;;  %4026 = vmatmul.mubr.f32.gmra.mrb[248].mxu1 %v3894_v5 }
 0x4c0   :  { %4293 = vmatprep.mubr.f32.mxu0 %v9596_v27  ;;  %4031 = vmatprep.mubr.f32.mxu1 %v9596_v27 }
 0x4c1   :  { %6815 = vmatpush1.bf16.msra.mxu1 %v6814_v0 }
 0x4c2   :  { %6817 = vmatprep.subr.bf16.mxu1 %v6816_v24 }
 0x4c3   :  { %4294 = vmatmul.mubr.f32.gmra.mrb[252].mxu0 %v4172_v45  ;;  %4032 = vmatmul.mubr.f32.gmra.mrb[250].mxu1 %v3895_v19 }
 0x4c4   :  { %4299 = vmatprep.mubr.f32.mxu0 %v9596_v27  ;;  %4037 = vmatprep.mubr.f32.mxu1 %v9596_v27 }
 0x4c5   :  { %6819 = vmatpush1.bf16.msra.mxu1 %v6818_v53 }
 0x4c6   :  { %6821 = vmatprep.subr.bf16.mxu1 %v6820_v16 }
 0x4c7   :  { %4300 = vmatmul.mubr.f32.gmra.mrb[254].mxu0 %v4173_v35  ;;  %4038 = vmatmul.mubr.f32.gmra.mrb[252].mxu1 %v3896_v60 }
 0x4c8   :  { %4305 = vmatprep.mubr.f32.mxu0 %v9596_v27  ;;  %4043 = vmatprep.mubr.f32.mxu1 %v9596_v27 }
 0x4c9   :  { %6823 = vmatpush1.bf16.msra.mxu1 %v6822_v37 }
 0x4ca   :  { %6825 = vmatprep.subr.bf16.mxu1 %v6824_v25 }
 0x4cb   :  { %4306 = vmatmul.mubr.f32.gmra.mrb[0].mxu0 %v4174_v38  ;;  %4044 = vmatmul.mubr.f32.gmra.mrb[254].mxu1 %v3897_v13 }
 0x4cc   :  { %4311 = vmatprep.mubr.f32.mxu0 %v9596_v27  ;;  %4049 = vmatprep.mubr.f32.mxu1 %v9596_v27 }
 0x4cd   :  { %6827 = vmatpush1.bf16.msra.mxu1 %v6826_v39 }
 0x4ce   :  { %6884 = vmatprep.subr.bf16.mxu1 %v7077_v44 }
 0x4cf   :  { %4312 = vmatmul.mubr.f32.gmra.mrb[2].mxu0 %v4175_v40  ;;  %4050 = vmatmul.mubr.f32.gmra.mrb[0].mxu1 %v3898_v4 }
 0x4d0   :  { %4317 = vmatprep.mubr.f32.mxu0 %v9596_v27  ;;  %4055 = vmatprep.mubr.f32.mxu1 %v9596_v27 }
 0x4d3   :  { %4318 = vmatmul.mubr.f32.gmra.mrb[4].mxu0 %v4176_v10  ;;  %4056 = vmatmul.mubr.f32.gmra.mrb[2].mxu1 %v3899_v48 }
 0x4d4   :  { %4323 = vmatprep.mubr.f32.mxu0 %v9596_v27  ;;  %4061 = vmatprep.mubr.f32.mxu1 %v9596_v27 }
 0x4d7   :  { %4324 = vmatmul.mubr.f32.gmra.mrb[6].mxu0 %v4177_v12  ;;  %4062 = vmatmul.mubr.f32.gmra.mrb[4].mxu1 %v3900_v58 }
 0x4d8   :  { %4329 = vmatprep.mubr.f32.mxu0 %v9596_v27  ;;  %4067 = vmatprep.mubr.f32.mxu1 %v9596_v27 }
 0x4db   :  { %4330 = vmatmul.mubr.f32.gmra.mrb[8].mxu0 %v4178_v26  ;;  %4068 = vmatmul.mubr.f32.gmra.mrb[6].mxu1 %v3901_v30 }
 0x4dc   :  { %4335 = vmatprep.mubr.f32.mxu0 %v9596_v27  ;;  %4073 = vmatprep.mubr.f32.mxu1 %v9596_v27 }
 0x4df   :  { %4336 = vmatmul.mubr.f32.gmra.mrb[10].mxu0 %v4179_v28  ;;  %4074 = vmatmul.mubr.f32.gmra.mrb[8].mxu1 %v3902_v15 }
 0x4e0   :  { %4341 = vmatprep.mubr.f32.mxu0 %v9596_v27  ;;  %4079 = vmatprep.mubr.f32.mxu1 %v9596_v27 }
 0x4e3   :  { %4342 = vmatmul.mubr.f32.gmra.mrb[12].mxu0 %v4180_v43  ;;  %4080 = vmatmul.mubr.f32.gmra.mrb[10].mxu1 %v3903_v1 }
 0x4e4   :  { %4347 = vmatprep.mubr.f32.mxu0 %v9596_v27  ;;  %4561 = vmatprep.mubr.f32.mxu1 %v9596_v27 }
 0x4e7   :  { %4348 = vmatmul.mubr.f32.gmra.mrb[14].mxu0 %v4181_v56  ;;  %4562 = vmatmul.mubr.f32.vlgmr.msra.gmra.mrb[12].mxu1 %v4450_v18 }
 0x4e8   :  { %4353 = vmatprep.mubr.f32.mxu0 %v9596_v27  ;;  %4567 = vmatprep.mubr.f32.mxu1 %v9596_v27 }
 0x4eb   :  { %4354 = vmatmul.mubr.f32.gmra.mrb[16].mxu0 %v4182_v36  ;;  %4568 = vmatmul.mubr.f32.gmra.mrb[14].mxu1 %v4451_v59 }
 0x4ec   :  { %4359 = vmatprep.mubr.f32.mxu0 %v9596_v27  ;;  %4573 = vmatprep.mubr.f32.mxu1 %v9596_v27 }
 0x4ef   :  { %4360 = vmatmul.mubr.f32.gmra.mrb[18].mxu0 %v4183_v49  ;;  %4574 = vmatmul.mubr.f32.gmra.mrb[16].mxu1 %v4452_v62 }
 0x4f0   :  { %4579 = vmatprep.mubr.f32.mxu1 %v9596_v27  ;;  %4815 = vmatprep.mubr.f32.mxu0 %v9596_v27 }
 0x4f3   :  { %4580 = vmatmul.mubr.f32.gmra.mrb[18].mxu1 %v4453_v50 }
 0x4f4   :  { %4585 = vmatprep.mubr.f32.mxu1 %v9596_v27 }
 0x4f7   :  { %4586 = vmatmul.mubr.f32.gmra.mrb[20].mxu1 %v4454_v33 }
 0x4f8   :  { %4591 = vmatprep.mubr.f32.mxu1 %v9596_v27 }
 0x4fb   :  { %4592 = vmatmul.mubr.f32.gmra.mrb[22].mxu1 %v4455_v47 }
 0x4fc   :  { %4597 = vmatprep.mubr.f32.mxu1 %v9596_v27 }
 0x4ff   :  { %4598 = vmatmul.mubr.f32.gmra.mrb[24].mxu1 %v4456_v55 }
 0x500   :  { %4603 = vmatprep.mubr.f32.mxu1 %v9596_v27 }
 0x503   :  { %4604 = vmatmul.mubr.f32.gmra.mrb[26].mxu1 %v4457_v42 }
 0x504   :  { %4609 = vmatprep.mubr.f32.mxu1 %v9596_v27 }
 0x507   :  { %4610 = vmatmul.mubr.f32.gmra.mrb[28].mxu1 %v4458_v14 }
 0x508   :  { %4615 = vmatprep.mubr.f32.mxu1 %v9596_v27 }
 0x50b   :  { %4616 = vmatmul.mubr.f32.gmra.mrb[30].mxu1 %v4459_v46 }
 0x50c   :  { %4621 = vmatprep.mubr.f32.mxu1 %v9596_v27 }
 0x50f   :  { %4622 = vmatmul.mubr.f32.gmra.mrb[32].mxu1 %v4460_v20 }
 0x510   :  { %4627 = vmatprep.mubr.f32.mxu1 %v9596_v27 }
 0x513   :  { %4628 = vmatmul.mubr.f32.gmra.mrb[34].mxu1 %v4461_v21 }
 0x514   :  { %4633 = vmatprep.mubr.f32.mxu1 %v9596_v27 }
 0x517   :  { %4634 = vmatmul.mubr.f32.gmra.mrb[36].mxu1 %v4462_v61 }
 0x518   :  { %4639 = vmatprep.mubr.f32.mxu1 %v9596_v27 }
 0x51b   :  { %4640 = vmatmul.mubr.f32.gmra.mrb[38].mxu1 %v4463_v52 }
 0x54a   :  { %v3470_v2 = vpop.f32.mrb[212].mxu1 }
 0x54b   :  { %v3472_v63 = vpop.f32.mrb[213].mxu1 }
 0x54c   :  { %3555 = vst.msk [vmem:[#allocation3 + $0x8] sm:$0xff] %vm3554_vm1, %v3472_v63 }
 0x54e   :  { %v3476_v41 = vpop.f32.mrb[214].mxu1 }
 0x54f   :  { %v3478_v57 = vpop.f32.mrb[215].mxu1 }
 0x550   :  { %3557 = vst.msk [vmem:[#allocation3 + $0x18] sm:$0xff] %vm3554_vm1, %v3478_v57 }
 0x552   :  { %v3482_v51 = vpop.f32.mrb[216].mxu1 }
 0x553   :  { %v3484_v34 = vpop.f32.mrb[217].mxu1  ;;  %v3583_v27 = vld [vmem:[#allocation3 + $0x8] sm:$0xff] }
 0x554   :  { %3559 = vst.msk [vmem:[#allocation3 + $0x28] sm:$0xff] %vm3554_vm1, %v3484_v34 }
 0x556   :  { %v3723_v29 = vpop.f32.mrb[220].mxu0  ;;  %v3488_v7 = vpop.f32.mrb[218].mxu1 }
 0x557   :  { %v9758_v0 = vadd.f32 %v3723_v29, %v3470_v2  ;;  %v3725_v9 = vpop.f32.mrb[221].mxu0  ;;  %v3490_v6 = vpop.f32.mrb[219].mxu1  ;;  %v3585_v32 = vld [vmem:[#allocation3 + $0x18] sm:$0xff] }
 0x558   :  { %v3807_v5 = vadd.f32 %v3725_v9, %v3583_v27  ;;  %3561 = vst.msk [vmem:[#allocation3 + $0x38] sm:$0xff] %vm3554_vm1, %v3490_v6 }
 0x55a   :  { %3835 = vst.msk [vmem:[#allocation3 + $0x8] sm:$0xff] %vm3554_vm1, %v3807_v5  ;;  %v3729_v24 = vpop.f32.mrb[222].mxu0  ;;  %v3494_v22 = vpop.f32.mrb[220].mxu1 }
 0x55b   :  { %v9762_v17 = vadd.f32 %v3729_v24, %v3476_v41  ;;  %v3731_v53 = vpop.f32.mrb[223].mxu0  ;;  %v3496_v8 = vpop.f32.mrb[221].mxu1  ;;  %v3587_v54 = vld [vmem:[#allocation3 + $0x28] sm:$0xff] }
 0x55c   :  { %v3809_v45 = vadd.f32 %v3731_v53, %v3585_v32  ;;  %3563 = vst.msk [vmem:[#allocation3 + $0x48] sm:$0xff] %vm3554_vm1, %v3496_v8 }
 0x55e   :  { %3837 = vst.msk [vmem:[#allocation3 + $0x18] sm:$0xff] %vm3554_vm1, %v3809_v45  ;;  %v3735_v19 = vpop.f32.mrb[224].mxu0  ;;  %v3500_v16 = vpop.f32.mrb[222].mxu1 }
 0x55f   :  { %v9766_v11 = vadd.f32 %v3735_v19, %v3482_v51  ;;  %v3737_v23 = vpop.f32.mrb[225].mxu0  ;;  %v3502_v37 = vpop.f32.mrb[223].mxu1  ;;  %v3589_v31 = vld [vmem:[#allocation3 + $0x38] sm:$0xff] }
 0x560   :  { %v3811_v3 = vadd.f32 %v3737_v23, %v3587_v54  ;;  %3565 = vst.msk [vmem:[#allocation3 + $0x58] sm:$0xff] %vm3554_vm1, %v3502_v37 }
 0x562   :  { %3839 = vst.msk [vmem:[#allocation3 + $0x28] sm:$0xff] %vm3554_vm1, %v3811_v3  ;;  %v3741_v35 = vpop.f32.mrb[226].mxu0  ;;  %v3506_v60 = vpop.f32.mrb[224].mxu1 }
 0x563   :  { %v9770_v25 = vadd.f32 %v3741_v35, %v3488_v7  ;;  %v3743_v39 = vpop.f32.mrb[227].mxu0  ;;  %v3508_v38 = vpop.f32.mrb[225].mxu1  ;;  %v3591_v48 = vld [vmem:[#allocation3 + $0x48] sm:$0xff] }
 0x564   :  { %v3813_v13 = vadd.f32 %v3743_v39, %v3589_v31  ;;  %3567 = vst.msk [vmem:[#allocation3 + $0x68] sm:$0xff] %vm3554_vm1, %v3508_v38  ;;  %v3863_v31 = vld [vmem:[#allocation3 + $0x8] sm:$0xff] }
 0x566   :  { %3841 = vst.msk [vmem:[#allocation3 + $0x38] sm:$0xff] %vm3554_vm1, %v3813_v13  ;;  %v3747_v40 = vpop.f32.mrb[228].mxu0  ;;  %v3512_v4 = vpop.f32.mrb[226].mxu1 }
 0x567   :  { %v9774_v10 = vadd.f32 %v3747_v40, %v3494_v22  ;;  %v3749_v12 = vpop.f32.mrb[229].mxu0  ;;  %v3514_v58 = vpop.f32.mrb[227].mxu1  ;;  %v3593_v43 = vld [vmem:[#allocation3 + $0x58] sm:$0xff] }
 0x568   :  { %v3815_v26 = vadd.f32 %v3749_v12, %v3591_v48  ;;  %3569 = vst.msk [vmem:[#allocation3 + $0x78] sm:$0xff] %vm3554_vm1, %v3514_v58 }
 0x56a   :  { %3843 = vst.msk [vmem:[#allocation3 + $0x48] sm:$0xff] %vm3554_vm1, %v3815_v26  ;;  %v3753_v30 = vpop.f32.mrb[230].mxu0  ;;  %v3518_v28 = vpop.f32.mrb[228].mxu1 }
 0x56b   :  { %v9778_v15 = vadd.f32 %v3753_v30, %v3500_v16  ;;  %v3755_v1 = vpop.f32.mrb[231].mxu0  ;;  %v3520_v56 = vpop.f32.mrb[229].mxu1  ;;  %v3595_v62 = vld [vmem:[#allocation3 + $0x68] sm:$0xff]  ;;  %v3865_v30 = vld [vmem:[#allocation3 + $0x18] sm:$0xff] }
 0x56c   :  { %v3817_v18 = vadd.f32 %v3755_v1, %v3593_v43  ;;  %3571 = vst.msk [vmem:[#allocation3 + $0x88] sm:$0xff] %vm3554_vm1, %v3520_v56 }
 0x56e   :  { %3845 = vst.msk [vmem:[#allocation3 + $0x58] sm:$0xff] %vm3554_vm1, %v3817_v18  ;;  %v3759_v36 = vpop.f32.mrb[232].mxu0  ;;  %v3524_v59 = vpop.f32.mrb[230].mxu1 }
 0x56f   :  { %v9782_v49 = vadd.f32 %v3759_v36, %v3506_v60  ;;  %v3761_v50 = vpop.f32.mrb[233].mxu0  ;;  %v3526_v33 = vpop.f32.mrb[231].mxu1  ;;  %v3597_v46 = vld [vmem:[#allocation3 + $0x78] sm:$0xff] }
 0x570   :  { %v3819_v47 = vadd.f32 %v3761_v50, %v3595_v62  ;;  %3573 = vst.msk [vmem:[#allocation3 + $0x98] sm:$0xff] %vm3554_vm1, %v3526_v33  ;;  %v3867_v50 = vld [vmem:[#allocation3 + $0x28] sm:$0xff] }
 0x572   :  { %3847 = vst.msk [vmem:[#allocation3 + $0x68] sm:$0xff] %vm3554_vm1, %v3819_v47  ;;  %v3765_v55 = vpop.f32.mrb[234].mxu0  ;;  %v3530_v42 = vpop.f32.mrb[232].mxu1 }
 0x573   :  { %v9786_v14 = vadd.f32 %v3765_v55, %v3512_v4  ;;  %v3767_v20 = vpop.f32.mrb[235].mxu0  ;;  %v3532_v21 = vpop.f32.mrb[233].mxu1  ;;  %v3599_v41 = vld [vmem:[#allocation3 + $0x88] sm:$0xff] }
 0x574   :  { %v3821_v61 = vadd.f32 %v3767_v20, %v3597_v46  ;;  %3575 = vst.msk [vmem:[#allocation3 + $0xa8] sm:$0xff] %vm3554_vm1, %v3532_v21 }
 0x576   :  { %3849 = vst.msk [vmem:[#allocation3 + $0x78] sm:$0xff] %vm3554_vm1, %v3821_v61  ;;  %v3771_v52 = vpop.f32.mrb[236].mxu0  ;;  %v3536_v2 = vpop.f32.mrb[234].mxu1 }
 0x577   :  { %v9790_v63 = vadd.f32 %v3771_v52, %v3518_v28  ;;  %v3773_v57 = vpop.f32.mrb[237].mxu0  ;;  %v3538_v51 = vpop.f32.mrb[235].mxu1  ;;  %v3601_v9 = vld [vmem:[#allocation3 + $0x98] sm:$0xff] }
 0x578   :  { %v3823_v34 = vadd.f32 %v3773_v57, %v3599_v41  ;;  %3577 = vst.msk [vmem:[#allocation3 + $0xb8] sm:$0xff] %vm3554_vm1, %v3538_v51  ;;  %v3869_v52 = vld [vmem:[#allocation3 + $0x38] sm:$0xff] }
 0x57a   :  { %3851 = vst.msk [vmem:[#allocation3 + $0x88] sm:$0xff] %vm3554_vm1, %v3823_v34  ;;  %v3777_v29 = vpop.f32.mrb[238].mxu0  ;;  %v3542_v7 = vpop.f32.mrb[236].mxu1 }
 0x57b   :  { %v9794_v27 = vadd.f32 %v3777_v29, %v3524_v59  ;;  %v3779_v6 = vpop.f32.mrb[239].mxu0  ;;  %v3544_v5 = vpop.f32.mrb[237].mxu1  ;;  %v3603_v8 = vld [vmem:[#allocation3 + $0xa8] sm:$0xff] }
 0x57c   :  { %v3825_v24 = vadd.f32 %v3779_v6, %v3601_v9  ;;  %3579 = vst.msk [vmem:[#allocation3 + $0xc8] sm:$0xff] %vm3554_vm1, %v3544_v5  ;;  %v3871_v6 = vld [vmem:[#allocation3 + $0x48] sm:$0xff] }
 0x57e   :  { %3853 = vst.msk [vmem:[#allocation3 + $0x98] sm:$0xff] %vm3554_vm1, %v3825_v24  ;;  %v3783_v22 = vpop.f32.mrb[240].mxu0  ;;  %v3548_v32 = vpop.f32.mrb[238].mxu1 }
 0x57f   :  { %v9798_v53 = vadd.f32 %v3783_v22, %v3530_v42  ;;  %v3785_v45 = vpop.f32.mrb[241].mxu0  ;;  %v3550_v19 = vpop.f32.mrb[239].mxu1  ;;  %v3605_v3 = vld [vmem:[#allocation3 + $0xb8] sm:$0xff] }
 0x580   :  { %v3827_v16 = vadd.f32 %v3785_v45, %v3603_v8  ;;  %3581 = vst.msk [vmem:[#allocation3 + $0xd8] sm:$0xff] %vm3554_vm1, %v3550_v19 }
 0x582   :  { %3855 = vst.msk [vmem:[#allocation3 + $0xa8] sm:$0xff] %vm3554_vm1, %v3827_v16  ;;  %v3789_v54 = vpop.f32.mrb[242].mxu0  ;;  %v4003_v23 = vpop.f32.mrb[240].mxu1 }
 0x583   :  { %v9802_v37 = vadd.f32 %v3789_v54, %v3536_v2  ;;  %v3791_v35 = vpop.f32.mrb[243].mxu0  ;;  %v4086_v60 = vadd.f32 %v4003_v23, %v9758_v0  ;;  %v4005_v39 = vpop.f32.mrb[241].mxu1  ;;  %v3607_v12 = vld [vmem:[#allocation3 + $0xc8] sm:$0xff]  ;;  %v3873_v54 = vld [vmem:[#allocation3 + $0x58] sm:$0xff] }
 0x584   :  { %v3829_v38 = vadd.f32 %v3791_v35, %v3605_v3  ;;  %v4087_v13 = vadd.f32 %v4005_v39, %v3863_v31 }
 0x586   :  { %3857 = vst.msk [vmem:[#allocation3 + $0xb8] sm:$0xff] %vm3554_vm1, %v3829_v38  ;;  %v3795_v40 = vpop.f32.mrb[244].mxu0  ;;  %4115 = vst.msk [vmem:[#allocation3 + $0x8] sm:$0xff] %vm3554_vm1, %v4087_v13  ;;  %v4009_v4 = vpop.f32.mrb[242].mxu1 }
 0x587   :  { %v9807_v48 = vadd.f32 %v3795_v40, %v3542_v7  ;;  %v3797_v58 = vpop.f32.mrb[245].mxu0  ;;  %v4088_v26 = vadd.f32 %v4009_v4, %v9762_v17  ;;  %v4011_v28 = vpop.f32.mrb[243].mxu1  ;;  %v3609_v36 = vld [vmem:[#allocation3 + $0xd8] sm:$0xff]  ;;  %v3875_v40 = vld [vmem:[#allocation3 + $0x68] sm:$0xff] }
 0x588   :  { %v3831_v43 = vadd.f32 %v3797_v58, %v3607_v12  ;;  %v4089_v0 = vadd.f32 %v4011_v28, %v3865_v30 }
 0x58a   :  { %3859 = vst.msk [vmem:[#allocation3 + $0xc8] sm:$0xff] %vm3554_vm1, %v3831_v43  ;;  %v3801_v1 = vpop.f32.mrb[246].mxu0  ;;  %4117 = vst.msk [vmem:[#allocation3 + $0x18] sm:$0xff] %vm3554_vm1, %v4089_v0  ;;  %v4015_v56 = vpop.f32.mrb[244].mxu1 }
 0x58b   :  { %v9812_v18 = vadd.f32 %v3801_v1, %v3548_v32  ;;  %v3803_v59 = vpop.f32.mrb[247].mxu0  ;;  %v4090_v62 = vadd.f32 %v4015_v56, %v9766_v11  ;;  %v4017_v33 = vpop.f32.mrb[245].mxu1  ;;  %v3877_v1 = vld [vmem:[#allocation3 + $0x78] sm:$0xff] }
 0x58c   :  { %v3833_v47 = vadd.f32 %v3803_v59, %v3609_v36  ;;  %v4091_v17 = vadd.f32 %v4017_v33, %v3867_v50 }
 0x58d   :  { %v4143_v20 = vld [vmem:[#allocation3 + $0x8] sm:$0xff] }
 0x58e   :  { %3861 = vst.msk [vmem:[#allocation3 + $0xd8] sm:$0xff] %vm3554_vm1, %v3833_v47  ;;  %v4283_v55 = vpop.f32.mrb[248].mxu0  ;;  %4119 = vst.msk [vmem:[#allocation3 + $0x28] sm:$0xff] %vm3554_vm1, %v4091_v17  ;;  %v4021_v42 = vpop.f32.mrb[246].mxu1 }
 0x58f   :  { %v9817_v46 = vadd.f32 %v4283_v55, %v4086_v60  ;;  %v4285_v21 = vpop.f32.mrb[249].mxu0  ;;  %v4092_v61 = vadd.f32 %v4021_v42, %v9770_v25  ;;  %v4023_v2 = vpop.f32.mrb[247].mxu1  ;;  %v3879_v55 = vld [vmem:[#allocation3 + $0x88] sm:$0xff] }
 0x590   :  { %v4367_v41 = vadd.f32 %v4285_v21, %v4143_v20  ;;  %v4093_v11 = vadd.f32 %v4023_v2, %v3869_v52 }
 0x591   :  { %v4145_v29 = vld [vmem:[#allocation3 + $0x18] sm:$0xff] }
 0x592   :  { %4395 = vst.msk [vmem:[#allocation3 + $0x8] sm:$0xff] %vm3554_vm1, %v4367_v41  ;;  %v4289_v57 = vpop.f32.mrb[250].mxu0  ;;  %4121 = vst.msk [vmem:[#allocation3 + $0x38] sm:$0xff] %vm3554_vm1, %v4093_v11  ;;  %v4027_v51 = vpop.f32.mrb[248].mxu1 }
 0x593   :  { %v9822_v34 = vadd.f32 %v4289_v57, %v4088_v26  ;;  %v4291_v7 = vpop.f32.mrb[251].mxu0  ;;  %v4094_v9 = vadd.f32 %v4027_v51, %v9774_v10  ;;  %v4029_v5 = vpop.f32.mrb[249].mxu1  ;;  %v3881_v57 = vld [vmem:[#allocation3 + $0x98] sm:$0xff] }
 0x594   :  { %v4369_v24 = vadd.f32 %v4291_v7, %v4145_v29  ;;  %v4095_v25 = vadd.f32 %v4029_v5, %v3871_v6 }
 0x595   :  { %v4147_v45 = vld [vmem:[#allocation3 + $0x28] sm:$0xff] }
 0x596   :  { %4397 = vst.msk [vmem:[#allocation3 + $0x18] sm:$0xff] %vm3554_vm1, %v4369_v24  ;;  %v4295_v22 = vpop.f32.mrb[252].mxu0  ;;  %4123 = vst.msk [vmem:[#allocation3 + $0x48] sm:$0xff] %vm3554_vm1, %v4095_v25  ;;  %v4033_v32 = vpop.f32.mrb[250].mxu1 }
 0x597   :  { %v9827_v8 = vadd.f32 %v4295_v22, %v4090_v62  ;;  %v4297_v19 = vpop.f32.mrb[253].mxu0  ;;  %v4096_v16 = vadd.f32 %v4033_v32, %v9778_v15  ;;  %v4035_v23 = vpop.f32.mrb[251].mxu1  ;;  %v3883_v22 = vld [vmem:[#allocation3 + $0xa8] sm:$0xff] }
 0x598   :  { %v4371_v3 = vadd.f32 %v4297_v19, %v4147_v45  ;;  %v4097_v10 = vadd.f32 %v4035_v23, %v3873_v54  ;;  %v4972_v19 = vld [vmem:[%s10527_s8] sm:$0xff]  ;;  %v4973_v23 = vld [vmem:[%s10527_s8 + $0x8] sm:$0xff] }
 0x599   :  { %v4149_v39 = vld [vmem:[#allocation3 + $0x38] sm:$0xff] }
 0x59a   :  { %4399 = vst.msk [vmem:[#allocation3 + $0x28] sm:$0xff] %vm3554_vm1, %v4371_v3  ;;  %v4301_v35 = vpop.f32.mrb[254].mxu0  ;;  %4125 = vst.msk [vmem:[#allocation3 + $0x58] sm:$0xff] %vm3554_vm1, %v4097_v10  ;;  %v4039_v60 = vpop.f32.mrb[252].mxu1  ;;  %v4975_v3 = vld [vmem:[%s10527_s8 + $0x18] sm:$0xff] }
 0x59b   :  { %v9832_v31 = vadd.f32 %v4301_v35, %v4092_v61  ;;  %v4303_v38 = vpop.f32.mrb[255].mxu0  ;;  %v4098_v13 = vadd.f32 %v4039_v60, %v9782_v49  ;;  %v4041_v4 = vpop.f32.mrb[253].mxu1 }
 0x59c   :  { %v4373_v12 = vadd.f32 %v4303_v38, %v4149_v39  ;;  %v4099_v15 = vadd.f32 %v4041_v4, %v3875_v40  ;;  %v3885_v38 = vld [vmem:[#allocation3 + $0xb8] sm:$0xff]  ;;  %v6885_v40 = vpack.c.bf16 %v4973_v23, %v4972_v19 }
 0x59d   :  { %v4151_v28 = vld [vmem:[#allocation3 + $0x48] sm:$0xff] }
 0x59e   :  { %4401 = vst.msk [vmem:[#allocation3 + $0x38] sm:$0xff] %vm3554_vm1, %v4373_v12  ;;  %v4307_v58 = vpop.f32.mrb[0].mxu0  ;;  %4127 = vst.msk [vmem:[#allocation3 + $0x68] sm:$0xff] %vm3554_vm1, %v4099_v15  ;;  %v4045_v26 = vpop.f32.mrb[254].mxu1  ;;  %6886 = vmatpush1.bf16.msra.mxu1 %v6885_v40 }
 0x59f   :  { %v9837_v30 = vadd.f32 %v4307_v58, %v4094_v9  ;;  %v4309_v43 = vpop.f32.mrb[1].mxu0  ;;  %v4100_v0 = vadd.f32 %v4045_v26, %v9786_v14  ;;  %v4047_v56 = vpop.f32.mrb[255].mxu1  ;;  %6887 = vmatprep.subr.bf16.mxu1 %v7077_v44 }
 0x5a0   :  { %v4375_v36 = vadd.f32 %v4309_v43, %v4151_v28  ;;  %v4101_v49 = vadd.f32 %v4047_v56, %v3877_v1  ;;  %v4976_v28 = vld [vmem:[%s10527_s8 + $0x20] sm:$0xff] }
 0x5a1   :  { %v4153_v33 = vld [vmem:[#allocation3 + $0x58] sm:$0xff] }
 0x5a2   :  { %4403 = vst.msk [vmem:[#allocation3 + $0x48] sm:$0xff] %vm3554_vm1, %v4375_v36  ;;  %v4313_v59 = vpop.f32.mrb[2].mxu0  ;;  %4129 = vst.msk [vmem:[#allocation3 + $0x78] sm:$0xff] %vm3554_vm1, %v4101_v49  ;;  %v4051_v62 = vpop.f32.mrb[0].mxu1  ;;  %v3887_v36 = vld [vmem:[#allocation3 + $0xc8] sm:$0xff] }
 0x5a3   :  { %v9842_v50 = vadd.f32 %v4313_v59, %v4096_v16  ;;  %v4315_v47 = vpop.f32.mrb[3].mxu0  ;;  %v4102_v17 = vadd.f32 %v4051_v62, %v9790_v63  ;;  %v4053_v42 = vpop.f32.mrb[1].mxu1 }
 0x5a4   :  { %v4377_v20 = vadd.f32 %v4315_v47, %v4153_v33  ;;  %v4103_v14 = vadd.f32 %v4053_v42, %v3879_v55  ;;  %v4978_v55 = vld [vmem:[%s10527_s8 + $0x30] sm:$0xff] }
 0x5a5   :  { %v4155_v2 = vld [vmem:[#allocation3 + $0x68] sm:$0xff] }
 0x5a6   :  { %4405 = vst.msk [vmem:[#allocation3 + $0x58] sm:$0xff] %vm3554_vm1, %v4377_v20  ;;  %v4319_v21 = vpop.f32.mrb[4].mxu0  ;;  %4131 = vst.msk [vmem:[#allocation3 + $0x88] sm:$0xff] %vm3554_vm1, %v4103_v14  ;;  %v4057_v61 = vpop.f32.mrb[2].mxu1 }
 0x5a7   :  { %v9847_v52 = vadd.f32 %v4319_v21, %v4098_v13  ;;  %v4321_v41 = vpop.f32.mrb[5].mxu0  ;;  %v4104_v11 = vadd.f32 %v4057_v61, %v9794_v27  ;;  %v4059_v51 = vpop.f32.mrb[3].mxu1  ;;  %v3889_v61 = vld [vmem:[#allocation3 + $0xd8] sm:$0xff] }
 0x5a8   :  { %v4379_v29 = vadd.f32 %v4321_v41, %v4155_v2  ;;  %v4105_v63 = vadd.f32 %v4059_v51, %v3881_v57 }
 0x5a9   :  { %v4157_v5 = vld [vmem:[#allocation3 + $0x78] sm:$0xff] }
 0x5aa   :  { %4407 = vst.msk [vmem:[#allocation3 + $0x68] sm:$0xff] %vm3554_vm1, %v4379_v29  ;;  %v4325_v7 = vpop.f32.mrb[6].mxu0  ;;  %4133 = vst.msk [vmem:[#allocation3 + $0x98] sm:$0xff] %vm3554_vm1, %v4105_v63  ;;  %v4063_v9 = vpop.f32.mrb[4].mxu1 }
 0x5ab   :  { %v9852_v6 = vadd.f32 %v4325_v7, %v4100_v0  ;;  %v4327_v24 = vpop.f32.mrb[7].mxu0  ;;  %v4106_v25 = vadd.f32 %v4063_v9, %v9798_v53  ;;  %v4065_v32 = vpop.f32.mrb[5].mxu1  ;;  %v4974_v53 = vld [vmem:[%s10527_s8 + $0x10] sm:$0xff] }
 0x5ac   :  { %v4381_v45 = vadd.f32 %v4327_v24, %v4157_v5  ;;  %v4107_v27 = vadd.f32 %v4065_v32, %v3883_v22  ;;  %v6888_v15 = vpack.c.bf16 %v4975_v3, %v4974_v53  ;;  %v4423_v5 = vld [vmem:[#allocation3 + $0x8] sm:$0xff] }
 0x5ad   :  { %v4159_v35 = vld [vmem:[#allocation3 + $0x88] sm:$0xff] }
 0x5ae   :  { %4409 = vst.msk [vmem:[#allocation3 + $0x78] sm:$0xff] %vm3554_vm1, %v4381_v45  ;;  %v4331_v16 = vpop.f32.mrb[8].mxu0  ;;  %4135 = vst.msk [vmem:[#allocation3 + $0xa8] sm:$0xff] %vm3554_vm1, %v4107_v27  ;;  %v4069_v54 = vpop.f32.mrb[6].mxu1  ;;  %6889 = vmatpush1.bf16.msra.mxu1 %v6888_v15 }
 0x5af   :  { %v9869_v10 = vadd.f32 %v4331_v16, %v4102_v17  ;;  %v4333_v60 = vpop.f32.mrb[9].mxu0  ;;  %v4108_v39 = vadd.f32 %v4069_v54, %v9802_v37  ;;  %v4071_v13 = vpop.f32.mrb[7].mxu1  ;;  %v4977_v37 = vld [vmem:[%s10527_s8 + $0x28] sm:$0xff]  ;;  %6890 = vmatprep.subr.bf16.mxu1 %v7077_v44 }
 0x5b0   :  { %v4383_v4 = vadd.f32 %v4333_v60, %v4159_v35  ;;  %v4109_v12 = vadd.f32 %v4071_v13, %v3885_v38  ;;  %v6891_v33 = vpack.c.bf16 %v4977_v37, %v4976_v28  ;;  %v4429_v37 = vld [vmem:[#allocation3 + $0x38] sm:$0xff] }
 0x5b1   :  { %v4161_v0 = vld [vmem:[#allocation3 + $0x98] sm:$0xff] }
 0x5b2   :  { %4411 = vst.msk [vmem:[#allocation3 + $0x88] sm:$0xff] %vm3554_vm1, %v4383_v4  ;;  %v4337_v58 = vpop.f32.mrb[10].mxu0  ;;  %4137 = vst.msk [vmem:[#allocation3 + $0xb8] sm:$0xff] %vm3554_vm1, %v4109_v12  ;;  %v4075_v26 = vpop.f32.mrb[8].mxu1  ;;  %6892 = vmatpush1.bf16.msra.mxu1 %v6891_v33  ;;  %v4427_v12 = vld [vmem:[#allocation3 + $0x28] sm:$0xff] }
 0x5b3   :  { %v9881_v43 = vadd.f32 %v4337_v58, %v4104_v11  ;;  %v4339_v1 = vpop.f32.mrb[11].mxu0  ;;  %v4110_v56 = vadd.f32 %v4075_v26, %v9807_v48  ;;  %v4077_v49 = vpop.f32.mrb[9].mxu1  ;;  %v4979_v48 = vld [vmem:[%s10527_s8 + $0x38] sm:$0xff]  ;;  %6893 = vmatprep.subr.bf16.mxu1 %v7077_v44  ;;  %v4431_v33 = vld [vmem:[#allocation3 + $0x48] sm:$0xff] }
 0x5b4   :  { %v4385_v59 = vadd.f32 %v4339_v1, %v4161_v0  ;;  %v4111_v62 = vadd.f32 %v4077_v49, %v3887_v36  ;;  %v6894_v57 = vpack.c.bf16 %v4979_v48, %v4978_v55  ;;  %v4433_v48 = vld [vmem:[#allocation3 + $0x58] sm:$0xff] }
 0x5b5   :  { %v4163_v20 = vld [vmem:[#allocation3 + $0xa8] sm:$0xff] }
 0x5b6   :  { %4413 = vst.msk [vmem:[#allocation3 + $0x98] sm:$0xff] %vm3554_vm1, %v4385_v59  ;;  %v4343_v47 = vpop.f32.mrb[12].mxu0  ;;  %4139 = vst.msk [vmem:[#allocation3 + $0xc8] sm:$0xff] %vm3554_vm1, %v4111_v62  ;;  %v4081_v17 = vpop.f32.mrb[10].mxu1  ;;  %6895 = vmatpush1.bf16.msra.mxu1 %v6894_v57  ;;  %v4435_v57 = vld [vmem:[#allocation3 + $0x68] sm:$0xff] }
 0x5b7   :  { %v9893_v42 = vadd.f32 %v4343_v47, %v4106_v25  ;;  %v4345_v14 = vpop.f32.mrb[13].mxu0  ;;  %v4112_v21 = vadd.f32 %v4081_v17, %v9812_v18  ;;  %v4083_v2 = vpop.f32.mrb[11].mxu1  ;;  %6896 = vmatprep.subr.bf16.mxu1 %v7077_v44 }
 0x5b8   :  { %v4387_v41 = vadd.f32 %v4345_v14, %v4163_v20  ;;  %v4113_v11 = vadd.f32 %v4083_v2, %v3889_v61 }
 0x5b9   :  { %v4165_v7 = vld [vmem:[#allocation3 + $0xb8] sm:$0xff] }
 0x5ba   :  { %4415 = vst.msk [vmem:[#allocation3 + $0xa8] sm:$0xff] %vm3554_vm1, %v4387_v41  ;;  %v4349_v51 = vpop.f32.mrb[14].mxu0  ;;  %4141 = vst.msk [vmem:[#allocation3 + $0xd8] sm:$0xff] %vm3554_vm1, %v4113_v11  ;;  %v4563_v29 = vpop.f32.mrb[12].mxu1 }
 0x5bb   :  { %v9899_v63 = vadd.f32 %v4349_v51, %v4108_v39  ;;  %v4351_v9 = vpop.f32.mrb[15].mxu0  ;;  %v4646_v18 = vadd.f32 %v4563_v29, %v9817_v46  ;;  %v4565_v24 = vpop.f32.mrb[13].mxu1  ;;  %v4425_v46 = vld [vmem:[#allocation3 + $0x18] sm:$0xff] }
 0x5bc   :  { %v4389_v25 = vadd.f32 %v4351_v9, %v4165_v7  ;;  %v4647_v22 = vadd.f32 %v4565_v24, %v4423_v5  ;;  %v4437_v9 = vld [vmem:[#allocation3 + $0x78] sm:$0xff] }
 0x5bd   :  { %v4167_v19 = vld [vmem:[#allocation3 + $0xc8] sm:$0xff] }
 0x5be   :  { %4417 = vst.msk [vmem:[#allocation3 + $0xb8] sm:$0xff] %vm3554_vm1, %v4389_v25  ;;  %v4355_v32 = vpop.f32.mrb[16].mxu0  ;;  %4675 = vst.msk [vmem:[#allocation3 + $0x8] sm:$0xff] %vm3554_vm1, %v4647_v22  ;;  %v4569_v45 = vpop.f32.mrb[14].mxu1 }
 0x5bf   :  { %v9905_v27 = vadd.f32 %v4355_v32, %v4110_v56  ;;  %v4357_v16 = vpop.f32.mrb[17].mxu0  ;;  %v4648_v54 = vadd.f32 %v4569_v45, %v9822_v34  ;;  %v4571_v23 = vpop.f32.mrb[15].mxu1 }
 0x5c0   :  { %v4391_v53 = vadd.f32 %v4357_v16, %v4167_v19  ;;  %v4649_v3 = vadd.f32 %v4571_v23, %v4425_v46  ;;  %v4439_v19 = vld [vmem:[#allocation3 + $0x88] sm:$0xff]  ;;  %v4441_v23 = vld [vmem:[#allocation3 + $0x98] sm:$0xff] }
 0x5c1   :  { %v9908_v35 = vpack.c.bf16 %v4648_v54, %v4646_v18  ;;  %v4169_v13 = vld [vmem:[#allocation3 + $0xd8] sm:$0xff] }
 0x5c2   :  { %4419 = vst.msk [vmem:[#allocation3 + $0xc8] sm:$0xff] %vm3554_vm1, %v4391_v53  ;;  %v4361_v60 = vpop.f32.mrb[18].mxu0  ;;  %4677 = vst.msk [vmem:[#allocation3 + $0x18] sm:$0xff] %vm3554_vm1, %v4649_v3  ;;  %v4575_v39 = vpop.f32.mrb[16].mxu1 }
 0x5c3   :  { %v9912_v38 = vadd.f32 %v4361_v60, %v4112_v21  ;;  %v4363_v40 = vpop.f32.mrb[19].mxu0  ;;  %v4650_v4 = vadd.f32 %v4575_v39, %v9827_v8  ;;  %v4577_v34 = vpop.f32.mrb[17].mxu1 }
 0x5c4   :  { %v4393_v15 = vadd.f32 %v4363_v40, %v4169_v13  ;;  %v4651_v58 = vadd.f32 %v4577_v34, %v4427_v12  ;;  %v4443_v12 = vld [vmem:[#allocation3 + $0xa8] sm:$0xff] }
 0x5c5   :  { %v4703_v56 = vld [vmem:[#allocation3 + $0x8] sm:$0xff] }
 0x5c6   :  { %4421 = vst.msk [vmem:[#allocation3 + $0xd8] sm:$0xff] %vm3554_vm1, %v4393_v15  ;;  %4679 = vst.msk [vmem:[#allocation3 + $0x28] sm:$0xff] %vm3554_vm1, %v4651_v58  ;;  %v4581_v26 = vpop.f32.mrb[18].mxu1 }
 0x5c7   :  { %v4652_v28 = vadd.f32 %v4581_v26, %v9832_v31  ;;  %v4583_v0 = vpop.f32.mrb[19].mxu1  ;;  %v4445_v26 = vld [vmem:[#allocation3 + $0xb8] sm:$0xff] }
 0x5c8   :  { %v4653_v1 = vadd.f32 %v4583_v0, %v4429_v37 }
 0x5c9   :  { %v4705_v36 = vld [vmem:[#allocation3 + $0x18] sm:$0xff]  ;;  %v9918_v49 = vpack.c.bf16 %v4652_v28, %v4650_v4 }
 0x5ca   :  { %4681 = vst.msk [vmem:[#allocation3 + $0x38] sm:$0xff] %vm3554_vm1, %v4653_v1  ;;  %v4587_v8 = vpop.f32.mrb[20].mxu1  ;;  %v9921_v59 = vpack.c.bf16 %v4705_v36, %v4703_v56 }
 0x5cb   :  { %v4654_v62 = vadd.f32 %v4587_v8, %v9837_v30  ;;  %v4589_v47 = vpop.f32.mrb[21].mxu1 }
 0x5cc   :  { %v4655_v17 = vadd.f32 %v4589_v47, %v4431_v33  ;;  %6829 = vmatprep.subr.bf16.mxu0 %v9921_v59 }
 0x5cd   :  { %6831 = vmatpush1.bf16.msra.mxu0 %v9908_v35  ;;  %v4707_v21 = vld [vmem:[#allocation3 + $0x28] sm:$0xff] }
 0x5ce   :  { %4683 = vst.msk [vmem:[#allocation3 + $0x48] sm:$0xff] %vm3554_vm1, %v4655_v17  ;;  %v4593_v31 = vpop.f32.mrb[22].mxu1 }
 0x5cf   :  { %v4656_v55 = vadd.f32 %v4593_v31, %v9842_v50  ;;  %v4595_v20 = vpop.f32.mrb[23].mxu1  ;;  %v4449_v31 = vld [vmem:[#allocation3 + $0xd8] sm:$0xff] }
 0x5d0   :  { %v4657_v14 = vadd.f32 %v4595_v20, %v4433_v48 }
 0x5d1   :  { %v4709_v61 = vld [vmem:[#allocation3 + $0x38] sm:$0xff]  ;;  %v9928_v2 = vpack.c.bf16 %v4656_v55, %v4654_v62  ;;  %v4447_v62 = vld [vmem:[#allocation3 + $0xc8] sm:$0xff] }
 0x5d2   :  { %4685 = vst.msk [vmem:[#allocation3 + $0x58] sm:$0xff] %vm3554_vm1, %v4657_v14  ;;  %v4599_v30 = vpop.f32.mrb[24].mxu1  ;;  %v9931_v41 = vpack.c.bf16 %v4709_v61, %v4707_v21 }
 0x5d3   :  { %v4658_v11 = vadd.f32 %v4599_v30, %v9847_v52  ;;  %v4601_v51 = vpop.f32.mrb[25].mxu1 }
 0x5d4   :  { %v4659_v29 = vadd.f32 %v4601_v51, %v4435_v57  ;;  %6833 = vmatprep.subr.bf16.mxu0 %v9931_v41  ;;  %v9967_v57 = vld [vmem:[#allocation4 + $0x70] sm:$0xff]  ;;  %v4731_v51 = vld [vmem:[%s10528_s7 + $0x8] sm:$0xff] }
 0x5d5   :  { %6835 = vmatpush1.bf16.msra.mxu0 %v9918_v49  ;;  %v4711_v24 = vld [vmem:[#allocation3 + $0x48] sm:$0xff] }
 0x5d6   :  { %4687 = vst.msk [vmem:[#allocation3 + $0x68] sm:$0xff] %vm3554_vm1, %v4659_v29  ;;  %v4605_v50 = vpop.f32.mrb[26].mxu1  ;;  %v6065_v29 = vld [vmem:[%s10528_s7 + $0x28] sm:$0xff] }
 0x5d7   :  { %v4660_v7 = vadd.f32 %v4605_v50, %v9852_v6  ;;  %v4607_v18 = vpop.f32.mrb[27].mxu1 }
 0x5d8   :  { %v4661_v5 = vadd.f32 %v4607_v18, %v4437_v9  ;;  %v6083_v9 = vld [vmem:[%s10527_s8 + $0xb8] sm:$0xff]  ;;  %v6066_v18 = vld [vmem:[%s10528_s7 + $0x30] sm:$0xff] }
 0x5d9   :  { %v4713_v25 = vld [vmem:[#allocation3 + $0x58] sm:$0xff]  ;;  %v9938_v22 = vpack.c.bf16 %v4660_v7, %v4658_v11  ;;  %v6082_v7 = vld [vmem:[%s10527_s8 + $0xb0] sm:$0xff] }
 0x5da   :  { %4689 = vst.msk [vmem:[#allocation3 + $0x78] sm:$0xff] %vm3554_vm1, %v4661_v5  ;;  %v4611_v52 = vpop.f32.mrb[28].mxu1  ;;  %v9941_v32 = vpack.c.bf16 %v4713_v25, %v4711_v24  ;;  %v6918_v5 = vpack.c.bf16 %v6083_v9, %v6082_v7  ;;  %v6084_v24 = vld [vmem:[%s10527_s8 + $0xc0] sm:$0xff]  ;;  %v6085_v25 = vld [vmem:[%s10527_s8 + $0xc8] sm:$0xff] }
 0x5db   :  { %v4662_v45 = vadd.f32 %v4611_v52, %v9869_v10  ;;  %v4613_v16 = vpop.f32.mrb[29].mxu1  ;;  %v6921_v52 = vpack.c.bf16 %v6085_v25, %v6084_v24  ;;  %v5231_v24 = vld [vmem:[%s10529_s9 + $0x8] sm:$0xff]  ;;  %v5248_v25 = vld [vmem:[%s10529_s9 + $0x90] sm:$0xff] }
 0x5dc   :  { %v4663_v54 = vadd.f32 %v4613_v16, %v4439_v19  ;;  %6837 = vmatprep.subr.bf16.mxu0 %v9941_v32  ;;  %v4980_v19 = vld [vmem:[%s10527_s8 + $0x40] sm:$0xff]  ;;  %v4981_v16 = vld [vmem:[%s10527_s8 + $0x48] sm:$0xff] }
 0x5dd   :  { %6839 = vmatpush1.bf16.msra.mxu0 %v9928_v2  ;;  %v4715_v60 = vld [vmem:[#allocation3 + $0x68] sm:$0xff] }
 0x5de   :  { %4691 = vst.msk [vmem:[#allocation3 + $0x88] sm:$0xff] %vm3554_vm1, %v4663_v54  ;;  %v4617_v6 = vpop.f32.mrb[30].mxu1  ;;  %v6897_v54 = vpack.c.bf16 %v4981_v16, %v4980_v19  ;;  %v5280_v19 = vld [vmem:[%s10529_s9 + $0x190] sm:$0xff]  ;;  %v5281_v16 = vld [vmem:[%s10529_s9 + $0x198] sm:$0xff] }
 0x5df   :  { %v4664_v46 = vadd.f32 %v4617_v6, %v9881_v43  ;;  %v4619_v53 = vpop.f32.mrb[31].mxu1  ;;  %v6086_v6 = vld [vmem:[%s10527_s8 + $0xd0] sm:$0xff] }
 0x5e0   :  { %v4665_v3 = vadd.f32 %v4619_v53, %v4441_v23  ;;  %v4982_v23 = vld [vmem:[%s10527_s8 + $0x50] sm:$0xff]  ;;  %6898 = vmatpush1.bf16.msra.mxu1 %v6897_v54 }
 0x5e1   :  { %v4717_v39 = vld [vmem:[#allocation3 + $0x78] sm:$0xff]  ;;  %v9948_v13 = vpack.c.bf16 %v4664_v46, %v4662_v45  ;;  %v6069_v45 = vld [vmem:[%s10528_s7 + $0x48] sm:$0xff]  ;;  %6899 = vmatprep.subr.bf16.mxu1 %v7077_v44 }
 0x5e2   :  { %4693 = vst.msk [vmem:[#allocation3 + $0x98] sm:$0xff] %vm3554_vm1, %v4665_v3  ;;  %v4623_v10 = vpop.f32.mrb[32].mxu1  ;;  %v6840_v40 = vpack.c.bf16 %v4717_v39, %v4715_v60  ;;  %v6087_v46 = vld [vmem:[%s10527_s8 + $0xd8] sm:$0xff]  ;;  %v6088_v60 = vld [vmem:[%s10527_s8 + $0xe0] sm:$0xff]  ;;  %v6089_v39 = vld [vmem:[%s10527_s8 + $0xe8] sm:$0xff] }
 0x5e3   :  { %v4666_v4 = vadd.f32 %v4623_v10, %v9893_v42  ;;  %v4625_v34 = vpop.f32.mrb[33].mxu1  ;;  %v6924_v53 = vpack.c.bf16 %v6087_v46, %v6086_v6  ;;  %v4983_v3 = vld [vmem:[%s10527_s8 + $0x58] sm:$0xff]  ;;  %v6927_v10 = vpack.c.bf16 %v6089_v39, %v6088_v60 }
 0x5e4   :  { %v4667_v15 = vadd.f32 %v4625_v34, %v4443_v12  ;;  %6841 = vmatprep.subr.bf16.mxu0 %v6840_v40  ;;  %v6090_v12 = vld [vmem:[%s10527_s8 + $0xf0] sm:$0xff]  ;;  %v6091_v34 = vld [vmem:[%s10527_s8 + $0xf8] sm:$0xff] }
 0x5e5   :  { %6843 = vmatpush1.bf16.msra.mxu0 %v9938_v22  ;;  %v4719_v0 = vld [vmem:[#allocation3 + $0x88] sm:$0xff] }
 0x5e6   :  { %4695 = vst.msk [vmem:[#allocation3 + $0xa8] sm:$0xff] %vm3554_vm1, %v4667_v15  ;;  %v4629_v43 = vpop.f32.mrb[34].mxu1 }
 0x5e7   :  { %v4668_v58 = vadd.f32 %v4629_v43, %v9899_v63  ;;  %v4631_v28 = vpop.f32.mrb[35].mxu1  ;;  %v6930_v43 = vpack.c.bf16 %v6091_v34, %v6090_v12  ;;  %v5251_v34 = vld [vmem:[%s10529_s9 + $0xa8] sm:$0xff] }
 0x5e8   :  { %v4669_v37 = vadd.f32 %v4631_v28, %v4445_v26  ;;  %v6093_v26 = vld [vmem:[%s10527_s8 + $0x108] sm:$0xff]  ;;  %v4986_v28 = vld [vmem:[%s10527_s8 + $0x70] sm:$0xff] }
 0x5e9   :  { %v4721_v1 = vld [vmem:[#allocation3 + $0x98] sm:$0xff]  ;;  %v6850_v56 = vpack.c.bf16 %v4668_v58, %v4666_v4  ;;  %v4985_v4 = vld [vmem:[%s10527_s8 + $0x68] sm:$0xff]  ;;  %v6092_v58 = vld [vmem:[%s10527_s8 + $0x100] sm:$0xff] }
 0x5ea   :  { %4697 = vst.msk [vmem:[#allocation3 + $0xb8] sm:$0xff] %vm3554_vm1, %v4669_v37  ;;  %v4635_v42 = vpop.f32.mrb[36].mxu1  ;;  %v6844_v36 = vpack.c.bf16 %v4721_v1, %v4719_v0  ;;  %v4987_v37 = vld [vmem:[%s10527_s8 + $0x78] sm:$0xff]  ;;  %v6933_v1 = vpack.c.bf16 %v6093_v26, %v6092_v58 }
 0x5eb   :  { %v4670_v8 = vadd.f32 %v4635_v42, %v9905_v27  ;;  %v4637_v33 = vpop.f32.mrb[37].mxu1  ;;  %v6906_v0 = vpack.c.bf16 %v4987_v37, %v4986_v28  ;;  %v6095_v42 = vld [vmem:[%s10527_s8 + $0x118] sm:$0xff] }
 0x5ec   :  { %v4671_v47 = vadd.f32 %v4637_v33, %v4447_v62  ;;  %6845 = vmatprep.subr.bf16.mxu0 %v6844_v36  ;;  %v4989_v62 = vld [vmem:[%s10527_s8 + $0x88] sm:$0xff] }
 0x5ed   :  { %6847 = vmatpush1.bf16.msra.mxu0 %v9948_v13  ;;  %v4723_v20 = vld [vmem:[#allocation3 + $0xa8] sm:$0xff] }
 0x5ee   :  { %4699 = vst.msk [vmem:[#allocation3 + $0xc8] sm:$0xff] %vm3554_vm1, %v4671_v47  ;;  %v4641_v63 = vpop.f32.mrb[38].mxu1  ;;  %v6096_v47 = vld [vmem:[%s10527_s8 + $0x120] sm:$0xff] }
 0x5ef   :  { %v4672_v17 = vadd.f32 %v4641_v63, %v9912_v38  ;;  %v4643_v55 = vpop.f32.mrb[39].mxu1  ;;  %v4730_v38 = vld [vmem:[%s10528_s7] sm:$0xff]  ;;  %v6097_v63 = vld [vmem:[%s10527_s8 + $0x128] sm:$0xff] }
 0x5f0   :  { %v4673_v48 = vadd.f32 %v4643_v55, %v4449_v31  ;;  %v4990_v31 = vld [vmem:[%s10527_s8 + $0x90] sm:$0xff]  ;;  %v4991_v55 = vld [vmem:[%s10527_s8 + $0x98] sm:$0xff] }
 0x5f1   :  { %v4725_v14 = vld [vmem:[#allocation3 + $0xb8] sm:$0xff]  ;;  %v6854_v21 = vpack.c.bf16 %v4672_v17, %v4670_v8  ;;  %v4988_v8 = vld [vmem:[%s10527_s8 + $0x80] sm:$0xff]  ;;  %v6939_v17 = vpack.c.bf16 %v6097_v63, %v6096_v47  ;;  %v5252_v47 = vld [vmem:[%s10529_s9 + $0xb0] sm:$0xff] }
 0x5f2   :  { %4701 = vst.msk [vmem:[#allocation3 + $0xd8] sm:$0xff] %vm3554_vm1, %v4673_v48  ;;  %v6848_v27 = vpack.c.bf16 %v4725_v14, %v4723_v20  ;;  %v6909_v33 = vpack.c.bf16 %v4989_v62, %v4988_v8  ;;  %v6098_v48 = vld [vmem:[%s10527_s8 + $0x130] sm:$0xff]  ;;  %v6912_v20 = vpack.c.bf16 %v4991_v55, %v4990_v31  ;;  %v6099_v14 = vld [vmem:[%s10527_s8 + $0x138] sm:$0xff]  ;;  %v5266_v8 = vld [vmem:[%s10529_s9 + $0x120] sm:$0xff] }
 0x5f3   :  { %v5267_v62 = vld [vmem:[%s10529_s9 + $0x128] sm:$0xff]  ;;  %v5253_v63 = vld [vmem:[%s10529_s9 + $0xb8] sm:$0xff] }
 0x5f4   :  { %6849 = vmatprep.subr.bf16.mxu0 %v6848_v27 }
 0x5f5   :  { %6851 = vmatpush1.bf16.msra.mxu0 %v6850_v56  ;;  %v4727_v61 = vld [vmem:[#allocation3 + $0xc8] sm:$0xff] }
 0x5f9   :  { %v4729_v30 = vld [vmem:[#allocation3 + $0xd8] sm:$0xff] }
 0x5fa   :  { %v6852_v11 = vpack.c.bf16 %v4729_v30, %v4727_v61  ;;  %v5247_v61 = vld [vmem:[%s10529_s9 + $0x88] sm:$0xff] }
 0x5fc   :  { %6853 = vmatprep.subr.bf16.mxu0 %v6852_v11 }
 0x5fd   :  { %6855 = vmatpush1.bf16.msra.mxu0 %v6854_v21 }
 0x5fe   :  { %6857 = vmatprep.subr.bf16.mxu0 %v9921_v59  ;;  %v4733_v59 = vld [vmem:[%s10528_s7 + $0x18] sm:$0xff] }
 0x600   :  { %6060 = vmatmul.mubr.msk.f32.vlgmr.msra.gmra.mrb[20].mxu0 %vm4735_vm2, %v4730_v38  ;;  %v5279_v38 = vld [vmem:[%s10529_s9 + $0x188] sm:$0xff] }
 0x601   :  { %6859 = vmatpush1.bf16.msra.mxu0 %v9908_v35  ;;  %4821 = vmatprep.mubr.f32.mxu0 %v9967_v57  ;;  %v4732_v35 = vld [vmem:[%s10528_s7 + $0x10] sm:$0xff] }
 0x602   :  { %6861 = vmatprep.subr.bf16.mxu0 %v9931_v41  ;;  %v6081_v41 = vld [vmem:[%s10527_s8 + $0xa8] sm:$0xff] }
 0x604   :  { %6061 = vmatmul.mubr.msk.f32.gmra.mrb[22].mxu0 %vm4735_vm2, %v4731_v51 }
 0x605   :  { %6863 = vmatpush1.bf16.msra.mxu0 %v9918_v49  ;;  %4827 = vmatprep.mubr.f32.mxu0 %v9967_v57  ;;  %v4734_v49 = vld [vmem:[%s10528_s7 + $0x20] sm:$0xff] }
 0x606   :  { %6865 = vmatprep.subr.bf16.mxu0 %v9941_v32  ;;  %v6068_v32 = vld [vmem:[%s10528_s7 + $0x40] sm:$0xff] }
 0x608   :  { %6062 = vmatmul.mubr.msk.f32.gmra.mrb[24].mxu0 %vm4735_vm2, %v4732_v35 }
 0x609   :  { %6867 = vmatpush1.bf16.msra.mxu0 %v9928_v2  ;;  %4833 = vmatprep.mubr.f32.mxu0 %v9967_v57  ;;  %v6080_v2 = vld [vmem:[%s10527_s8 + $0xa0] sm:$0xff] }
 0x60a   :  { %6869 = vmatprep.subr.bf16.mxu0 %v6840_v40  ;;  %v6915_v50 = vpack.c.bf16 %v6081_v41, %v6080_v2  ;;  %v4984_v40 = vld [vmem:[%s10527_s8 + $0x60] sm:$0xff] }
 0x60b   :  { %v6903_v15 = vpack.c.bf16 %v4985_v4, %v4984_v40  ;;  %v5264_v40 = vld [vmem:[%s10529_s9 + $0x110] sm:$0xff]  ;;  %v5265_v4 = vld [vmem:[%s10529_s9 + $0x118] sm:$0xff] }
 0x60c   :  { %6063 = vmatmul.mubr.msk.f32.gmra.mrb[26].mxu0 %vm4735_vm2, %v4733_v59 }
 0x60d   :  { %6871 = vmatpush1.bf16.msra.mxu0 %v9938_v22  ;;  %4839 = vmatprep.mubr.f32.mxu0 %v9967_v57  ;;  %v6067_v22 = vld [vmem:[%s10528_s7 + $0x38] sm:$0xff] }
 0x60e   :  { %6873 = vmatprep.subr.bf16.mxu0 %v6844_v36 }
 0x610   :  { %6064 = vmatmul.mubr.msk.f32.gmra.mrb[28].mxu0 %vm4735_vm2, %v4734_v49 }
 0x611   :  { %6875 = vmatpush1.bf16.msra.mxu0 %v9948_v13  ;;  %4931 = vmatprep.mubr.f32.mxu0 %v9967_v57  ;;  %v6900_v13 = vpack.c.bf16 %v4983_v3, %v4982_v23  ;;  %v5233_v3 = vld [vmem:[%s10529_s9 + $0x18] sm:$0xff] }
 0x612   :  { %6877 = vmatprep.subr.bf16.mxu0 %v6848_v27  ;;  %v5246_v27 = vld [vmem:[%s10529_s9 + $0x80] sm:$0xff] }
 0x613   :  { %6901 = vmatpush1.bf16.msra.mxu1 %v6900_v13  ;;  %v6944_v30 = vpack.c.bf16 %v5247_v61, %v5246_v27  ;;  %v5250_v13 = vld [vmem:[%s10529_s9 + $0xa0] sm:$0xff]  ;;  %v5237_v27 = vld [vmem:[%s10529_s9 + $0x38] sm:$0xff] }
 0x614   :  { %6902 = vmatprep.subr.bf16.mxu1 %v7077_v44 }
 0x615   :  { %6879 = vmatpush1.bf16.msra.mxu0 %v6850_v56  ;;  %v6094_v56 = vld [vmem:[%s10527_s8 + $0x110] sm:$0xff] }
 0x616   :  { %6881 = vmatprep.subr.bf16.mxu0 %v6852_v11  ;;  %v6936_v36 = vpack.c.bf16 %v6095_v42, %v6094_v56  ;;  %v5278_v11 = vld [vmem:[%s10529_s9 + $0x180] sm:$0xff]  ;;  %v6952_v56 = vpack.c.bf16 %v5251_v34, %v5250_v13  ;;  %v5235_v42 = vld [vmem:[%s10529_s9 + $0x28] sm:$0xff] }
 0x617   :  { %6904 = vmatpush1.bf16.msra.mxu1 %v6903_v15  ;;  %v6976_v51 = vpack.c.bf16 %v5279_v38, %v5278_v11  ;;  %v5282_v15 = vld [vmem:[%s10529_s9 + $0x1a0] sm:$0xff]  ;;  %v5255_v11 = vld [vmem:[%s10529_s9 + $0xc8] sm:$0xff] }
 0x618   :  { %6905 = vmatprep.subr.bf16.mxu1 %v7077_v44  ;;  %v5286_v13 = vld [vmem:[%s10529_s9 + $0x1c0] sm:$0xff] }
 0x619   :  { %6883 = vmatpush1.bf16.msra.mxu0 %v6854_v21  ;;  %v6942_v21 = vpack.c.bf16 %v6099_v14, %v6098_v48  ;;  %v6956_v14 = vpack.c.bf16 %v5253_v63, %v5252_v47  ;;  %v5291_v47 = vld [vmem:[%s10529_s9 + $0x1e8] sm:$0xff] }
 0x61a   :  { %6914 = vmatprep.subr.bf16.mxu0 %v7077_v44 }
 0x61b   :  { %6907 = vmatpush1.bf16.msra.mxu1 %v6906_v0  ;;  %v5234_v0 = vld [vmem:[%s10529_s9 + $0x20] sm:$0xff] }
 0x61c   :  { %6070 = vmatmul.mubr.msk.f32.vlgmr.msra.gmra.mrb[30].mxu0 %vm4735_vm2, %v6065_v29  ;;  %6908 = vmatprep.subr.bf16.mxu1 %v7077_v44  ;;  %v6954_v48 = vpack.c.bf16 %v5235_v42, %v5234_v0  ;;  %v5288_v0 = vld [vmem:[%s10529_s9 + $0x1d0] sm:$0xff] }
 0x61d   :  { %4937 = vmatprep.mubr.f32.mxu0 %v9967_v57  ;;  %6916 = vmatpush1.bf16.msra.mxu0 %v6915_v50  ;;  %v5272_v42 = vld [vmem:[%s10529_s9 + $0x150] sm:$0xff] }
 0x61e   :  { %6917 = vmatprep.subr.bf16.mxu0 %v7077_v44 }
 0x61f   :  { %6910 = vmatpush1.bf16.msra.mxu1 %v6909_v33 }
 0x620   :  { %6071 = vmatmul.mubr.msk.f32.gmra.mrb[32].mxu0 %vm4735_vm2, %v6066_v18  ;;  %6911 = vmatprep.subr.bf16.mxu1 %v7077_v44 }
 0x621   :  { %4943 = vmatprep.mubr.f32.mxu0 %v9967_v57  ;;  %6919 = vmatpush1.bf16.msra.mxu0 %v6918_v5  ;;  %v5230_v5 = vld [vmem:[%s10529_s9] sm:$0xff] }
 0x622   :  { %6920 = vmatprep.subr.bf16.mxu0 %v7077_v44  ;;  %v6946_v23 = vpack.c.bf16 %v5231_v24, %v5230_v5 }
 0x623   :  { %6913 = vmatpush1.bf16.msra.mxu1 %v6912_v20  ;;  %v6986_v20 = vpack.c.bf16 %v5267_v62, %v5266_v8 }
 0x624   :  { %6072 = vmatmul.mubr.msk.f32.gmra.mrb[34].mxu0 %vm4735_vm2, %v6067_v22  ;;  %6945 = vmatprep.subr.bf16.mxu1 %v6944_v30  ;;  %v5262_v22 = vld [vmem:[%s10529_s9 + $0x100] sm:$0xff] }
 0x625   :  { %4949 = vmatprep.mubr.f32.mxu0 %v9967_v57  ;;  %6922 = vmatpush1.bf16.msra.mxu0 %v6921_v52  ;;  %v5263_v52 = vld [vmem:[%s10529_s9 + $0x108] sm:$0xff]  ;;  %v5254_v30 = vld [vmem:[%s10529_s9 + $0xc0] sm:$0xff] }
 0x626   :  { %6923 = vmatprep.subr.bf16.mxu0 %v7077_v44  ;;  %v6978_v60 = vpack.c.bf16 %v5263_v52, %v5262_v22 }
 0x628   :  { %6073 = vmatmul.mubr.msk.f32.gmra.mrb[36].mxu0 %vm4735_vm2, %v6068_v32 }
 0x629   :  { %4955 = vmatprep.mubr.f32.mxu0 %v9967_v57  ;;  %6925 = vmatpush1.bf16.msra.mxu0 %v6924_v53  ;;  %v5232_v53 = vld [vmem:[%s10529_s9 + $0x10] sm:$0xff] }
 0x62a   :  { %6926 = vmatprep.subr.bf16.mxu0 %v7077_v44  ;;  %v6950_v37 = vpack.c.bf16 %v5233_v3, %v5232_v53  ;;  %v5259_v53 = vld [vmem:[%s10529_s9 + $0xe8] sm:$0xff] }
 0x62c   :  { %6074 = vmatmul.mubr.msk.f32.gmra.mrb[38].mxu0 %vm4735_vm2, %v6069_v45  ;;  %v5249_v45 = vld [vmem:[%s10529_s9 + $0x98] sm:$0xff] }
 0x62d   :  { %6928 = vmatpush1.bf16.msra.mxu0 %v6927_v10  ;;  %v6948_v39 = vpack.c.bf16 %v5249_v45, %v5248_v25  ;;  %v6980_v10 = vpack.c.bf16 %v5281_v16, %v5280_v19  ;;  %v5285_v19 = vld [vmem:[%s10529_s9 + $0x1b8] sm:$0xff]  ;;  %v5268_v16 = vld [vmem:[%s10529_s9 + $0x130] sm:$0xff] }
 0x62e   :  { %6929 = vmatprep.subr.bf16.mxu0 %v7077_v44 }
 0x631   :  { %6931 = vmatpush1.bf16.msra.mxu0 %v6930_v43  ;;  %v5283_v43 = vld [vmem:[%s10529_s9 + $0x1a8] sm:$0xff] }
 0x632   :  { %6932 = vmatprep.subr.bf16.mxu0 %v7077_v44 }
 0x635   :  { %6934 = vmatpush1.bf16.msra.mxu0 %v6933_v1  ;;  %v6982_v1 = vpack.c.bf16 %v5265_v4, %v5264_v40  ;;  %v5287_v40 = vld [vmem:[%s10529_s9 + $0x1c8] sm:$0xff]  ;;  %v5270_v4 = vld [vmem:[%s10529_s9 + $0x140] sm:$0xff] }
 0x636   :  { %6935 = vmatprep.subr.bf16.mxu0 %v7077_v44  ;;  %v6992_v34 = vpack.c.bf16 %v5287_v40, %v5286_v13  ;;  %v5299_v40 = vld [vmem:[%s10529_s9 + $0x228] sm:$0xff] }
 0x639   :  { %6937 = vmatpush1.bf16.msra.mxu0 %v6936_v36  ;;  %v6984_v36 = vpack.c.bf16 %v5283_v43, %v5282_v15  ;;  %v5260_v43 = vld [vmem:[%s10529_s9 + $0xf0] sm:$0xff] }
 0x63a   :  { %6938 = vmatprep.subr.bf16.mxu0 %v7077_v44 }
 0x63d   :  { %6940 = vmatpush1.bf16.msra.mxu0 %v6939_v17 }
 0x63e   :  { %6941 = vmatprep.subr.bf16.mxu0 %v7077_v44 }
 0x641   :  { %6943 = vmatpush1.bf16.msra.mxu0 %v6942_v21  ;;  %v5236_v21 = vld [vmem:[%s10529_s9 + $0x30] sm:$0xff] }
 0x642   :  { %6977 = vmatprep.subr.bf16.mxu0 %v6976_v51 }
 0x6d3   :  { %v4817_v35 = vpop.f32.mrb[20].mxu0 }
 0x6d4   :  { %v4819_v59 = vpop.f32.mrb[21].mxu0 }
 0x6d7   :  { %v4823_v49 = vpop.f32.mrb[22].mxu0 }
 0x6d8   :  { %v4825_v2 = vpop.f32.mrb[23].mxu0 }
 0x6db   :  { %v4829_v41 = vpop.f32.mrb[24].mxu0 }
 0x6dc   :  { %v4831_v29 = vpop.f32.mrb[25].mxu0 }
 0x6df   :  { %v10143_v50 = vpop.f32.mrb[26].mxu0 }
 0x6e0   :  { %v10145_v7 = vpop.f32.mrb[27].mxu0 }
 0x6e3   :  { %v10147_v9 = vpop.f32.mrb[28].mxu0 }
 0x6e4   :  { %v10149_v18 = vpop.f32.mrb[29].mxu0 }
 0x6ef   :  { %v4933_v32 = vpop.f32.mrb[30].mxu0 }
 0x6f0   :  { %v4962_v54 = vmax.f32 %v4817_v35, %v4933_v32  ;;  %v4935_v6 = vpop.f32.mrb[31].mxu0  ;;  %v5284_v32 = vld [vmem:[%s10529_s9 + $0x1b0] sm:$0xff] }
 0x6f1   :  { %v4963_v46 = vmax.f32 %v4819_v59, %v4935_v6  ;;  %v6958_v59 = vpack.c.bf16 %v5237_v27, %v5236_v21  ;;  %v6988_v6 = vpack.c.bf16 %v5285_v19, %v5284_v32  ;;  %v5276_v21 = vld [vmem:[%s10529_s9 + $0x170] sm:$0xff]  ;;  %v5277_v27 = vld [vmem:[%s10529_s9 + $0x178] sm:$0xff] }
 0x6f3   :  { %v4939_v12 = vpop.f32.mrb[32].mxu0  ;;  %6075 = vmatprep.mubr.msk.f32.mxu1 %vm3554_vm1, %v4963_v46  ;;  %6100 = vmatprep.mubr.msk.f32.mxu0 %vm3554_vm1, %v4963_v46 }
 0x6f4   :  { %v4964_v58 = vmax.f32 %v4823_v49, %v4939_v12  ;;  %v4941_v26 = vpop.f32.mrb[33].mxu0  ;;  %5072 = vmatmul.mubr.f32.vlgmr.msra.gmra.mrb[40].mxu1 %v4962_v54  ;;  %5183 = vmatmul.mubr.f32.vlgmr.msra.gmra.mrb[40].mxu0 %v4962_v54  ;;  %v6960_v49 = vpack.c.bf16 %v5255_v11, %v5254_v30  ;;  %v5269_v54 = vld [vmem:[%s10529_s9 + $0x138] sm:$0xff]  ;;  %v5271_v12 = vld [vmem:[%s10529_s9 + $0x148] sm:$0xff] }
 0x6f5   :  { %v4965_v28 = vmax.f32 %v4825_v2, %v4941_v26  ;;  %6947 = vmatpush3.bf16.msra.mxu1 %v6946_v23  ;;  %6979 = vmatpush3.bf16.msra.mxu0 %v6978_v60  ;;  %v5238_v2 = vld [vmem:[%s10529_s9 + $0x40] sm:$0xff]  ;;  %v6990_v46 = vpack.c.bf16 %v5269_v54, %v5268_v16  ;;  %v6994_v15 = vpack.c.bf16 %v5271_v12, %v5270_v4  ;;  %v5296_v54 = vld [vmem:[%s10529_s9 + $0x210] sm:$0xff] }
 0x6f6   :  { %6949 = vmatprep.subr.bf16.mxu1 %v6948_v39  ;;  %6981 = vmatprep.subr.bf16.mxu0 %v6980_v10  ;;  %v5258_v23 = vld [vmem:[%s10529_s9 + $0xe0] sm:$0xff]  ;;  %v5243_v39 = vld [vmem:[%s10529_s9 + $0x68] sm:$0xff] }
 0x6f7   :  { %v4945_v33 = vpop.f32.mrb[34].mxu0  ;;  %6076 = vmatprep.mubr.msk.f32.mxu1 %vm3554_vm1, %v4965_v28  ;;  %6101 = vmatprep.mubr.msk.f32.mxu0 %vm3554_vm1, %v4965_v28  ;;  %v6968_v3 = vpack.c.bf16 %v5259_v53, %v5258_v23  ;;  %v5242_v60 = vld [vmem:[%s10529_s9 + $0x60] sm:$0xff]  ;;  %v5244_v28 = vld [vmem:[%s10529_s9 + $0x70] sm:$0xff] }
 0x6f8   :  { %v4966_v17 = vmax.f32 %v4829_v41, %v4945_v33  ;;  %v4947_v31 = vpop.f32.mrb[35].mxu0  ;;  %5077 = vmatmul.mubr.f32.gmra.mrb[42].mxu1 %v4964_v58  ;;  %5188 = vmatmul.mubr.f32.gmra.mrb[42].mxu0 %v4964_v58  ;;  %v5239_v41 = vld [vmem:[%s10529_s9 + $0x48] sm:$0xff]  ;;  %v6970_v10 = vpack.c.bf16 %v5243_v39, %v5242_v60  ;;  %v5261_v58 = vld [vmem:[%s10529_s9 + $0xf8] sm:$0xff]  ;;  %v5290_v33 = vld [vmem:[%s10529_s9 + $0x1e0] sm:$0xff] }
 0x6f9   :  { %v4967_v55 = vmax.f32 %v4831_v29, %v4947_v31  ;;  %6951 = vmatpush3.bf16.msra.mxu1 %v6950_v37  ;;  %6983 = vmatpush3.bf16.msra.mxu0 %v6982_v1  ;;  %v6962_v22 = vpack.c.bf16 %v5239_v41, %v5238_v2  ;;  %v6972_v26 = vpack.c.bf16 %v5261_v58, %v5260_v43  ;;  %v5245_v37 = vld [vmem:[%s10529_s9 + $0x78] sm:$0xff]  ;;  %v5275_v31 = vld [vmem:[%s10529_s9 + $0x168] sm:$0xff] }
 0x6fa   :  { %6953 = vmatprep.subr.bf16.mxu1 %v6952_v56  ;;  %6985 = vmatprep.subr.bf16.mxu0 %v6984_v36  ;;  %v6974_v1 = vpack.c.bf16 %v5245_v37, %v5244_v28  ;;  %v5289_v56 = vld [vmem:[%s10529_s9 + $0x1d8] sm:$0xff]  ;;  %v7000_v63 = vpack.c.bf16 %v5291_v47, %v5290_v33 }
 0x6fb   :  { %v4951_v61 = vpop.f32.mrb[36].mxu0  ;;  %6077 = vmatprep.mubr.msk.f32.mxu1 %vm3554_vm1, %v4967_v55  ;;  %6102 = vmatprep.mubr.msk.f32.mxu0 %vm3554_vm1, %v4967_v55  ;;  %v5273_v36 = vld [vmem:[%s10529_s9 + $0x158] sm:$0xff]  ;;  %v6996_v8 = vpack.c.bf16 %v5289_v56, %v5288_v0  ;;  %v5300_v0 = vld [vmem:[%s10529_s9 + $0x230] sm:$0xff] }
 0x6fc   :  { %v4968_v38 = vmax.f32 %v10143_v50, %v4951_v61  ;;  %v4953_v51 = vpop.f32.mrb[37].mxu0  ;;  %5082 = vmatmul.mubr.f32.gmra.mrb[44].mxu1 %v4966_v17  ;;  %5193 = vmatmul.mubr.f32.gmra.mrb[44].mxu0 %v4966_v17  ;;  %v5256_v50 = vld [vmem:[%s10529_s9 + $0xd0] sm:$0xff]  ;;  %v6998_v62 = vpack.c.bf16 %v5273_v36, %v5272_v42  ;;  %v5274_v17 = vld [vmem:[%s10529_s9 + $0x160] sm:$0xff]  ;;  %v7006_v61 = vpack.c.bf16 %v5277_v27, %v5276_v21  ;;  %v5303_v36 = vld [vmem:[%s10529_s9 + $0x248] sm:$0xff] }
 0x6fd   :  { %v4969_v35 = vmax.f32 %v10145_v7, %v4953_v51  ;;  %6955 = vmatpush3.bf16.msra.mxu1 %v6954_v48  ;;  %6987 = vmatpush3.bf16.msra.mxu0 %v6986_v20  ;;  %v5257_v7 = vld [vmem:[%s10529_s9 + $0xd8] sm:$0xff]  ;;  %v7002_v55 = vpack.c.bf16 %v5275_v31, %v5274_v17  ;;  %v5292_v48 = vld [vmem:[%s10529_s9 + $0x1f0] sm:$0xff]  ;;  %v5302_v42 = vld [vmem:[%s10529_s9 + $0x240] sm:$0xff] }
 0x6fe   :  { %6957 = vmatprep.subr.bf16.mxu1 %v6956_v14  ;;  %v6964_v52 = vpack.c.bf16 %v5257_v7, %v5256_v50  ;;  %6989 = vmatprep.subr.bf16.mxu0 %v6988_v6  ;;  %v5293_v20 = vld [vmem:[%s10529_s9 + $0x1f8] sm:$0xff]  ;;  %v5307_v17 = vld [vmem:[%s10529_s9 + $0x268] sm:$0xff]  ;;  %v5528_v27 = vld [vmem:[%s10531_s11] sm:$0xff] }
 0x6ff   :  { %v4957_v29 = vpop.f32.mrb[38].mxu0  ;;  %6078 = vmatprep.mubr.msk.f32.mxu1 %vm3554_vm1, %v4969_v35  ;;  %6103 = vmatprep.mubr.msk.f32.mxu0 %vm3554_vm1, %v4969_v35  ;;  %v7004_v14 = vpack.c.bf16 %v5293_v20, %v5292_v48  ;;  %v5297_v6 = vld [vmem:[%s10529_s9 + $0x218] sm:$0xff] }
 0x700   :  { %v4970_v5 = vmax.f32 %v10147_v9, %v4957_v29  ;;  %v4959_v24 = vpop.f32.mrb[39].mxu0  ;;  %5087 = vmatmul.mubr.f32.gmra.mrb[46].mxu1 %v4968_v38  ;;  %5198 = vmatmul.mubr.f32.gmra.mrb[46].mxu0 %v4968_v38  ;;  %v5240_v9 = vld [vmem:[%s10529_s9 + $0x50] sm:$0xff]  ;;  %v7012_v39 = vpack.c.bf16 %v5297_v6, %v5296_v54  ;;  %v5305_v33 = vld [vmem:[%s10529_s9 + $0x258] sm:$0xff] }
 0x701   :  { %v4971_v25 = vmax.f32 %v10149_v18, %v4959_v24  ;;  %6959 = vmatpush3.bf16.msra.mxu1 %v6958_v59  ;;  %v5241_v18 = vld [vmem:[%s10529_s9 + $0x58] sm:$0xff]  ;;  %6991 = vmatpush3.bf16.msra.mxu0 %v6990_v46  ;;  %v10350_v59 = vld [vmem:[%s10530_s6] ss:$0 sm:$0xff]  ;;  %v5295_v24 = vld [vmem:[%s10529_s9 + $0x208] sm:$0xff] }
 0x702   :  { %6961 = vmatprep.subr.bf16.mxu1 %v6960_v49  ;;  %v6966_v45 = vpack.c.bf16 %v5241_v18, %v5240_v9  ;;  %6993 = vmatprep.subr.bf16.mxu0 %v6992_v34  ;;  %v5309_v48 = vld [vmem:[%s10529_s9 + $0x278] sm:$0xff] }
 0x703   :  { %6079 = vmatprep.mubr.msk.f32.mxu1 %vm3554_vm1, %v4971_v25  ;;  %6104 = vmatprep.mubr.msk.f32.mxu0 %vm3554_vm1, %v4971_v25  ;;  %v5628_v6 = vld [vmem:[%s10532_s13 + $0x18] sm:$0xff] }
 0x704   :  { %5092 = vmatmul.mubr.f32.gmra.mrb[48].mxu1 %v4970_v5  ;;  %5203 = vmatmul.mubr.f32.gmra.mrb[48].mxu0 %v4970_v5  ;;  %v5294_v5 = vld [vmem:[%s10529_s9 + $0x200] sm:$0xff] }
 0x705   :  { %6963 = vmatpush3.bf16.msra.mxu1 %v6962_v22  ;;  %6995 = vmatpush3.bf16.msra.mxu0 %v6994_v15  ;;  %v7009_v19 = vpack.c.bf16 %v5295_v24, %v5294_v5  ;;  %v5538_v24 = vld [vmem:[%s10531_s11 + $0x50] sm:$0xff] }
 0x706   :  { %6965 = vmatprep.subr.bf16.mxu1 %v6964_v52  ;;  %6997 = vmatprep.subr.bf16.mxu0 %v6996_v8  ;;  %v7021_v8 = vpack.c.bf16 %v5303_v36, %v5302_v42  ;;  %v5635_v36 = vld [vmem:[%s10532_s13 + $0x50] sm:$0xf] }
 0x709   :  { %6967 = vmatpush3.bf16.msra.mxu1 %v6966_v45  ;;  %6999 = vmatpush3.bf16.msra.mxu0 %v6998_v62  ;;  %v5304_v62 = vld [vmem:[%s10529_s9 + $0x250] sm:$0xff] }
 0x70a   :  { %6969 = vmatprep.subr.bf16.mxu1 %v6968_v3  ;;  %7001 = vmatprep.subr.bf16.mxu0 %v7000_v63  ;;  %v7024_v47 = vpack.c.bf16 %v5305_v33, %v5304_v62  ;;  %v5306_v63 = vld [vmem:[%s10529_s9 + $0x260] sm:$0xff] }
 0x70b   :  { %v7027_v31 = vpack.c.bf16 %v5307_v17, %v5306_v63 }
 0x70d   :  { %6971 = vmatpush3.bf16.msra.mxu1 %v6970_v10  ;;  %7003 = vmatpush3.bf16.msra.mxu0 %v7002_v55  ;;  %v5298_v10 = vld [vmem:[%s10529_s9 + $0x220] sm:$0xff]  ;;  %v5308_v55 = vld [vmem:[%s10529_s9 + $0x270] sm:$0xff] }
 0x70e   :  { %6973 = vmatprep.subr.bf16.mxu1 %v6972_v26  ;;  %7005 = vmatprep.subr.bf16.mxu0 %v7004_v14  ;;  %v7015_v28 = vpack.c.bf16 %v5299_v40, %v5298_v10  ;;  %v7030_v20 = vpack.c.bf16 %v5309_v48, %v5308_v55 }
 0x711   :  { %6975 = vmatpush3.bf16.msra.mxu1 %v6974_v1  ;;  %7007 = vmatpush3.bf16.msra.mxu0 %v7006_v61  ;;  %v5301_v1 = vld [vmem:[%s10529_s9 + $0x238] sm:$0xff]  ;;  %v5529_v61 = vld [vmem:[%s10531_s11 + $0x8] sm:$0xff] }
 0x712   :  { %7008 = vmatprep.subr.bf16.mxu1 %v7077_v44  ;;  %7032 = vmatprep.subr.bf16.mxu0 %v7077_v44  ;;  %v7018_v56 = vpack.c.bf16 %v5301_v1, %v5300_v0 }
 0x7c7   :  { %v5073_v30 = vpop.f32.mrb[40].mxu1  ;;  %v5184_v11 = vpop.f32.mrb[40].mxu0 }
 0x7c8   :  { %v5208_v38 = vmax.f32 %v5073_v30, %v5184_v11  ;;  %v5075_v51 = vpop.f32.mrb[41].mxu1  ;;  %v5186_v35 = vpop.f32.mrb[41].mxu0  ;;  %v7033_v30 = vpack.c.bf16 %v5529_v61, %v5528_v27  ;;  %v5530_v11 = vld [vmem:[%s10531_s11 + $0x10] sm:$0xff] }
 0x7c9   :  { %v5532_v51 = vld [vmem:[%s10531_s11 + $0x20] sm:$0xff] }
 0x7ca   :  { %v5220_v7 = vadd.f32 %v10350_v59, %v5208_v38  ;;  %v5531_v38 = vld [vmem:[%s10531_s11 + $0x18] sm:$0xff] }
 0x7cb   :  { %v5078_v49 = vpop.f32.mrb[42].mxu1  ;;  %v5189_v2 = vpop.f32.mrb[42].mxu0  ;;  %v7036_v35 = vpack.c.bf16 %v5531_v38, %v5530_v11 }
 0x7cc   :  { %v5209_v41 = vmax.f32 %v5078_v49, %v5189_v2  ;;  %v5080_v29 = vpop.f32.mrb[43].mxu1  ;;  %v5191_v50 = vpop.f32.mrb[43].mxu0  ;;  %v5225_v16 = vmax.f32 %v5220_v7, 0.0  ;;  %v5534_v2 = vld [vmem:[%s10531_s11 + $0x30] sm:$0xff]  ;;  %v5537_v7 = vld [vmem:[%s10531_s11 + $0x48] sm:$0xff] }
 0x7cd   :  { %v5536_v50 = vld [vmem:[%s10531_s11 + $0x40] sm:$0xff] }
 0x7ce   :  { %v5221_v25 = vadd.f32 %v10350_v59, %v5209_v41  ;;  %v5535_v41 = vld [vmem:[%s10531_s11 + $0x38] sm:$0xff]  ;;  %v7045_v5 = vpack.c.bf16 %v5537_v7, %v5536_v50 }
 0x7cf   :  { %v5083_v22 = vpop.f32.mrb[44].mxu1  ;;  %v5194_v52 = vpop.f32.mrb[44].mxu0  ;;  %v7042_v29 = vpack.c.bf16 %v5535_v41, %v5534_v2 }
 0x7d0   :  { %v5226_v9 = vmax.f32 %v5221_v25, 0.0  ;;  %v5210_v18 = vmax.f32 %v5083_v22, %v5194_v52  ;;  %v5085_v32 = vpop.f32.mrb[45].mxu1  ;;  %v5196_v45 = vpop.f32.mrb[45].mxu0  ;;  %v5539_v25 = vld [vmem:[%s10531_s11 + $0x58] sm:$0xff]  ;;  %v5540_v52 = vld [vmem:[%s10531_s11 + $0x60] sm:$0xff] }
 0x7d1   :  { %v7048_v22 = vpack.c.bf16 %v5539_v25, %v5538_v24  ;;  %v5542_v32 = vld [vmem:[%s10531_s11 + $0x70] sm:$0xff]  ;;  %v5625_v45 = vld [vmem:[%s10532_s13] sm:$0xff] }
 0x7d2   :  { %5381 = vmatprep.mubr.f32.mxu1 %v5226_v9  ;;  %v5222_v13 = vadd.f32 %v10350_v59, %v5210_v18  ;;  %v5541_v9 = vld [vmem:[%s10531_s11 + $0x68] sm:$0xff] }
 0x7d3   :  { %v5088_v46 = vpop.f32.mrb[46].mxu1  ;;  %v5199_v23 = vpop.f32.mrb[46].mxu0  ;;  %5382 = vmatmul.mubr.f32.vlgmr.msra.gmra.mrb[50].mxu1 %v5225_v16  ;;  %v7051_v18 = vpack.c.bf16 %v5541_v9, %v5540_v52  ;;  %v5627_v16 = vld [vmem:[%s10532_s13 + $0x10] sm:$0xff] }
 0x7d4   :  { %v5211_v53 = vmax.f32 %v5088_v46, %v5199_v23  ;;  %7010 = vmatpush3.bf16.msra.mxu1 %v7009_v19  ;;  %v5090_v3 = vpop.f32.mrb[47].mxu1  ;;  %v5201_v60 = vpop.f32.mrb[47].mxu0  ;;  %6259 = vmatprep.mubr.msk.f32.mxu1 %vm7078_vm3, %v9967_v57  ;;  %v5227_v37 = vmax.f32 %v5222_v13, 0.0  ;;  %v5626_v19 = vld [vmem:[%s10532_s13 + $0x8] sm:$0xff]  ;;  %v7057_v46 = vpack.c.bf16 %v5628_v6, %v5627_v16  ;;  %v5629_v23 = vld [vmem:[%s10532_s13 + $0x20] sm:$0xff] }
 0x7d5   :  { %7011 = vmatprep.subr.bf16.mxu1 %v7077_v44  ;;  %v7054_v54 = vpack.c.bf16 %v5626_v19, %v5625_v45  ;;  %v5631_v60 = vld [vmem:[%s10532_s13 + $0x30] sm:$0xff] }
 0x7d6   :  { %v5223_v4 = vadd.f32 %v10350_v59, %v5211_v53  ;;  %v5630_v53 = vld [vmem:[%s10532_s13 + $0x28] sm:$0xff] }
 0x7d7   :  { %v5093_v12 = vpop.f32.mrb[48].mxu1  ;;  %v5204_v34 = vpop.f32.mrb[48].mxu0  ;;  %v7060_v3 = vpack.c.bf16 %v5630_v53, %v5629_v23 }
 0x7d8   :  { %v5228_v15 = vmax.f32 %v5223_v4, 0.0  ;;  %v5212_v43 = vmax.f32 %v5093_v12, %v5204_v34  ;;  %7013 = vmatpush3.bf16.msra.mxu1 %v7012_v39  ;;  %v5095_v58 = vpop.f32.mrb[49].mxu1  ;;  %v5206_v26 = vpop.f32.mrb[49].mxu0  ;;  %v5632_v39 = vld [vmem:[%s10532_s13 + $0x38] sm:$0xff]  ;;  %v6106_v12 = vld [vmem:[%s10533_s10] ss:$0 sm:$0xff] }
 0x7d9   :  { %7014 = vmatprep.subr.bf16.mxu1 %v7077_v44  ;;  %v7063_v13 = vpack.c.bf16 %v5632_v39, %v5631_v60 }
 0x7da   :  { %5451 = vmatprep.mubr.f32.mxu0 %v5228_v15  ;;  %v5224_v14 = vadd.f32 %v10350_v59, %v5212_v43  ;;  %v5533_v59 = vld [vmem:[%s10531_s11 + $0x28] sm:$0xff] }
 0x7db   :  { %5452 = vmatmul.mubr.f32.vlgmr.msra.gmra.mrb[50].mxu0 %v5227_v37  ;;  %v7039_v49 = vpack.c.bf16 %v5533_v59, %v5532_v51 }
 0x7dc   :  { %7016 = vmatpush3.bf16.msra.mxu1 %v7015_v28  ;;  %6292 = vmatprep.mubr.msk.f32.mxu0 %vm7078_vm3, %v9967_v57  ;;  %v5229_v21 = vmax.f32 %v5224_v14, 0.0 }
 0x7dd   :  { %7017 = vmatprep.subr.bf16.mxu1 %v7077_v44  ;;  %7034 = vmatpush3.bf16.msra.mxu0 %v7033_v30 }
 0x7de   :  { %7035 = vmatprep.subr.bf16.mxu0 %v7077_v44 }
 0x7e0   :  { %7019 = vmatpush3.bf16.msra.mxu1 %v7018_v56  ;;  %v5634_v56 = vld [vmem:[%s10532_s13 + $0x48] sm:$0xff] }
 0x7e1   :  { %7020 = vmatprep.subr.bf16.mxu1 %v7077_v44  ;;  %7037 = vmatpush3.bf16.msra.mxu0 %v7036_v35 }
 0x7e2   :  { %7038 = vmatprep.subr.bf16.mxu0 %v7077_v44 }
 0x7e4   :  { %7022 = vmatpush3.bf16.msra.mxu1 %v7021_v8  ;;  %v6107_v8 = vld [vmem:[%s10534_s12] ss:$0 sm:$0xff] }
 0x7e5   :  { %7023 = vmatprep.subr.bf16.mxu1 %v7077_v44  ;;  %7040 = vmatpush3.bf16.msra.mxu0 %v7039_v49 }
 0x7e6   :  { %7041 = vmatprep.subr.bf16.mxu0 %v7077_v44 }
 0x7e8   :  { %7025 = vmatpush3.bf16.msra.mxu1 %v7024_v47 }
 0x7e9   :  { %7026 = vmatprep.subr.bf16.mxu1 %v7077_v44  ;;  %7043 = vmatpush3.bf16.msra.mxu0 %v7042_v29 }
 0x7ea   :  { %7044 = vmatprep.subr.bf16.mxu0 %v7077_v44 }
 0x7ec   :  { %7028 = vmatpush3.bf16.msra.mxu1 %v7027_v31 }
 0x7ed   :  { %7029 = vmatprep.subr.bf16.mxu1 %v7077_v44  ;;  %7046 = vmatpush3.bf16.msra.mxu0 %v7045_v5 }
 0x7ee   :  { %7047 = vmatprep.subr.bf16.mxu0 %v7077_v44 }
 0x7f0   :  { %7031 = vmatpush3.bf16.msra.mxu1 %v7030_v20 }
 0x7f1   :  { %7053 = vmatprep.subr.bf16.mxu1 %v7077_v44  ;;  %7049 = vmatpush3.bf16.msra.mxu0 %v7048_v22 }
 0x7f2   :  { %7050 = vmatprep.subr.bf16.mxu0 %v7077_v44 }
 0x7f3   :  { %6260 = vmatmul.mubr.f32.vlgmr.msra.gmra.mrb[52].mxu1 %v5229_v21 }
 0x7f4   :  { %6317 = vmatprep.mubr.msk.f32.mxu1 %vm7078_vm3, %v9967_v57  ;;  %7055 = vmatpush3.bf16.msra.mxu1 %v7054_v54 }
 0x7f5   :  { %7052 = vmatpush3.bf16.msra.mxu0 %v7051_v18  ;;  %7056 = vmatprep.subr.bf16.mxu1 %v7077_v44 }
 0x7f6   :  { %6290 = vmatprep.subr.mxu0 %v9967_v57 }
 0x7f8   :  { %7058 = vmatpush3.bf16.msra.mxu1 %v7057_v46 }
 0x7f9   :  { %6291 = vmatpush3.msra.mxu0 %v5542_v32  ;;  %7059 = vmatprep.subr.bf16.mxu1 %v7077_v44 }
 0x7fc   :  { %7061 = vmatpush3.bf16.msra.mxu1 %v7060_v3 }
 0x7fd   :  { %7062 = vmatprep.subr.bf16.mxu1 %v7077_v44 }
 0x800   :  { %7064 = vmatpush3.bf16.msra.mxu1 %v7063_v13 }
 0x801   :  { %7065 = vmatprep.subr.bf16.mxu1 %v7077_v44  ;;  %v5633_v44 = vld [vmem:[%s10532_s13 + $0x40] sm:$0xff] }
 0x802   :  { %v7066_v42 = vpack.c.bf16 %v5634_v56, %v5633_v44 }
 0x804   :  { %7067 = vmatpush3.bf16.msra.mxu1 %v7066_v42 }
 0x805   :  { %6315 = vmatprep.subr.mxu1 %v9967_v57  ;;  %v6109_v57 = vld [vmem:[%s10535_s14] ss:$0 sm:$0xff] }
 0x808   :  { %6316 = vmatpush3.msk.msra.mxu1 %vm5647_vm5, %v5635_v36 }
 0x8a6   :  { %v6144_v10 = vpop.f32.mrb[50].mxu1 }
 0x8a7   :  { %v6145_v40 = vpop.f32.mrb[51].mxu1 }
 0x8a8   :  { %v6146_v4 = vadd.f32 %v6145_v40, %v6144_v10 }
 0x8aa   :  { %v5384_v43 = vadd.f32 %v6146_v4, %v6106_v12 }
 0x8ae   :  { %v6179_v34 = vpop.f32.mrb[50].mxu0 }
 0x8af   :  { %v6180_v15 = vpop.f32.mrb[51].mxu0 }
 0x8b0   :  { %v6181_v58 = vadd.f32 %v6180_v15, %v6179_v34 }
 0x8b2   :  { %v5454_v26 = vadd.f32 %v6181_v58, %v5384_v43 }
 0x8c6   :  { %v5523_v28 = vpop.f32.mrb[52].mxu1 }
 0x8c7   :  { %v5524_v37 = vadd.f32 %v5523_v28, %v5454_v26  ;;  %v6261_v0 = vpop.f32.mrb[53].mxu1 }
 0x8c9   :  { %v5527_v1 = vmax.f32 %v5524_v37, 0.0 }
 0x8cb   :  { %6293 = vmatmul.mubr.msk.f32.vlgmr.msra.gmra.mrb[52].mxu0 %vm5550_vm4, %v5527_v1 }
 0x99e   :  { %v5620_v62 = vpop.f32.mrb[52].mxu0 }
 0x99f   :  { %v5621_v33 = vadd.f32 %v6107_v8, %v5620_v62  ;;  %v6294_v47 = vpop.f32.mrb[53].mxu0 }
 0x9a1   :  { %v5624_v63 = vmax.f32 %v5621_v33, 0.0 }
 0x9a3   :  { %6318 = vmatmul.mubr.msk.f32.vlgmr.msra.gmra.mrb[54].mxu1 %vm5643_vm6, %v5624_v63 }
 0xa76   :  { %v5717_v17 = vpop.f32.mrb[54].mxu1 }
 0xa77   :  { %v5718_v31 = vadd.f32 %v6109_v57, %v5717_v17  ;;  %v6319_v55 = vpop.f32.mrb[55].mxu1 }
 0xa79   :  { %5721 = vst [vmem:[%s10536_s15] sm:$0xff] %v5718_v31 }

</bundles_post_ra>
